<compile_context>
chip_gen: v7x
topology: tpu7x:2x2x1
jax: 0.10.0
libtpu: 0.0.40
codegen_flags: <defaults>
</compile_context>

<pallas_src>
import functools
import numpy as np
import jax
import jax.numpy as jnp
from jax.experimental import pallas as pl
from jax.experimental.pallas import tpu as pltpu

LEAKY_SLOPE = 0.1
BN_EPS = 1e-5
CHANS = (10, 64, 128, 256)   # conv channel progression forced by the module


# ----------------------------- Pallas kernels -----------------------------

def _encoder_kernel(x_ref, w1_ref, w2_ref, w3_ref,
                    s1_ref, t1_ref, s2_ref, t2_ref, s3_ref, t3_ref,
                    o_ref, pad1_ref, pad2_ref, pad3_ref, *, H, W, PAD):
    """min-max normalize + 3 x (conv3x3 + BN(eval) + LeakyReLU) for one image.

    Activations are (HW, C) = (H*W, C) tiles, rows ordered (h, w), channels on
    lanes.  A 3x3 same-padded conv = 9 accumulated matmuls of row-shifted
    copies of the activation.  Out-of-image dh taps land in the zeroed halo of
    the staging buffer; out-of-image dw taps are zeroed via in-kernel masks.
    """
    HW = H * W
    b = pl.program_id(0)

    # --- global min-max normalization over the *whole* batch (torch semantics).
    x_all = x_ref[...]                              # (B*HW, Cin) f32
    mn = jnp.min(x_all)
    mx = jnp.max(x_all)
    # Guard only the degenerate constant-input case (torch would emit NaNs);
    # for any real input mx - mn >> 1e-12 so this matches torch exactly.
    rng = jnp.maximum(mx - mn, 1e-12)
    xb = x_ref[pl.ds(b * HW, HW), :]                # this image's rows
    h = (xb - mn) / rng                             # (HW, Cin) f32

    # --- per-position masks for the dw = +-1 taps (dh handled by zero halo).
    ri = jax.lax.broadcasted_iota(jnp.int32, (HW, 1), 0).astype(jnp.float32)
    hi = jnp.floor(ri / float(W))
    wi = ri - hi * float(W)
    mask_l = (wi >= 1.0).astype(jnp.float32)        # dw = -1 valid
    mask_r = (wi <= float(W) - 2.0).astype(jnp.float32)  # dw = +1 valid

    def conv_block(h_in, pad_ref, w_ref, scale_ref, shift_ref):
        cin = pad_ref.shape[1]
        # Zero only the halo rows; the interior is fully overwritten below.
        pad_ref[pl.ds(0, PAD), :] = jnp.zeros((PAD, cin), jnp.float32)
        pad_ref[pl.ds(PAD + HW, PAD), :] = jnp.zeros((PAD, cin), jnp.float32)
        pad_ref[pl.ds(PAD, HW), :] = h_in
        acc = None
        k = 0
        for dh in (-1, 0, 1):
            for dw in (-1, 0, 1):
                off = dh * W + dw
                xs = pad_ref[pl.ds(PAD + off, HW), :]       # (HW, Cin) shifted rows
                if dw == -1:
                    xs = xs * mask_l
                elif dw == 1:
                    xs = xs * mask_r
                p = jnp.dot(xs.astype(jnp.bfloat16), w_ref[k],
                            preferred_element_type=jnp.float32)
                acc = p if acc is None else acc + p
                k += 1
        # conv bias + eval-mode BatchNorm folded into per-channel scale/shift.
        y = acc * scale_ref[...] + shift_ref[...]
        # LeakyReLU(0.1); Dropout is identity (eval).
        return jnp.where(y >= 0.0, y, LEAKY_SLOPE * y)

    h = conv_block(h, pad1_ref, w1_ref, s1_ref, t1_ref)
    h = conv_block(h, pad2_ref, w2_ref, s2_ref, t2_ref)
    h = conv_block(h, pad3_ref, w3_ref, s3_ref, t3_ref)
    o_ref[...] = h.astype(o_ref.dtype)              # (HW, 256) bf16, lane-dense


def _proj_kernel(x_ref, w_ref, b_ref, o_ref):
    # Single-step (untiled K) matmul per N tile: bf16 x bf16 -> f32, bias fused.
    o_ref[...] = (jnp.dot(x_ref[...], w_ref[...],
                          preferred_element_type=jnp.float32) + b_ref[...])


# ------------------------------- wrappers ---------------------------------

def fused_encoder(x, conv_params):
    """x: (B, 10, H, W) NCHW -> features (B, H*W*256) bf16 in (h, w, c) order."""
    B, cin0, H, W = x.shape
    HW = H * W
    M = B * HW
    PAD = 8                                      # >= W+1 halo, sublane aligned
    cout_last = conv_params[-1]["w"].shape[-1]
    x2 = x.transpose(0, 2, 3, 1).reshape(M, cin0)   # rows (b, h, w), lanes = channels

    c1, c2, c3 = conv_params

    def const(shape):
        return pl.BlockSpec(shape, lambda b, _n=len(shape): (0,) * _n)

    feats = pl.pallas_call(
        functools.partial(_encoder_kernel, H=H, W=W, PAD=PAD),
        grid=(B,),
        in_specs=[const((M, cin0)),
                  const(c1["w"].shape), const(c2["w"].shape), const(c3["w"].shape),
                  const(c1["scale"].shape), const(c1["shift"].shape),
                  const(c2["scale"].shape), const(c2["shift"].shape),
                  const(c3["scale"].shape), const(c3["shift"].shape)],
        out_specs=pl.BlockSpec((None, HW, cout_last), lambda b: (b, 0, 0)),
        out_shape=jax.ShapeDtypeStruct((B, HW, cout_last), jnp.bfloat16),
        scratch_shapes=[
            pltpu.VMEM((HW + 2 * PAD, c1["w"].shape[1]), jnp.float32),
            pltpu.VMEM((HW + 2 * PAD, c2["w"].shape[1]), jnp.float32),
            pltpu.VMEM((HW + 2 * PAD, c3["w"].shape[1]), jnp.float32)],
        compiler_params=pltpu.CompilerParams(dimension_semantics=("parallel",)),
    )(x2, c1["w"], c2["w"], c3["w"],
      c1["scale"], c1["shift"], c2["scale"], c2["shift"], c3["scale"], c3["shift"])
    # rows (h, w) x lanes c  ->  (B, H*W*C) with K ordered (h, w, c); the
    # projection weight was pre-reordered to that K order at pack time.
    return feats.reshape(B, HW * cout_last)


def linear_proj(features, w_packed, bias2, *, tn=128):
    """features: (B, K) bf16; w_packed: (K, N) bf16 (packed once); bias2: (1, N)."""
    B, K = features.shape
    Kw, N = w_packed.shape
    assert K == Kw
    if N % tn != 0:
        tn = N
    nn = N // tn
    return pl.pallas_call(
        _proj_kernel,
        grid=(nn,),               # N axis parallel (2 TCs on v7x); K untiled
        in_specs=[pl.BlockSpec((B, K), lambda n: (0, 0)),
                  pl.BlockSpec((K, tn), lambda n: (0, n)),
                  pl.BlockSpec((1, tn), lambda n: (0, n))],
        out_specs=pl.BlockSpec((B, tn), lambda n: (0, n)),
        out_shape=jax.ShapeDtypeStruct((B, N), jnp.float32),
        compiler_params=pltpu.CompilerParams(dimension_semantics=("parallel",)),
    )(features, w_packed, bias2)


# --------------------------- params + forward -----------------------------

def init_params(key, seq_len, i_f_len):
    """PyTorch-layout parameters (what the nn.Module would hold)."""
    params = {"convs": []}
    for li in range(3):
        cin, cout = CHANS[li], CHANS[li + 1]
        key, kw, kb = jax.random.split(key, 3)
        bound = 1.0 / np.sqrt(cin * 9)
        params["convs"].append(dict(
            w=jax.random.uniform(kw, (cout, cin, 3, 3), jnp.float32, -bound, bound),
            b=jax.random.uniform(kb, (cout,), jnp.float32, -bound, bound),
            gamma=jnp.ones((cout,), jnp.float32),
            beta=jnp.zeros((cout,), jnp.float32),
            mean=jnp.zeros((cout,), jnp.float32),
            var=jnp.ones((cout,), jnp.float32)))
    flattened = CHANS[-1] * 11 * 6
    n_out = seq_len * i_f_len
    key, kw, kb = jax.random.split(key, 3)
    bound = 1.0 / np.sqrt(flattened)
    params["proj_w"] = jax.random.uniform(kw, (n_out, flattened), jnp.float32,
                                          -bound, bound)
    params["proj_b"] = jax.random.uniform(kb, (n_out,), jnp.float32, -bound, bound)
    return params


def pack_params(raw, *, H=11, W=6):
    """One-time packing (outside the jitted forward):
       * conv weights -> (tap=kh*3+kw, Cin, Cout) cast to bf16; conv bias +
         eval-BN folded into per-channel f32 (1, Cout) scale/shift.
       * Linear weight: K reordered from torch (c,h,w) to the kernel's (h,w,c)
         flatten order, transposed to (K, N), cast to bf16.  No per-call w.T."""
    packed = {"convs": []}
    for cp in raw["convs"]:
        cout, cin = cp["w"].shape[:2]
        w_tap = cp["w"].transpose(2, 3, 1, 0).reshape(9, cin, cout).astype(jnp.bfloat16)
        scale = cp["gamma"] / jnp.sqrt(cp["var"] + BN_EPS)
        shift = (cp["b"] - cp["mean"]) * scale + cp["beta"]
        packed["convs"].append(dict(w=w_tap,
                                    scale=scale.reshape(1, cout).astype(jnp.float32),
                                    shift=shift.reshape(1, cout).astype(jnp.float32)))
    n_out, K = raw["proj_w"].shape
    C = K // (H * W)
    w_proj = raw["proj_w"].reshape(n_out, C, H, W).transpose(0, 2, 3, 1)
    packed["proj_w"] = w_proj.reshape(n_out, K).T.astype(jnp.bfloat16)   # (K, N)
    packed["proj_b"] = raw["proj_b"].reshape(1, n_out).astype(jnp.float32)
    return packed


def image_inertial_encoder_forward(packed, x, *, seq_len, i_f_len):
    # x: (B, 10, 11, 6) float32 -> (B, seq_len, i_f_len)
    B = x.shape[0]
    features = fused_encoder(x, packed["convs"])                  # (B, 16896) bf16
    out = linear_proj(features, packed["proj_w"], packed["proj_b"])
    return out.reshape(B, seq_len, i_f_len)


# ------------------------------ reference ---------------------------------

def reference_forward(params, x, *, seq_len, i_f_len):
    B = x.shape[0]
    h = (x - x.min()) / (x.max() - x.min())
    for cp in params["convs"]:
        h = jax.lax.conv_general_dilated(
            h, cp["w"], window_strides=(1, 1), padding="SAME",
            dimension_numbers=("NCHW", "OIHW", "NCHW"))
        h = h + cp["b"][None, :, None, None]
        h = (h - cp["mean"][None, :, None, None]) / jnp.sqrt(
            cp["var"][None, :, None, None] + BN_EPS)
        h = h * cp["gamma"][None, :, None, None] + cp["beta"][None, :, None, None]
        h = jnp.where(h >= 0, h, LEAKY_SLOPE * h)
    feats = h.reshape(B, -1)
    out = feats @ params["proj_w"].T + params["proj_b"]
    return out.reshape(B, seq_len, i_f_len)


if __name__ == "__main__":
    seq_len, i_f_len = 8, 32
    B = 2
    key = jax.random.PRNGKey(0)
    key, kx, kp = jax.random.split(key, 3)
    # Input extents forced by the module: (batch, 10, 11, 6)
    x = jax.random.normal(kx, (B, 10, 11, 6), jnp.float32)
    raw_params = init_params(kp, seq_len, i_f_len)
    packed = pack_params(raw_params)          # one-time packing, outside the jit

    fwd = jax.jit(functools.partial(image_inertial_encoder_forward,
                                    seq_len=seq_len, i_f_len=i_f_len))
    out = fwd(packed, x)
    jax.block_until_ready(out)
    assert out.shape == (B, seq_len, i_f_len)

    ref = reference_forward(raw_params, x, seq_len=seq_len, i_f_len=i_f_len)
    np.testing.assert_allclose(np.asarray(out), np.asarray(ref),
                               rtol=2e-2, atol=2e-2)
    print("KERNEL_OK")
</pallas_src>

<mosaic_0001>
module attributes {stable_mosaic.version = 11 : i64} {
  func.func @_encoder_kernel(%arg0: i32, %arg1: memref<132x10xf32, #tpu.memory_space<vmem>>, %arg2: memref<9x10x64xbf16, #tpu.memory_space<vmem>>, %arg3: memref<9x64x128xbf16, #tpu.memory_space<vmem>>, %arg4: memref<9x128x256xbf16, #tpu.memory_space<vmem>>, %arg5: memref<1x64xf32, #tpu.memory_space<vmem>>, %arg6: memref<1x64xf32, #tpu.memory_space<vmem>>, %arg7: memref<1x128xf32, #tpu.memory_space<vmem>>, %arg8: memref<1x128xf32, #tpu.memory_space<vmem>>, %arg9: memref<1x256xf32, #tpu.memory_space<vmem>>, %arg10: memref<1x256xf32, #tpu.memory_space<vmem>>, %arg11: memref<1x66x256xbf16, #tpu.memory_space<vmem>>, %arg12: memref<82x10xf32, #tpu.memory_space<vmem>>, %arg13: memref<82x64xf32, #tpu.memory_space<vmem>>, %arg14: memref<82x128xf32, #tpu.memory_space<vmem>>) attributes {dimension_semantics = [#tpu.dimension_semantics<parallel>], iteration_bounds = array<i64: 2>, scalar_prefetch = 0 : i64, scratch_operands = 3 : i64, tpu.core_type = #tpu.core_type<tc>, window_params = [{pipeline_mode = #tpu.pipeline_mode<synchronous>, transform_indices = @transform_0, window_bounds = array<i64: 132, 10>}, {pipeline_mode = #tpu.pipeline_mode<synchronous>, transform_indices = @transform_1, window_bounds = array<i64: 9, 10, 64>}, {pipeline_mode = #tpu.pipeline_mode<synchronous>, transform_indices = @transform_2, window_bounds = array<i64: 9, 64, 128>}, {pipeline_mode = #tpu.pipeline_mode<synchronous>, transform_indices = @transform_3, window_bounds = array<i64: 9, 128, 256>}, {pipeline_mode = #tpu.pipeline_mode<synchronous>, transform_indices = @transform_4, window_bounds = array<i64: 1, 64>}, {pipeline_mode = #tpu.pipeline_mode<synchronous>, transform_indices = @transform_5, window_bounds = array<i64: 1, 64>}, {pipeline_mode = #tpu.pipeline_mode<synchronous>, transform_indices = @transform_6, window_bounds = array<i64: 1, 128>}, {pipeline_mode = #tpu.pipeline_mode<synchronous>, transform_indices = @transform_7, window_bounds = array<i64: 1, 128>}, {pipeline_mode = #tpu.pipeline_mode<synchronous>, transform_indices = @transform_8, window_bounds = array<i64: 1, 256>}, {pipeline_mode = #tpu.pipeline_mode<synchronous>, transform_indices = @transform_9, window_bounds = array<i64: 1, 256>}, {transform_indices = @transform_10, window_bounds = array<i64: 1, 66, 256>}]} {
    %c0 = arith.constant 0 : index
    %c0_0 = arith.constant 0 : index
    %0 = vector.load %arg1[%c0, %c0_0] : memref<132x10xf32, #tpu.memory_space<vmem>>, vector<132x10xf32>
    %1 = vector.shape_cast %0 : vector<132x10xf32> to vector<1x132x10xf32>
    %cst = arith.constant dense<0x7F800000> : vector<1xf32>
    %2 = vector.multi_reduction <minimumf>, %1, %cst [1, 2] : vector<1x132x10xf32> to vector<1xf32>
    %3 = vector.shape_cast %2 : vector<1xf32> to vector<1x1x1xf32>
    %4 = vector.extract %3[0, 0, 0] : f32 from vector<1x1x1xf32>
    %5 = vector.shape_cast %0 : vector<132x10xf32> to vector<1x132x10xf32>
    %cst_1 = arith.constant dense<0xFF800000> : vector<1xf32>
    %6 = vector.multi_reduction <maximumf>, %5, %cst_1 [1, 2] : vector<1x132x10xf32> to vector<1xf32>
    %7 = vector.shape_cast %6 : vector<1xf32> to vector<1x1x1xf32>
    %8 = vector.extract %7[0, 0, 0] : f32 from vector<1x1x1xf32>
    %9 = arith.subf %8, %4 : f32
    %cst_2 = arith.constant 9.99999996E-13 : f32
    %10 = arith.maximumf %9, %cst_2 : f32
    %c66_i32 = arith.constant 66 : i32
    %11 = arith.muli %arg0, %c66_i32 : i32
    %12 = arith.index_cast %11 : i32 to index
    %c0_3 = arith.constant 0 : index
    %13 = vector.load %arg1[%12, %c0_3] : memref<132x10xf32, #tpu.memory_space<vmem>>, vector<66x10xf32>
    %14 = vector.broadcast %4 : f32 to vector<66x10xf32>
    %15 = arith.subf %13, %14 : vector<66x10xf32>
    %16 = vector.broadcast %10 : f32 to vector<66x10xf32>
    %17 = arith.divf %15, %16 : vector<66x10xf32>
    %18 = tpu.iota {dimensions = array<i32: 0>} : vector<66x1xi32>
    %19 = arith.sitofp %18 : vector<66x1xi32> to vector<66x1xf32>
    %cst_4 = arith.constant 6.000000e+00 : f32
    %20 = vector.broadcast %cst_4 : f32 to vector<66x1xf32>
    %21 = arith.divf %19, %20 : vector<66x1xf32>
    %22 = math.floor %21 : vector<66x1xf32>
    %cst_5 = arith.constant 6.000000e+00 : f32
    %23 = vector.broadcast %cst_5 : f32 to vector<66x1xf32>
    %24 = arith.mulf %22, %23 : vector<66x1xf32>
    %25 = arith.subf %19, %24 : vector<66x1xf32>
    %cst_6 = arith.constant 1.000000e+00 : f32
    %26 = vector.broadcast %cst_6 : f32 to vector<66x1xf32>
    %27 = arith.cmpf oge, %25, %26 : vector<66x1xf32>
    %28 = arith.extui %27 : vector<66x1xi1> to vector<66x1xi32>
    %29 = arith.sitofp %28 : vector<66x1xi32> to vector<66x1xf32>
    %cst_7 = arith.constant 4.000000e+00 : f32
    %30 = vector.broadcast %cst_7 : f32 to vector<66x1xf32>
    %31 = arith.cmpf ole, %25, %30 : vector<66x1xf32>
    %32 = arith.extui %31 : vector<66x1xi1> to vector<66x1xi32>
    %33 = arith.sitofp %32 : vector<66x1xi32> to vector<66x1xf32>
    %cst_8 = arith.constant 0.000000e+00 : f32
    %34 = vector.broadcast %cst_8 : f32 to vector<8x10xf32>
    %c0_9 = arith.constant 0 : index
    %c0_10 = arith.constant 0 : index
    %35 = vector.load %arg12[%c0_9, %c0_10] : memref<82x10xf32, #tpu.memory_space<vmem>>, vector<8x10xf32>
    tpu.vector_store %arg12[%c0_9, %c0_10], %34 {strides = array<i32>} : memref<82x10xf32, #tpu.memory_space<vmem>>, vector<8x10xf32>,
    %cst_11 = arith.constant 0.000000e+00 : f32
    %36 = vector.broadcast %cst_11 : f32 to vector<8x10xf32>
    %c74 = arith.constant 74 : index
    %c0_12 = arith.constant 0 : index
    %37 = vector.load %arg12[%c74, %c0_12] : memref<82x10xf32, #tpu.memory_space<vmem>>, vector<8x10xf32>
    tpu.vector_store %arg12[%c74, %c0_12], %36 {strides = array<i32>} : memref<82x10xf32, #tpu.memory_space<vmem>>, vector<8x10xf32>,
    %c8 = arith.constant 8 : index
    %c0_13 = arith.constant 0 : index
    %38 = vector.load %arg12[%c8, %c0_13] : memref<82x10xf32, #tpu.memory_space<vmem>>, vector<66x10xf32>
    tpu.vector_store %arg12[%c8, %c0_13], %17 {strides = array<i32>} : memref<82x10xf32, #tpu.memory_space<vmem>>, vector<66x10xf32>,
    %c1 = arith.constant 1 : index
    %c0_14 = arith.constant 0 : index
    %39 = vector.load %arg12[%c1, %c0_14] : memref<82x10xf32, #tpu.memory_space<vmem>>, vector<66x10xf32>
    %40 = vector.broadcast %29 : vector<66x1xf32> to vector<66x10xf32>
    %41 = arith.mulf %39, %40 : vector<66x10xf32>
    %42 = arith.truncf %41 : vector<66x10xf32> to vector<66x10xbf16>
    %c0_15 = arith.constant 0 : index
    %c0_16 = arith.constant 0 : index
    %c0_17 = arith.constant 0 : index
    %43 = vector.load %arg2[%c0_15, %c0_16, %c0_17] : memref<9x10x64xbf16, #tpu.memory_space<vmem>>, vector<1x10x64xbf16>
    %44 = vector.shape_cast %43 : vector<1x10x64xbf16> to vector<10x64xbf16>
    %cst_18 = arith.constant dense<0.000000e+00> : vector<66x64xf32>
    %45 = tpu.matmul %42, %44, %cst_18 {dimension_numbers = #tpu.dot_dimension_numbers<[1], [0], [0], [1], [0, 0, 1, 1], [], []>} : vector<66x10xbf16>, vector<10x64xbf16>, vector<66x64xf32> -> vector<66x64xf32>
    %c2 = arith.constant 2 : index
    %c0_19 = arith.constant 0 : index
    %46 = vector.load %arg12[%c2, %c0_19] : memref<82x10xf32, #tpu.memory_space<vmem>>, vector<66x10xf32>
    %47 = arith.truncf %46 : vector<66x10xf32> to vector<66x10xbf16>
    %c1_20 = arith.constant 1 : index
    %c0_21 = arith.constant 0 : index
    %c0_22 = arith.constant 0 : index
    %48 = vector.load %arg2[%c1_20, %c0_21, %c0_22] : memref<9x10x64xbf16, #tpu.memory_space<vmem>>, vector<1x10x64xbf16>
    %49 = vector.shape_cast %48 : vector<1x10x64xbf16> to vector<10x64xbf16>
    %cst_23 = arith.constant dense<0.000000e+00> : vector<66x64xf32>
    %50 = tpu.matmul %47, %49, %cst_23 {dimension_numbers = #tpu.dot_dimension_numbers<[1], [0], [0], [1], [0, 0, 1, 1], [], []>} : vector<66x10xbf16>, vector<10x64xbf16>, vector<66x64xf32> -> vector<66x64xf32>
    %51 = arith.addf %45, %50 : vector<66x64xf32>
    %c3 = arith.constant 3 : index
    %c0_24 = arith.constant 0 : index
    %52 = vector.load %arg12[%c3, %c0_24] : memref<82x10xf32, #tpu.memory_space<vmem>>, vector<66x10xf32>
    %53 = vector.broadcast %33 : vector<66x1xf32> to vector<66x10xf32>
    %54 = arith.mulf %52, %53 : vector<66x10xf32>
    %55 = arith.truncf %54 : vector<66x10xf32> to vector<66x10xbf16>
    %c2_25 = arith.constant 2 : index
    %c0_26 = arith.constant 0 : index
    %c0_27 = arith.constant 0 : index
    %56 = vector.load %arg2[%c2_25, %c0_26, %c0_27] : memref<9x10x64xbf16, #tpu.memory_space<vmem>>, vector<1x10x64xbf16>
    %57 = vector.shape_cast %56 : vector<1x10x64xbf16> to vector<10x64xbf16>
    %cst_28 = arith.constant dense<0.000000e+00> : vector<66x64xf32>
    %58 = tpu.matmul %55, %57, %cst_28 {dimension_numbers = #tpu.dot_dimension_numbers<[1], [0], [0], [1], [0, 0, 1, 1], [], []>} : vector<66x10xbf16>, vector<10x64xbf16>, vector<66x64xf32> -> vector<66x64xf32>
    %59 = arith.addf %51, %58 : vector<66x64xf32>
    %c7 = arith.constant 7 : index
    %c0_29 = arith.constant 0 : index
    %60 = vector.load %arg12[%c7, %c0_29] : memref<82x10xf32, #tpu.memory_space<vmem>>, vector<66x10xf32>
    %61 = vector.broadcast %29 : vector<66x1xf32> to vector<66x10xf32>
    %62 = arith.mulf %60, %61 : vector<66x10xf32>
    %63 = arith.truncf %62 : vector<66x10xf32> to vector<66x10xbf16>
    %c3_30 = arith.constant 3 : index
    %c0_31 = arith.constant 0 : index
    %c0_32 = arith.constant 0 : index
    %64 = vector.load %arg2[%c3_30, %c0_31, %c0_32] : memref<9x10x64xbf16, #tpu.memory_space<vmem>>, vector<1x10x64xbf16>
    %65 = vector.shape_cast %64 : vector<1x10x64xbf16> to vector<10x64xbf16>
    %cst_33 = arith.constant dense<0.000000e+00> : vector<66x64xf32>
    %66 = tpu.matmul %63, %65, %cst_33 {dimension_numbers = #tpu.dot_dimension_numbers<[1], [0], [0], [1], [0, 0, 1, 1], [], []>} : vector<66x10xbf16>, vector<10x64xbf16>, vector<66x64xf32> -> vector<66x64xf32>
    %67 = arith.addf %59, %66 : vector<66x64xf32>
    %c8_34 = arith.constant 8 : index
    %c0_35 = arith.constant 0 : index
    %68 = vector.load %arg12[%c8_34, %c0_35] : memref<82x10xf32, #tpu.memory_space<vmem>>, vector<66x10xf32>
    %69 = arith.truncf %68 : vector<66x10xf32> to vector<66x10xbf16>
    %c4 = arith.constant 4 : index
    %c0_36 = arith.constant 0 : index
    %c0_37 = arith.constant 0 : index
    %70 = vector.load %arg2[%c4, %c0_36, %c0_37] : memref<9x10x64xbf16, #tpu.memory_space<vmem>>, vector<1x10x64xbf16>
    %71 = vector.shape_cast %70 : vector<1x10x64xbf16> to vector<10x64xbf16>
    %cst_38 = arith.constant dense<0.000000e+00> : vector<66x64xf32>
    %72 = tpu.matmul %69, %71, %cst_38 {dimension_numbers = #tpu.dot_dimension_numbers<[1], [0], [0], [1], [0, 0, 1, 1], [], []>} : vector<66x10xbf16>, vector<10x64xbf16>, vector<66x64xf32> -> vector<66x64xf32>
    %73 = arith.addf %67, %72 : vector<66x64xf32>
    %c9 = arith.constant 9 : index
    %c0_39 = arith.constant 0 : index
    %74 = vector.load %arg12[%c9, %c0_39] : memref<82x10xf32, #tpu.memory_space<vmem>>, vector<66x10xf32>
    %75 = vector.broadcast %33 : vector<66x1xf32> to vector<66x10xf32>
    %76 = arith.mulf %74, %75 : vector<66x10xf32>
    %77 = arith.truncf %76 : vector<66x10xf32> to vector<66x10xbf16>
    %c5 = arith.constant 5 : index
    %c0_40 = arith.constant 0 : index
    %c0_41 = arith.constant 0 : index
    %78 = vector.load %arg2[%c5, %c0_40, %c0_41] : memref<9x10x64xbf16, #tpu.memory_space<vmem>>, vector<1x10x64xbf16>
    %79 = vector.shape_cast %78 : vector<1x10x64xbf16> to vector<10x64xbf16>
    %cst_42 = arith.constant dense<0.000000e+00> : vector<66x64xf32>
    %80 = tpu.matmul %77, %79, %cst_42 {dimension_numbers = #tpu.dot_dimension_numbers<[1], [0], [0], [1], [0, 0, 1, 1], [], []>} : vector<66x10xbf16>, vector<10x64xbf16>, vector<66x64xf32> -> vector<66x64xf32>
    %81 = arith.addf %73, %80 : vector<66x64xf32>
    %c13 = arith.constant 13 : index
    %c0_43 = arith.constant 0 : index
    %82 = vector.load %arg12[%c13, %c0_43] : memref<82x10xf32, #tpu.memory_space<vmem>>, vector<66x10xf32>
    %83 = vector.broadcast %29 : vector<66x1xf32> to vector<66x10xf32>
    %84 = arith.mulf %82, %83 : vector<66x10xf32>
    %85 = arith.truncf %84 : vector<66x10xf32> to vector<66x10xbf16>
    %c6 = arith.constant 6 : index
    %c0_44 = arith.constant 0 : index
    %c0_45 = arith.constant 0 : index
    %86 = vector.load %arg2[%c6, %c0_44, %c0_45] : memref<9x10x64xbf16, #tpu.memory_space<vmem>>, vector<1x10x64xbf16>
    %87 = vector.shape_cast %86 : vector<1x10x64xbf16> to vector<10x64xbf16>
    %cst_46 = arith.constant dense<0.000000e+00> : vector<66x64xf32>
    %88 = tpu.matmul %85, %87, %cst_46 {dimension_numbers = #tpu.dot_dimension_numbers<[1], [0], [0], [1], [0, 0, 1, 1], [], []>} : vector<66x10xbf16>, vector<10x64xbf16>, vector<66x64xf32> -> vector<66x64xf32>
    %89 = arith.addf %81, %88 : vector<66x64xf32>
    %c14 = arith.constant 14 : index
    %c0_47 = arith.constant 0 : index
    %90 = vector.load %arg12[%c14, %c0_47] : memref<82x10xf32, #tpu.memory_space<vmem>>, vector<66x10xf32>
    %91 = arith.truncf %90 : vector<66x10xf32> to vector<66x10xbf16>
    %c7_48 = arith.constant 7 : index
    %c0_49 = arith.constant 0 : index
    %c0_50 = arith.constant 0 : index
    %92 = vector.load %arg2[%c7_48, %c0_49, %c0_50] : memref<9x10x64xbf16, #tpu.memory_space<vmem>>, vector<1x10x64xbf16>
    %93 = vector.shape_cast %92 : vector<1x10x64xbf16> to vector<10x64xbf16>
    %cst_51 = arith.constant dense<0.000000e+00> : vector<66x64xf32>
    %94 = tpu.matmul %91, %93, %cst_51 {dimension_numbers = #tpu.dot_dimension_numbers<[1], [0], [0], [1], [0, 0, 1, 1], [], []>} : vector<66x10xbf16>, vector<10x64xbf16>, vector<66x64xf32> -> vector<66x64xf32>
    %95 = arith.addf %89, %94 : vector<66x64xf32>
    %c15 = arith.constant 15 : index
    %c0_52 = arith.constant 0 : index
    %96 = vector.load %arg12[%c15, %c0_52] : memref<82x10xf32, #tpu.memory_space<vmem>>, vector<66x10xf32>
    %97 = vector.broadcast %33 : vector<66x1xf32> to vector<66x10xf32>
    %98 = arith.mulf %96, %97 : vector<66x10xf32>
    %99 = arith.truncf %98 : vector<66x10xf32> to vector<66x10xbf16>
    %c8_53 = arith.constant 8 : index
    %c0_54 = arith.constant 0 : index
    %c0_55 = arith.constant 0 : index
    %100 = vector.load %arg2[%c8_53, %c0_54, %c0_55] : memref<9x10x64xbf16, #tpu.memory_space<vmem>>, vector<1x10x64xbf16>
    %101 = vector.shape_cast %100 : vector<1x10x64xbf16> to vector<10x64xbf16>
    %cst_56 = arith.constant dense<0.000000e+00> : vector<66x64xf32>
    %102 = tpu.matmul %99, %101, %cst_56 {dimension_numbers = #tpu.dot_dimension_numbers<[1], [0], [0], [1], [0, 0, 1, 1], [], []>} : vector<66x10xbf16>, vector<10x64xbf16>, vector<66x64xf32> -> vector<66x64xf32>
    %103 = arith.addf %95, %102 : vector<66x64xf32>
    %c0_57 = arith.constant 0 : index
    %c0_58 = arith.constant 0 : index
    %104 = vector.load %arg5[%c0_57, %c0_58] : memref<1x64xf32, #tpu.memory_space<vmem>>, vector<1x64xf32>
    %105 = vector.broadcast %104 : vector<1x64xf32> to vector<66x64xf32>
    %106 = arith.mulf %103, %105 : vector<66x64xf32>
    %c0_59 = arith.constant 0 : index
    %c0_60 = arith.constant 0 : index
    %107 = vector.load %arg6[%c0_59, %c0_60] : memref<1x64xf32, #tpu.memory_space<vmem>>, vector<1x64xf32>
    %108 = vector.broadcast %107 : vector<1x64xf32> to vector<66x64xf32>
    %109 = arith.addf %106, %108 : vector<66x64xf32>
    %cst_61 = arith.constant 0.000000e+00 : f32
    %110 = vector.broadcast %cst_61 : f32 to vector<66x64xf32>
    %111 = arith.cmpf oge, %109, %110 : vector<66x64xf32>
    %cst_62 = arith.constant 1.000000e-01 : f32
    %112 = vector.broadcast %cst_62 : f32 to vector<66x64xf32>
    %113 = arith.mulf %112, %109 : vector<66x64xf32>
    %114 = arith.select %111, %109, %113 : vector<66x64xi1>, vector<66x64xf32>
    %cst_63 = arith.constant 0.000000e+00 : f32
    %115 = vector.broadcast %cst_63 : f32 to vector<8x64xf32>
    %c0_64 = arith.constant 0 : index
    %c0_65 = arith.constant 0 : index
    %116 = vector.load %arg13[%c0_64, %c0_65] : memref<82x64xf32, #tpu.memory_space<vmem>>, vector<8x64xf32>
    tpu.vector_store %arg13[%c0_64, %c0_65], %115 {strides = array<i32>} : memref<82x64xf32, #tpu.memory_space<vmem>>, vector<8x64xf32>,
    %cst_66 = arith.constant 0.000000e+00 : f32
    %117 = vector.broadcast %cst_66 : f32 to vector<8x64xf32>
    %c74_67 = arith.constant 74 : index
    %c0_68 = arith.constant 0 : index
    %118 = vector.load %arg13[%c74_67, %c0_68] : memref<82x64xf32, #tpu.memory_space<vmem>>, vector<8x64xf32>
    tpu.vector_store %arg13[%c74_67, %c0_68], %117 {strides = array<i32>} : memref<82x64xf32, #tpu.memory_space<vmem>>, vector<8x64xf32>,
    %c8_69 = arith.constant 8 : index
    %c0_70 = arith.constant 0 : index
    %119 = vector.load %arg13[%c8_69, %c0_70] : memref<82x64xf32, #tpu.memory_space<vmem>>, vector<66x64xf32>
    tpu.vector_store %arg13[%c8_69, %c0_70], %114 {strides = array<i32>} : memref<82x64xf32, #tpu.memory_space<vmem>>, vector<66x64xf32>,
    %c1_71 = arith.constant 1 : index
    %c0_72 = arith.constant 0 : index
    %120 = vector.load %arg13[%c1_71, %c0_72] : memref<82x64xf32, #tpu.memory_space<vmem>>, vector<66x64xf32>
    %121 = vector.broadcast %29 : vector<66x1xf32> to vector<66x64xf32>
    %122 = arith.mulf %120, %121 : vector<66x64xf32>
    %123 = arith.truncf %122 : vector<66x64xf32> to vector<66x64xbf16>
    %c0_73 = arith.constant 0 : index
    %c0_74 = arith.constant 0 : index
    %c0_75 = arith.constant 0 : index
    %124 = vector.load %arg3[%c0_73, %c0_74, %c0_75] : memref<9x64x128xbf16, #tpu.memory_space<vmem>>, vector<1x64x128xbf16>
    %125 = vector.shape_cast %124 : vector<1x64x128xbf16> to vector<64x128xbf16>
    %cst_76 = arith.constant dense<0.000000e+00> : vector<66x128xf32>
    %126 = tpu.matmul %123, %125, %cst_76 {dimension_numbers = #tpu.dot_dimension_numbers<[1], [0], [0], [1], [0, 0, 1, 1], [], []>} : vector<66x64xbf16>, vector<64x128xbf16>, vector<66x128xf32> -> vector<66x128xf32>
    %c2_77 = arith.constant 2 : index
    %c0_78 = arith.constant 0 : index
    %127 = vector.load %arg13[%c2_77, %c0_78] : memref<82x64xf32, #tpu.memory_space<vmem>>, vector<66x64xf32>
    %128 = arith.truncf %127 : vector<66x64xf32> to vector<66x64xbf16>
    %c1_79 = arith.constant 1 : index
    %c0_80 = arith.constant 0 : index
    %c0_81 = arith.constant 0 : index
    %129 = vector.load %arg3[%c1_79, %c0_80, %c0_81] : memref<9x64x128xbf16, #tpu.memory_space<vmem>>, vector<1x64x128xbf16>
    %130 = vector.shape_cast %129 : vector<1x64x128xbf16> to vector<64x128xbf16>
    %cst_82 = arith.constant dense<0.000000e+00> : vector<66x128xf32>
    %131 = tpu.matmul %128, %130, %cst_82 {dimension_numbers = #tpu.dot_dimension_numbers<[1], [0], [0], [1], [0, 0, 1, 1], [], []>} : vector<66x64xbf16>, vector<64x128xbf16>, vector<66x128xf32> -> vector<66x128xf32>
    %132 = arith.addf %126, %131 : vector<66x128xf32>
    %c3_83 = arith.constant 3 : index
    %c0_84 = arith.constant 0 : index
    %133 = vector.load %arg13[%c3_83, %c0_84] : memref<82x64xf32, #tpu.memory_space<vmem>>, vector<66x64xf32>
    %134 = vector.broadcast %33 : vector<66x1xf32> to vector<66x64xf32>
    %135 = arith.mulf %133, %134 : vector<66x64xf32>
    %136 = arith.truncf %135 : vector<66x64xf32> to vector<66x64xbf16>
    %c2_85 = arith.constant 2 : index
    %c0_86 = arith.constant 0 : index
    %c0_87 = arith.constant 0 : index
    %137 = vector.load %arg3[%c2_85, %c0_86, %c0_87] : memref<9x64x128xbf16, #tpu.memory_space<vmem>>, vector<1x64x128xbf16>
    %138 = vector.shape_cast %137 : vector<1x64x128xbf16> to vector<64x128xbf16>
    %cst_88 = arith.constant dense<0.000000e+00> : vector<66x128xf32>
    %139 = tpu.matmul %136, %138, %cst_88 {dimension_numbers = #tpu.dot_dimension_numbers<[1], [0], [0], [1], [0, 0, 1, 1], [], []>} : vector<66x64xbf16>, vector<64x128xbf16>, vector<66x128xf32> -> vector<66x128xf32>
    %140 = arith.addf %132, %139 : vector<66x128xf32>
    %c7_89 = arith.constant 7 : index
    %c0_90 = arith.constant 0 : index
    %141 = vector.load %arg13[%c7_89, %c0_90] : memref<82x64xf32, #tpu.memory_space<vmem>>, vector<66x64xf32>
    %142 = vector.broadcast %29 : vector<66x1xf32> to vector<66x64xf32>
    %143 = arith.mulf %141, %142 : vector<66x64xf32>
    %144 = arith.truncf %143 : vector<66x64xf32> to vector<66x64xbf16>
    %c3_91 = arith.constant 3 : index
    %c0_92 = arith.constant 0 : index
    %c0_93 = arith.constant 0 : index
    %145 = vector.load %arg3[%c3_91, %c0_92, %c0_93] : memref<9x64x128xbf16, #tpu.memory_space<vmem>>, vector<1x64x128xbf16>
    %146 = vector.shape_cast %145 : vector<1x64x128xbf16> to vector<64x128xbf16>
    %cst_94 = arith.constant dense<0.000000e+00> : vector<66x128xf32>
    %147 = tpu.matmul %144, %146, %cst_94 {dimension_numbers = #tpu.dot_dimension_numbers<[1], [0], [0], [1], [0, 0, 1, 1], [], []>} : vector<66x64xbf16>, vector<64x128xbf16>, vector<66x128xf32> -> vector<66x128xf32>
    %148 = arith.addf %140, %147 : vector<66x128xf32>
    %c8_95 = arith.constant 8 : index
    %c0_96 = arith.constant 0 : index
    %149 = vector.load %arg13[%c8_95, %c0_96] : memref<82x64xf32, #tpu.memory_space<vmem>>, vector<66x64xf32>
    %150 = arith.truncf %149 : vector<66x64xf32> to vector<66x64xbf16>
    %c4_97 = arith.constant 4 : index
    %c0_98 = arith.constant 0 : index
    %c0_99 = arith.constant 0 : index
    %151 = vector.load %arg3[%c4_97, %c0_98, %c0_99] : memref<9x64x128xbf16, #tpu.memory_space<vmem>>, vector<1x64x128xbf16>
    %152 = vector.shape_cast %151 : vector<1x64x128xbf16> to vector<64x128xbf16>
    %cst_100 = arith.constant dense<0.000000e+00> : vector<66x128xf32>
    %153 = tpu.matmul %150, %152, %cst_100 {dimension_numbers = #tpu.dot_dimension_numbers<[1], [0], [0], [1], [0, 0, 1, 1], [], []>} : vector<66x64xbf16>, vector<64x128xbf16>, vector<66x128xf32> -> vector<66x128xf32>
    %154 = arith.addf %148, %153 : vector<66x128xf32>
    %c9_101 = arith.constant 9 : index
    %c0_102 = arith.constant 0 : index
    %155 = vector.load %arg13[%c9_101, %c0_102] : memref<82x64xf32, #tpu.memory_space<vmem>>, vector<66x64xf32>
    %156 = vector.broadcast %33 : vector<66x1xf32> to vector<66x64xf32>
    %157 = arith.mulf %155, %156 : vector<66x64xf32>
    %158 = arith.truncf %157 : vector<66x64xf32> to vector<66x64xbf16>
    %c5_103 = arith.constant 5 : index
    %c0_104 = arith.constant 0 : index
    %c0_105 = arith.constant 0 : index
    %159 = vector.load %arg3[%c5_103, %c0_104, %c0_105] : memref<9x64x128xbf16, #tpu.memory_space<vmem>>, vector<1x64x128xbf16>
    %160 = vector.shape_cast %159 : vector<1x64x128xbf16> to vector<64x128xbf16>
    %cst_106 = arith.constant dense<0.000000e+00> : vector<66x128xf32>
    %161 = tpu.matmul %158, %160, %cst_106 {dimension_numbers = #tpu.dot_dimension_numbers<[1], [0], [0], [1], [0, 0, 1, 1], [], []>} : vector<66x64xbf16>, vector<64x128xbf16>, vector<66x128xf32> -> vector<66x128xf32>
    %162 = arith.addf %154, %161 : vector<66x128xf32>
    %c13_107 = arith.constant 13 : index
    %c0_108 = arith.constant 0 : index
    %163 = vector.load %arg13[%c13_107, %c0_108] : memref<82x64xf32, #tpu.memory_space<vmem>>, vector<66x64xf32>
    %164 = vector.broadcast %29 : vector<66x1xf32> to vector<66x64xf32>
    %165 = arith.mulf %163, %164 : vector<66x64xf32>
    %166 = arith.truncf %165 : vector<66x64xf32> to vector<66x64xbf16>
    %c6_109 = arith.constant 6 : index
    %c0_110 = arith.constant 0 : index
    %c0_111 = arith.constant 0 : index
    %167 = vector.load %arg3[%c6_109, %c0_110, %c0_111] : memref<9x64x128xbf16, #tpu.memory_space<vmem>>, vector<1x64x128xbf16>
    %168 = vector.shape_cast %167 : vector<1x64x128xbf16> to vector<64x128xbf16>
    %cst_112 = arith.constant dense<0.000000e+00> : vector<66x128xf32>
    %169 = tpu.matmul %166, %168, %cst_112 {dimension_numbers = #tpu.dot_dimension_numbers<[1], [0], [0], [1], [0, 0, 1, 1], [], []>} : vector<66x64xbf16>, vector<64x128xbf16>, vector<66x128xf32> -> vector<66x128xf32>
    %170 = arith.addf %162, %169 : vector<66x128xf32>
    %c14_113 = arith.constant 14 : index
    %c0_114 = arith.constant 0 : index
    %171 = vector.load %arg13[%c14_113, %c0_114] : memref<82x64xf32, #tpu.memory_space<vmem>>, vector<66x64xf32>
    %172 = arith.truncf %171 : vector<66x64xf32> to vector<66x64xbf16>
    %c7_115 = arith.constant 7 : index
    %c0_116 = arith.constant 0 : index
    %c0_117 = arith.constant 0 : index
    %173 = vector.load %arg3[%c7_115, %c0_116, %c0_117] : memref<9x64x128xbf16, #tpu.memory_space<vmem>>, vector<1x64x128xbf16>
    %174 = vector.shape_cast %173 : vector<1x64x128xbf16> to vector<64x128xbf16>
    %cst_118 = arith.constant dense<0.000000e+00> : vector<66x128xf32>
    %175 = tpu.matmul %172, %174, %cst_118 {dimension_numbers = #tpu.dot_dimension_numbers<[1], [0], [0], [1], [0, 0, 1, 1], [], []>} : vector<66x64xbf16>, vector<64x128xbf16>, vector<66x128xf32> -> vector<66x128xf32>
    %176 = arith.addf %170, %175 : vector<66x128xf32>
    %c15_119 = arith.constant 15 : index
    %c0_120 = arith.constant 0 : index
    %177 = vector.load %arg13[%c15_119, %c0_120] : memref<82x64xf32, #tpu.memory_space<vmem>>, vector<66x64xf32>
    %178 = vector.broadcast %33 : vector<66x1xf32> to vector<66x64xf32>
    %179 = arith.mulf %177, %178 : vector<66x64xf32>
    %180 = arith.truncf %179 : vector<66x64xf32> to vector<66x64xbf16>
    %c8_121 = arith.constant 8 : index
    %c0_122 = arith.constant 0 : index
    %c0_123 = arith.constant 0 : index
    %181 = vector.load %arg3[%c8_121, %c0_122, %c0_123] : memref<9x64x128xbf16, #tpu.memory_space<vmem>>, vector<1x64x128xbf16>
    %182 = vector.shape_cast %181 : vector<1x64x128xbf16> to vector<64x128xbf16>
    %cst_124 = arith.constant dense<0.000000e+00> : vector<66x128xf32>
    %183 = tpu.matmul %180, %182, %cst_124 {dimension_numbers = #tpu.dot_dimension_numbers<[1], [0], [0], [1], [0, 0, 1, 1], [], []>} : vector<66x64xbf16>, vector<64x128xbf16>, vector<66x128xf32> -> vector<66x128xf32>
    %184 = arith.addf %176, %183 : vector<66x128xf32>
    %c0_125 = arith.constant 0 : index
    %c0_126 = arith.constant 0 : index
    %185 = vector.load %arg7[%c0_125, %c0_126] : memref<1x128xf32, #tpu.memory_space<vmem>>, vector<1x128xf32>
    %186 = vector.broadcast %185 : vector<1x128xf32> to vector<66x128xf32>
    %187 = arith.mulf %184, %186 : vector<66x128xf32>
    %c0_127 = arith.constant 0 : index
    %c0_128 = arith.constant 0 : index
    %188 = vector.load %arg8[%c0_127, %c0_128] : memref<1x128xf32, #tpu.memory_space<vmem>>, vector<1x128xf32>
    %189 = vector.broadcast %188 : vector<1x128xf32> to vector<66x128xf32>
    %190 = arith.addf %187, %189 : vector<66x128xf32>
    %cst_129 = arith.constant 0.000000e+00 : f32
    %191 = vector.broadcast %cst_129 : f32 to vector<66x128xf32>
    %192 = arith.cmpf oge, %190, %191 : vector<66x128xf32>
    %cst_130 = arith.constant 1.000000e-01 : f32
    %193 = vector.broadcast %cst_130 : f32 to vector<66x128xf32>
    %194 = arith.mulf %193, %190 : vector<66x128xf32>
    %195 = arith.select %192, %190, %194 : vector<66x128xi1>, vector<66x128xf32>
    %cst_131 = arith.constant 0.000000e+00 : f32
    %196 = vector.broadcast %cst_131 : f32 to vector<8x128xf32>
    %c0_132 = arith.constant 0 : index
    %c0_133 = arith.constant 0 : index
    %197 = vector.load %arg14[%c0_132, %c0_133] : memref<82x128xf32, #tpu.memory_space<vmem>>, vector<8x128xf32>
    tpu.vector_store %arg14[%c0_132, %c0_133], %196 {strides = array<i32>} : memref<82x128xf32, #tpu.memory_space<vmem>>, vector<8x128xf32>,
    %cst_134 = arith.constant 0.000000e+00 : f32
    %198 = vector.broadcast %cst_134 : f32 to vector<8x128xf32>
    %c74_135 = arith.constant 74 : index
    %c0_136 = arith.constant 0 : index
    %199 = vector.load %arg14[%c74_135, %c0_136] : memref<82x128xf32, #tpu.memory_space<vmem>>, vector<8x128xf32>
    tpu.vector_store %arg14[%c74_135, %c0_136], %198 {strides = array<i32>} : memref<82x128xf32, #tpu.memory_space<vmem>>, vector<8x128xf32>,
    %c8_137 = arith.constant 8 : index
    %c0_138 = arith.constant 0 : index
    %200 = vector.load %arg14[%c8_137, %c0_138] : memref<82x128xf32, #tpu.memory_space<vmem>>, vector<66x128xf32>
    tpu.vector_store %arg14[%c8_137, %c0_138], %195 {strides = array<i32>} : memref<82x128xf32, #tpu.memory_space<vmem>>, vector<66x128xf32>,
    %c1_139 = arith.constant 1 : index
    %c0_140 = arith.constant 0 : index
    %201 = vector.load %arg14[%c1_139, %c0_140] : memref<82x128xf32, #tpu.memory_space<vmem>>, vector<66x128xf32>
    %202 = vector.broadcast %29 : vector<66x1xf32> to vector<66x128xf32>
    %203 = arith.mulf %201, %202 : vector<66x128xf32>
    %204 = arith.truncf %203 : vector<66x128xf32> to vector<66x128xbf16>
    %c0_141 = arith.constant 0 : index
    %c0_142 = arith.constant 0 : index
    %c0_143 = arith.constant 0 : index
    %205 = vector.load %arg4[%c0_141, %c0_142, %c0_143] : memref<9x128x256xbf16, #tpu.memory_space<vmem>>, vector<1x128x256xbf16>
    %206 = vector.shape_cast %205 : vector<1x128x256xbf16> to vector<128x256xbf16>
    %cst_144 = arith.constant dense<0.000000e+00> : vector<66x256xf32>
    %207 = tpu.matmul %204, %206, %cst_144 {dimension_numbers = #tpu.dot_dimension_numbers<[1], [0], [0], [1], [0, 0, 1, 1], [], []>} : vector<66x128xbf16>, vector<128x256xbf16>, vector<66x256xf32> -> vector<66x256xf32>
    %c2_145 = arith.constant 2 : index
    %c0_146 = arith.constant 0 : index
    %208 = vector.load %arg14[%c2_145, %c0_146] : memref<82x128xf32, #tpu.memory_space<vmem>>, vector<66x128xf32>
    %209 = arith.truncf %208 : vector<66x128xf32> to vector<66x128xbf16>
    %c1_147 = arith.constant 1 : index
    %c0_148 = arith.constant 0 : index
    %c0_149 = arith.constant 0 : index
    %210 = vector.load %arg4[%c1_147, %c0_148, %c0_149] : memref<9x128x256xbf16, #tpu.memory_space<vmem>>, vector<1x128x256xbf16>
    %211 = vector.shape_cast %210 : vector<1x128x256xbf16> to vector<128x256xbf16>
    %cst_150 = arith.constant dense<0.000000e+00> : vector<66x256xf32>
    %212 = tpu.matmul %209, %211, %cst_150 {dimension_numbers = #tpu.dot_dimension_numbers<[1], [0], [0], [1], [0, 0, 1, 1], [], []>} : vector<66x128xbf16>, vector<128x256xbf16>, vector<66x256xf32> -> vector<66x256xf32>
    %213 = arith.addf %207, %212 : vector<66x256xf32>
    %c3_151 = arith.constant 3 : index
    %c0_152 = arith.constant 0 : index
    %214 = vector.load %arg14[%c3_151, %c0_152] : memref<82x128xf32, #tpu.memory_space<vmem>>, vector<66x128xf32>
    %215 = vector.broadcast %33 : vector<66x1xf32> to vector<66x128xf32>
    %216 = arith.mulf %214, %215 : vector<66x128xf32>
    %217 = arith.truncf %216 : vector<66x128xf32> to vector<66x128xbf16>
    %c2_153 = arith.constant 2 : index
    %c0_154 = arith.constant 0 : index
    %c0_155 = arith.constant 0 : index
    %218 = vector.load %arg4[%c2_153, %c0_154, %c0_155] : memref<9x128x256xbf16, #tpu.memory_space<vmem>>, vector<1x128x256xbf16>
    %219 = vector.shape_cast %218 : vector<1x128x256xbf16> to vector<128x256xbf16>
    %cst_156 = arith.constant dense<0.000000e+00> : vector<66x256xf32>
    %220 = tpu.matmul %217, %219, %cst_156 {dimension_numbers = #tpu.dot_dimension_numbers<[1], [0], [0], [1], [0, 0, 1, 1], [], []>} : vector<66x128xbf16>, vector<128x256xbf16>, vector<66x256xf32> -> vector<66x256xf32>
    %221 = arith.addf %213, %220 : vector<66x256xf32>
    %c7_157 = arith.constant 7 : index
    %c0_158 = arith.constant 0 : index
    %222 = vector.load %arg14[%c7_157, %c0_158] : memref<82x128xf32, #tpu.memory_space<vmem>>, vector<66x128xf32>
    %223 = vector.broadcast %29 : vector<66x1xf32> to vector<66x128xf32>
    %224 = arith.mulf %222, %223 : vector<66x128xf32>
    %225 = arith.truncf %224 : vector<66x128xf32> to vector<66x128xbf16>
    %c3_159 = arith.constant 3 : index
    %c0_160 = arith.constant 0 : index
    %c0_161 = arith.constant 0 : index
    %226 = vector.load %arg4[%c3_159, %c0_160, %c0_161] : memref<9x128x256xbf16, #tpu.memory_space<vmem>>, vector<1x128x256xbf16>
    %227 = vector.shape_cast %226 : vector<1x128x256xbf16> to vector<128x256xbf16>
    %cst_162 = arith.constant dense<0.000000e+00> : vector<66x256xf32>
    %228 = tpu.matmul %225, %227, %cst_162 {dimension_numbers = #tpu.dot_dimension_numbers<[1], [0], [0], [1], [0, 0, 1, 1], [], []>} : vector<66x128xbf16>, vector<128x256xbf16>, vector<66x256xf32> -> vector<66x256xf32>
    %229 = arith.addf %221, %228 : vector<66x256xf32>
    %c8_163 = arith.constant 8 : index
    %c0_164 = arith.constant 0 : index
    %230 = vector.load %arg14[%c8_163, %c0_164] : memref<82x128xf32, #tpu.memory_space<vmem>>, vector<66x128xf32>
    %231 = arith.truncf %230 : vector<66x128xf32> to vector<66x128xbf16>
    %c4_165 = arith.constant 4 : index
    %c0_166 = arith.constant 0 : index
    %c0_167 = arith.constant 0 : index
    %232 = vector.load %arg4[%c4_165, %c0_166, %c0_167] : memref<9x128x256xbf16, #tpu.memory_space<vmem>>, vector<1x128x256xbf16>
    %233 = vector.shape_cast %232 : vector<1x128x256xbf16> to vector<128x256xbf16>
    %cst_168 = arith.constant dense<0.000000e+00> : vector<66x256xf32>
    %234 = tpu.matmul %231, %233, %cst_168 {dimension_numbers = #tpu.dot_dimension_numbers<[1], [0], [0], [1], [0, 0, 1, 1], [], []>} : vector<66x128xbf16>, vector<128x256xbf16>, vector<66x256xf32> -> vector<66x256xf32>
    %235 = arith.addf %229, %234 : vector<66x256xf32>
    %c9_169 = arith.constant 9 : index
    %c0_170 = arith.constant 0 : index
    %236 = vector.load %arg14[%c9_169, %c0_170] : memref<82x128xf32, #tpu.memory_space<vmem>>, vector<66x128xf32>
    %237 = vector.broadcast %33 : vector<66x1xf32> to vector<66x128xf32>
    %238 = arith.mulf %236, %237 : vector<66x128xf32>
    %239 = arith.truncf %238 : vector<66x128xf32> to vector<66x128xbf16>
    %c5_171 = arith.constant 5 : index
    %c0_172 = arith.constant 0 : index
    %c0_173 = arith.constant 0 : index
    %240 = vector.load %arg4[%c5_171, %c0_172, %c0_173] : memref<9x128x256xbf16, #tpu.memory_space<vmem>>, vector<1x128x256xbf16>
    %241 = vector.shape_cast %240 : vector<1x128x256xbf16> to vector<128x256xbf16>
    %cst_174 = arith.constant dense<0.000000e+00> : vector<66x256xf32>
    %242 = tpu.matmul %239, %241, %cst_174 {dimension_numbers = #tpu.dot_dimension_numbers<[1], [0], [0], [1], [0, 0, 1, 1], [], []>} : vector<66x128xbf16>, vector<128x256xbf16>, vector<66x256xf32> -> vector<66x256xf32>
    %243 = arith.addf %235, %242 : vector<66x256xf32>
    %c13_175 = arith.constant 13 : index
    %c0_176 = arith.constant 0 : index
    %244 = vector.load %arg14[%c13_175, %c0_176] : memref<82x128xf32, #tpu.memory_space<vmem>>, vector<66x128xf32>
    %245 = vector.broadcast %29 : vector<66x1xf32> to vector<66x128xf32>
    %246 = arith.mulf %244, %245 : vector<66x128xf32>
    %247 = arith.truncf %246 : vector<66x128xf32> to vector<66x128xbf16>
    %c6_177 = arith.constant 6 : index
    %c0_178 = arith.constant 0 : index
    %c0_179 = arith.constant 0 : index
    %248 = vector.load %arg4[%c6_177, %c0_178, %c0_179] : memref<9x128x256xbf16, #tpu.memory_space<vmem>>, vector<1x128x256xbf16>
    %249 = vector.shape_cast %248 : vector<1x128x256xbf16> to vector<128x256xbf16>
    %cst_180 = arith.constant dense<0.000000e+00> : vector<66x256xf32>
    %250 = tpu.matmul %247, %249, %cst_180 {dimension_numbers = #tpu.dot_dimension_numbers<[1], [0], [0], [1], [0, 0, 1, 1], [], []>} : vector<66x128xbf16>, vector<128x256xbf16>, vector<66x256xf32> -> vector<66x256xf32>
    %251 = arith.addf %243, %250 : vector<66x256xf32>
    %c14_181 = arith.constant 14 : index
    %c0_182 = arith.constant 0 : index
    %252 = vector.load %arg14[%c14_181, %c0_182] : memref<82x128xf32, #tpu.memory_space<vmem>>, vector<66x128xf32>
    %253 = arith.truncf %252 : vector<66x128xf32> to vector<66x128xbf16>
    %c7_183 = arith.constant 7 : index
    %c0_184 = arith.constant 0 : index
    %c0_185 = arith.constant 0 : index
    %254 = vector.load %arg4[%c7_183, %c0_184, %c0_185] : memref<9x128x256xbf16, #tpu.memory_space<vmem>>, vector<1x128x256xbf16>
    %255 = vector.shape_cast %254 : vector<1x128x256xbf16> to vector<128x256xbf16>
    %cst_186 = arith.constant dense<0.000000e+00> : vector<66x256xf32>
    %256 = tpu.matmul %253, %255, %cst_186 {dimension_numbers = #tpu.dot_dimension_numbers<[1], [0], [0], [1], [0, 0, 1, 1], [], []>} : vector<66x128xbf16>, vector<128x256xbf16>, vector<66x256xf32> -> vector<66x256xf32>
    %257 = arith.addf %251, %256 : vector<66x256xf32>
    %c15_187 = arith.constant 15 : index
    %c0_188 = arith.constant 0 : index
    %258 = vector.load %arg14[%c15_187, %c0_188] : memref<82x128xf32, #tpu.memory_space<vmem>>, vector<66x128xf32>
    %259 = vector.broadcast %33 : vector<66x1xf32> to vector<66x128xf32>
    %260 = arith.mulf %258, %259 : vector<66x128xf32>
    %261 = arith.truncf %260 : vector<66x128xf32> to vector<66x128xbf16>
    %c8_189 = arith.constant 8 : index
    %c0_190 = arith.constant 0 : index
    %c0_191 = arith.constant 0 : index
    %262 = vector.load %arg4[%c8_189, %c0_190, %c0_191] : memref<9x128x256xbf16, #tpu.memory_space<vmem>>, vector<1x128x256xbf16>
    %263 = vector.shape_cast %262 : vector<1x128x256xbf16> to vector<128x256xbf16>
    %cst_192 = arith.constant dense<0.000000e+00> : vector<66x256xf32>
    %264 = tpu.matmul %261, %263, %cst_192 {dimension_numbers = #tpu.dot_dimension_numbers<[1], [0], [0], [1], [0, 0, 1, 1], [], []>} : vector<66x128xbf16>, vector<128x256xbf16>, vector<66x256xf32> -> vector<66x256xf32>
    %265 = arith.addf %257, %264 : vector<66x256xf32>
    %c0_193 = arith.constant 0 : index
    %c0_194 = arith.constant 0 : index
    %266 = vector.load %arg9[%c0_193, %c0_194] : memref<1x256xf32, #tpu.memory_space<vmem>>, vector<1x256xf32>
    %267 = vector.broadcast %266 : vector<1x256xf32> to vector<66x256xf32>
    %268 = arith.mulf %265, %267 : vector<66x256xf32>
    %c0_195 = arith.constant 0 : index
    %c0_196 = arith.constant 0 : index
    %269 = vector.load %arg10[%c0_195, %c0_196] : memref<1x256xf32, #tpu.memory_space<vmem>>, vector<1x256xf32>
    %270 = vector.broadcast %269 : vector<1x256xf32> to vector<66x256xf32>
    %271 = arith.addf %268, %270 : vector<66x256xf32>
    %cst_197 = arith.constant 0.000000e+00 : f32
    %272 = vector.broadcast %cst_197 : f32 to vector<66x256xf32>
    %273 = arith.cmpf oge, %271, %272 : vector<66x256xf32>
    %cst_198 = arith.constant 1.000000e-01 : f32
    %274 = vector.broadcast %cst_198 : f32 to vector<66x256xf32>
    %275 = arith.mulf %274, %271 : vector<66x256xf32>
    %276 = arith.select %273, %271, %275 : vector<66x256xi1>, vector<66x256xf32>
    %277 = arith.truncf %276 : vector<66x256xf32> to vector<66x256xbf16>
    %c0_199 = arith.constant 0 : index
    %c0_200 = arith.constant 0 : index
    %c0_201 = arith.constant 0 : index
    %278 = vector.load %arg11[%c0_199, %c0_200, %c0_201] : memref<1x66x256xbf16, #tpu.memory_space<vmem>>, vector<1x66x256xbf16>
    %279 = vector.shape_cast %278 : vector<1x66x256xbf16> to vector<66x256xbf16>
    %280 = vector.shape_cast %277 : vector<66x256xbf16> to vector<1x66x256xbf16>
    tpu.vector_store %arg11[%c0_199, %c0_200, %c0_201], %280 {strides = array<i32>} : memref<1x66x256xbf16, #tpu.memory_space<vmem>>, vector<1x66x256xbf16>,
    return
  }
  func.func @transform_0(%arg0: i32) -> (i32, i32) {
    %c0_i32 = arith.constant 0 : i32
    %c0_i32_0 = arith.constant 0 : i32
    %c0_i32_1 = arith.constant 0 : i32
    return %c0_i32, %c0_i32_0 : i32, i32
  }
  func.func @transform_1(%arg0: i32) -> (i32, i32, i32) {
    %c0_i32 = arith.constant 0 : i32
    %c0_i32_0 = arith.constant 0 : i32
    %c0_i32_1 = arith.constant 0 : i32
    %c0_i32_2 = arith.constant 0 : i32
    return %c0_i32, %c0_i32_0, %c0_i32_1 : i32, i32, i32
  }
  func.func @transform_2(%arg0: i32) -> (i32, i32, i32) {
    %c0_i32 = arith.constant 0 : i32
    %c0_i32_0 = arith.constant 0 : i32
    %c0_i32_1 = arith.constant 0 : i32
    %c0_i32_2 = arith.constant 0 : i32
    return %c0_i32, %c0_i32_0, %c0_i32_1 : i32, i32, i32
  }
  func.func @transform_3(%arg0: i32) -> (i32, i32, i32) {
    %c0_i32 = arith.constant 0 : i32
    %c0_i32_0 = arith.constant 0 : i32
    %c0_i32_1 = arith.constant 0 : i32
    %c0_i32_2 = arith.constant 0 : i32
    return %c0_i32, %c0_i32_0, %c0_i32_1 : i32, i32, i32
  }
  func.func @transform_4(%arg0: i32) -> (i32, i32) {
    %c0_i32 = arith.constant 0 : i32
    %c0_i32_0 = arith.constant 0 : i32
    %c0_i32_1 = arith.constant 0 : i32
    return %c0_i32, %c0_i32_0 : i32, i32
  }
  func.func @transform_5(%arg0: i32) -> (i32, i32) {
    %c0_i32 = arith.constant 0 : i32
    %c0_i32_0 = arith.constant 0 : i32
    %c0_i32_1 = arith.constant 0 : i32
    return %c0_i32, %c0_i32_0 : i32, i32
  }
  func.func @transform_6(%arg0: i32) -> (i32, i32) {
    %c0_i32 = arith.constant 0 : i32
    %c0_i32_0 = arith.constant 0 : i32
    %c0_i32_1 = arith.constant 0 : i32
    return %c0_i32, %c0_i32_0 : i32, i32
  }
  func.func @transform_7(%arg0: i32) -> (i32, i32) {
    %c0_i32 = arith.constant 0 : i32
    %c0_i32_0 = arith.constant 0 : i32
    %c0_i32_1 = arith.constant 0 : i32
    return %c0_i32, %c0_i32_0 : i32, i32
  }
  func.func @transform_8(%arg0: i32) -> (i32, i32) {
    %c0_i32 = arith.constant 0 : i32
    %c0_i32_0 = arith.constant 0 : i32
    %c0_i32_1 = arith.constant 0 : i32
    return %c0_i32, %c0_i32_0 : i32, i32
  }
  func.func @transform_9(%arg0: i32) -> (i32, i32) {
    %c0_i32 = arith.constant 0 : i32
    %c0_i32_0 = arith.constant 0 : i32
    %c0_i32_1 = arith.constant 0 : i32
    return %c0_i32, %c0_i32_0 : i32, i32
  }
  func.func @transform_10(%arg0: i32) -> (i32, i32, i32) {
    %c0_i32 = arith.constant 0 : i32
    %c0_i32_0 = arith.constant 0 : i32
    %c0_i32_1 = arith.constant 0 : i32
    return %arg0, %c0_i32, %c0_i32_0 : i32, i32, i32
  }
}

module attributes {stable_mosaic.version = 11 : i64} {
  func.func @_proj_kernel(%arg0: i32, %arg1: memref<2x16896xbf16, #tpu.memory_space<vmem>>, %arg2: memref<16896x128xbf16, #tpu.memory_space<vmem>>, %arg3: memref<1x128xf32, #tpu.memory_space<vmem>>, %arg4: memref<2x128xf32, #tpu.memory_space<vmem>>) attributes {dimension_semantics = [#tpu.dimension_semantics<parallel>], iteration_bounds = array<i64: 2>, scalar_prefetch = 0 : i64, scratch_operands = 0 : i64, tpu.core_type = #tpu.core_type<tc>, window_params = [{pipeline_mode = #tpu.pipeline_mode<synchronous>, transform_indices = @transform_0, window_bounds = array<i64: 2, 16896>}, {transform_indices = @transform_1, window_bounds = array<i64: 16896, 128>}, {transform_indices = @transform_2, window_bounds = array<i64: 1, 128>}, {transform_indices = @transform_3, window_bounds = array<i64: 2, 128>}]} {
    %c0 = arith.constant 0 : index
    %c0_0 = arith.constant 0 : index
    %0 = vector.load %arg1[%c0, %c0_0] : memref<2x16896xbf16, #tpu.memory_space<vmem>>, vector<2x16896xbf16>
    %c0_1 = arith.constant 0 : index
    %c0_2 = arith.constant 0 : index
    %1 = vector.load %arg2[%c0_1, %c0_2] : memref<16896x128xbf16, #tpu.memory_space<vmem>>, vector<16896x128xbf16>
    %cst = arith.constant dense<0.000000e+00> : vector<2x128xf32>
    %2 = tpu.matmul %0, %1, %cst {dimension_numbers = #tpu.dot_dimension_numbers<[1], [0], [0], [1], [0, 0, 1, 1], [], []>} : vector<2x16896xbf16>, vector<16896x128xbf16>, vector<2x128xf32> -> vector<2x128xf32>
    %c0_3 = arith.constant 0 : index
    %c0_4 = arith.constant 0 : index
    %3 = vector.load %arg3[%c0_3, %c0_4] : memref<1x128xf32, #tpu.memory_space<vmem>>, vector<1x128xf32>
    %4 = vector.broadcast %3 : vector<1x128xf32> to vector<2x128xf32>
    %5 = arith.addf %2, %4 : vector<2x128xf32>
    %c0_5 = arith.constant 0 : index
    %c0_6 = arith.constant 0 : index
    %6 = vector.load %arg4[%c0_5, %c0_6] : memref<2x128xf32, #tpu.memory_space<vmem>>, vector<2x128xf32>
    tpu.vector_store %arg4[%c0_5, %c0_6], %5 {strides = array<i32>} : memref<2x128xf32, #tpu.memory_space<vmem>>, vector<2x128xf32>,
    return
  }
  func.func @transform_0(%arg0: i32) -> (i32, i32) {
    %c0_i32 = arith.constant 0 : i32
    %c0_i32_0 = arith.constant 0 : i32
    %c0_i32_1 = arith.constant 0 : i32
    return %c0_i32, %c0_i32_0 : i32, i32
  }
  func.func @transform_1(%arg0: i32) -> (i32, i32) {
    %c0_i32 = arith.constant 0 : i32
    %c0_i32_0 = arith.constant 0 : i32
    return %c0_i32, %arg0 : i32, i32
  }
  func.func @transform_2(%arg0: i32) -> (i32, i32) {
    %c0_i32 = arith.constant 0 : i32
    %c0_i32_0 = arith.constant 0 : i32
    return %c0_i32, %arg0 : i32, i32
  }
  func.func @transform_3(%arg0: i32) -> (i32, i32) {
    %c0_i32 = arith.constant 0 : i32
    %c0_i32_0 = arith.constant 0 : i32
    return %c0_i32, %arg0 : i32, i32
  }
}

</mosaic_0001>

<bundles_post_ra>
// kernel: image_inertial_encoder_forward.2
= control target key start
LH: loop header
LB: loop body
LE: loop exit
PB: predicated region body
PF: predicated region fallthrough
CT: control target
= control target key end

     0   :  { %s9052_s0 = inlined_call_operand.vmem [shape: f32[132,10], index: 0, kind: input, shape index: {}]   ;;  %s9053_s1 = inlined_call_operand.hbm [shape: bf16[9,10,64], index: 1, kind: input, shape index: {}]   ;;  %s9054_s2 = inlined_call_operand.hbm [shape: bf16[9,64,128], index: 2, kind: input, shape index: {}]   ;;  %s9055_s3 = inlined_call_operand.hbm [shape: bf16[9,128,256], index: 3, kind: input, shape index: {}]   ;;  %s9056_s4 = inlined_call_operand.hbm [shape: f32[1,64], index: 4, kind: input, shape index: {}]   ;;  %s9057_s5 = inlined_call_operand.hbm [shape: f32[1,64], index: 5, kind: input, shape index: {}]   ;;  %s9058_s6 = inlined_call_operand.hbm [shape: f32[1,128], index: 6, kind: input, shape index: {}]   ;;  %s9059_s7 = inlined_call_operand.hbm [shape: f32[1,128], index: 7, kind: input, shape index: {}]   ;;  %s9060_s8 = inlined_call_operand.hbm [shape: f32[1,256], index: 8, kind: input, shape index: {}]   ;;  %s9061_s9 = inlined_call_operand.hbm [shape: f32[1,256], index: 9, kind: input, shape index: {}]   ;;  %s9062_s10 = inlined_call_operand.vmem [shape: bf16[2,66,256], index: 10, kind: output, shape index: {}]  }
   0x1   :  { %9065 = sst [smem:[#allocation24_spill]] %s9053_s1 }
   0x2   :  { %15 = vsyncpa [#allocation6], 0 }
   0x3   :  { %16 = vsyncpa [#allocation8], 0 }
   0x4   :  { %17 = vsyncpa [#allocation11], 0 }
   0x5   :  { %18 = vsyncpa [#allocation14], 0 }
   0x6   :  { %19 = vsyncpa [#allocation17], 0  ;;  %s7655_s13 = smov 0  }
   0x7 LB: > { %s7661_s14 = sadd.s32 4294967295, %s7581_s13   ;;  %p5529_p0 = scmp.ge.s32.totalorder %s7581_s13, 1  ;;  %s7581_s13 = sphi %s7655_s13, %s25_s13  }
   0x8   : > { %p266_p1 = scmp.lt.s32.totalorder %s7581_s13, 3  ;;  %p9063_p2 = scmp.eq.s32.totalorder %s7661_s14, 0 }
   0x9   : > { %s7583_s16 = smov [#allocation7]   ;;  %s7584_s18 = smov [#allocation10]  }
   0xa   : > { %p7666_p3 = pnand %p5529_p0, %p266_p1  ;;  %s294_s17 = sshll.u32 %s7583_s16, 4  ;;  %s7670_s17 = int_to_ptr.vmem [resolvable:$true] %s294_s17 }
   0xb   : > { %s321_s19 = sshll.u32 %s7584_s18, 4  ;;  %s7585_s21 = smov [#allocation13]   ;;  %s7674_s19 = int_to_ptr.vmem [resolvable:$true] %s321_s19 }
   0xc   : > { %s9066_s15 = scalar_select %p7666_p3, 1, 0 }
   0xd   : > { %p6968_p4 = pneg %p7666_p3  ;;  %s343_s22 = sshll.u32 %s7585_s21, 4  ;;  %s7682_s22 = int_to_ptr.vmem [resolvable:$true] %s343_s22 }
   0xe   : > { %s7586_s23 = smov [#allocation16]   ;;  %s7303_s27 = scalar_lea.hbm %s9054_s2, 4608 }
   0xf   : > { %p7678_p5 = pnand %p9063_p2, %p6968_p4  ;;  %s7684_s24 = sshll.u32 %s7586_s23, 4  ;;  %s366_s24 = int_to_ptr.vmem [resolvable:$true] %s7684_s24 }
  0x10   : > { %p7304_p6 = scmp.ne.s32.totalorder %s9054_s2, %s7303_s27  ;;  %p7310_p10 = scmp.lt.u32.totalorder %s7303_s27, %s9054_s2 }
  0x11   : > { %p7694_p7 = pneg %p7678_p5 }
  0x13   : > { %p7306_p8 = pnand %p7694_p7, %p7304_p6 }
  0x15   : > { %p7307_p9 = pneg %p7306_p8 }
  0x17   : > { %p7312_p11 = pnand %p7310_p10, %p7307_p9 }
  0x19   : > { %7315 = shalt.err (!%p7312_p11)
}
  0x1a   : > { %s7316_s16 = scalar_lea.vmem %s7670_s17, 4608  ;;  %p7324_p1 = scmp.lt.s32.totalorder %s7670_s17, %s7670_s17 }
  0x1b   : > { %p7317_p12 = scmp.ne.s32.totalorder %s7670_s17, %s7316_s16  ;;  %p7325_p4 = scmp.lt.s32.totalorder %s7316_s16, %s7316_s16 }
  0x1d   : > { %p7319_p13 = pnand %p7317_p12, %p7694_p7  ;;  %p7326_p6 = por %p7325_p4, %p7324_p1 }
  0x1f   : > { %p7320_p0 = pneg %p7319_p13 }
  0x21   : > { %p7327_p8 = pnand %p7326_p6, %p7320_p0 }
  0x23   : > { %7330 = shalt.err (!%p7327_p8)
}
  0x24   : > { %s7587_s18 = smov 64   ;;  %s7588_s21 = smov 4  }
  0x25   : > { %6974 = dma.hbm_to_vmem [thread:$0]  (!%p7678_p5), %s9054_s2, 4608, %s7670_s17, [#allocation8], %s7587_s18, %s7587_s18, %s7588_s21  }
  0x26   : > { %s7331_s28 = scalar_lea.hbm %s9056_s4, 16 }
  0x27   : > { %p7332_p9 = scmp.ne.s32.totalorder %s9056_s4, %s7331_s28  ;;  %p7338_p12 = scmp.lt.u32.totalorder %s7331_s28, %s9056_s4 }
  0x29   : > { %p7334_p10 = pnand %p7332_p9, %p7694_p7 }
  0x2b   : > { %p7335_p11 = pneg %p7334_p10 }
  0x2d   : > { %p7340_p13 = pnand %p7338_p12, %p7335_p11 }
  0x2f   : > { %7343 = shalt.err (!%p7340_p13)
}
  0x30   : > { %s7344_s17 = scalar_lea.vmem %s7674_s19, 16  ;;  %s7351_s23 = scalar_lea.vmem %s7674_s19, 32 }
  0x31   : > { %p7345_p0 = scmp.ne.s32.totalorder %s7674_s19, %s7344_s17  ;;  %p7352_p6 = scmp.lt.s32.totalorder %s7674_s19, %s7674_s19 }
  0x32   : > { %p7353_p8 = scmp.lt.s32.totalorder %s7351_s23, %s7344_s17 }
  0x33   : > { %p7347_p1 = pnand %p7345_p0, %p7694_p7 }
  0x34   : > { %p7354_p9 = por %p7353_p8, %p7352_p6 }
  0x35   : > { %p7348_p4 = pneg %p7347_p1 }
  0x37   : > { %p7355_p10 = pnand %p7354_p9, %p7348_p4 }
  0x39   : > { %7358 = shalt.err (!%p7355_p10)
}
  0x3a   : > { %6980 = dma.hbm_to_vmem [thread:$0]  (!%p7678_p5), %s9056_s4, 16, %s7674_s19, [#allocation11]  }
  0x3b   : > { %s7359_s29 = scalar_lea.hbm %s9058_s6, 16 }
  0x3c   : > { %p7360_p11 = scmp.ne.s32.totalorder %s9058_s6, %s7359_s29  ;;  %p7366_p0 = scmp.lt.u32.totalorder %s7359_s29, %s9058_s6 }
  0x3e   : > { %p7362_p12 = pnand %p7360_p11, %p7694_p7 }
  0x40   : > { %p7363_p13 = pneg %p7362_p12 }
  0x42   : > { %p7368_p1 = pnand %p7366_p0, %p7363_p13 }
  0x44   : > { %7371 = shalt.err (!%p7368_p1)
}
  0x45   : > { %s7372_s19 = scalar_lea.vmem %s7682_s22, 16  ;;  %s7379_s23 = scalar_lea.vmem %s7682_s22, 32 }
  0x46   : > { %p7373_p4 = scmp.ne.s32.totalorder %s7682_s22, %s7372_s19  ;;  %p7380_p9 = scmp.lt.s32.totalorder %s7682_s22, %s7682_s22 }
  0x47   : > { %p7381_p10 = scmp.lt.s32.totalorder %s7379_s23, %s7372_s19 }
  0x48   : > { %p7375_p6 = pnand %p7373_p4, %p7694_p7 }
  0x49   : > { %p7382_p11 = por %p7381_p10, %p7380_p9 }
  0x4a   : > { %p7376_p8 = pneg %p7375_p6 }
  0x4c   : > { %p7383_p12 = pnand %p7382_p11, %p7376_p8 }
  0x4e   : > { %7386 = shalt.err (!%p7383_p12)
}
  0x4f   : > { %6986 = dma.hbm_to_vmem [thread:$0]  (!%p7678_p5), %s9058_s6, 16, %s7682_s22, [#allocation14]  }
  0x50   : > { %s7387_s29 = scalar_lea.hbm %s9060_s8, 32 }
  0x51   : > { %p7388_p13 = scmp.ne.s32.totalorder %s9060_s8, %s7387_s29  ;;  %p7394_p4 = scmp.lt.u32.totalorder %s7387_s29, %s9060_s8 }
  0x53   : > { %p7390_p0 = pnand %p7388_p13, %p7694_p7 }
  0x55   : > { %p7391_p1 = pneg %p7390_p0 }
  0x57   : > { %p7396_p6 = pnand %p7394_p4, %p7391_p1 }
  0x59   : > { %7399 = shalt.err (!%p7396_p6)
}
  0x5a   : > { %s7400_s19 = scalar_lea.vmem %s366_s24, 32  ;;  %p7408_p11 = scmp.lt.s32.totalorder %s366_s24, %s366_s24 }
  0x5b   : > { %p7401_p8 = scmp.ne.s32.totalorder %s366_s24, %s7400_s19  ;;  %p7409_p12 = scmp.lt.s32.totalorder %s7400_s19, %s7400_s19 }
  0x5d   : > { %p7403_p9 = pnand %p7401_p8, %p7694_p7  ;;  %p7410_p2 = por %p7409_p12, %p7408_p11 }
  0x5f   : > { %p7404_p10 = pneg %p7403_p9 }
  0x61   : > { %p7411_p3 = pnand %p7410_p2, %p7404_p10 }
  0x63   : > { %7414 = shalt.err (!%p7411_p3)
}
  0x64   : > { %6992 = dma.hbm_to_vmem [thread:$0]  (!%p7678_p5), %s9060_s8, 32, %s366_s24, [#allocation17]  }
  0x65   : > { %s7589_s25 = smov [#allocation5]   ;;  %s7590_s27 = smov [#allocation9]  }
  0x66   : > { %s281_s26 = sshll.u32 %s7589_s25, 4  ;;  %s307_s28 = sshll.u32 %s7590_s27, 4  ;;  %s282_s26 = int_to_ptr.vmem [resolvable:$true] %s281_s26  ;;  %s308_s28 = int_to_ptr.vmem [resolvable:$true] %s307_s28 }
  0x67   : > { %s9069_s1 = sld [smem:[#allocation24_spill]] }
  0x6d   : > { %s7415_s12 = scalar_lea.hbm %s9069_s1, 1152 }
  0x6e   : > { %p7416_p2 = scmp.ne.s32.totalorder %s9069_s1, %s7415_s12  ;;  %p7422_p0 = scmp.lt.u32.totalorder %s7415_s12, %s9069_s1 }
  0x70   : > { %p7418_p3 = pnand %p7416_p2, %p7694_p7 }
  0x72   : > { %p7419_p13 = pneg %p7418_p3 }
  0x74   : > { %p7424_p1 = pnand %p7422_p0, %p7419_p13 }
  0x76   : > { %7427 = shalt.err (!%p7424_p1)
}
  0x77   : > { %s7428_s24 = scalar_lea.vmem %s282_s26, 1152  ;;  %p7436_p9 = scmp.lt.s32.totalorder %s282_s26, %s282_s26 }
  0x78   : > { %p7429_p4 = scmp.ne.s32.totalorder %s282_s26, %s7428_s24  ;;  %p7437_p10 = scmp.lt.s32.totalorder %s7428_s24, %s7428_s24 }
  0x7a   : > { %p7431_p6 = pnand %p7429_p4, %p7694_p7  ;;  %p7438_p11 = por %p7437_p10, %p7436_p9 }
  0x7c   : > { %p7432_p8 = pneg %p7431_p6 }
  0x7e   : > { %p7439_p12 = pnand %p7438_p11, %p7432_p8 }
  0x80   : > { %7442 = shalt.err (!%p7439_p12)
}
  0x81   : > { %6971 = dma.hbm_to_vmem [thread:$0]  (!%p7678_p5), %s9069_s1, 1152, %s282_s26, [#allocation6], %s7587_s18, %s7587_s18, %s7588_s21  }
  0x82   : > { %s7443_s11 = scalar_lea.hbm %s9055_s3, 18432 }
  0x83   : > { %p7444_p2 = scmp.ne.s32.totalorder %s9055_s3, %s7443_s11  ;;  %p7450_p0 = scmp.lt.u32.totalorder %s7443_s11, %s9055_s3 }
  0x85   : > { %p7446_p3 = pnand %p7444_p2, %p7694_p7 }
  0x87   : > { %p7447_p13 = pneg %p7446_p3 }
  0x89   : > { %p7452_p1 = pnand %p7450_p0, %p7447_p13 }
  0x8b   : > { %7455 = shalt.err (!%p7452_p1)
}
  0x8c   : > { %s7456_s22 = scalar_lea.vmem %s308_s28, 18432  ;;  %p7464_p9 = scmp.lt.s32.totalorder %s308_s28, %s308_s28 }
  0x8d   : > { %p7457_p4 = scmp.ne.s32.totalorder %s308_s28, %s7456_s22  ;;  %p7465_p10 = scmp.lt.s32.totalorder %s7456_s22, %s7456_s22 }
  0x8f   : > { %p7459_p6 = pnand %p7457_p4, %p7694_p7  ;;  %p7466_p11 = por %p7465_p10, %p7464_p9 }
  0x91   : > { %p7460_p8 = pneg %p7459_p6 }
  0x93   : > { %p7467_p12 = pnand %p7466_p11, %p7460_p8 }
  0x95   : > { %7470 = shalt.err (!%p7467_p12)
}
  0x96   : > { %s7591_s18 = smov 128   ;;  %s7592_s21 = smov 8  }
  0x97   : > { %6977 = dma.hbm_to_vmem [thread:$0]  (!%p7678_p5), %s9055_s3, 18432, %s308_s28, [#allocation8], %s7591_s18, %s7591_s18, %s7592_s21  }
  0x98   : > { %s7593_s23 = smov [#allocation12]   ;;  %s7594_s27 = smov [#allocation15]  }
  0x99   : > { %s332_s25 = sshll.u32 %s7593_s23, 4  ;;  %s354_s29 = sshll.u32 %s7594_s27, 4  ;;  %s333_s25 = int_to_ptr.vmem [resolvable:$true] %s332_s25  ;;  %s355_s29 = int_to_ptr.vmem [resolvable:$true] %s354_s29 }
  0x9a   : > { %s7471_s16 = scalar_lea.hbm %s9057_s5, 16 }
  0x9b   : > { %p7472_p2 = scmp.ne.s32.totalorder %s9057_s5, %s7471_s16  ;;  %p7478_p0 = scmp.lt.u32.totalorder %s7471_s16, %s9057_s5 }
  0x9d   : > { %p7474_p3 = pnand %p7472_p2, %p7694_p7 }
  0x9f   : > { %p7475_p13 = pneg %p7474_p3 }
  0xa1   : > { %p7480_p1 = pnand %p7478_p0, %p7475_p13 }
  0xa3   : > { %7483 = shalt.err (!%p7480_p1)
}
  0xa4   : > { %s7484_s28 = scalar_lea.vmem %s333_s25, 16  ;;  %s7491_s18 = scalar_lea.vmem %s333_s25, 32 }
  0xa5   : > { %p7485_p4 = scmp.ne.s32.totalorder %s333_s25, %s7484_s28  ;;  %p7492_p9 = scmp.lt.s32.totalorder %s333_s25, %s333_s25 }
  0xa6   : > { %p7493_p10 = scmp.lt.s32.totalorder %s7491_s18, %s7484_s28 }
  0xa7   : > { %p7487_p6 = pnand %p7485_p4, %p7694_p7 }
  0xa8   : > { %p7494_p11 = por %p7493_p10, %p7492_p9 }
  0xa9   : > { %p7488_p8 = pneg %p7487_p6 }
  0xab   : > { %p7495_p12 = pnand %p7494_p11, %p7488_p8 }
  0xad   : > { %7498 = shalt.err (!%p7495_p12)
}
  0xae   : > { %6983 = dma.hbm_to_vmem [thread:$0]  (!%p7678_p5), %s9057_s5, 16, %s333_s25, [#allocation11]  }
  0xaf   : > { %s7499_s23 = scalar_lea.hbm %s9059_s7, 16 }
  0xb0   : > { %p7500_p2 = scmp.ne.s32.totalorder %s9059_s7, %s7499_s23  ;;  %p7506_p0 = scmp.lt.u32.totalorder %s7499_s23, %s9059_s7 }
  0xb2   : > { %p7502_p3 = pnand %p7500_p2, %p7694_p7 }
  0xb4   : > { %p7503_p13 = pneg %p7502_p3 }
  0xb6   : > { %p7508_p1 = pnand %p7506_p0, %p7503_p13 }
  0xb8   : > { %7511 = shalt.err (!%p7508_p1)
}
  0xb9   : > { %s7512_s17 = scalar_lea.vmem %s355_s29, 16  ;;  %s7519_s25 = scalar_lea.vmem %s355_s29, 32 }
  0xba   : > { %p7513_p4 = scmp.ne.s32.totalorder %s355_s29, %s7512_s17  ;;  %p7520_p9 = scmp.lt.s32.totalorder %s355_s29, %s355_s29 }
  0xbb   : > { %p7521_p10 = scmp.lt.s32.totalorder %s7519_s25, %s7512_s17 }
  0xbc   : > { %p7515_p6 = pnand %p7513_p4, %p7694_p7 }
  0xbd   : > { %p7522_p11 = por %p7521_p10, %p7520_p9 }
  0xbe   : > { %p7516_p8 = pneg %p7515_p6 }
  0xc0   : > { %p7523_p12 = pnand %p7522_p11, %p7516_p8 }
  0xc2   : > { %7526 = shalt.err (!%p7523_p12)
}
  0xc3   : > { %6989 = dma.hbm_to_vmem [thread:$0]  (!%p7678_p5), %s9059_s7, 16, %s355_s29, [#allocation14]  }
  0xc4   : > { %s7595_s28 = smov [#allocation18]   ;;  %s7527_s1 = scalar_lea.hbm %s9061_s9, 32 }
  0xc5   : > { %s376_s18 = sshll.u32 %s7595_s28, 4  ;;  %p7528_p2 = scmp.ne.s32.totalorder %s9061_s9, %s7527_s1  ;;  %s377_s18 = int_to_ptr.vmem [resolvable:$true] %s376_s18 }
  0xc6   : > { %p7534_p0 = scmp.lt.u32.totalorder %s7527_s1, %s9061_s9 }
  0xc7   : > { %p7530_p3 = pnand %p7528_p2, %p7694_p7 }
  0xc9   : > { %p7531_p13 = pneg %p7530_p3 }
  0xcb   : > { %p7536_p1 = pnand %p7534_p0, %p7531_p13 }
  0xcd   : > { %7539 = shalt.err (!%p7536_p1)
}
  0xce   : > { %s7540_s29 = scalar_lea.vmem %s377_s18, 32  ;;  %p7548_p9 = scmp.lt.s32.totalorder %s377_s18, %s377_s18 }
  0xcf   : > { %p7541_p4 = scmp.ne.s32.totalorder %s377_s18, %s7540_s29  ;;  %p7549_p10 = scmp.lt.s32.totalorder %s7540_s29, %s7540_s29 }
  0xd1   : > { %p7543_p6 = pnand %p7541_p4, %p7694_p7  ;;  %p7550_p11 = por %p7549_p10, %p7548_p9 }
  0xd3   : > { %p7544_p8 = pneg %p7543_p6 }
  0xd5   : > { %p7551_p12 = pnand %p7550_p11, %p7544_p8 }
  0xd7   : > { %7554 = shalt.err (!%p7551_p12)
}
  0xd8   : > { %6995 = dma.hbm_to_vmem [thread:$0]  (!%p7678_p5), %s9061_s9, 32, %s377_s18, [#allocation17]  }
  0xd9   : > { %p9070_p2 = scmp.ne.s32.totalorder %s9066_s15, 0 }
  0xda   : > { %p9071_p3 = scmp.eq.s32.totalorder (!%p9070_p2), %s7661_s14, 0 }
  0xdb   : > { %389 = sbr.rel (%p9070_p2) target bundleno = 1998 (0x7ce), region = 60 }
  0xe2   : > { %7560 = dma.done.wait (%p9071_p3), [#allocation6], 1152   ;;  %p9072_p7 = pmov %p9071_p3 }
  0xe3   : > { %p9073_p13 = pmov %p9071_p3 }
  0xe4   : > { %7562 = vsyncadd (%p9072_p7), [#allocation6], 4294966144 }
  0xe5   : > { %7564 = dma.done.wait (%p9073_p13), [#allocation8], 23040   ;;  %p9074_p0 = pmov %p9071_p3 }
  0xe7   : > { %7566 = vsyncadd (%p9074_p0), [#allocation8], 4294944256  ;;  %p9075_p1 = pmov %p9074_p0 }
  0xe8   : > { %p9076_p5 = pmov %p9074_p0 }
  0xe9   : > { %7568 = dma.done.wait (%p9075_p1), [#allocation11], 32  }
  0xea   : > { %7570 = vsyncadd (%p9076_p5), [#allocation11], 4294967264  ;;  %p9077_p4 = pmov %p9074_p0 }
  0xeb   : > { %p9078_p6 = pmov %p9074_p0 }
  0xec   : > { %7572 = dma.done.wait (%p9077_p4), [#allocation14], 32  }
  0xed   : > { %7574 = vsyncadd (%p9078_p6), [#allocation14], 4294967264  ;;  %p9079_p8 = pmov %p9074_p0 }
  0xee   : > { %p9080_p9 = pmov %p9074_p0 }
  0xef   : > { %7576 = dma.done.wait (%p9079_p8), [#allocation17], 64  }
  0xf0   : > { %7578 = vsyncadd (%p9080_p9), [#allocation17], 4294967232  ;;  %vm477_vm0 = vcmask 80896   ;;  %v460_v0 = vld [vmem:[%s9052_s0] sm:$0xff]  ;;  %v461_v1 = vld [vmem:[%s9052_s0 + $0x8] sm:$0xff]  ;;  %vm506_vm1 = vcmask 76800  }
  0xf1   : > { %v462_v2 = vld [vmem:[%s9052_s0 + $0x10] sm:$0xff]  ;;  %v463_v3 = vld [vmem:[%s9052_s0 + $0x18] sm:$0xff]  ;;  %v464_v4 = vld [vmem:[%s9052_s0 + $0x20] sm:$0xff]  ;;  %v478_v6 = vsel %vm477_vm0, %v460_v0, inf  ;;  %v479_v7 = vsel %vm477_vm0, %v461_v1, inf  ;;  %v521_v46 = vsel %vm477_vm0, %v460_v0, -inf }
  0xf2   : > { %v465_v5 = vld [vmem:[%s9052_s0 + $0x28] sm:$0xff]  ;;  %v480_v8 = vsel %vm477_vm0, %v462_v2, inf  ;;  %v466_v9 = vld [vmem:[%s9052_s0 + $0x30] sm:$0xff]  ;;  %v467_v10 = vld [vmem:[%s9052_s0 + $0x38] sm:$0xff]  ;;  %v481_v12 = vsel %vm477_vm0, %v463_v3, inf  ;;  %v482_v13 = vsel %vm477_vm0, %v464_v4, inf }
  0xf3   : > { %v468_v11 = vld [vmem:[%s9052_s0 + $0x40] sm:$0xff]  ;;  %v484_v14 = vsel %vm477_vm0, %v465_v5, inf  ;;  %v469_v15 = vld [vmem:[%s9052_s0 + $0x48] sm:$0xff]  ;;  %v470_v16 = vld [vmem:[%s9052_s0 + $0x50] sm:$0xff]  ;;  %v483_v18 = vmin.f32 %v478_v6, %v482_v13  ;;  %v486_v20 = vsel %vm477_vm0, %v466_v9, inf  ;;  %v488_v21 = vsel %vm477_vm0, %v467_v10, inf }
  0xf4   : > { %v471_v17 = vld [vmem:[%s9052_s0 + $0x58] sm:$0xff]  ;;  %v485_v19 = vmin.f32 %v479_v7, %v484_v14  ;;  %v472_v22 = vld [vmem:[%s9052_s0 + $0x60] sm:$0xff]  ;;  %v473_v23 = vld [vmem:[%s9052_s0 + $0x68] sm:$0xff]  ;;  %v487_v25 = vmin.f32 %v480_v8, %v486_v20  ;;  %v489_v26 = vmin.f32 %v481_v12, %v488_v21  ;;  %v490_v27 = vsel %vm477_vm0, %v468_v11, inf  ;;  %s565_s16 = smul.u32 66, %s7661_s14  ;;  %p454_p10 = scmp.lt.s32.totalorder %s7661_s14, 1 }
  0xf5   : > { %v474_v24 = vld [vmem:[%s9052_s0 + $0x70] sm:$0xff]  ;;  %v492_v28 = vsel %vm477_vm0, %v469_v15, inf  ;;  %v475_v29 = vld [vmem:[%s9052_s0 + $0x78] sm:$0xff]  ;;  %v476_v30 = vld [vmem:[%s9052_s0 + $0x80] sm:$0xf]  ;;  %v491_v31 = vmin.f32 %v483_v18, %v490_v27  ;;  %v494_v33 = vsel %vm477_vm0, %v470_v16, inf }
  0xf6   : > { %v493_v32 = vmin.f32 %v485_v19, %v492_v28  ;;  %v496_v34 = vsel %vm477_vm0, %v471_v17, inf  ;;  %v495_v35 = vmin.f32 %v487_v25, %v494_v33  ;;  %v498_v37 = vsel %vm477_vm0, %v472_v22, inf  ;;  %v7039_v19 = vld [vmem:[#allocation5 + $0x20] sm:$0x1f]   ;;  %v7040_v20 = vld [vmem:[#allocation5 + $0x8] sm:$0x1f]   ;;  %s566_s25 = scalar_lea.vmem %s9052_s0, %s565_s16 }
  0xf7   : > { %v497_v36 = vmin.f32 %v489_v26, %v496_v34  ;;  %v500_v38 = vsel %vm477_vm0, %v473_v23, inf  ;;  %v499_v39 = vmin.f32 %v491_v31, %v498_v37  ;;  %v502_v41 = vsel %vm477_vm0, %v474_v24, inf  ;;  %s7598_s15 = smov 1e-12   ;;  %s9091_s14 = smov (!%p454_p10, %s7661_s14), 1 }
  0xf8   : > { %v501_v40 = vmin.f32 %v493_v32, %v500_v38  ;;  %v504_v42 = vsel %vm477_vm0, %v475_v29, inf  ;;  %v503_v43 = vmin.f32 %v495_v35, %v502_v41  ;;  %v507_v45 = vsel %vm506_vm1, %v476_v30, inf  ;;  %v567_v41 = vld [vmem:[%s566_s25] sm:$0xff]  ;;  %s6927_s19 = smul.u32 72, %s9091_s14 }
  0xf9   : > { %v505_v44 = vmin.f32 %v497_v36, %v504_v42  ;;  %v508_v47 = vmin.f32 %v499_v39, %v507_v45  ;;  %v522_v48 = vsel %vm477_vm0, %v461_v1, -inf  ;;  %v523_v49 = vsel %vm477_vm0, %v462_v2, -inf  ;;  %v568_v42 = vld [vmem:[%s566_s25 + $0x8] sm:$0xff]  ;;  %v570_v45 = vld [vmem:[%s566_s25 + $0x18] sm:$0xff] }
  0xfa   : > { %v524_v50 = vsel %vm477_vm0, %v463_v3, -inf  ;;  %v525_v52 = vsel %vm477_vm0, %v464_v4, -inf  ;;  %v527_v53 = vsel %vm477_vm0, %v465_v5, -inf  ;;  %v529_v54 = vsel %vm477_vm0, %v466_v9, -inf  ;;  %s9010_s18 = scalar_lea.vmem %s9062_s10, %s6927_s19 }
  0xfb   : > { %v510_v51 = vmin.f32 %v503_v43, %v505_v44  ;;  %v509_v55 = vmin.f32 %v508_v47, %v501_v40  ;;  %v526_v56 = vmax.f32 %v521_v46, %v525_v52  ;;  %v528_v57 = vmax.f32 %v522_v48, %v527_v53  ;;  %v569_v43 = vld [vmem:[%s566_s25 + $0x10] sm:$0xff]  ;;  %v571_v46 = vld [vmem:[%s566_s25 + $0x20] sm:$0xff]  ;;  %v572_v47 = vld [vmem:[%s566_s25 + $0x28] sm:$0xff] }
  0xfc   : > { %v530_v58 = vmax.f32 %v523_v49, %v529_v54  ;;  %v531_v59 = vsel %vm477_vm0, %v467_v10, -inf  ;;  %v533_v60 = vsel %vm477_vm0, %v468_v11, -inf  ;;  %v535_v61 = vsel %vm477_vm0, %v469_v15, -inf  ;;  %v573_v48 = vld [vmem:[%s566_s25 + $0x30] sm:$0xff]  ;;  %v574_v49 = vld [vmem:[%s566_s25 + $0x38] sm:$0xff] }
  0xfd   : > { %v537_v62 = vsel %vm477_vm0, %v470_v16, -inf  ;;  %v511_v63 = vmin.f32 %v509_v55, %v510_v51  ;;  %v532_v0 = vmax.f32 %v524_v50, %v531_v59  ;;  %v534_v1 = vmax.f32 %v526_v56, %v533_v60  ;;  %v575_v50 = vld [vmem:[%s566_s25 + $0x40] sm:$0x3] }
  0xfe   : > { %v536_v2 = vmax.f32 %v528_v57, %v535_v61  ;;  %v538_v3 = vmax.f32 %v530_v58, %v537_v62  ;;  %v539_v4 = vsel %vm477_vm0, %v471_v17, -inf  ;;  %v541_v5 = vsel %vm477_vm0, %v472_v22, -inf }
  0xff   : > { %v543_v6 = vsel %vm477_vm0, %v473_v23, -inf  ;;  %512 = vmin.xlane.f32.xlu0 %v511_v63  ;;  %v540_v7 = vmax.f32 %v532_v0, %v539_v4  ;;  %v542_v8 = vmax.f32 %v534_v1, %v541_v5  ;;  %v545_v10 = vsel %vm477_vm0, %v474_v24, -inf }
 0x100   : > { %v544_v9 = vmax.f32 %v536_v2, %v543_v6  ;;  %v546_v11 = vmax.f32 %v538_v3, %v545_v10  ;;  %v547_v12 = vsel %vm477_vm0, %v475_v29, -inf  ;;  %v549_v13 = vsel %vm506_vm1, %v476_v30, -inf  ;;  %v7042_v10 = vld [vmem:[#allocation5] sm:$0x1f]  }
 0x101   : > { %v548_v14 = vmax.f32 %v540_v7, %v547_v12  ;;  %v550_v15 = vmax.f32 %v542_v8, %v549_v13  ;;  %vm781_vm2 = vcmask 1044480   ;;  %v7596_v21 = vmov 0.0  }
 0x102   : > { %6094 = vmatprep.subr.bf16.mxu0 %v7596_v21  ;;  %707 = vst.msk [vmem:[#allocation2] sm:$0xff] %vm477_vm0, %v7596_v21  ;;  %708 = vst.msk [vmem:[#allocation2 + $0x4a] sm:$0xff] %vm477_vm0, %v7596_v21  ;;  %6006 = vmatprep.subr.bf16.mxu1 %v7596_v21  ;;  %v7994_v22 = vsel %vm781_vm2, %v7039_v19, 0  ;;  %v783_v23 = vsel %vm781_vm2, %v7040_v20, 0  ;;  %vm7597_vm3 = vmmov 0   ;;  %v597_v39 = vlaneseq }
 0x103   : > { %v551_v16 = vmax.f32 %v550_v15, %v544_v9  ;;  %v552_v18 = vmax.f32 %v546_v11, %v548_v14  ;;  %3297 = vst [vmem:[#allocation4] sm:$0xff] %v7596_v21  ;;  %3298 = vst [vmem:[#allocation4 + $0x4a] sm:$0xff] %v7596_v21  ;;  %6008 = vmatprep.mubr.msk.bf16.mxu1 %vm7597_vm3, %v7596_v21  ;;  %6096 = vmatprep.mubr.msk.bf16.mxu0 %vm7597_vm3, %v7596_v21  ;;  %vm717_vm4 = vcmask 74752   ;;  %v7041_v9 = vld [vmem:[#allocation5 + $0x28] sm:$0x1f]  }
 0x104   : > { %6095 = vmatpush3.bf16.msra.mxu0 %v7994_v22  ;;  %6007 = vmatpush3.bf16.msra.mxu1 %v783_v23  ;;  %v8008_v40 = vshrl.u32 %v597_v39, 7  ;;  %v1380_v23 = vsel %vm781_vm2, %v7041_v9, 0 }
 0x105   : > { %v553_v17 = vmax.f32 %v551_v16, %v552_v18  ;;  %6116 = vmatprep.subr.bf16.mxu0 %v7596_v21  ;;  %6028 = vmatprep.subr.bf16.mxu1 %v7596_v21 }
 0x106   : > { %v8011_v52 = vadd.s32 8, %v8008_v40  ;;  %v607_v7 = vcvt.s32.f32 %v8008_v40  ;;  %v8025_v12 = vadd.s32 16, %v8008_v40  ;;  %v8028_v18 = vadd.s32 24, %v8008_v40 }
 0x107   : > { %554 = vmax.xlane.f32.xlu0 %v553_v17 }
 0x108   : > { %v608_v8 = vcvt.s32.f32 %v8011_v52  ;;  %v617_v11 = vmul.f32 0.16666667, %v607_v7 }
 0x10a   : > { %v618_v16 = vmul.f32 0.16666667, %v608_v8 }
 0x18c   : > { %v513_v24 = vpop.xlane.xlu0 %512 }
 0x18d   : > { %v514_v25 = vrot.slane %v513_v24, 4 }
 0x18f   : > { %v515_v26 = vmin.f32 %v513_v24, %v514_v25  ;;  %v878_v24 = vsel %vm781_vm2, %v7042_v10, 0  ;;  %v626_v25 = vfloor.f32 %v617_v11  ;;  %v7043_v10 = vld [vmem:[#allocation5 + $0x30] sm:$0x1f]  }
 0x191   : > { %v516_v27 = vrot.slane %v515_v26, 2 }
 0x193   : > { %v517_v28 = vmin.f32 %v515_v26, %v516_v27  ;;  %v627_v26 = vfloor.f32 %v618_v16  ;;  %v609_v27 = vcvt.s32.f32 %v8025_v12 }
 0x194   : > { %v555_v29 = vpop.xlane.xlu0 %554 }
 0x195   : > { %v556_v30 = vrot.slane %v555_v29, 4  ;;  %v518_v31 = vrot.slane %v517_v28, 1 }
 0x197   : > { %v557_v32 = vmax.f32 %v555_v29, %v556_v30  ;;  %v519_v33 = vmin.f32 %v517_v28, %v518_v31  ;;  %v610_v28 = vcvt.s32.f32 %v8028_v18 }
 0x199   : > { %v558_v34 = vrot.slane %v557_v32, 2  ;;  %6928 = vpush %v519_v33  ;;  %v8042_v33 = vadd.s32 32, %v8008_v40 }
 0x19b   : > { %v559_v35 = vmax.f32 %v557_v32, %v558_v34  ;;  %v8045_v34 = vadd.s32 40, %v8008_v40 }
 0x19d   : > { %v560_v36 = vrot.slane %v559_v35, 1 }
 0x19f   : > { %v561_v37 = vmax.f32 %v559_v35, %v560_v36  ;;  %v635_v35 = vmul.f32 6.0, %v626_v25  ;;  %v636_v36 = vmul.f32 6.0, %v627_v26 }
 0x1a1   : > { %6930 = vpush %v561_v37  ;;  %v619_v37 = vmul.f32 0.16666667, %v609_v27 }
 0x1ca   : > { %s6929_s11 = spop %6928 }
 0x1cb   : > { %v576_v44 = vstv %s6929_s11 }
 0x1cc   : > { %v577_v51 = vsub.f32 %v567_v41, %v576_v44  ;;  %v578_v53 = vsub.f32 %v568_v42, %v576_v44  ;;  %v579_v54 = vsub.f32 %v569_v43, %v576_v44  ;;  %v580_v55 = vsub.f32 %v570_v45, %v576_v44 }
 0x1cd   : > { %v581_v56 = vsub.f32 %v571_v46, %v576_v44  ;;  %v582_v58 = vsub.f32 %v572_v47, %v576_v44  ;;  %v583_v59 = vsub.f32 %v573_v48, %v576_v44  ;;  %v584_v60 = vsub.f32 %v574_v49, %v576_v44 }
 0x1ce   : > { %v585_v61 = vsub.f32 %v575_v50, %v576_v44  ;;  %v611_v42 = vcvt.s32.f32 %v8042_v33  ;;  %v612_v43 = vcvt.s32.f32 %v8045_v34  ;;  %v8054_v44 = vsub.f32 %v607_v7, %v635_v35 }
 0x1cf   : > { %v8056_v45 = vsub.f32 %v608_v8, %v636_v36  ;;  %v628_v46 = vfloor.f32 %v619_v37  ;;  %v8061_v50 = vadd.s32 48, %v8008_v40 }
 0x1d0   : > { %vm680_vm5 = vcmp.le.f32.partialorder %v8054_v44, 4.0  ;;  %vm653_vm9 = vcmp.ge.f32.partialorder %v8054_v44, 1.0 }
 0x1d1   : > { %vm681_vm6 = vcmp.le.f32.partialorder %v8056_v45, 4.0  ;;  %vm654_vm10 = vcmp.ge.f32.partialorder %v8056_v45, 1.0 }
 0x1d2   : > { %s6931_s29 = spop %6930 }
 0x1d3   : > { %s563_s12 = ssub.f32 %s6931_s29, %s6929_s11 }
 0x1d5   : > { %s564_s20 = smax.f32 %s7598_s15, %s563_s12 }
 0x1d6   : > { %v586_v38 = vstv %s564_s20 }
 0x1d7   : > { %7300 = vrcp.f32 %v586_v38  ;;  %v620_v38 = vmul.f32 0.16666667, %v610_v28 }
 0x1d9   : > { %v629_v47 = vfloor.f32 %v620_v38  ;;  %v8133_v38 = vsel %vm653_vm9, 1.0, %v7596_v21 }
 0x1e1   : > { %v7301_v57 = vpop.eup %7300 }
 0x1e2   : > { %v588_v62 = vmul.f32 %v7301_v57, %v577_v51  ;;  %v589_v63 = vmul.f32 %v7301_v57, %v578_v53  ;;  %v590_v0 = vmul.f32 %v7301_v57, %v579_v54  ;;  %v591_v1 = vmul.f32 %v7301_v57, %v580_v55 }
 0x1e3   : > { %v592_v2 = vmul.f32 %v7301_v57, %v581_v56  ;;  %v593_v3 = vmul.f32 %v7301_v57, %v582_v58  ;;  %v594_v4 = vmul.f32 %v7301_v57, %v583_v59  ;;  %v595_v5 = vmul.f32 %v7301_v57, %v584_v60 }
 0x1e4   : > { %709 = vst.msk [vmem:[#allocation2 + $0x8] sm:$0xff] %vm477_vm0, %v588_v62  ;;  %710 = vst.msk [vmem:[#allocation2 + $0x10] sm:$0xff] %vm477_vm0, %v589_v63  ;;  %v596_v6 = vmul.f32 %v7301_v57, %v585_v61  ;;  %v8064_v51 = vadd.s32 56, %v8008_v40  ;;  %v621_v54 = vmul.f32 0.16666667, %v611_v42  ;;  %v637_v56 = vmul.f32 6.0, %v628_v46 }
 0x1e5   : > { %711 = vst.msk [vmem:[#allocation2 + $0x18] sm:$0xff] %vm477_vm0, %v590_v0  ;;  %712 = vst.msk [vmem:[#allocation2 + $0x20] sm:$0xff] %vm477_vm0, %v591_v1  ;;  %v622_v55 = vmul.f32 0.16666667, %v612_v43  ;;  %v638_v57 = vmul.f32 6.0, %v629_v47  ;;  %v613_v60 = vcvt.s32.f32 %v8061_v50  ;;  %v8071_v61 = vsel %vm680_vm5, 1.0, %v7596_v21 }
 0x1e6   : > { %713 = vst.msk [vmem:[#allocation2 + $0x28] sm:$0xff] %vm477_vm0, %v592_v2  ;;  %714 = vst.msk [vmem:[#allocation2 + $0x30] sm:$0xff] %vm477_vm0, %v593_v3  ;;  %v8074_v62 = vsel %vm681_vm6, 1.0, %v7596_v21  ;;  %v630_v1 = vfloor.f32 %v621_v54  ;;  %v614_v2 = vcvt.s32.f32 %v8064_v51  ;;  %v8084_v3 = vsub.f32 %v609_v27, %v637_v56  ;;  %v7044_v54 = vld [vmem:[#allocation5 + $0x10] sm:$0x1f]  }
 0x1e7   : > { %715 = vst.msk [vmem:[#allocation2 + $0x38] sm:$0xff] %vm477_vm0, %v594_v4  ;;  %716 = vst.msk [vmem:[#allocation2 + $0x40] sm:$0xff] %vm477_vm0, %v595_v5  ;;  %v8086_v4 = vsub.f32 %v610_v28, %v638_v57  ;;  %v631_v5 = vfloor.f32 %v622_v55  ;;  %v623_v12 = vmul.f32 0.16666667, %v613_v60 }
 0x1e8   : > { %718 = vst.msk [vmem:[#allocation2 + $0x48] sm:$0x3] %vm717_vm4, %v596_v6  ;;  %v639_v11 = vmul.f32 6.0, %v630_v1  ;;  %vm682_vm7 = vcmp.le.f32.partialorder %v8084_v3, 4.0  ;;  %vm655_vm13 = vcmp.ge.f32.partialorder %v8084_v3, 1.0 }
 0x1e9   : > { %vm683_vm8 = vcmp.le.f32.partialorder %v8086_v4, 4.0  ;;  %v632_v25 = vfloor.f32 %v623_v12  ;;  %vm656_vm14 = vcmp.ge.f32.partialorder %v8086_v4, 1.0  ;;  %v8163_v57 = vsel %vm655_vm13, 1.0, %v7596_v21 }
 0x1ea   : > { %v8116_v26 = vsub.f32 %v611_v42, %v639_v11 }
 0x1eb   : > { %v744_v13 = vld [vmem:[#allocation2 + $0x2] sm:$0xff]  ;;  %v745_v14 = vld [vmem:[#allocation2 + $0xa] sm:$0xff]  ;;  %v641_v33 = vmul.f32 6.0, %v632_v25 }
 0x1ec   : > { %v1212_v15 = vld [vmem:[#allocation2 + $0x8] sm:$0xff]  ;;  %v753_v17 = vpack.c.bf16 %v745_v14, %v744_v13  ;;  %v1213_v19 = vld [vmem:[#allocation2 + $0x10] sm:$0xff]  ;;  %v747_v30 = vld [vmem:[#allocation2 + $0x1a] sm:$0xff]  ;;  %v624_v13 = vmul.f32 0.16666667, %v614_v2  ;;  %v640_v14 = vmul.f32 6.0, %v631_v5 }
 0x1ed   : > { %v1221_v20 = vpack.c.bf16 %v1213_v19, %v1212_v15  ;;  %v746_v29 = vld [vmem:[#allocation2 + $0x12] sm:$0xff]  ;;  %v1215_v32 = vld [vmem:[#allocation2 + $0x20] sm:$0xff]  ;;  %v749_v49 = vld [vmem:[#allocation2 + $0x2a] sm:$0xff]  ;;  %v8099_v15 = vadd.s32 64, %v8008_v40  ;;  %v8104_v19 = vsel %vm682_vm7, 1.0, %v7596_v21  ;;  %vm684_vm11 = vcmp.le.f32.partialorder %v8116_v26, 4.0 }
 0x1ee   : > { %6009 = vmatmul.mubr.msk.bf16.vlgmr.msra.gmra.mrb[0].mxu1 %vm477_vm0, %v753_v17  ;;  %v1214_v31 = vld [vmem:[#allocation2 + $0x18] sm:$0xff]  ;;  %v754_v39 = vpack.c.bf16 %v747_v30, %v746_v29  ;;  %v748_v48 = vld [vmem:[#allocation2 + $0x22] sm:$0xff]  ;;  %v1217_v53 = vld [vmem:[#allocation2 + $0x30] sm:$0xff]  ;;  %v1510_v17 = vsel %vm781_vm2, %v7043_v10, 0  ;;  %v8118_v27 = vsub.f32 %v612_v43, %v640_v14  ;;  %v633_v28 = vfloor.f32 %v624_v13 }
 0x1ef   : > { %6097 = vmatmul.mubr.msk.bf16.vlgmr.msra.gmra.mrb[0].mxu0 %vm477_vm0, %v1221_v20  ;;  %6012 = vmatprep.mubr.msk.bf16.mxu1 %vm7597_vm3, %v7596_v21  ;;  %v1222_v41 = vpack.c.bf16 %v1215_v32, %v1214_v31  ;;  %v1216_v52 = vld [vmem:[#allocation2 + $0x28] sm:$0xff]  ;;  %v755_v58 = vpack.c.bf16 %v749_v49, %v748_v48  ;;  %v8078_v0 = vld [vmem:[#allocation2 + $0x11] sm:$0xff]  ;;  %v751_v7 = vld [vmem:[#allocation2 + $0x3a] sm:$0xff]  ;;  %v8107_v20 = vsel %vm683_vm8, 1.0, %v7596_v21  ;;  %v615_v29 = vcvt.s32.f32 %v8099_v15 }
 0x1f0   : > { %6117 = vmatpush3.bf16.msra.mxu0 %v1380_v23  ;;  %6100 = vmatprep.mubr.msk.bf16.mxu0 %vm7597_vm3, %v7596_v21  ;;  %v1223_v59 = vpack.c.bf16 %v1217_v53, %v1216_v52  ;;  %v8076_v63 = vld [vmem:[#allocation2 + $0x9] sm:$0xff]  ;;  %v750_v6 = vld [vmem:[#allocation2 + $0x32] sm:$0xff]  ;;  %v1343_v9 = vmul.f32 %v8074_v62, %v8078_v0  ;;  %v752_v30 = vld [vmem:[#allocation2 + $0x42] sm:$0x3]  ;;  %vm685_vm12 = vcmp.le.f32.partialorder %v8118_v27, 4.0  ;;  %v642_v34 = vmul.f32 6.0, %v633_v28 }
 0x1f1   : > { %6029 = vmatpush3.bf16.msra.mxu1 %v878_v24  ;;  %6138 = vmatprep.subr.bf16.mxu0 %v7596_v21  ;;  %v1342_v8 = vmul.f32 %v8071_v61, %v8076_v63  ;;  %v756_v16 = vpack.c.bf16 %v751_v7, %v750_v6  ;;  %v8109_v23 = vld [vmem:[#allocation2 + $0x19] sm:$0xff]  ;;  %v8111_v24 = vld [vmem:[#allocation2 + $0x21] sm:$0xff]  ;;  %v625_v35 = vmul.f32 0.16666667, %v615_v29  ;;  %v757_v36 = vpack.c.bf16 %v752_v30, %v752_v30  ;;  %v1337_v44 = vld [vmem:[#allocation2 + $0x29] sm:$0xff] }
 0x1f2   : > { %6050 = vmatprep.subr.bf16.mxu1 %v7596_v21  ;;  %v1344_v31 = vmul.f32 %v8104_v19, %v8109_v23  ;;  %v1345_v32 = vmul.f32 %v8107_v20, %v8111_v24  ;;  %v8140_v42 = vsel %vm684_vm11, 1.0, %v7596_v21  ;;  %v8143_v43 = vsel %vm685_vm12, 1.0, %v7596_v21  ;;  %v8145_v45 = vld [vmem:[#allocation2 + $0x31] sm:$0xff]  ;;  %v1339_v1 = vld [vmem:[#allocation2 + $0x39] sm:$0xff]  ;;  %v1341_v12 = vld [vmem:[#allocation2 + $0x49] sm:$0x3] }
 0x1f3   : > { %v1351_v18 = vpack.c.bf16 %v1343_v9, %v1342_v8  ;;  %v650_v46 = vsub.f32 %v613_v60, %v641_v33  ;;  %v651_v47 = vsub.f32 %v614_v2, %v642_v34  ;;  %v634_v48 = vfloor.f32 %v625_v35  ;;  %v1340_v2 = vld [vmem:[#allocation2 + $0x41] sm:$0xff]  ;;  %v1463_v25 = vld [vmem:[#allocation2 + $0xd] sm:$0xff] }
 0x1f4   : > { %v1352_v37 = vpack.c.bf16 %v1345_v32, %v1344_v31  ;;  %v1346_v52 = vmul.f32 %v8140_v42, %v1337_v44  ;;  %v1347_v53 = vmul.f32 %v8143_v43, %v8145_v45  ;;  %v730_v4 = vmul.f32 %v8163_v57, %v8078_v0  ;;  %v7045_v30 = vld [vmem:[#allocation5 + $0x38] sm:$0x1f]  }
 0x1f5   : > { %vm686_vm15 = vcmp.le.f32.partialorder %v650_v46, 4.0  ;;  %vm687_vm1 = vcmp.le.f32.partialorder %v651_v47, 4.0  ;;  %v643_v50 = vmul.f32 6.0, %v634_v48  ;;  %vm657_vm4 = vcmp.ge.f32.partialorder %v8116_v26, 1.0  ;;  %v1464_v26 = vld [vmem:[#allocation2 + $0x15] sm:$0xff]  ;;  %v952_v48 = vld [vmem:[#allocation2 + $0x3] sm:$0xff] }
 0x1f6   : > { %6013 = vmatmul.mubr.msk.bf16.gmra.mrb[4].mxu1 %vm477_vm0, %v754_v39  ;;  %v8136_v39 = vsel %vm654_vm10, 1.0, %v7596_v21  ;;  %v1353_v56 = vpack.c.bf16 %v1347_v53, %v1346_v52  ;;  %v8171_v60 = vsel %vm686_vm15, 1.0, %v7596_v21  ;;  %vm658_vm5 = vcmp.ge.f32.partialorder %v8118_v27, 1.0  ;;  %v727_v35 = vld [vmem:[#allocation2 + $0x41] sm:$0x3]  ;;  %v1468_v52 = vld [vmem:[#allocation2 + $0x35] sm:$0xff] }
 0x1f7   : > { %6101 = vmatmul.mubr.msk.bf16.gmra.mrb[4].mxu0 %vm477_vm0, %v1222_v41  ;;  %6016 = vmatprep.mubr.msk.bf16.mxu1 %vm7597_vm3, %v7596_v21  ;;  %v719_v41 = vld [vmem:[#allocation2 + $0x1] sm:$0xff]  ;;  %v729_v51 = vmul.f32 %v8136_v39, %v8076_v63  ;;  %v8174_v63 = vsel %vm687_vm1, 1.0, %v7596_v21  ;;  %v652_v3 = vsub.f32 %v615_v29, %v643_v50  ;;  %v1348_v6 = vmul.f32 %v8171_v60, %v1339_v1 }
 0x1f8   : > { %6104 = vmatprep.mubr.msk.bf16.mxu0 %vm7597_vm3, %v7596_v21  ;;  %v728_v49 = vmul.f32 %v8133_v38, %v719_v41  ;;  %v1349_v7 = vmul.f32 %v8174_v63, %v1340_v2  ;;  %v8191_v10 = vsel %vm657_vm4, 1.0, %v7596_v21  ;;  %v8194_v0 = vsel %vm658_vm5, 1.0, %v7596_v21  ;;  %v954_v2 = vld [vmem:[#allocation2 + $0x13] sm:$0xff] }
 0x1f9   : > { %vm688_vm6 = vcmp.le.f32.partialorder %v652_v3, 4.0  ;;  %v732_v13 = vmul.f32 %v8191_v10, %v8111_v24  ;;  %v733_v14 = vmul.f32 %v8194_v0, %v1337_v44  ;;  %vm659_vm7 = vcmp.ge.f32.partialorder %v650_v46, 1.0 }
 0x1fa   : > { %v737_v55 = vpack.c.bf16 %v729_v51, %v728_v49  ;;  %v1354_v9 = vpack.c.bf16 %v1349_v7, %v1348_v6  ;;  %v8198_v11 = vsel %vm688_vm6, 1.0, %v7596_v21  ;;  %vm660_vm8 = vcmp.ge.f32.partialorder %v651_v47, 1.0  ;;  %v953_v49 = vld [vmem:[#allocation2 + $0xb] sm:$0xff] }
 0x1fb   : > { %v1350_v15 = vmul.f32 %v8198_v11, %v1341_v12  ;;  %v1472_v28 = vmul.f32 %v8133_v38, %v1463_v25  ;;  %v1473_v29 = vmul.f32 %v8136_v39, %v1464_v26  ;;  %vm661_vm9 = vcmp.ge.f32.partialorder %v652_v3, 1.0  ;;  %v1467_v51 = vld [vmem:[#allocation2 + $0x2d] sm:$0xff]  ;;  %v955_v3 = vld [vmem:[#allocation2 + $0x1b] sm:$0xff]  ;;  %v1470_v6 = vld [vmem:[#allocation2 + $0x45] sm:$0xff] }
 0x1fc   : > { %v1631_v33 = vsel %vm781_vm2, %v7045_v30, 0  ;;  %v8228_v34 = vsel %vm661_vm9, 1.0, %v7596_v21  ;;  %v961_v53 = vmul.f32 %v8071_v61, %v952_v48  ;;  %v1476_v50 = vmul.f32 %v8191_v10, %v1467_v51  ;;  %v959_v30 = vld [vmem:[#allocation2 + $0x3b] sm:$0xff]  ;;  %v1596_v48 = vld [vmem:[#allocation2 + $0x26] sm:$0xff] }
 0x1fd   : > { %v1481_v32 = vpack.c.bf16 %v1473_v29, %v1472_v28  ;;  %v736_v41 = vmul.f32 %v8228_v34, %v727_v35  ;;  %v963_v7 = vmul.f32 %v8104_v19, %v954_v2  ;;  %v958_v29 = vld [vmem:[#allocation2 + $0x33] sm:$0xff]  ;;  %vm1914_vm5 = vcmask 517120  }
 0x1fe   : > { %6017 = vmatmul.mubr.msk.bf16.gmra.mrb[8].mxu1 %vm477_vm0, %v755_v58  ;;  %v8166_v58 = vsel %vm656_vm14, 1.0, %v7596_v21  ;;  %v1593_v35 = vld [vmem:[#allocation2 + $0xe] sm:$0xff]  ;;  %v1084_v2 = vld [vmem:[#allocation2 + $0x17] sm:$0xff] }
 0x1ff   : > { %6105 = vmatmul.mubr.msk.bf16.gmra.mrb[8].mxu0 %vm477_vm0, %v1223_v59  ;;  %6020 = vmatprep.mubr.msk.bf16.mxu1 %vm7597_vm3, %v7596_v21  ;;  %v999_v59 = vsel %vm781_vm2, %v7044_v54, 0  ;;  %v731_v5 = vmul.f32 %v8166_v58, %v8109_v23  ;;  %v8213_v23 = vsel %vm660_vm8, 1.0, %v7596_v21  ;;  %v741_v46 = vpack.c.bf16 %v736_v41, %v736_v41 }
 0x200   : > { %6118 = vmatprep.mubr.msk.bf16.mxu0 %vm7597_vm3, %v7596_v21  ;;  %v735_v27 = vmul.f32 %v8213_v23, %v1339_v1  ;;  %v962_v54 = vmul.f32 %v8074_v62, %v953_v49  ;;  %v1479_v12 = vmul.f32 %v8213_v23, %v1470_v6  ;;  %v1599_v6 = vld [vmem:[#allocation2 + $0x3e] sm:$0xff] }
 0x201   : > { %v738_v8 = vpack.c.bf16 %v731_v5, %v730_v4  ;;  %v1469_v5 = vld [vmem:[#allocation2 + $0x3d] sm:$0xff] }
 0x206   : > { %6021 = vmatmul.mubr.msk.bf16.gmra.mrb[12].mxu1 %vm477_vm0, %v756_v16  ;;  %v739_v16 = vpack.c.bf16 %v733_v14, %v732_v13  ;;  %v1471_v14 = vld [vmem:[#allocation2 + $0x4d] sm:$0x3] }
 0x207   : > { %6119 = vmatmul.mubr.msk.bf16.vlgmr.msra.gmra.mrb[0].mxu0 %vm477_vm0, %v1351_v18  ;;  %6024 = vmatprep.mubr.msk.bf16.mxu1 %vm7597_vm3, %v7596_v21  ;;  %v1355_v18 = vpack.c.bf16 %v1350_v15, %v1350_v15  ;;  %v1480_v25 = vmul.f32 %v8228_v34, %v1471_v14 }
 0x208   : > { %6139 = vmatpush3.bf16.msra.mxu0 %v1510_v17  ;;  %6122 = vmatprep.mubr.msk.bf16.mxu0 %vm7597_vm3, %v7596_v21  ;;  %v8210_v17 = vsel %vm659_vm7, 1.0, %v7596_v21 }
 0x209   : > { %6160 = vmatprep.subr.bf16.mxu0 %v7596_v21  ;;  %v734_v24 = vmul.f32 %v8210_v17, %v8145_v45 }
 0x20b   : > { %v740_v31 = vpack.c.bf16 %v735_v27, %v734_v24  ;;  %v1485_v27 = vpack.c.bf16 %v1480_v25, %v1480_v25  ;;  %v1088_v25 = vld [vmem:[#allocation2 + $0x37] sm:$0xff] }
 0x20e   : > { %6025 = vmatmul.mubr.msk.bf16.gmra.mrb[16].mxu1 %vm477_vm0, %v757_v36  ;;  %v1465_v36 = vld [vmem:[#allocation2 + $0x1d] sm:$0xff] }
 0x20f   : > { %6123 = vmatmul.mubr.msk.bf16.gmra.mrb[4].mxu0 %vm477_vm0, %v1352_v37  ;;  %6030 = vmatprep.mubr.msk.bf16.mxu1 %vm7597_vm3, %v7596_v21  ;;  %v1466_v37 = vld [vmem:[#allocation2 + $0x25] sm:$0xff]  ;;  %v1474_v44 = vmul.f32 %v8163_v57, %v1465_v36  ;;  %v1594_v36 = vld [vmem:[#allocation2 + $0x16] sm:$0xff] }
 0x210   : > { %6126 = vmatprep.mubr.msk.bf16.mxu0 %vm7597_vm3, %v7596_v21  ;;  %v1475_v45 = vmul.f32 %v8166_v58, %v1466_v37  ;;  %v1602_v41 = vpack.c.bf16 %v1594_v36, %v1593_v35 }
 0x212   : > { %v1482_v47 = vpack.c.bf16 %v1475_v45, %v1474_v44  ;;  %v960_v45 = vld [vmem:[#allocation2 + $0x43] sm:$0x3] }
 0x216   : > { %6031 = vmatmul.mubr.msk.bf16.vlgmr.msra.gmra.mrb[0].mxu1 %vm477_vm0, %v737_v55  ;;  %v1477_v55 = vmul.f32 %v8194_v0, %v1468_v52  ;;  %v1082_v52 = vld [vmem:[#allocation2 + $0x7] sm:$0xff] }
 0x217   : > { %6127 = vmatmul.mubr.msk.bf16.gmra.mrb[8].mxu0 %vm477_vm0, %v1353_v56  ;;  %6034 = vmatprep.mubr.msk.bf16.mxu1 %vm7597_vm3, %v7596_v21  ;;  %v7046_v56 = vld [vmem:[#allocation5 + $0x18] sm:$0x1f]  }
 0x218   : > { %6130 = vmatprep.mubr.msk.bf16.mxu0 %vm7597_vm3, %v7596_v21  ;;  %6051 = vmatpush3.bf16.msra.mxu1 %v999_v59  ;;  %v970_v59 = vpack.c.bf16 %v962_v54, %v961_v53  ;;  %v1483_v1 = vpack.c.bf16 %v1477_v55, %v1476_v50  ;;  %v1129_v4 = vsel %vm781_vm2, %v7046_v56, 0  ;;  %v1083_v53 = vld [vmem:[#allocation2 + $0xf] sm:$0xff]  ;;  %v1091_v54 = vmul.f32 %v8133_v38, %v1082_v52  ;;  %v1220_v52 = vld [vmem:[#allocation2 + $0x48] sm:$0x3] }
 0x219   : > { %6072 = vmatprep.subr.bf16.mxu1 %v7596_v21  ;;  %v1092_v50 = vmul.f32 %v8136_v39, %v1083_v53  ;;  %v1597_v55 = vld [vmem:[#allocation2 + $0x2e] sm:$0xff]  ;;  %v1598_v56 = vld [vmem:[#allocation2 + $0x36] sm:$0xff] }
 0x21e   : > { %6035 = vmatmul.mubr.msk.bf16.gmra.mrb[4].mxu1 %vm477_vm0, %v738_v8  ;;  %v964_v8 = vmul.f32 %v8107_v20, %v955_v3  ;;  %v1085_v3 = vld [vmem:[#allocation2 + $0x1f] sm:$0xff] }
 0x21f   : > { %6131 = vmatmul.mubr.msk.bf16.gmra.mrb[12].mxu0 %vm477_vm0, %v1354_v9  ;;  %6038 = vmatprep.mubr.msk.bf16.mxu1 %vm7597_vm3, %v7596_v21  ;;  %v1478_v9 = vmul.f32 %v8210_v17, %v1469_v5  ;;  %v1094_v5 = vmul.f32 %v8166_v58, %v1085_v3  ;;  %v1725_v35 = vmul.f32 %v8104_v19, %v1085_v3  ;;  %v7049_v3 = vld [vmem:[#allocation7 + $0x28] sm:$0xff]  }
 0x220   : > { %6134 = vmatprep.mubr.msk.bf16.mxu0 %vm7597_vm3, %v7596_v21  ;;  %v971_v13 = vpack.c.bf16 %v964_v8, %v963_v7  ;;  %v1600_v7 = vld [vmem:[#allocation2 + $0x46] sm:$0xff] }
 0x221   : > { %v1484_v15 = vpack.c.bf16 %v1479_v12, %v1478_v9  ;;  %v1605_v9 = vpack.c.bf16 %v1600_v7, %v1599_v6  ;;  %v1086_v12 = vld [vmem:[#allocation2 + $0x27] sm:$0xff] }
 0x222   : > { %v1726_v36 = vmul.f32 %v8107_v20, %v1086_v12 }
 0x226   : > { %6039 = vmatmul.mubr.msk.bf16.gmra.mrb[8].mxu1 %vm477_vm0, %v739_v16  ;;  %v956_v16 = vld [vmem:[#allocation2 + $0x23] sm:$0xff] }
 0x227   : > { %6135 = vmatmul.mubr.msk.bf16.gmra.mrb[16].mxu0 %vm477_vm0, %v1355_v18  ;;  %6042 = vmatprep.mubr.msk.bf16.mxu1 %vm7597_vm3, %v7596_v21  ;;  %v957_v18 = vld [vmem:[#allocation2 + $0x2b] sm:$0xff]  ;;  %v965_v26 = vmul.f32 %v8140_v42, %v956_v16 }
 0x228   : > { %6140 = vmatprep.mubr.msk.bf16.mxu0 %vm7597_vm3, %v7596_v21  ;;  %v966_v24 = vmul.f32 %v8143_v43, %v957_v18 }
 0x22a   : > { %v972_v28 = vpack.c.bf16 %v966_v24, %v965_v26  ;;  %v1089_v26 = vld [vmem:[#allocation2 + $0x3f] sm:$0xff]  ;;  %v1097_v24 = vmul.f32 %v8210_v17, %v1088_v25 }
 0x22e   : > { %6043 = vmatmul.mubr.msk.bf16.gmra.mrb[12].mxu1 %vm477_vm0, %v740_v31  ;;  %v967_v31 = vmul.f32 %v8171_v60, %v958_v29  ;;  %v1724_v29 = vmul.f32 %v8074_v62, %v1084_v2 }
 0x22f   : > { %6141 = vmatmul.mubr.msk.bf16.vlgmr.msra.gmra.mrb[0].mxu0 %vm477_vm0, %v1481_v32  ;;  %6046 = vmatprep.mubr.msk.bf16.mxu1 %vm7597_vm3, %v7596_v21  ;;  %v968_v32 = vmul.f32 %v8174_v63, %v959_v30 }
 0x230   : > { %6161 = vmatpush3.bf16.msra.mxu0 %v1631_v33  ;;  %6144 = vmatprep.mubr.msk.bf16.mxu0 %vm7597_vm3, %v7596_v21  ;;  %v7047_v33 = vld [vmem:[#allocation5 + $0x40] sm:$0x1f]  }
 0x231   : > { %6182 = vmatprep.subr.bf16.mxu0 %v7596_v21  ;;  %v973_v37 = vpack.c.bf16 %v968_v32, %v967_v31  ;;  %v1761_v44 = vsel %vm781_vm2, %v7047_v33, 0  ;;  %v1090_v32 = vld [vmem:[#allocation2 + $0x47] sm:$0x3]  ;;  %vm1903_vm2 = vcmask 523264  }
 0x232   : > { %v1099_v33 = vmul.f32 %v8228_v34, %v1090_v32  ;;  %1904 = vst.msk [vmem:[#allocation3] sm:$0xff] %vm1903_vm2, %v7596_v21  ;;  %1905 = vst.msk [vmem:[#allocation3 + $0x4a] sm:$0xff] %vm1903_vm2, %v7596_v21 }
 0x236   : > { %6047 = vmatmul.mubr.msk.bf16.gmra.mrb[16].mxu1 %vm477_vm0, %v741_v46  ;;  %v969_v46 = vmul.f32 %v8198_v11, %v960_v45  ;;  %v1219_v45 = vld [vmem:[#allocation2 + $0x40] sm:$0xff] }
 0x237   : > { %6145 = vmatmul.mubr.msk.bf16.gmra.mrb[4].mxu0 %vm477_vm0, %v1482_v47  ;;  %6052 = vmatprep.mubr.msk.bf16.mxu1 %vm7597_vm3, %v7596_v21  ;;  %v1595_v47 = vld [vmem:[#allocation2 + $0x1e] sm:$0xff] }
 0x238   : > { %6148 = vmatprep.mubr.msk.bf16.mxu0 %vm7597_vm3, %v7596_v21  ;;  %v974_v49 = vpack.c.bf16 %v969_v46, %v969_v46  ;;  %v1603_v51 = vpack.c.bf16 %v1596_v48, %v1595_v47  ;;  %v1728_v47 = vmul.f32 %v8143_v43, %v1088_v25 }
 0x23e   : > { %6053 = vmatmul.mubr.msk.bf16.vlgmr.msra.gmra.mrb[0].mxu1 %vm477_vm0, %v970_v59  ;;  %v1100_v59 = vpack.c.bf16 %v1092_v50, %v1091_v54  ;;  %v1225_v50 = vpack.c.bf16 %v1220_v52, %v1220_v52 }
 0x23f   : > { %6149 = vmatmul.mubr.msk.bf16.gmra.mrb[8].mxu0 %vm477_vm0, %v1483_v1  ;;  %6056 = vmatprep.mubr.msk.bf16.mxu1 %vm7597_vm3, %v7596_v21  ;;  %v1604_v1 = vpack.c.bf16 %v1598_v56, %v1597_v55  ;;  %v1722_v55 = vld [vmem:[#allocation2 + $0x4f] sm:$0x3] }
 0x240   : > { %6152 = vmatprep.mubr.msk.bf16.mxu0 %vm7597_vm3, %v7596_v21  ;;  %6073 = vmatpush3.bf16.msra.mxu1 %v1129_v4  ;;  %v1093_v4 = vmul.f32 %v8163_v57, %v1084_v2  ;;  %v7048_v2 = vld [vmem:[#allocation7 + $0x20] sm:$0xff]  }
 0x241   : > { %6456 = vmatprep.subr.bf16.mxu1 %v7596_v21 }
 0x242   : > { %v1101_v8 = vpack.c.bf16 %v1094_v5, %v1093_v4  ;;  %v7050_v4 = vld [vmem:[#allocation7 + $0x30] sm:$0xff]   ;;  %v7051_v5 = vld [vmem:[#allocation7 + $0x38] sm:$0xff]  }
 0x246   : > { %6057 = vmatmul.mubr.msk.bf16.gmra.mrb[4].mxu1 %vm477_vm0, %v971_v13  ;;  %v1087_v13 = vld [vmem:[#allocation2 + $0x2f] sm:$0xff] }
 0x247   : > { %6153 = vmatmul.mubr.msk.bf16.gmra.mrb[12].mxu0 %vm477_vm0, %v1484_v15  ;;  %6060 = vmatprep.mubr.msk.bf16.mxu1 %vm7597_vm3, %v7596_v21  ;;  %v1096_v14 = vmul.f32 %v8194_v0, %v1087_v13  ;;  %v1601_v15 = vld [vmem:[#allocation2 + $0x4e] sm:$0x3]  ;;  %v1727_v46 = vmul.f32 %v8140_v42, %v1087_v13 }
 0x248   : > { %6156 = vmatprep.mubr.msk.bf16.mxu0 %vm7597_vm3, %v7596_v21  ;;  %v1606_v16 = vpack.c.bf16 %v1601_v15, %v1601_v15 }
 0x24e   : > { %6061 = vmatmul.mubr.msk.bf16.gmra.mrb[8].mxu1 %vm477_vm0, %v972_v28  ;;  %v1723_v28 = vmul.f32 %v8071_v61, %v1083_v53  ;;  %v1729_v53 = vmul.f32 %v8171_v60, %v1089_v26 }
 0x24f   : > { %6157 = vmatmul.mubr.msk.bf16.gmra.mrb[16].mxu0 %vm477_vm0, %v1485_v27  ;;  %6064 = vmatprep.mubr.msk.bf16.mxu1 %vm7597_vm3, %v7596_v21  ;;  %v1098_v27 = vmul.f32 %v8213_v23, %v1089_v26 }
 0x250   : > { %6162 = vmatprep.mubr.msk.bf16.mxu0 %vm7597_vm3, %v7596_v21  ;;  %v1732_v31 = vpack.c.bf16 %v1724_v29, %v1723_v28  ;;  %v8366_v29 = vld [vmem:[#allocation12] ss:$0 sm:$0xff] }
 0x251   : > { %v1103_v30 = vpack.c.bf16 %v1098_v27, %v1097_v24  ;;  %v8364_v24 = vld [vmem:[#allocation10] ss:$0 sm:$0xff] }
 0x256   : > { %6065 = vmatmul.mubr.msk.bf16.gmra.mrb[12].mxu1 %vm477_vm0, %v973_v37  ;;  %v1104_v37 = vpack.c.bf16 %v1099_v33, %v1099_v33 }
 0x257   : > { %6163 = vmatmul.mubr.msk.bf16.vlgmr.msra.gmra.mrb[0].mxu0 %vm477_vm0, %v1602_v41  ;;  %6068 = vmatprep.mubr.msk.bf16.mxu1 %vm7597_vm3, %v7596_v21  ;;  %v1733_v41 = vpack.c.bf16 %v1726_v36, %v1725_v35 }
 0x258   : > { %6183 = vmatpush3.bf16.msra.mxu0 %v1761_v44  ;;  %6166 = vmatprep.mubr.msk.bf16.mxu0 %vm7597_vm3, %v7596_v21  ;;  %v1218_v44 = vld [vmem:[#allocation2 + $0x38] sm:$0xff] }
 0x259   : > { %v1224_v48 = vpack.c.bf16 %v1219_v45, %v1218_v44 }
 0x25e   : > { %6069 = vmatmul.mubr.msk.bf16.gmra.mrb[16].mxu1 %vm477_vm0, %v974_v49  ;;  %v1734_v49 = vpack.c.bf16 %v1728_v47, %v1727_v46 }
 0x25f   : > { %6167 = vmatmul.mubr.msk.bf16.gmra.mrb[4].mxu0 %vm477_vm0, %v1603_v51  ;;  %6074 = vmatprep.mubr.msk.bf16.mxu1 %vm7597_vm3, %v7596_v21  ;;  %v1721_v51 = vld [vmem:[#allocation2 + $0x47] sm:$0xff] }
 0x260   : > { %6170 = vmatprep.mubr.msk.bf16.mxu0 %vm7597_vm3, %v7596_v21  ;;  %v1730_v54 = vmul.f32 %v8174_v63, %v1721_v51 }
 0x262   : > { %v1735_v56 = vpack.c.bf16 %v1730_v54, %v1729_v53 }
 0x266   : > { %6075 = vmatmul.mubr.msk.bf16.vlgmr.msra.gmra.mrb[0].mxu1 %vm477_vm0, %v1100_v59  ;;  %v1731_v59 = vmul.f32 %v8198_v11, %v1722_v55 }
 0x267   : > { %6171 = vmatmul.mubr.msk.bf16.gmra.mrb[8].mxu0 %vm477_vm0, %v1604_v1  ;;  %6078 = vmatprep.mubr.msk.bf16.mxu1 %vm7597_vm3, %v7596_v21 }
 0x268   : > { %6174 = vmatprep.mubr.msk.bf16.mxu0 %vm7597_vm3, %v7596_v21  ;;  %6457 = vmatpush3.bf16.msra.mxu1 %v7994_v22  ;;  %v1095_v22 = vmul.f32 %v8191_v10, %v1086_v12  ;;  %v1736_v1 = vpack.c.bf16 %v1731_v59, %v1731_v59 }
 0x269   : > { %6204 = vmatprep.subr.bf16.mxu1 %v7596_v21 }
 0x26a   : > { %v1102_v18 = vpack.c.bf16 %v1096_v14, %v1095_v22 }
 0x26e   : > { %6079 = vmatmul.mubr.msk.bf16.gmra.mrb[4].mxu1 %vm477_vm0, %v1101_v8 }
 0x26f   : > { %6175 = vmatmul.mubr.msk.bf16.gmra.mrb[12].mxu0 %vm477_vm0, %v1605_v9  ;;  %6082 = vmatprep.mubr.msk.bf16.mxu1 %vm7597_vm3, %v7596_v21 }
 0x270   : > { %6178 = vmatprep.mubr.msk.bf16.mxu0 %vm7597_vm3, %v7596_v21 }
 0x276   : > { %6083 = vmatmul.mubr.msk.bf16.gmra.mrb[8].mxu1 %vm477_vm0, %v1102_v18 }
 0x277   : > { %6179 = vmatmul.mubr.msk.bf16.gmra.mrb[16].mxu0 %vm477_vm0, %v1606_v16  ;;  %6086 = vmatprep.mubr.msk.bf16.mxu1 %vm7597_vm3, %v7596_v21 }
 0x278   : > { %6184 = vmatprep.mubr.msk.bf16.mxu0 %vm7597_vm3, %v7596_v21 }
 0x27e   : > { %6087 = vmatmul.mubr.msk.bf16.gmra.mrb[12].mxu1 %vm477_vm0, %v1103_v30 }
 0x27f   : > { %6185 = vmatmul.mubr.msk.bf16.vlgmr.msra.gmra.mrb[0].mxu0 %vm477_vm0, %v1732_v31  ;;  %6090 = vmatprep.mubr.msk.bf16.mxu1 %vm7597_vm3, %v7596_v21 }
 0x280   : > { %6188 = vmatprep.mubr.msk.bf16.mxu0 %vm7597_vm3, %v7596_v21 }
 0x286   : > { %6091 = vmatmul.mubr.msk.bf16.gmra.mrb[16].mxu1 %vm477_vm0, %v1104_v37 }
 0x287   : > { %6189 = vmatmul.mubr.msk.bf16.gmra.mrb[4].mxu0 %vm477_vm0, %v1733_v41  ;;  %6108 = vmatprep.mubr.msk.bf16.mxu1 %vm7597_vm3, %v7596_v21 }
 0x288   : > { %6192 = vmatprep.mubr.msk.bf16.mxu0 %vm7597_vm3, %v7596_v21 }
 0x28e   : > { %6109 = vmatmul.mubr.msk.bf16.vlgmr.msra.gmra.mrb[12].mxu1 %vm477_vm0, %v1224_v48 }
 0x28f   : > { %6193 = vmatmul.mubr.msk.bf16.gmra.mrb[8].mxu0 %vm477_vm0, %v1734_v49  ;;  %6112 = vmatprep.mubr.msk.bf16.mxu1 %vm7597_vm3, %v7596_v21 }
 0x290   : > { %6196 = vmatprep.mubr.msk.bf16.mxu0 %vm7597_vm3, %v7596_v21  ;;  %6205 = vmatpush3.bf16.msra.mxu1 %v7048_v2 }
 0x291   : > { %6206 = vmatprep.subr.bf16.mxu1 %v7596_v21 }
 0x294   : > { %6207 = vmatpush3.bf16.msra.mxu1 %v7049_v3 }
 0x295   : > { %6208 = vmatprep.subr.bf16.mxu1 %v7596_v21 }
 0x296   : > { %6113 = vmatmul.mubr.msk.bf16.gmra.mrb[16].mxu1 %vm477_vm0, %v1225_v50 }
 0x297   : > { %6197 = vmatmul.mubr.msk.bf16.gmra.mrb[12].mxu0 %vm477_vm0, %v1735_v56  ;;  %6212 = vmatprep.mubr.msk.bf16.mxu1 %vm7597_vm3, %v7596_v21 }
 0x298   : > { %6200 = vmatprep.mubr.msk.bf16.mxu0 %vm7597_vm3, %v7596_v21  ;;  %6209 = vmatpush3.bf16.msra.mxu1 %v7050_v4 }
 0x299   : > { %6210 = vmatprep.subr.bf16.mxu1 %v7596_v21 }
 0x29c   : > { %6211 = vmatpush3.bf16.msra.mxu1 %v7051_v5 }
 0x29d   : > { %6232 = vmatprep.subr.bf16.mxu1 %v7596_v21 }
 0x29f   : > { %6201 = vmatmul.mubr.msk.bf16.gmra.mrb[16].mxu0 %vm477_vm0, %v1736_v1 }
 0x339   : > { %v1165_v6 = vpop.f32.mrb[0].mxu1 }
 0x33a   : > { %v6076_v7 = vpop.f32.mrb[1].mxu1 }
 0x33b   : > { %v1168_v8 = vpop.f32.mrb[2].mxu1 }
 0x33c   : > { %v6077_v9 = vpop.f32.mrb[3].mxu1 }
 0x341   : > { %v1173_v12 = vpop.f32.mrb[4].mxu1 }
 0x342   : > { %v6080_v13 = vpop.f32.mrb[5].mxu1 }
 0x343   : > { %v1176_v22 = vpop.f32.mrb[6].mxu1 }
 0x344   : > { %v6081_v14 = vpop.f32.mrb[7].mxu1 }
 0x349   : > { %v1181_v15 = vpop.f32.mrb[8].mxu1 }
 0x34a   : > { %v6084_v16 = vpop.f32.mrb[9].mxu1 }
 0x34b   : > { %v1184_v18 = vpop.f32.mrb[10].mxu1 }
 0x34c   : > { %v6085_v25 = vpop.f32.mrb[11].mxu1 }
 0x352   : > { %v1797_v26 = vpop.f32.mrb[0].mxu0 }
 0x353   : > { %v6458_v27 = vadd.f32 %v1797_v26, %v1165_v6  ;;  %v6186_v28 = vpop.f32.mrb[1].mxu0  ;;  %v7052_v26 = vld [vmem:[#allocation7] sm:$0xff]  }
 0x354   : > { %v1800_v21 = vpop.f32.mrb[2].mxu0 }
 0x355   : > { %v1851_v30 = vmul.f32 %v6458_v27, %v8364_v24  ;;  %v6459_v31 = vadd.f32 %v1800_v21, %v1168_v8  ;;  %v6187_v32 = vpop.f32.mrb[3].mxu0 }
 0x356   : > { %v7053_v32 = vld [vmem:[#allocation7 + $0x8] sm:$0xff]  }
 0x357   : > { %v1867_v33 = vadd.f32 %v8366_v29, %v1851_v30  ;;  %v1852_v35 = vmul.f32 %v6459_v31, %v8364_v24 }
 0x359   : > { %vm1876_vm0 = vcmp.ge.f32.partialorder %v1867_v33, 0.0  ;;  %v1885_v36 = vmul.f32 0.1, %v1867_v33  ;;  %v1868_v37 = vadd.f32 %v8366_v29, %v1852_v35 }
 0x35a   : > { %v1805_v41 = vpop.f32.mrb[4].mxu0 }
 0x35b   : > { %v1894_v44 = vsel %vm1876_vm0, %v1867_v33, %v1885_v36  ;;  %vm1877_vm10 = vcmp.ge.f32.partialorder %v1868_v37, 0.0  ;;  %v1886_v45 = vmul.f32 0.1, %v1868_v37  ;;  %v6460_v46 = vadd.f32 %v1805_v41, %v1173_v12  ;;  %v6190_v47 = vpop.f32.mrb[5].mxu0 }
 0x35c   : > { %1906 = vst.msk [vmem:[#allocation3 + $0x8] sm:$0xff] %vm1903_vm2, %v1894_v44  ;;  %v1808_v48 = vpop.f32.mrb[6].mxu0 }
 0x35d   : > { %v1895_v49 = vsel %vm1877_vm10, %v1868_v37, %v1886_v45  ;;  %v1853_v51 = vmul.f32 %v6460_v46, %v8364_v24  ;;  %v6461_v52 = vadd.f32 %v1808_v48, %v1176_v22  ;;  %v6191_v53 = vpop.f32.mrb[7].mxu0  ;;  %v7054_v48 = vld [vmem:[#allocation7 + $0x10] sm:$0xff]  }
 0x35e   : > { %1907 = vst.msk [vmem:[#allocation3 + $0x10] sm:$0xff] %vm1903_vm2, %v1895_v49 }
 0x35f   : > { %v1869_v54 = vadd.f32 %v8366_v29, %v1853_v51  ;;  %v1854_v50 = vmul.f32 %v6461_v52, %v8364_v24 }
 0x361   : > { %vm1878_vm11 = vcmp.ge.f32.partialorder %v1869_v54, 0.0  ;;  %v1887_v55 = vmul.f32 0.1, %v1869_v54  ;;  %v1870_v56 = vadd.f32 %v8366_v29, %v1854_v50  ;;  %v1310_v59 = vpop.f32.mrb[12].mxu1 }
 0x362   : > { %v1813_v1 = vpop.f32.mrb[8].mxu0  ;;  %v6110_v2 = vpop.f32.mrb[13].mxu1 }
 0x363   : > { %v1896_v3 = vsel %vm1878_vm11, %v1869_v54, %v1887_v55  ;;  %vm1879_vm12 = vcmp.ge.f32.partialorder %v1870_v56, 0.0  ;;  %v1888_v4 = vmul.f32 0.1, %v1870_v56  ;;  %v6462_v5 = vadd.f32 %v1813_v1, %v1181_v15  ;;  %v6194_v6 = vpop.f32.mrb[9].mxu0  ;;  %v1313_v7 = vpop.f32.mrb[14].mxu1  ;;  %v1947_v16 = vld [vmem:[#allocation3 + $0x2] sm:$0xff] }
 0x364   : > { %1908 = vst.msk [vmem:[#allocation3 + $0x18] sm:$0xff] %vm1903_vm2, %v1896_v3  ;;  %v1816_v8 = vpop.f32.mrb[10].mxu0  ;;  %v6111_v9 = vpop.f32.mrb[15].mxu1 }
 0x365   : > { %v1897_v12 = vsel %vm1879_vm12, %v1870_v56, %v1888_v4  ;;  %v1855_v13 = vmul.f32 %v6462_v5, %v8364_v24  ;;  %v6463_v22 = vadd.f32 %v1816_v8, %v1184_v18  ;;  %v6195_v14 = vpop.f32.mrb[11].mxu0  ;;  %v1948_v25 = vld [vmem:[#allocation3 + $0xa] sm:$0xff]  ;;  %v8385_v18 = vld [vmem:[#allocation4] sm:$0xff] }
 0x366   : > { %1909 = vst.msk [vmem:[#allocation3 + $0x20] sm:$0xff] %vm1903_vm2, %v1897_v12  ;;  %v1956_v27 = vpack.c.bf16 %v1948_v25, %v1947_v16  ;;  %v8391_v49 = vld [vmem:[#allocation3 + $0x9] sm:$0xff] }
 0x367   : > { %v1871_v28 = vadd.f32 %v8366_v29, %v1855_v13  ;;  %v1856_v15 = vmul.f32 %v6463_v22, %v8364_v24  ;;  %v8403_v3 = vmul.f32 %v8071_v61, %v8391_v49 }
 0x368   : > { %6213 = vmatmul.mubr.msk.bf16.vlgmr.msra.gmra.mrb[20].mxu1 %vm1903_vm2, %v1956_v27 }
 0x369   : > { %vm1880_vm13 = vcmp.ge.f32.partialorder %v1871_v28, 0.0  ;;  %v1889_v21 = vmul.f32 0.1, %v1871_v28  ;;  %v1872_v30 = vadd.f32 %v8366_v29, %v1856_v15  ;;  %6233 = vmatpush3.bf16.msra.mxu1 %v7052_v26  ;;  %v1318_v31 = vpop.f32.mrb[16].mxu1  ;;  %6216 = vmatprep.mubr.msk.bf16.mxu1 %vm7597_vm3, %v8385_v18 }
 0x36a   : > { %v1821_v33 = vpop.f32.mrb[12].mxu0  ;;  %v6114_v35 = vpop.f32.mrb[17].mxu1  ;;  %6234 = vmatprep.subr.bf16.mxu1 %v8385_v18 }
 0x36b   : > { %v1898_v36 = vsel %vm1880_vm13, %v1871_v28, %v1889_v21  ;;  %vm1881_vm14 = vcmp.ge.f32.partialorder %v1872_v30, 0.0  ;;  %v1890_v37 = vmul.f32 0.1, %v1872_v30  ;;  %v6464_v41 = vadd.f32 %v1821_v33, %v1310_v59  ;;  %v6198_v44 = vpop.f32.mrb[13].mxu0  ;;  %v1321_v45 = vpop.f32.mrb[18].mxu1  ;;  %v1949_v50 = vld [vmem:[#allocation3 + $0x12] sm:$0xff] }
 0x36c   : > { %1910 = vst.msk [vmem:[#allocation3 + $0x28] sm:$0xff] %vm1903_vm2, %v1898_v36  ;;  %v1824_v46 = vpop.f32.mrb[14].mxu0  ;;  %v6115_v47 = vpop.f32.mrb[19].mxu1  ;;  %v8394_v56 = vld [vmem:[#allocation3 + $0x11] sm:$0xff] }
 0x36d   : > { %v1899_v51 = vsel %vm1881_vm14, %v1872_v30, %v1890_v37  ;;  %v1857_v52 = vmul.f32 %v6464_v41, %v8364_v24  ;;  %v6465_v53 = vadd.f32 %v1824_v46, %v1313_v7  ;;  %v6199_v54 = vpop.f32.mrb[15].mxu0  ;;  %v1950_v55 = vld [vmem:[#allocation3 + $0x1a] sm:$0xff]  ;;  %6235 = vmatpush3.bf16.msra.mxu1 %v7053_v32  ;;  %v8407_v4 = vmul.f32 %v8074_v62, %v8394_v56  ;;  %v7055_v7 = vld [vmem:[#allocation7 + $0x18] sm:$0xff]  }
 0x36e   : > { %1911 = vst.msk [vmem:[#allocation3 + $0x30] sm:$0xff] %vm1903_vm2, %v1899_v51  ;;  %v1957_v59 = vpack.c.bf16 %v1950_v55, %v1949_v50  ;;  %6236 = vmatprep.subr.bf16.mxu1 %v8385_v18  ;;  %v8412_v8 = vld [vmem:[#allocation3 + $0x19] sm:$0xff]  ;;  %v8434_v37 = vld [vmem:[#allocation3 + $0xf] sm:$0xff] }
 0x36f   : > { %v1873_v1 = vadd.f32 %v8366_v29, %v1857_v52  ;;  %v1858_v2 = vmul.f32 %v6465_v53, %v8364_v24  ;;  %v2657_v12 = vpack.c.bf16 %v8407_v4, %v8403_v3  ;;  %v8422_v27 = vmul.f32 %v8104_v19, %v8412_v8  ;;  %v8436_v41 = vld [vmem:[#allocation3 + $0x17] sm:$0xff] }
 0x370   : > { %6217 = vmatmul.mubr.msk.bf16.gmra.mrb[24].mxu1 %vm1903_vm2, %v1957_v59  ;;  %v8451_v47 = vmul.f32 %v8074_v62, %v8436_v41  ;;  %v7075_v3 = vld [vmem:[#allocation7 + $0xd8] sm:$0xff]  }
 0x371   : > { %vm1882_vm15 = vcmp.ge.f32.partialorder %v1873_v1, 0.0  ;;  %v1891_v5 = vmul.f32 0.1, %v1873_v1  ;;  %v1874_v6 = vadd.f32 %v8366_v29, %v1858_v2  ;;  %6220 = vmatprep.mubr.msk.bf16.mxu1 %vm7597_vm3, %v8385_v18  ;;  %6237 = vmatpush3.bf16.msra.mxu1 %v7054_v48 }
 0x372   : > { %v1829_v9 = vpop.f32.mrb[16].mxu0  ;;  %6238 = vmatprep.subr.bf16.mxu1 %v8385_v18 }
 0x373   : > { %v1900_v13 = vsel %vm1882_vm15, %v1873_v1, %v1891_v5  ;;  %vm1883_vm1 = vcmp.ge.f32.partialorder %v1874_v6, 0.0  ;;  %v1892_v22 = vmul.f32 0.1, %v1874_v6  ;;  %v6466_v14 = vadd.f32 %v1829_v9, %v1318_v31  ;;  %v6202_v16 = vpop.f32.mrb[17].mxu0  ;;  %v8417_v25 = vld [vmem:[#allocation3 + $0x21] sm:$0xff] }
 0x374   : > { %1912 = vst.msk [vmem:[#allocation3 + $0x38] sm:$0xff] %vm1903_vm2, %v1900_v13  ;;  %v1832_v26 = vpop.f32.mrb[18].mxu0  ;;  %v8426_v28 = vmul.f32 %v8107_v20, %v8417_v25  ;;  %v1951_v32 = vld [vmem:[#allocation3 + $0x22] sm:$0xff] }
 0x375   : > { %v1901_v15 = vsel %vm1883_vm1, %v1874_v6, %v1892_v22  ;;  %v1859_v21 = vmul.f32 %v6466_v14, %v8364_v24  ;;  %v6203_v30 = vpop.f32.mrb[19].mxu0  ;;  %v1952_v31 = vld [vmem:[#allocation3 + $0x2a] sm:$0xff]  ;;  %6239 = vmatpush3.bf16.msra.mxu1 %v7055_v7  ;;  %v8441_v24 = vld [vmem:[#allocation3 + $0x1f] sm:$0xff] }
 0x376   : > { %1913 = vst.msk [vmem:[#allocation3 + $0x40] sm:$0xff] %vm1903_vm2, %v1901_v15  ;;  %v1958_v33 = vpack.c.bf16 %v1952_v31, %v1951_v32  ;;  %6260 = vmatprep.subr.bf16.mxu1 %v8385_v18  ;;  %v2658_v35 = vpack.c.bf16 %v8426_v28, %v8422_v27  ;;  %v8438_v44 = vld [vmem:[#allocation3 + $0x27] sm:$0xff]  ;;  %v8459_v53 = vmul.f32 %v8104_v19, %v8441_v24  ;;  %v8471_v5 = vld [vmem:[#allocation3 + $0x2f] sm:$0xff]  ;;  %v7056_v32 = vld [vmem:[#allocation7 + $0x40] sm:$0xff]  }
 0x377   : > { %v1875_v36 = vadd.f32 %v8366_v29, %v1859_v21  ;;  %v1921_v46 = vld [vmem:[#allocation3 + $0x29] sm:$0xff]  ;;  %v8447_v29 = vmul.f32 %v8071_v61, %v8434_v37  ;;  %v8455_v48 = vmul.f32 %v8107_v20, %v8438_v44  ;;  %v8484_v22 = vmul.f32 %v8140_v42, %v8471_v5  ;;  %v1916_v15 = vld [vmem:[#allocation3 + $0x1] sm:$0xff] }
 0x378   : > { %6221 = vmatmul.mubr.msk.bf16.gmra.mrb[28].mxu1 %vm1903_vm2, %v1958_v33  ;;  %v8464_v50 = vmul.f32 %v8140_v42, %v1921_v46  ;;  %v1926_v21 = vmul.f32 %v8136_v39, %v8391_v49  ;;  %v1925_v30 = vmul.f32 %v8133_v38, %v1916_v15  ;;  %v7057_v33 = vld [vmem:[#allocation7 + $0x48] sm:$0xff]   ;;  %v7058_v49 = vld [vmem:[#allocation7 + $0x50] sm:$0xff]  }
 0x379   : > { %vm1884_vm4 = vcmp.ge.f32.partialorder %v1875_v36, 0.0  ;;  %v1893_v45 = vmul.f32 0.1, %v1875_v36  ;;  %6224 = vmatprep.mubr.msk.bf16.mxu1 %vm7597_vm3, %v8385_v18  ;;  %v3104_v59 = vpack.c.bf16 %v8451_v47, %v8447_v29  ;;  %v3105_v6 = vpack.c.bf16 %v8455_v48, %v8459_v53  ;;  %v3094_v48 = vld [vmem:[#allocation3 + $0x4f] sm:$0x3] }
 0x37a   : > { %v1934_v31 = vpack.c.bf16 %v1926_v21, %v1925_v30  ;;  %v2193_v30 = vld [vmem:[#allocation3 + $0xb] sm:$0xff] }
 0x37b   : > { %v1902_v51 = vsel %vm1884_vm4, %v1875_v36, %v1893_v45  ;;  %v1922_v52 = vld [vmem:[#allocation3 + $0x31] sm:$0xff]  ;;  %v1928_v36 = vmul.f32 %v8166_v58, %v8412_v8  ;;  %v1927_v45 = vmul.f32 %v8163_v57, %v8394_v56  ;;  %v1929_v8 = vmul.f32 %v8191_v10, %v8417_v25 }
 0x37c   : > { %1915 = vst.msk [vmem:[#allocation3 + $0x48] sm:$0x3] %vm1914_vm5, %v1902_v51  ;;  %v8461_v54 = vld [vmem:[#allocation3 + $0x37] sm:$0xff]  ;;  %v8467_v55 = vmul.f32 %v8143_v43, %v1922_v52 }
 0x37d   : > { %v1953_v1 = vld [vmem:[#allocation3 + $0x32] sm:$0xff]  ;;  %v1954_v2 = vld [vmem:[#allocation3 + $0x3a] sm:$0xff]  ;;  %v8479_v13 = vmul.f32 %v8143_v43, %v8461_v54  ;;  %v1955_v16 = vld [vmem:[#allocation3 + $0x42] sm:$0x3]  ;;  %v1935_v51 = vpack.c.bf16 %v1928_v36, %v1927_v45 }
 0x37e   : > { %v1959_v7 = vpack.c.bf16 %v1954_v2, %v1953_v1  ;;  %v2659_v9 = vpack.c.bf16 %v8467_v55, %v8464_v50  ;;  %v1960_v26 = vpack.c.bf16 %v1955_v16, %v1955_v16  ;;  %v7059_v1 = vld [vmem:[#allocation7 + $0x58] sm:$0xff]   ;;  %v1930_v2 = vmul.f32 %v8194_v0, %v1921_v46  ;;  %v1924_v15 = vld [vmem:[#allocation3 + $0x41] sm:$0x3] }
 0x37f   : > { %v3106_v14 = vpack.c.bf16 %v8479_v13, %v8484_v22  ;;  %v1931_v46 = vmul.f32 %v8210_v17, %v1922_v52  ;;  %v1933_v25 = vmul.f32 %v8228_v34, %v1924_v15  ;;  %v2195_v45 = vld [vmem:[#allocation3 + $0x1b] sm:$0xff]  ;;  %v7089_v50 = vld [vmem:[#allocation9 + $0x94] ss:$8 sps:$4 sm:$0xff]   ;;  %v7099_v13 = vld [vmem:[#allocation9 + $0xd0] ss:$8 sps:$4 sm:$0xff]  }
 0x380   : > { %6225 = vmatmul.mubr.msk.bf16.gmra.mrb[32].mxu1 %vm1903_vm2, %v1959_v7  ;;  %v1936_v56 = vpack.c.bf16 %v1930_v2, %v1929_v8  ;;  %v8513_v7 = vld [vmem:[#allocation3 + $0x39] sm:$0xff]  ;;  %v7062_v8 = vld [vmem:[#allocation7 + $0x70] sm:$0xff]  }
 0x381   : > { %6228 = vmatprep.mubr.msk.bf16.mxu1 %vm7597_vm3, %v8385_v18  ;;  %v1932_v16 = vmul.f32 %v8213_v23, %v8513_v7  ;;  %v1938_v21 = vpack.c.bf16 %v1933_v25, %v1933_v25  ;;  %v2654_v27 = vmul.f32 %v8171_v60, %v8513_v7  ;;  %v7090_v7 = vld [vmem:[#allocation9 + $0xa0] ss:$8 sps:$4 sm:$0xff]   ;;  %v7101_v22 = vld [vmem:[#allocation9 + $0xd4] ss:$8 sps:$4 sm:$0xff]  }
 0x383   : > { %v2646_v4 = vld [vmem:[#allocation3 + $0x41] sm:$0xff] }
 0x388   : > { %6229 = vmatmul.mubr.msk.bf16.gmra.mrb[36].mxu1 %vm1903_vm2, %v1960_v26  ;;  %v1937_v26 = vpack.c.bf16 %v1932_v16, %v1931_v46  ;;  %v2197_v16 = vld [vmem:[#allocation3 + $0x2b] sm:$0xff]  ;;  %v2196_v46 = vld [vmem:[#allocation3 + $0x23] sm:$0xff] }
 0x389   : > { %6240 = vmatprep.mubr.msk.bf16.mxu1 %vm7597_vm3, %v8385_v18  ;;  %v2206_v15 = vmul.f32 %v8143_v43, %v2197_v16  ;;  %v2205_v25 = vmul.f32 %v8140_v42, %v2196_v46  ;;  %v7065_v16 = vld [vmem:[#allocation7 + $0x88] sm:$0xff]   ;;  %v2356_v46 = vmul.f32 %v8166_v58, %v8441_v24  ;;  %v2358_v24 = vmul.f32 %v8194_v0, %v8471_v5 }
 0x38a   : > { %v2359_v5 = vmul.f32 %v8210_v17, %v8461_v54  ;;  %v7069_v54 = vld [vmem:[#allocation7 + $0xa8] sm:$0xff]  }
 0x390   : > { %6241 = vmatmul.mubr.msk.bf16.vlgmr.msra.gmra.mrb[20].mxu1 %vm1903_vm2, %v1934_v31  ;;  %v2202_v31 = vmul.f32 %v8074_v62, %v2193_v30  ;;  %v2199_v30 = vld [vmem:[#allocation3 + $0x3b] sm:$0xff] }
 0x391   : > { %6261 = vmatpush3.bf16.msra.mxu1 %v7056_v32  ;;  %6244 = vmatprep.mubr.msk.bf16.mxu1 %vm7597_vm3, %v8385_v18  ;;  %v2192_v32 = vld [vmem:[#allocation3 + $0x3] sm:$0xff] }
 0x392   : > { %6262 = vmatprep.subr.bf16.mxu1 %v8385_v18  ;;  %v2201_v52 = vmul.f32 %v8071_v61, %v2192_v32  ;;  %v2198_v32 = vld [vmem:[#allocation3 + $0x33] sm:$0xff] }
 0x394   : > { %v2210_v36 = vpack.c.bf16 %v2202_v31, %v2201_v52  ;;  %v2208_v31 = vmul.f32 %v8174_v63, %v2199_v30  ;;  %v2207_v52 = vmul.f32 %v8171_v60, %v2198_v32  ;;  %v8577_v30 = vld [vmem:[#allocation3 + $0x3f] sm:$0xff] }
 0x395   : > { %6263 = vmatpush3.bf16.msra.mxu1 %v7057_v33  ;;  %v7060_v33 = vld [vmem:[#allocation7 + $0x60] sm:$0xff]   ;;  %v2360_v32 = vmul.f32 %v8213_v23, %v8577_v30  ;;  %v3101_v47 = vmul.f32 %v8171_v60, %v8577_v30  ;;  %v7107_v30 = vld [vmem:[#allocation9 + $0xf4] ss:$8 sps:$4 sm:$0xff]  }
 0x396   : > { %6264 = vmatprep.subr.bf16.mxu1 %v8385_v18 }
 0x398   : > { %6245 = vmatmul.mubr.msk.bf16.gmra.mrb[24].mxu1 %vm1903_vm2, %v1935_v51  ;;  %v7061_v51 = vld [vmem:[#allocation7 + $0x68] sm:$0xff]  }
 0x399   : > { %6248 = vmatprep.mubr.msk.bf16.mxu1 %vm7597_vm3, %v8385_v18  ;;  %6265 = vmatpush3.bf16.msra.mxu1 %v7058_v49  ;;  %v2194_v49 = vld [vmem:[#allocation3 + $0x13] sm:$0xff] }
 0x39a   : > { %6266 = vmatprep.subr.bf16.mxu1 %v8385_v18  ;;  %v2203_v2 = vmul.f32 %v8104_v19, %v2194_v49 }
 0x39d   : > { %6267 = vmatpush3.bf16.msra.mxu1 %v7059_v1  ;;  %v2204_v1 = vmul.f32 %v8107_v20, %v2195_v45 }
 0x39e   : > { %6288 = vmatprep.subr.bf16.mxu1 %v8385_v18 }
 0x3a0   : > { %6249 = vmatmul.mubr.msk.bf16.gmra.mrb[28].mxu1 %vm1903_vm2, %v1936_v56  ;;  %v2211_v56 = vpack.c.bf16 %v2204_v1, %v2203_v2  ;;  %v2354_v1 = vmul.f32 %v8136_v39, %v8434_v37  ;;  %v7066_v37 = vld [vmem:[#allocation7 + $0x90] sm:$0xff]  }
 0x3a1   : > { %6252 = vmatprep.mubr.msk.bf16.mxu1 %vm7597_vm3, %v8385_v18 }
 0x3a8   : > { %6253 = vmatmul.mubr.msk.bf16.gmra.mrb[32].mxu1 %vm1903_vm2, %v1937_v26  ;;  %v7063_v26 = vld [vmem:[#allocation7 + $0x78] sm:$0xff]  }
 0x3a9   : > { %6256 = vmatprep.mubr.msk.bf16.mxu1 %vm7597_vm3, %v8385_v18 }
 0x3b0   : > { %6257 = vmatmul.mubr.msk.bf16.gmra.mrb[36].mxu1 %vm1903_vm2, %v1938_v21  ;;  %v2212_v21 = vpack.c.bf16 %v2206_v15, %v2205_v25  ;;  %v7067_v25 = vld [vmem:[#allocation7 + $0x98] sm:$0xff]  }
 0x3b1   : > { %6268 = vmatprep.mubr.msk.bf16.mxu1 %vm7597_vm3, %v8385_v18 }
 0x3b8   : > { %6269 = vmatmul.mubr.msk.bf16.vlgmr.msra.gmra.mrb[20].mxu1 %vm1903_vm2, %v2210_v36  ;;  %v2200_v36 = vld [vmem:[#allocation3 + $0x43] sm:$0x3] }
 0x3b9   : > { %6289 = vmatpush3.bf16.msra.mxu1 %v7060_v33  ;;  %6272 = vmatprep.mubr.msk.bf16.mxu1 %vm7597_vm3, %v8385_v18  ;;  %v2213_v33 = vpack.c.bf16 %v2208_v31, %v2207_v52  ;;  %v2209_v45 = vmul.f32 %v8198_v11, %v2200_v36  ;;  %v2365_v31 = vpack.c.bf16 %v2360_v32, %v2359_v5  ;;  %v2352_v52 = vld [vmem:[#allocation3 + $0x47] sm:$0x3]  ;;  %v2497_v36 = vld [vmem:[#allocation3 + $0x10] sm:$0xff]  ;;  %v7072_v32 = vld [vmem:[#allocation7 + $0xc0] sm:$0xff]  }
 0x3ba   : > { %6290 = vmatprep.subr.bf16.mxu1 %v8385_v18  ;;  %v7073_v5 = vld [vmem:[#allocation7 + $0xc8] sm:$0xff]  }
 0x3bb   : > { %v2214_v49 = vpack.c.bf16 %v2209_v45, %v2209_v45  ;;  %v2496_v45 = vld [vmem:[#allocation3 + $0x8] sm:$0xff] }
 0x3bd   : > { %6291 = vmatpush3.bf16.msra.mxu1 %v7061_v51  ;;  %v2344_v51 = vld [vmem:[#allocation3 + $0x7] sm:$0xff] }
 0x3be   : > { %6292 = vmatprep.subr.bf16.mxu1 %v8385_v18  ;;  %v2353_v2 = vmul.f32 %v8133_v38, %v2344_v51  ;;  %v2505_v51 = vpack.c.bf16 %v2497_v36, %v2496_v45  ;;  %v2792_v45 = vld [vmem:[#allocation3 + $0x15] sm:$0xff] }
 0x3c0   : > { %6273 = vmatmul.mubr.msk.bf16.gmra.mrb[24].mxu1 %vm1903_vm2, %v2211_v56  ;;  %v2362_v56 = vpack.c.bf16 %v2354_v1, %v2353_v2  ;;  %v2499_v1 = vld [vmem:[#allocation3 + $0x20] sm:$0xff]  ;;  %v2498_v2 = vld [vmem:[#allocation3 + $0x18] sm:$0xff] }
 0x3c1   : > { %6276 = vmatprep.mubr.msk.bf16.mxu1 %vm7597_vm3, %v8385_v18  ;;  %6293 = vmatpush3.bf16.msra.mxu1 %v7062_v8  ;;  %v7064_v8 = vld [vmem:[#allocation7 + $0x80] sm:$0xff]  }
 0x3c2   : > { %6294 = vmatprep.subr.bf16.mxu1 %v8385_v18 }
 0x3c5   : > { %6295 = vmatpush3.bf16.msra.mxu1 %v7063_v26  ;;  %v2355_v26 = vmul.f32 %v8163_v57, %v8436_v41  ;;  %v2357_v41 = vmul.f32 %v8191_v10, %v8438_v44  ;;  %v2361_v44 = vmul.f32 %v8228_v34, %v2352_v52  ;;  %v7084_v52 = vld [vmem:[#allocation9 + $0x80] ss:$8 sps:$4 sm:$0xff]  }
 0x3c6   : > { %6316 = vmatprep.subr.bf16.mxu1 %v8385_v18 }
 0x3c7   : > { %v2363_v15 = vpack.c.bf16 %v2356_v46, %v2355_v26  ;;  %v2501_v46 = vld [vmem:[#allocation3 + $0x30] sm:$0xff]  ;;  %v2500_v26 = vld [vmem:[#allocation3 + $0x28] sm:$0xff] }
 0x3c8   : > { %6277 = vmatmul.mubr.msk.bf16.gmra.mrb[28].mxu1 %vm1903_vm2, %v2212_v21  ;;  %v2364_v21 = vpack.c.bf16 %v2358_v24, %v2357_v41  ;;  %v2504_v41 = vld [vmem:[#allocation3 + $0x48] sm:$0x3] }
 0x3c9   : > { %6280 = vmatprep.mubr.msk.bf16.mxu1 %vm7597_vm3, %v8385_v18 }
 0x3d0   : > { %6281 = vmatmul.mubr.msk.bf16.gmra.mrb[32].mxu1 %vm1903_vm2, %v2213_v33  ;;  %v2366_v33 = vpack.c.bf16 %v2361_v44, %v2361_v44  ;;  %v7086_v44 = vld [vmem:[#allocation9 + $0x84] ss:$8 sps:$4 sm:$0xff]  }
 0x3d1   : > { %6284 = vmatprep.mubr.msk.bf16.mxu1 %vm7597_vm3, %v8385_v18  ;;  %3458 = vmatprep.subr.bf16.mxu0 %v7086_v44  ;;  %v2799_v44 = vld [vmem:[#allocation3 + $0x4d] sm:$0x3] }
 0x3d2   : > { %3459 = vmatpush1.bf16.msra.mxu0 %v7084_v52 }
 0x3d3   : > { %3460 = vmatprep.subr.bf16.mxu0 %v7089_v50 }
 0x3d8   : > { %6285 = vmatmul.mubr.msk.bf16.gmra.mrb[36].mxu1 %vm1903_vm2, %v2214_v49  ;;  %v7068_v49 = vld [vmem:[#allocation7 + $0xa0] sm:$0xff]  }
 0x3d9   : > { %6296 = vmatprep.mubr.msk.bf16.mxu1 %vm7597_vm3, %v8385_v18 }
 0x3e0   : > { %6297 = vmatmul.mubr.msk.bf16.vlgmr.msra.gmra.mrb[20].mxu1 %vm1903_vm2, %v2362_v56  ;;  %v2506_v56 = vpack.c.bf16 %v2499_v1, %v2498_v2  ;;  %v7093_v1 = vld [vmem:[#allocation9 + $0xb0] ss:$8 sps:$4 sm:$0xff]  }
 0x3e1   : > { %6317 = vmatpush3.bf16.msra.mxu1 %v7064_v8  ;;  %6300 = vmatprep.mubr.msk.bf16.mxu1 %vm7597_vm3, %v8385_v18  ;;  %v7070_v8 = vld [vmem:[#allocation7 + $0xb0] sm:$0xff]  }
 0x3e2   : > { %6318 = vmatprep.subr.bf16.mxu1 %v8385_v18 }
 0x3e5   : > { %6319 = vmatpush3.bf16.msra.mxu1 %v7065_v16  ;;  %v7071_v16 = vld [vmem:[#allocation7 + $0xb8] sm:$0xff]  }
 0x3e6   : > { %6320 = vmatprep.subr.bf16.mxu1 %v8385_v18 }
 0x3e8   : > { %6301 = vmatmul.mubr.msk.bf16.gmra.mrb[24].mxu1 %vm1903_vm2, %v2363_v15  ;;  %v2503_v15 = vld [vmem:[#allocation3 + $0x40] sm:$0xff] }
 0x3e9   : > { %6304 = vmatprep.mubr.msk.bf16.mxu1 %vm7597_vm3, %v8385_v18  ;;  %6321 = vmatpush3.bf16.msra.mxu1 %v7066_v37  ;;  %v2507_v37 = vpack.c.bf16 %v2501_v46, %v2500_v26  ;;  %v2794_v46 = vld [vmem:[#allocation3 + $0x25] sm:$0xff]  ;;  %v7096_v26 = vld [vmem:[#allocation9 + $0xc0] ss:$8 sps:$4 sm:$0xff]  }
 0x3ea   : > { %6322 = vmatprep.subr.bf16.mxu1 %v8385_v18 }
 0x3ed   : > { %6323 = vmatpush3.bf16.msra.mxu1 %v7067_v25  ;;  %v2502_v25 = vld [vmem:[#allocation3 + $0x38] sm:$0xff] }
 0x3ee   : > { %6344 = vmatprep.subr.bf16.mxu1 %v8385_v18  ;;  %v2508_v24 = vpack.c.bf16 %v2503_v15, %v2502_v25  ;;  %v7077_v15 = vld [vmem:[#allocation7 + $0xe8] sm:$0xff]   ;;  %v2803_v25 = vmul.f32 %v8166_v58, %v2794_v46 }
 0x3f0   : > { %6305 = vmatmul.mubr.msk.bf16.gmra.mrb[28].mxu1 %vm1903_vm2, %v2364_v21  ;;  %v2509_v21 = vpack.c.bf16 %v2504_v41, %v2504_v41  ;;  %v7078_v41 = vld [vmem:[#allocation7 + $0xf0] sm:$0xff]  }
 0x3f1   : > { %6308 = vmatprep.mubr.msk.bf16.mxu1 %vm7597_vm3, %v8385_v18 }
 0x3f8   : > { %6309 = vmatmul.mubr.msk.bf16.gmra.mrb[32].mxu1 %vm1903_vm2, %v2365_v31  ;;  %v7074_v31 = vld [vmem:[#allocation7 + $0xd0] sm:$0xff]  }
 0x3f9   : > { %6312 = vmatprep.mubr.msk.bf16.mxu1 %vm7597_vm3, %v8385_v18 }
 0x400   : > { %6313 = vmatmul.mubr.msk.bf16.gmra.mrb[36].mxu1 %vm1903_vm2, %v2366_v33  ;;  %v7092_v33 = vld [vmem:[#allocation9 + $0xa4] ss:$8 sps:$4 sm:$0xff]  }
 0x401   : > { %6324 = vmatprep.mubr.msk.bf16.mxu1 %vm7597_vm3, %v8385_v18 }
 0x408   : > { %6325 = vmatmul.mubr.msk.bf16.vlgmr.msra.gmra.mrb[20].mxu1 %vm1903_vm2, %v2505_v51  ;;  %v2791_v51 = vld [vmem:[#allocation3 + $0xd] sm:$0xff] }
 0x409   : > { %6345 = vmatpush3.bf16.msra.mxu1 %v7068_v49  ;;  %6328 = vmatprep.mubr.msk.bf16.mxu1 %vm7597_vm3, %v8385_v18  ;;  %v7095_v49 = vld [vmem:[#allocation9 + $0xb4] ss:$8 sps:$4 sm:$0xff]   ;;  %v2800_v2 = vmul.f32 %v8133_v38, %v2791_v51 }
 0x40a   : > { %6346 = vmatprep.subr.bf16.mxu1 %v8385_v18  ;;  %v2946_v51 = vld [vmem:[#allocation3 + $0x26] sm:$0xff] }
 0x40d   : > { %6347 = vmatpush3.bf16.msra.mxu1 %v7069_v54  ;;  %v2801_v54 = vmul.f32 %v8136_v39, %v2792_v45  ;;  %v7080_v45 = vld [vmem:[#allocation7 + $0x100] sm:$0xff]  }
 0x40e   : > { %6348 = vmatprep.subr.bf16.mxu1 %v8385_v18 }
 0x410   : > { %6329 = vmatmul.mubr.msk.bf16.gmra.mrb[24].mxu1 %vm1903_vm2, %v2506_v56  ;;  %v7076_v56 = vld [vmem:[#allocation7 + $0xe0] sm:$0xff]  }
 0x411   : > { %6332 = vmatprep.mubr.msk.bf16.mxu1 %vm7597_vm3, %v8385_v18  ;;  %6349 = vmatpush3.bf16.msra.mxu1 %v7070_v8  ;;  %v7098_v8 = vld [vmem:[#allocation9 + $0xc4] ss:$8 sps:$4 sm:$0xff]  }
 0x412   : > { %6350 = vmatprep.subr.bf16.mxu1 %v8385_v18 }
 0x415   : > { %6351 = vmatpush3.bf16.msra.mxu1 %v7071_v16  ;;  %v2809_v16 = vpack.c.bf16 %v2801_v54, %v2800_v2  ;;  %v2945_v54 = vld [vmem:[#allocation3 + $0x1e] sm:$0xff] }
 0x416   : > { %6372 = vmatprep.subr.bf16.mxu1 %v8385_v18  ;;  %v2953_v2 = vpack.c.bf16 %v2946_v51, %v2945_v54  ;;  %v7135_v54 = vld [vmem:[#allocation9 + $0x110] ss:$8 sps:$4 sm:$0xff]  }
 0x418   : > { %6333 = vmatmul.mubr.msk.bf16.gmra.mrb[28].mxu1 %vm1903_vm2, %v2507_v37  ;;  %v2793_v37 = vld [vmem:[#allocation3 + $0x1d] sm:$0xff] }
 0x419   : > { %6336 = vmatprep.mubr.msk.bf16.mxu1 %vm7597_vm3, %v8385_v18 }
 0x420   : > { %6337 = vmatmul.mubr.msk.bf16.gmra.mrb[32].mxu1 %vm1903_vm2, %v2508_v24  ;;  %v2802_v24 = vmul.f32 %v8163_v57, %v2793_v37  ;;  %v2949_v37 = vld [vmem:[#allocation3 + $0x3e] sm:$0xff] }
 0x421   : > { %6340 = vmatprep.mubr.msk.bf16.mxu1 %vm7597_vm3, %v8385_v18 }
 0x428   : > { %6341 = vmatmul.mubr.msk.bf16.gmra.mrb[36].mxu1 %vm1903_vm2, %v2509_v21  ;;  %v2810_v21 = vpack.c.bf16 %v2803_v25, %v2802_v24  ;;  %v2951_v25 = vld [vmem:[#allocation3 + $0x4e] sm:$0x3] }
 0x429   : > { %6352 = vmatprep.mubr.msk.bf16.mxu1 %vm7597_vm3, %v8385_v18  ;;  %v2956_v24 = vpack.c.bf16 %v2951_v25, %v2951_v25 }
 0x430   : > { %6353 = vmatmul.mubr.msk.bf16.vlgmr.msra.gmra.mrb[20].mxu1 %vm1903_vm2, %v2657_v12  ;;  %v2655_v12 = vmul.f32 %v8174_v63, %v2646_v4 }
 0x431   : > { %6373 = vmatpush3.bf16.msra.mxu1 %v7072_v32  ;;  %6356 = vmatprep.mubr.msk.bf16.mxu1 %vm7597_vm3, %v8385_v18  ;;  %v2796_v32 = vld [vmem:[#allocation3 + $0x35] sm:$0xff] }
 0x432   : > { %6374 = vmatprep.subr.bf16.mxu1 %v8385_v18  ;;  %v2660_v28 = vpack.c.bf16 %v2655_v12, %v2654_v27  ;;  %v2798_v27 = vld [vmem:[#allocation3 + $0x45] sm:$0xff] }
 0x435   : > { %6375 = vmatpush3.bf16.msra.mxu1 %v7073_v5  ;;  %v2795_v5 = vld [vmem:[#allocation3 + $0x2d] sm:$0xff] }
 0x436   : > { %6376 = vmatprep.subr.bf16.mxu1 %v8385_v18  ;;  %v2804_v4 = vmul.f32 %v8191_v10, %v2795_v5  ;;  %v7110_v5 = vld [vmem:[#allocation9 + $0x4] ss:$8 sps:$4 sm:$0xff]  }
 0x438   : > { %6357 = vmatmul.mubr.msk.bf16.gmra.mrb[24].mxu1 %vm1903_vm2, %v2658_v35  ;;  %v2647_v35 = vld [vmem:[#allocation3 + $0x49] sm:$0x3] }
 0x439   : > { %6360 = vmatprep.mubr.msk.bf16.mxu1 %vm7597_vm3, %v8385_v18  ;;  %6377 = vmatpush3.bf16.msra.mxu1 %v7074_v31  ;;  %v2656_v55 = vmul.f32 %v8198_v11, %v2647_v35  ;;  %v7079_v31 = vld [vmem:[#allocation7 + $0xf8] sm:$0xff]   ;;  %v2807_v35 = vmul.f32 %v8213_v23, %v2798_v27 }
 0x43a   : > { %6378 = vmatprep.subr.bf16.mxu1 %v8385_v18 }
 0x43b   : > { %v2661_v36 = vpack.c.bf16 %v2656_v55, %v2656_v55  ;;  %v2808_v55 = vmul.f32 %v8228_v34, %v2799_v44 }
 0x43d   : > { %6379 = vmatpush3.bf16.msra.mxu1 %v7075_v3  ;;  %v2805_v3 = vmul.f32 %v8194_v0, %v2796_v32  ;;  %v7105_v32 = vld [vmem:[#allocation9 + $0xf0] ss:$8 sps:$4 sm:$0xff]  }
 0x43e   : > { %6400 = vmatprep.subr.bf16.mxu1 %v8385_v18 }
 0x43f   : > { %v2811_v12 = vpack.c.bf16 %v2805_v3, %v2804_v4  ;;  %v8719_v4 = vld [vmem:[#allocation15] ss:$0 sm:$0xff] }
 0x440   : > { %6361 = vmatmul.mubr.msk.bf16.gmra.mrb[28].mxu1 %vm1903_vm2, %v2659_v9  ;;  %v7087_v9 = vld [vmem:[#allocation9 + $0x90] ss:$8 sps:$4 sm:$0xff]  }
 0x441   : > { %6364 = vmatprep.mubr.msk.bf16.mxu1 %vm7597_vm3, %v8385_v18  ;;  %3461 = vmatpush1.bf16.msra.mxu0 %v7087_v9  ;;  %v2813_v9 = vpack.c.bf16 %v2808_v55, %v2808_v55 }
 0x442   : > { %3462 = vmatprep.subr.bf16.mxu0 %v7092_v33  ;;  %v2944_v33 = vld [vmem:[#allocation3 + $0x16] sm:$0xff] }
 0x445   : > { %3463 = vmatpush1.bf16.msra.mxu0 %v7090_v7 }
 0x446   : > { %3464 = vmatprep.subr.bf16.mxu0 %v7095_v49  ;;  %v7081_v49 = vld [vmem:[#allocation7 + $0x108] sm:$0xff]  }
 0x448   : > { %6365 = vmatmul.mubr.msk.bf16.gmra.mrb[32].mxu1 %vm1903_vm2, %v2660_v28  ;;  %v2797_v28 = vld [vmem:[#allocation3 + $0x3d] sm:$0xff] }
 0x449   : > { %6368 = vmatprep.mubr.msk.bf16.mxu1 %vm7597_vm3, %v8385_v18  ;;  %3465 = vmatpush1.bf16.msra.mxu0 %v7093_v1  ;;  %v2806_v52 = vmul.f32 %v8210_v17, %v2797_v28  ;;  %v7082_v1 = vld [vmem:[#allocation7 + $0x110] sm:$0xff]  }
 0x44a   : > { %3466 = vmatprep.subr.bf16.mxu0 %v7098_v8  ;;  %v7083_v8 = vld [vmem:[#allocation7 + $0x118] sm:$0xff]  }
 0x44b   : > { %v2812_v50 = vpack.c.bf16 %v2807_v35, %v2806_v52 }
 0x44d   : > { %3467 = vmatpush1.bf16.msra.mxu0 %v7096_v26  ;;  %v2950_v26 = vld [vmem:[#allocation3 + $0x46] sm:$0xff] }
 0x44e   : > { %3468 = vmatprep.subr.bf16.mxu0 %v7101_v22 }
 0x450   : > { %6369 = vmatmul.mubr.msk.bf16.gmra.mrb[36].mxu1 %vm1903_vm2, %v2661_v36  ;;  %v2943_v36 = vld [vmem:[#allocation3 + $0xe] sm:$0xff] }
 0x451   : > { %6380 = vmatprep.mubr.msk.bf16.mxu1 %vm7597_vm3, %v8385_v18  ;;  %v2952_v7 = vpack.c.bf16 %v2944_v33, %v2943_v36  ;;  %3469 = vmatpush1.bf16.msra.mxu0 %v7099_v13 }
 0x458   : > { %6381 = vmatmul.mubr.msk.bf16.vlgmr.msra.gmra.mrb[20].mxu1 %vm1903_vm2, %v2809_v16  ;;  %v2947_v16 = vld [vmem:[#allocation3 + $0x2e] sm:$0xff] }
 0x459   : > { %6401 = vmatpush3.bf16.msra.mxu1 %v7076_v56  ;;  %6384 = vmatprep.mubr.msk.bf16.mxu1 %vm7597_vm3, %v8385_v18  ;;  %v2948_v56 = vld [vmem:[#allocation3 + $0x36] sm:$0xff] }
 0x45a   : > { %6402 = vmatprep.subr.bf16.mxu1 %v8385_v18  ;;  %v2954_v46 = vpack.c.bf16 %v2948_v56, %v2947_v16 }
 0x45d   : > { %6403 = vmatpush3.bf16.msra.mxu1 %v7077_v15  ;;  %v2955_v15 = vpack.c.bf16 %v2950_v26, %v2949_v37 }
 0x45e   : > { %6404 = vmatprep.subr.bf16.mxu1 %v8385_v18 }
 0x460   : > { %6385 = vmatmul.mubr.msk.bf16.gmra.mrb[24].mxu1 %vm1903_vm2, %v2810_v21  ;;  %v7104_v21 = vld [vmem:[#allocation9 + $0xe4] ss:$8 sps:$4 sm:$0xff]  }
 0x461   : > { %6388 = vmatprep.mubr.msk.bf16.mxu1 %vm7597_vm3, %v8385_v18  ;;  %6405 = vmatpush3.bf16.msra.mxu1 %v7078_v41  ;;  %v3093_v41 = vld [vmem:[#allocation3 + $0x47] sm:$0xff] }
 0x462   : > { %6406 = vmatprep.subr.bf16.mxu1 %v8385_v18  ;;  %v3102_v29 = vmul.f32 %v8174_v63, %v3093_v41  ;;  %3470 = vmatprep.subr.bf16.mxu0 %v7104_v21  ;;  %v7108_v41 = vld [vmem:[#allocation9] ss:$8 sps:$4 sm:$0xff]  }
 0x464   : > { %v3107_v53 = vpack.c.bf16 %v3102_v29, %v3101_v47 }
 0x465   : > { %6407 = vmatpush3.bf16.msra.mxu1 %v7079_v31  ;;  %v7599_v31 = vmov 0  }
 0x466   : > { %6428 = vmatprep.subr.bf16.mxu1 %v8385_v18  ;;  %3490 = vmatprep.mubr.bf16.mxu0 %v7599_v31 }
 0x468   : > { %6389 = vmatmul.mubr.msk.bf16.gmra.mrb[28].mxu1 %vm1903_vm2, %v2811_v12 }
 0x469   : > { %6392 = vmatprep.mubr.msk.bf16.mxu1 %vm7597_vm3, %v8385_v18 }
 0x470   : > { %6393 = vmatmul.mubr.msk.bf16.gmra.mrb[32].mxu1 %vm1903_vm2, %v2812_v50 }
 0x471   : > { %6396 = vmatprep.mubr.msk.bf16.mxu1 %vm7597_vm3, %v8385_v18 }
 0x478   : > { %6397 = vmatmul.mubr.msk.bf16.gmra.mrb[36].mxu1 %vm1903_vm2, %v2813_v9 }
 0x479   : > { %6408 = vmatprep.mubr.msk.bf16.mxu1 %vm7597_vm3, %v8385_v18 }
 0x480   : > { %6409 = vmatmul.mubr.msk.bf16.vlgmr.msra.gmra.mrb[20].mxu1 %vm1903_vm2, %v2952_v7 }
 0x481   : > { %6429 = vmatpush3.bf16.msra.mxu1 %v7080_v45  ;;  %6412 = vmatprep.mubr.msk.bf16.mxu1 %vm7597_vm3, %v8385_v18 }
 0x482   : > { %6430 = vmatprep.subr.bf16.mxu1 %v8385_v18 }
 0x485   : > { %6431 = vmatpush3.bf16.msra.mxu1 %v7081_v49 }
 0x486   : > { %6432 = vmatprep.subr.bf16.mxu1 %v8385_v18 }
 0x488   : > { %6413 = vmatmul.mubr.msk.bf16.gmra.mrb[24].mxu1 %vm1903_vm2, %v2953_v2 }
 0x489   : > { %6416 = vmatprep.mubr.msk.bf16.mxu1 %vm7597_vm3, %v8385_v18  ;;  %6433 = vmatpush3.bf16.msra.mxu1 %v7082_v1 }
 0x48a   : > { %6434 = vmatprep.subr.bf16.mxu1 %v8385_v18 }
 0x48d   : > { %6435 = vmatpush3.bf16.msra.mxu1 %v7083_v8 }
 0x490   : > { %6417 = vmatmul.mubr.msk.bf16.gmra.mrb[28].mxu1 %vm1903_vm2, %v2954_v46 }
 0x491   : > { %6420 = vmatprep.mubr.msk.bf16.mxu1 %vm7597_vm3, %v8385_v18 }
 0x498   : > { %6421 = vmatmul.mubr.msk.bf16.gmra.mrb[32].mxu1 %vm1903_vm2, %v2955_v15 }
 0x499   : > { %6424 = vmatprep.mubr.msk.bf16.mxu1 %vm7597_vm3, %v8385_v18 }
 0x4a0   : > { %6425 = vmatmul.mubr.msk.bf16.gmra.mrb[36].mxu1 %vm1903_vm2, %v2956_v24 }
 0x4a1   : > { %6436 = vmatprep.mubr.msk.bf16.mxu1 %vm7597_vm3, %v8385_v18 }
 0x4a8   : > { %6437 = vmatmul.mubr.msk.bf16.vlgmr.msra.gmra.mrb[20].mxu1 %vm1903_vm2, %v3104_v59  ;;  %v3103_v59 = vmul.f32 %v8198_v11, %v3094_v48 }
 0x4a9   : > { %6440 = vmatprep.mubr.msk.bf16.mxu1 %vm7597_vm3, %v8385_v18 }
 0x4b0   : > { %6441 = vmatmul.mubr.msk.bf16.gmra.mrb[24].mxu1 %vm1903_vm2, %v3105_v6  ;;  %v3108_v6 = vpack.c.bf16 %v3103_v59, %v3103_v59  ;;  %v7113_v59 = vld [vmem:[#allocation9 + $0x14] ss:$8 sps:$4 sm:$0xff]  }
 0x4b1   : > { %6444 = vmatprep.mubr.msk.bf16.mxu1 %vm7597_vm3, %v8385_v18 }
 0x4b8   : > { %6445 = vmatmul.mubr.msk.bf16.gmra.mrb[28].mxu1 %vm1903_vm2, %v3106_v14  ;;  %v7102_v14 = vld [vmem:[#allocation9 + $0xe0] ss:$8 sps:$4 sm:$0xff]  }
 0x4b9   : > { %6448 = vmatprep.mubr.msk.bf16.mxu1 %vm7597_vm3, %v8385_v18  ;;  %3471 = vmatpush1.bf16.msra.mxu0 %v7102_v14 }
 0x4ba   : > { %3472 = vmatprep.subr.bf16.mxu0 %v7107_v30 }
 0x4bd   : > { %3473 = vmatpush1.bf16.msra.mxu0 %v7105_v32  ;;  %v7111_v32 = vld [vmem:[#allocation9 + $0x10] ss:$8 sps:$4 sm:$0xff]  }
 0x4be   : > { %3619 = vmatprep.subr.bf16.mxu0 %v7110_v5  ;;  %v7116_v5 = vld [vmem:[#allocation9 + $0x24] ss:$8 sps:$4 sm:$0xff]  }
 0x4c0   : > { %6449 = vmatmul.mubr.msk.bf16.gmra.mrb[32].mxu1 %vm1903_vm2, %v3107_v53 }
 0x4c1   : > { %6452 = vmatprep.mubr.msk.bf16.mxu1 %vm7597_vm3, %v8385_v18  ;;  %v8717_v18 = vld [vmem:[#allocation13] ss:$0 sm:$0xff] }
 0x4c8   : > { %6453 = vmatmul.mubr.msk.bf16.gmra.mrb[36].mxu1 %vm1903_vm2, %v3108_v6 }
 0x57b   : > { %v3191_v3 = vpop.f32.mrb[20].mxu1 }
 0x57c   : > { %v3245_v12 = vmul.f32 %v8717_v18, %v3191_v3  ;;  %v6438_v27 = vpop.f32.mrb[21].mxu1 }
 0x57d   : > { %v3194_v28 = vpop.f32.mrb[22].mxu1 }
 0x57e   : > { %v3261_v35 = vadd.f32 %v8719_v4, %v3245_v12  ;;  %v3246_v52 = vmul.f32 %v8717_v18, %v3194_v28  ;;  %v6439_v44 = vpop.f32.mrb[23].mxu1 }
 0x580   : > { %vm3270_vm3 = vcmp.ge.f32.partialorder %v3261_v35, 0.0  ;;  %v3279_v50 = vmul.f32 0.1, %v3261_v35  ;;  %v3262_v55 = vadd.f32 %v8719_v4, %v3246_v52 }
 0x582   : > { %v8725_v9 = vsel %vm3270_vm3, %v3261_v35, %v3279_v50  ;;  %vm3271_vm6 = vcmp.ge.f32.partialorder %v3262_v55, 0.0  ;;  %v3280_v33 = vmul.f32 0.1, %v3262_v55 }
 0x583   : > { %3299 = vst [vmem:[#allocation4 + $0x8] sm:$0xff] %v8725_v9  ;;  %v3199_v36 = vpop.f32.mrb[24].mxu1 }
 0x584   : > { %v8728_v45 = vsel %vm3271_vm6, %v3262_v55, %v3280_v33  ;;  %v3247_v7 = vmul.f32 %v8717_v18, %v3199_v36  ;;  %v6442_v49 = vpop.f32.mrb[25].mxu1 }
 0x585   : > { %3300 = vst [vmem:[#allocation4 + $0x10] sm:$0xff] %v8728_v45  ;;  %v3202_v51 = vpop.f32.mrb[26].mxu1 }
 0x586   : > { %v3263_v1 = vadd.f32 %v8719_v4, %v3247_v7  ;;  %v3248_v2 = vmul.f32 %v8717_v18, %v3202_v51  ;;  %v6443_v8 = vpop.f32.mrb[27].mxu1  ;;  %v7114_v7 = vld [vmem:[#allocation9 + $0x20] ss:$8 sps:$4 sm:$0xff]  }
 0x587   : > { %v7132_v8 = vld [vmem:[#allocation9 + $0x100] ss:$8 sps:$4 sm:$0xff]  }
 0x588   : > { %vm3272_vm7 = vcmp.ge.f32.partialorder %v3263_v1, 0.0  ;;  %v3281_v56 = vmul.f32 0.1, %v3263_v1  ;;  %v3264_v16 = vadd.f32 %v8719_v4, %v3248_v2  ;;  %v7119_v2 = vld [vmem:[#allocation9 + $0x34] ss:$8 sps:$4 sm:$0xff]  }
 0x58a   : > { %v8737_v46 = vsel %vm3272_vm7, %v3263_v1, %v3281_v56  ;;  %vm3273_vm8 = vcmp.ge.f32.partialorder %v3264_v16, 0.0  ;;  %v3282_v26 = vmul.f32 0.1, %v3264_v16  ;;  %v3347_v29 = vld [vmem:[#allocation4 + $0x2] sm:$0xff] }
 0x58b   : > { %3301 = vst [vmem:[#allocation4 + $0x18] sm:$0xff] %v8737_v46  ;;  %v3207_v37 = vpop.f32.mrb[28].mxu1 }
 0x58c   : > { %v8740_v15 = vsel %vm3273_vm8, %v3264_v16, %v3282_v26  ;;  %v3249_v25 = vmul.f32 %v8717_v18, %v3207_v37  ;;  %v6446_v24 = vpop.f32.mrb[29].mxu1  ;;  %v3348_v47 = vld [vmem:[#allocation4 + $0xa] sm:$0xff] }
 0x58d   : > { %3302 = vst [vmem:[#allocation4 + $0x20] sm:$0xff] %v8740_v15  ;;  %v3210_v48 = vpop.f32.mrb[30].mxu1  ;;  %v3356_v53 = vpack.c.bf16 %v3348_v47, %v3347_v29  ;;  %v8750_v3 = vld [vmem:[#allocation4 + $0x9] sm:$0xff] }
 0x58e   : > { %v3265_v13 = vadd.f32 %v8719_v4, %v3249_v25  ;;  %v3250_v22 = vmul.f32 %v8717_v18, %v3210_v48  ;;  %v6447_v14 = vpop.f32.mrb[31].mxu1  ;;  %v8766_v49 = vmul.f32 %v8071_v61, %v8750_v3  ;;  %v8773_v37 = vld [vmem:[#allocation4 + $0xf] sm:$0xff] }
 0x58f   : > { %3491 = vmatmul.mubr.bf16.vlgmr.msra.gmra.mrb[20].mxu0 %v3356_v53  ;;  %v7117_v47 = vld [vmem:[#allocation9 + $0x30] ss:$8 sps:$4 sm:$0xff]   ;;  %v7122_v48 = vld [vmem:[#allocation9 + $0x44] ss:$8 sps:$4 sm:$0xff]  }
 0x590   : > { %vm3274_vm9 = vcmp.ge.f32.partialorder %v3265_v13, 0.0  ;;  %v3283_v21 = vmul.f32 0.1, %v3265_v13  ;;  %v3266_v30 = vadd.f32 %v8719_v4, %v3250_v22  ;;  %3620 = vmatpush1.bf16.msra.mxu0 %v7108_v41  ;;  %3500 = vmatprep.mubr.bf16.mxu0 %v7599_v31 }
 0x591   : > { %3621 = vmatprep.subr.bf16.mxu0 %v7113_v59  ;;  %v8785_v59 = vmul.f32 %v8071_v61, %v8773_v37 }
 0x592   : > { %v8752_v12 = vsel %vm3274_vm9, %v3265_v13, %v3283_v21  ;;  %vm3275_vm2 = vcmp.ge.f32.partialorder %v3266_v30, 0.0  ;;  %v3284_v27 = vmul.f32 0.1, %v3266_v30  ;;  %v8754_v28 = vld [vmem:[#allocation4 + $0x11] sm:$0xff] }
 0x593   : > { %3303 = vst [vmem:[#allocation4 + $0x28] sm:$0xff] %v8752_v12  ;;  %v3215_v35 = vpop.f32.mrb[32].mxu1  ;;  %v8759_v52 = vmul.f32 %v8074_v62, %v8754_v28  ;;  %v3349_v33 = vld [vmem:[#allocation4 + $0x12] sm:$0xff] }
 0x594   : > { %v8761_v44 = vsel %vm3275_vm2, %v3266_v30, %v3284_v27  ;;  %v3251_v50 = vmul.f32 %v8717_v18, %v3215_v35  ;;  %v6450_v55 = vpop.f32.mrb[33].mxu1  ;;  %3622 = vmatpush1.bf16.msra.mxu0 %v7111_v32  ;;  %v3350_v36 = vld [vmem:[#allocation4 + $0x1a] sm:$0xff] }
 0x595   : > { %3304 = vst [vmem:[#allocation4 + $0x30] sm:$0xff] %v8761_v44  ;;  %v3218_v51 = vpop.f32.mrb[34].mxu1  ;;  %v3357_v1 = vpack.c.bf16 %v3350_v36, %v3349_v33  ;;  %3623 = vmatprep.subr.bf16.mxu0 %v7116_v5  ;;  %v8775_v25 = vld [vmem:[#allocation4 + $0x17] sm:$0xff]  ;;  %v7120_v36 = vld [vmem:[#allocation9 + $0x40] ss:$8 sps:$4 sm:$0xff]  }
 0x596   : > { %v3267_v56 = vadd.f32 %v8719_v4, %v3251_v50  ;;  %v3252_v16 = vmul.f32 %v8717_v18, %v3218_v51  ;;  %v6451_v26 = vpop.f32.mrb[35].mxu1  ;;  %v8781_v53 = vld [vmem:[#allocation4 + $0x19] sm:$0xff]  ;;  %v8789_v13 = vmul.f32 %v8074_v62, %v8775_v25 }
 0x597   : > { %3501 = vmatmul.mubr.bf16.gmra.mrb[24].mxu0 %v3357_v1  ;;  %v8813_v26 = vld [vmem:[#allocation4 + $0x1f] sm:$0xff] }
 0x598   : > { %vm3276_vm0 = vcmp.ge.f32.partialorder %v3267_v56, 0.0  ;;  %v3285_v41 = vmul.f32 0.1, %v3267_v56  ;;  %v3268_v29 = vadd.f32 %v8719_v4, %v3252_v16  ;;  %3624 = vmatpush1.bf16.msra.mxu0 %v7114_v7  ;;  %3510 = vmatprep.mubr.bf16.mxu0 %v7599_v31  ;;  %v8807_v7 = vmul.f32 %v8104_v19, %v8781_v53 }
 0x599   : > { %3625 = vmatprep.subr.bf16.mxu0 %v7119_v2  ;;  %v7125_v2 = vld [vmem:[#allocation9 + $0x54] ss:$8 sps:$4 sm:$0xff]  }
 0x59a   : > { %v8791_v22 = vsel %vm3276_vm0, %v3267_v56, %v3285_v41  ;;  %vm3277_vm10 = vcmp.ge.f32.partialorder %v3268_v29, 0.0  ;;  %v3286_v14 = vmul.f32 0.1, %v3268_v29  ;;  %v8793_v21 = vld [vmem:[#allocation4 + $0x21] sm:$0xff] }
 0x59b   : > { %3305 = vst [vmem:[#allocation4 + $0x38] sm:$0xff] %v8791_v22  ;;  %v3223_v30 = vpop.f32.mrb[36].mxu1  ;;  %v8798_v32 = vmul.f32 %v8107_v20, %v8793_v21  ;;  %v3351_v55 = vld [vmem:[#allocation4 + $0x22] sm:$0xff] }
 0x59c   : > { %v8802_v27 = vsel %vm3277_vm10, %v3268_v29, %v3286_v14  ;;  %v3253_v35 = vmul.f32 %v8717_v18, %v3223_v30  ;;  %v6454_v50 = vpop.f32.mrb[37].mxu1  ;;  %3626 = vmatpush1.bf16.msra.mxu0 %v7117_v47  ;;  %v3352_v33 = vld [vmem:[#allocation4 + $0x2a] sm:$0xff]  ;;  %v3318_v29 = vmul.f32 %v8136_v39, %v8750_v3 }
 0x59d   : > { %3306 = vst [vmem:[#allocation4 + $0x40] sm:$0xff] %v8802_v27  ;;  %v3226_v51 = vpop.f32.mrb[38].mxu1  ;;  %v3358_v1 = vpack.c.bf16 %v3352_v33, %v3351_v55  ;;  %3627 = vmatprep.subr.bf16.mxu0 %v7122_v48  ;;  %v8815_v41 = vld [vmem:[#allocation4 + $0x27] sm:$0xff]  ;;  %v7123_v48 = vld [vmem:[#allocation9 + $0x50] ss:$8 sps:$4 sm:$0xff]  }
 0x59e   : > { %v3269_v18 = vadd.f32 %v8719_v4, %v3253_v35  ;;  %v6455_v16 = vpop.f32.mrb[39].mxu1  ;;  %v3313_v14 = vld [vmem:[#allocation4 + $0x29] sm:$0xff]  ;;  %v8822_v4 = vmul.f32 %v8104_v19, %v8813_v26  ;;  %v8826_v35 = vmul.f32 %v8107_v20, %v8815_v41 }
 0x59f   : > { %3511 = vmatmul.mubr.bf16.gmra.mrb[28].mxu0 %v3358_v1  ;;  %v7128_v30 = vld [vmem:[#allocation9 + $0x64] ss:$8 sps:$4 sm:$0xff]   ;;  %v7126_v33 = vld [vmem:[#allocation9 + $0x60] ss:$8 sps:$4 sm:$0xff]   ;;  %v8833_v51 = vmul.f32 %v8140_v42, %v3313_v14 }
 0x5a0   : > { %vm3278_vm11 = vcmp.ge.f32.partialorder %v3269_v18, 0.0  ;;  %v3287_v47 = vmul.f32 0.1, %v3269_v18  ;;  %3628 = vmatpush1.bf16.msra.mxu0 %v7120_v36  ;;  %3520 = vmatprep.mubr.bf16.mxu0 %v7599_v31  ;;  %v7138_v3 = vld [vmem:[#allocation9 + $0x120] ss:$8 sps:$4 sm:$0xff]  }
 0x5a1   : > { %3629 = vmatprep.subr.bf16.mxu0 %v7125_v2 }
 0x5a2   : > { %v3296_v50 = vsel %vm3278_vm11, %v3269_v18, %v3287_v47  ;;  %v8828_v55 = vld [vmem:[#allocation4 + $0x31] sm:$0xff] }
 0x5a3   : > { %3307 = vst [vmem:[#allocation4 + $0x48] sm:$0x3] %v3296_v50  ;;  %v8830_v36 = vld [vmem:[#allocation4 + $0x37] sm:$0xff]  ;;  %v8837_v1 = vmul.f32 %v8143_v43, %v8828_v55  ;;  %v8841_v18 = vld [vmem:[#allocation4 + $0x2f] sm:$0xff] }
 0x5a4   : > { %v3353_v16 = vld [vmem:[#allocation4 + $0x32] sm:$0xff]  ;;  %v3354_v5 = vld [vmem:[#allocation4 + $0x3a] sm:$0xff]  ;;  %3630 = vmatpush1.bf16.msra.mxu0 %v7123_v48  ;;  %v8847_v24 = vmul.f32 %v8143_v43, %v8830_v36  ;;  %v8851_v56 = vmul.f32 %v8140_v42, %v8841_v18 }
 0x5a5   : > { %v3359_v47 = vpack.c.bf16 %v3354_v5, %v3353_v16  ;;  %3631 = vmatprep.subr.bf16.mxu0 %v7128_v30  ;;  %v7131_v50 = vld [vmem:[#allocation9 + $0x74] ss:$8 sps:$4 sm:$0xff]   ;;  %v7129_v48 = vld [vmem:[#allocation9 + $0x70] ss:$8 sps:$4 sm:$0xff]   ;;  %v7134_v5 = vld [vmem:[#allocation9 + $0x104] ss:$8 sps:$4 sm:$0xff]  }
 0x5a6   : > { %v5016_v30 = vpack.c.bf16 %v8847_v24, %v8851_v56  ;;  %v3355_v16 = vld [vmem:[#allocation4 + $0x42] sm:$0x3]  ;;  %v5219_v24 = vsub.s32 0, %v8008_v40  ;;  %v5215_v56 = vld [vmem:[#allocation16] sm:$0x3] }
 0x5a7   : > { %3521 = vmatmul.mubr.bf16.gmra.mrb[32].mxu0 %v3359_v47  ;;  %v3360_v2 = vpack.c.bf16 %v3355_v16, %v3355_v16  ;;  %v3308_v47 = vld [vmem:[#allocation4 + $0x1] sm:$0xff] }
 0x5a8   : > { %3632 = vmatpush1.bf16.msra.mxu0 %v7126_v33  ;;  %3530 = vmatprep.mubr.bf16.mxu0 %v7599_v31  ;;  %v3317_v33 = vmul.f32 %v8133_v38, %v3308_v47  ;;  %v7143_v47 = vld [vmem:[#allocation9 + $0x134] ss:$8 sps:$4 sm:$0xff]  }
 0x5a9   : > { %3633 = vmatprep.subr.bf16.mxu0 %v7131_v50  ;;  %v7137_v50 = vld [vmem:[#allocation9 + $0x114] ss:$8 sps:$4 sm:$0xff]  }
 0x5aa   : > { %v3326_v6 = vpack.c.bf16 %v3318_v29, %v3317_v33  ;;  %v7146_v29 = vld [vmem:[#allocation9 + $0x144] ss:$8 sps:$4 sm:$0xff]   ;;  %v7144_v33 = vld [vmem:[#allocation9 + $0x140] ss:$8 sps:$4 sm:$0xff]  }
 0x5ac   : > { %3634 = vmatpush1.bf16.msra.mxu0 %v7129_v48  ;;  %v7140_v48 = vld [vmem:[#allocation9 + $0x124] ss:$8 sps:$4 sm:$0xff]  }
 0x5ad   : > { %3820 = vmatprep.subr.bf16.mxu0 %v7134_v5  ;;  %v3319_v5 = vmul.f32 %v8163_v57, %v8754_v28 }
 0x5af   : > { %3531 = vmatmul.mubr.bf16.gmra.mrb[36].mxu0 %v3360_v2  ;;  %v3320_v2 = vmul.f32 %v8166_v58, %v8781_v53  ;;  %v3321_v53 = vmul.f32 %v8191_v10, %v8793_v21  ;;  %v3323_v21 = vmul.f32 %v8210_v17, %v8828_v55  ;;  %v3700_v55 = vld [vmem:[#allocation4 + $0x3] sm:$0xff] }
 0x5b0   : > { %3651 = vmatprep.mubr.bf16.mxu0 %v7599_v31 }
 0x5b1   : > { %v3327_v16 = vpack.c.bf16 %v3320_v2, %v3319_v5  ;;  %v7147_v2 = vld [vmem:[#allocation9 + $0x150] ss:$8 sps:$4 sm:$0xff]   ;;  %v7150_v5 = vld [vmem:[#allocation9 + $0x160] ss:$8 sps:$4 sm:$0xff]  }
 0x5b7   : > { %3652 = vmatmul.mubr.bf16.vlgmr.msra.gmra.mrb[20].mxu0 %v3326_v6  ;;  %v7141_v6 = vld [vmem:[#allocation9 + $0x130] ss:$8 sps:$4 sm:$0xff]  }
 0x5b8   : > { %3821 = vmatpush1.bf16.msra.mxu0 %v7132_v8  ;;  %3661 = vmatprep.mubr.bf16.mxu0 %v7599_v31  ;;  %v3322_v8 = vmul.f32 %v8194_v0, %v3313_v14  ;;  %v7152_v14 = vld [vmem:[#allocation9 + $0x164] ss:$8 sps:$4 sm:$0xff]  }
 0x5b9   : > { %3822 = vmatprep.subr.bf16.mxu0 %v7137_v50  ;;  %v8869_v50 = vld [vmem:[#allocation4 + $0x39] sm:$0xff] }
 0x5ba   : > { %v3328_v28 = vpack.c.bf16 %v3322_v8, %v3321_v53 }
 0x5bc   : > { %3823 = vmatpush1.bf16.msra.mxu0 %v7135_v54  ;;  %v7149_v54 = vld [vmem:[#allocation9 + $0x154] ss:$8 sps:$4 sm:$0xff]  }
 0x5bd   : > { %3824 = vmatprep.subr.bf16.mxu0 %v7140_v48  ;;  %v3324_v48 = vmul.f32 %v8213_v23, %v8869_v50 }
 0x5bf   : > { %3662 = vmatmul.mubr.bf16.gmra.mrb[24].mxu0 %v3327_v16  ;;  %v7155_v16 = vld [vmem:[#allocation9 + $0x174] ss:$8 sps:$4 sm:$0xff]  }
 0x5c0   : > { %3825 = vmatpush1.bf16.msra.mxu0 %v7138_v3  ;;  %3671 = vmatprep.mubr.bf16.mxu0 %v7599_v31  ;;  %v3329_v3 = vpack.c.bf16 %v3324_v48, %v3323_v21  ;;  %v3703_v21 = vld [vmem:[#allocation4 + $0x1b] sm:$0xff] }
 0x5c1   : > { %3826 = vmatprep.subr.bf16.mxu0 %v7143_v47  ;;  %v3316_v47 = vld [vmem:[#allocation4 + $0x41] sm:$0x3] }
 0x5c2   : > { %v3325_v8 = vmul.f32 %v8228_v34, %v3316_v47  ;;  %v7164_v47 = vld [vmem:[#allocation9 + $0x1a4] ss:$8 sps:$4 sm:$0xff]  }
 0x5c4   : > { %3827 = vmatpush1.bf16.msra.mxu0 %v7141_v6  ;;  %v7153_v6 = vld [vmem:[#allocation9 + $0x170] ss:$8 sps:$4 sm:$0xff]   ;;  %v3330_v53 = vpack.c.bf16 %v3325_v8, %v3325_v8 }
 0x5c5   : > { %3828 = vmatprep.subr.bf16.mxu0 %v7146_v29  ;;  %v7158_v29 = vld [vmem:[#allocation9 + $0x184] ss:$8 sps:$4 sm:$0xff]  }
 0x5c7   : > { %3672 = vmatmul.mubr.bf16.gmra.mrb[28].mxu0 %v3328_v28 }
 0x5c8   : > { %3829 = vmatpush1.bf16.msra.mxu0 %v7144_v33  ;;  %3681 = vmatprep.mubr.bf16.mxu0 %v7599_v31  ;;  %v3701_v33 = vld [vmem:[#allocation4 + $0xb] sm:$0xff] }
 0x5c9   : > { %3830 = vmatprep.subr.bf16.mxu0 %v7149_v54  ;;  %v3710_v28 = vmul.f32 %v8074_v62, %v3701_v33  ;;  %v3709_v54 = vmul.f32 %v8071_v61, %v3700_v55  ;;  %v7162_v62 = vld [vmem:[#allocation9 + $0x1a0] ss:$8 sps:$4 sm:$0xff]   ;;  %v7167_v61 = vld [vmem:[#allocation9 + $0x1b4] ss:$8 sps:$4 sm:$0xff]  }
 0x5ca   : > { %v3704_v33 = vld [vmem:[#allocation4 + $0x23] sm:$0xff] }
 0x5cb   : > { %v3718_v48 = vpack.c.bf16 %v3710_v28, %v3709_v54  ;;  %v7170_v28 = vld [vmem:[#allocation9 + $0x1c4] ss:$8 sps:$4 sm:$0xff]  }
 0x5cc   : > { %3831 = vmatpush1.bf16.msra.mxu0 %v7147_v2  ;;  %v7156_v2 = vld [vmem:[#allocation9 + $0x180] ss:$8 sps:$4 sm:$0xff]  }
 0x5cd   : > { %3832 = vmatprep.subr.bf16.mxu0 %v7152_v14  ;;  %v7161_v14 = vld [vmem:[#allocation9 + $0x194] ss:$8 sps:$4 sm:$0xff]  }
 0x5cf   : > { %3682 = vmatmul.mubr.bf16.gmra.mrb[32].mxu0 %v3329_v3  ;;  %v3702_v3 = vld [vmem:[#allocation4 + $0x13] sm:$0xff] }
 0x5d0   : > { %3833 = vmatpush1.bf16.msra.mxu0 %v7150_v5  ;;  %3691 = vmatprep.mubr.bf16.mxu0 %v7599_v31  ;;  %v7159_v5 = vld [vmem:[#allocation9 + $0x190] ss:$8 sps:$4 sm:$0xff]  }
 0x5d1   : > { %3834 = vmatprep.subr.bf16.mxu0 %v7155_v16  ;;  %v3712_v16 = vmul.f32 %v8107_v20, %v3703_v21  ;;  %v3713_v20 = vmul.f32 %v8140_v42, %v3704_v33  ;;  %v7171_v21 = vld [vmem:[#allocation9 + $0x1d0] ss:$8 sps:$4 sm:$0xff]   ;;  %v7174_v42 = vld [vmem:[#allocation9 + $0x1e0] ss:$8 sps:$4 sm:$0xff]   ;;  %v3929_v33 = vmul.f32 %v8136_v39, %v8773_v37 }
 0x5d2   : > { %v7186_v37 = vld [vmem:[#allocation9 + $0x220] ss:$8 sps:$4 sm:$0xff]  }
 0x5d4   : > { %3835 = vmatpush1.bf16.msra.mxu0 %v7153_v6  ;;  %v3711_v6 = vmul.f32 %v8104_v19, %v3702_v3  ;;  %v7168_v19 = vld [vmem:[#allocation9 + $0x1c0] ss:$8 sps:$4 sm:$0xff]   ;;  %v7176_v3 = vld [vmem:[#allocation9 + $0x1e4] ss:$8 sps:$4 sm:$0xff]  }
 0x5d5   : > { %4039 = vmatprep.subr.bf16.mxu0 %v7158_v29  ;;  %v3705_v29 = vld [vmem:[#allocation4 + $0x2b] sm:$0xff] }
 0x5d6   : > { %v3719_v8 = vpack.c.bf16 %v3712_v16, %v3711_v6  ;;  %v3714_v55 = vmul.f32 %v8143_v43, %v3705_v29  ;;  %v3708_v6 = vld [vmem:[#allocation4 + $0x43] sm:$0x3] }
 0x5d7   : > { %3692 = vmatmul.mubr.bf16.gmra.mrb[36].mxu0 %v3330_v53  ;;  %v7165_v53 = vld [vmem:[#allocation9 + $0x1b0] ss:$8 sps:$4 sm:$0xff]  }
 0x5d8   : > { %3852 = vmatprep.mubr.bf16.mxu0 %v7599_v31  ;;  %v3720_v54 = vpack.c.bf16 %v3714_v55, %v3713_v20 }
 0x5df   : > { %3853 = vmatmul.mubr.bf16.vlgmr.msra.gmra.mrb[20].mxu0 %v3718_v48  ;;  %v3707_v48 = vld [vmem:[#allocation4 + $0x3b] sm:$0xff] }
 0x5e0   : > { %4040 = vmatpush1.bf16.msra.mxu0 %v7156_v2  ;;  %3862 = vmatprep.mubr.bf16.mxu0 %v7599_v31  ;;  %v7173_v2 = vld [vmem:[#allocation9 + $0x1d4] ss:$8 sps:$4 sm:$0xff]  }
 0x5e1   : > { %4041 = vmatprep.subr.bf16.mxu0 %v7161_v14  ;;  %v3706_v14 = vld [vmem:[#allocation4 + $0x33] sm:$0xff] }
 0x5e2   : > { %v3715_v43 = vmul.f32 %v8171_v60, %v3706_v14  ;;  %v3930_v14 = vmul.f32 %v8163_v57, %v8775_v25  ;;  %v7192_v25 = vld [vmem:[#allocation9 + $0x240] ss:$8 sps:$4 sm:$0xff]  }
 0x5e4   : > { %4042 = vmatpush1.bf16.msra.mxu0 %v7159_v5  ;;  %v3716_v5 = vmul.f32 %v8174_v63, %v3707_v48  ;;  %v7188_v48 = vld [vmem:[#allocation9 + $0x224] ss:$8 sps:$4 sm:$0xff]  }
 0x5e5   : > { %4043 = vmatprep.subr.bf16.mxu0 %v7164_v47  ;;  %v7179_v47 = vld [vmem:[#allocation9 + $0x1f4] ss:$8 sps:$4 sm:$0xff]  }
 0x5e6   : > { %v3721_v16 = vpack.c.bf16 %v3716_v5, %v3715_v43  ;;  %v7191_v5 = vld [vmem:[#allocation9 + $0x234] ss:$8 sps:$4 sm:$0xff]   ;;  %v3933_v43 = vmul.f32 %v8194_v0, %v8841_v18  ;;  %v7200_v18 = vld [vmem:[#allocation9 + $0x264] ss:$8 sps:$4 sm:$0xff]  }
 0x5e7   : > { %3863 = vmatmul.mubr.bf16.gmra.mrb[24].mxu0 %v3719_v8  ;;  %v3717_v8 = vmul.f32 %v8198_v11, %v3708_v6  ;;  %v8906_v6 = vld [vmem:[#allocation4 + $0x3f] sm:$0xff] }
 0x5e8   : > { %4044 = vmatpush1.bf16.msra.mxu0 %v7162_v62  ;;  %3872 = vmatprep.mubr.bf16.mxu0 %v7599_v31  ;;  %v7177_v62 = vld [vmem:[#allocation9 + $0x1f0] ss:$8 sps:$4 sm:$0xff]  }
 0x5e9   : > { %4045 = vmatprep.subr.bf16.mxu0 %v7167_v61  ;;  %v7182_v61 = vld [vmem:[#allocation9 + $0x204] ss:$8 sps:$4 sm:$0xff]   ;;  %v3722_v29 = vpack.c.bf16 %v3717_v8, %v3717_v8  ;;  %v3935_v8 = vmul.f32 %v8213_v23, %v8906_v6 }
 0x5ec   : > { %4046 = vmatpush1.bf16.msra.mxu0 %v7165_v53  ;;  %v3919_v53 = vld [vmem:[#allocation4 + $0x7] sm:$0xff] }
 0x5ed   : > { %4047 = vmatprep.subr.bf16.mxu0 %v7170_v28  ;;  %v3928_v55 = vmul.f32 %v8133_v38, %v3919_v53  ;;  %v7180_v28 = vld [vmem:[#allocation9 + $0x200] ss:$8 sps:$4 sm:$0xff]   ;;  %v7203_v53 = vld [vmem:[#allocation9 + $0x274] ss:$8 sps:$4 sm:$0xff]  }
 0x5ef   : > { %3873 = vmatmul.mubr.bf16.gmra.mrb[28].mxu0 %v3720_v54  ;;  %v3937_v20 = vpack.c.bf16 %v3929_v33, %v3928_v55  ;;  %v7183_v54 = vld [vmem:[#allocation9 + $0x210] ss:$8 sps:$4 sm:$0xff]   ;;  %v3927_v33 = vld [vmem:[#allocation4 + $0x47] sm:$0x3] }
 0x5f0   : > { %4048 = vmatpush1.bf16.msra.mxu0 %v7168_v19  ;;  %3882 = vmatprep.mubr.bf16.mxu0 %v7599_v31  ;;  %v7185_v19 = vld [vmem:[#allocation9 + $0x214] ss:$8 sps:$4 sm:$0xff]   ;;  %v7201_v55 = vld [vmem:[#allocation9 + $0x270] ss:$8 sps:$4 sm:$0xff]  }
 0x5f1   : > { %4049 = vmatprep.subr.bf16.mxu0 %v7173_v2  ;;  %v3931_v2 = vmul.f32 %v8166_v58, %v8813_v26  ;;  %v3932_v26 = vmul.f32 %v8191_v10, %v8815_v41  ;;  %v3934_v41 = vmul.f32 %v8210_v17, %v8830_v36  ;;  %v7204_v36 = vld [vmem:[#allocation9 + $0x280] ss:$8 sps:$4 sm:$0xff]  }
 0x5f4   : > { %4050 = vmatpush1.bf16.msra.mxu0 %v7171_v21  ;;  %v3938_v21 = vpack.c.bf16 %v3931_v2, %v3930_v14  ;;  %v9081_v2 = vpack.c.bf16 %v8728_v45, %v8725_v9  ;;  %v7212_v14 = vld [vmem:[#allocation9 + $0x2a4] ss:$8 sps:$4 sm:$0xff]   ;;  %v7216_v45 = vld [vmem:[#allocation9 + $0x2c0] ss:$8 sps:$4 sm:$0xff]  }
 0x5f5   : > { %4051 = vmatprep.subr.bf16.mxu0 %v7176_v3  ;;  %v7189_v3 = vld [vmem:[#allocation9 + $0x230] ss:$8 sps:$4 sm:$0xff]   ;;  %v7218_v9 = vld [vmem:[#allocation9 + $0x2c4] ss:$8 sps:$4 sm:$0xff]  }
 0x5f7   : > { %3883 = vmatmul.mubr.bf16.gmra.mrb[32].mxu0 %v3721_v16  ;;  %v3939_v16 = vpack.c.bf16 %v3933_v43, %v3932_v26  ;;  %v7221_v43 = vld [vmem:[#allocation9 + $0x2d4] ss:$8 sps:$4 sm:$0xff]   ;;  %v7219_v26 = vld [vmem:[#allocation9 + $0x2d0] ss:$8 sps:$4 sm:$0xff]  }
 0x5f8   : > { %4052 = vmatpush1.bf16.msra.mxu0 %v7174_v42  ;;  %3892 = vmatprep.mubr.bf16.mxu0 %v7599_v31  ;;  %v7194_v42 = vld [vmem:[#allocation9 + $0x244] ss:$8 sps:$4 sm:$0xff]  }
 0x5f9   : > { %4053 = vmatprep.subr.bf16.mxu0 %v7179_v47  ;;  %v7197_v47 = vld [vmem:[#allocation9 + $0x254] ss:$8 sps:$4 sm:$0xff]  }
 0x5fc   : > { %4054 = vmatpush1.bf16.msra.mxu0 %v7177_v62  ;;  %v7195_v62 = vld [vmem:[#allocation9 + $0x250] ss:$8 sps:$4 sm:$0xff]  }
 0x5fd   : > { %4249 = vmatprep.subr.bf16.mxu0 %v7182_v61  ;;  %v7198_v61 = vld [vmem:[#allocation9 + $0x260] ss:$8 sps:$4 sm:$0xff]  }
 0x5ff   : > { %3893 = vmatmul.mubr.bf16.gmra.mrb[36].mxu0 %v3722_v29  ;;  %v3940_v29 = vpack.c.bf16 %v3935_v8, %v3934_v41  ;;  %v7228_v8 = vld [vmem:[#allocation9 + $0x300] ss:$8 sps:$4 sm:$0xff]   ;;  %v9085_v41 = vpack.c.bf16 %v8759_v52, %v8766_v49  ;;  %v7242_v52 = vld [vmem:[#allocation9 + $0x344] ss:$8 sps:$4 sm:$0xff]  }
 0x600   : > { %4071 = vmatprep.mubr.bf16.mxu0 %v7599_v31  ;;  %v7240_v49 = vld [vmem:[#allocation9 + $0x340] ss:$8 sps:$4 sm:$0xff]  }
 0x607   : > { %4072 = vmatmul.mubr.bf16.vlgmr.msra.gmra.mrb[20].mxu0 %v3937_v20  ;;  %v7206_v20 = vld [vmem:[#allocation9 + $0x284] ss:$8 sps:$4 sm:$0xff]  }
 0x608   : > { %4250 = vmatpush1.bf16.msra.mxu0 %v7180_v28  ;;  %4081 = vmatprep.mubr.bf16.mxu0 %v7599_v31  ;;  %v3936_v28 = vmul.f32 %v8228_v34, %v3927_v33  ;;  %v7237_v33 = vld [vmem:[#allocation9 + $0x330] ss:$8 sps:$4 sm:$0xff]  }
 0x609   : > { %4251 = vmatprep.subr.bf16.mxu0 %v7185_v19 }
 0x60a   : > { %v3941_v19 = vpack.c.bf16 %v3936_v28, %v3936_v28  ;;  %v4355_v28 = vld [vmem:[#allocation4 + $0x41] sm:$0xff] }
 0x60c   : > { %4252 = vmatpush1.bf16.msra.mxu0 %v7183_v54  ;;  %v7209_v54 = vld [vmem:[#allocation9 + $0x294] ss:$8 sps:$4 sm:$0xff]  }
 0x60d   : > { %4253 = vmatprep.subr.bf16.mxu0 %v7188_v48  ;;  %v7207_v48 = vld [vmem:[#allocation9 + $0x290] ss:$8 sps:$4 sm:$0xff]  }
 0x60f   : > { %4082 = vmatmul.mubr.bf16.gmra.mrb[24].mxu0 %v3938_v21  ;;  %v7215_v21 = vld [vmem:[#allocation9 + $0x2b4] ss:$8 sps:$4 sm:$0xff]  }
 0x610   : > { %4254 = vmatpush1.bf16.msra.mxu0 %v7186_v37  ;;  %4091 = vmatprep.mubr.bf16.mxu0 %v7599_v31  ;;  %v7210_v37 = vld [vmem:[#allocation9 + $0x2a0] ss:$8 sps:$4 sm:$0xff]  }
 0x611   : > { %4255 = vmatprep.subr.bf16.mxu0 %v7191_v5  ;;  %v9082_v5 = vpack.c.bf16 %v8740_v15, %v8737_v46  ;;  %v7224_v46 = vld [vmem:[#allocation9 + $0x2e4] ss:$8 sps:$4 sm:$0xff]   ;;  %v7222_v15 = vld [vmem:[#allocation9 + $0x2e0] ss:$8 sps:$4 sm:$0xff]  }
 0x614   : > { %4256 = vmatpush1.bf16.msra.mxu0 %v7189_v3  ;;  %v7213_v3 = vld [vmem:[#allocation9 + $0x2b0] ss:$8 sps:$4 sm:$0xff]  }
 0x615   : > { %4257 = vmatprep.subr.bf16.mxu0 %v7194_v42  ;;  %v9083_v42 = vpack.c.bf16 %v8761_v44, %v8752_v12  ;;  %v7230_v12 = vld [vmem:[#allocation9 + $0x304] ss:$8 sps:$4 sm:$0xff]   ;;  %v4146_v44 = vld [vmem:[#allocation4 + $0x48] sm:$0x3] }
 0x617   : > { %4092 = vmatmul.mubr.bf16.gmra.mrb[28].mxu0 %v3939_v16  ;;  %v9084_v16 = vpack.c.bf16 %v8802_v27, %v8791_v22  ;;  %v7231_v22 = vld [vmem:[#allocation9 + $0x310] ss:$8 sps:$4 sm:$0xff]   ;;  %v7236_v27 = vld [vmem:[#allocation9 + $0x324] ss:$8 sps:$4 sm:$0xff]  }
 0x618   : > { %4258 = vmatpush1.bf16.msra.mxu0 %v7192_v25  ;;  %4101 = vmatprep.mubr.bf16.mxu0 %v7599_v31  ;;  %v7227_v25 = vld [vmem:[#allocation9 + $0x2f4] ss:$8 sps:$4 sm:$0xff]  }
 0x619   : > { %4259 = vmatprep.subr.bf16.mxu0 %v7197_v47  ;;  %v7225_v47 = vld [vmem:[#allocation9 + $0x2f0] ss:$8 sps:$4 sm:$0xff]  }
 0x61c   : > { %4260 = vmatpush1.bf16.msra.mxu0 %v7195_v62  ;;  %v4151_v62 = vpack.c.bf16 %v4146_v44, %v4146_v44  ;;  %v4572_v44 = vld [vmem:[#allocation4 + $0x35] sm:$0xff] }
 0x61d   : > { %4261 = vmatprep.subr.bf16.mxu0 %v7200_v18  ;;  %v7233_v18 = vld [vmem:[#allocation9 + $0x314] ss:$8 sps:$4 sm:$0xff]  }
 0x61f   : > { %4102 = vmatmul.mubr.bf16.gmra.mrb[32].mxu0 %v3940_v29  ;;  %v7239_v29 = vld [vmem:[#allocation9 + $0x334] ss:$8 sps:$4 sm:$0xff]  }
 0x620   : > { %4262 = vmatpush1.bf16.msra.mxu0 %v7198_v61  ;;  %4111 = vmatprep.mubr.bf16.mxu0 %v7599_v31  ;;  %v7234_v61 = vld [vmem:[#allocation9 + $0x320] ss:$8 sps:$4 sm:$0xff]  }
 0x621   : > { %4263 = vmatprep.subr.bf16.mxu0 %v7203_v53  ;;  %v9086_v53 = vpack.c.bf16 %v8798_v32, %v8807_v7  ;;  %v7243_v32 = vld [vmem:[#allocation9 + $0x350] ss:$8 sps:$4 sm:$0xff]   ;;  %v4364_v7 = vmul.f32 %v8174_v63, %v4355_v28  ;;  %v7275_v28 = vld [vmem:[#allocation9 + $0x3f4] ss:$8 sps:$4 sm:$0xff]  }
 0x624   : > { %4264 = vmatpush1.bf16.msra.mxu0 %v7201_v55  ;;  %v7245_v55 = vld [vmem:[#allocation9 + $0x354] ss:$8 sps:$4 sm:$0xff]  }
 0x625   : > { %4468 = vmatprep.subr.bf16.mxu0 %v7206_v20  ;;  %v9087_v20 = vpack.c.bf16 %v8837_v1, %v8833_v51  ;;  %v7249_v51 = vld [vmem:[#allocation9 + $0x370] ss:$8 sps:$4 sm:$0xff]  }
 0x627   : > { %4112 = vmatmul.mubr.bf16.gmra.mrb[36].mxu0 %v3941_v19  ;;  %v7248_v19 = vld [vmem:[#allocation9 + $0x364] ss:$8 sps:$4 sm:$0xff]  }
 0x628   : > { %4281 = vmatprep.mubr.bf16.mxu0 %v7599_v31 }
 0x62f   : > { %4282 = vmatmul.mubr.bf16.vlgmr.msra.gmra.mrb[20].mxu0 %v9081_v2 }
 0x630   : > { %4469 = vmatpush1.bf16.msra.mxu0 %v7204_v36  ;;  %4291 = vmatprep.mubr.bf16.mxu0 %v7599_v31  ;;  %v4363_v36 = vmul.f32 %v8171_v60, %v8869_v50  ;;  %v4567_v50 = vld [vmem:[#allocation4 + $0xd] sm:$0xff] }
 0x631   : > { %4470 = vmatprep.subr.bf16.mxu0 %v7209_v54  ;;  %v7246_v54 = vld [vmem:[#allocation9 + $0x360] ss:$8 sps:$4 sm:$0xff]  }
 0x632   : > { %v4369_v2 = vpack.c.bf16 %v4364_v7, %v4363_v36  ;;  %v7278_v7 = vld [vmem:[#allocation9 + $0x404] ss:$8 sps:$4 sm:$0xff]  }
 0x633   : > { %v4786_v36 = vld [vmem:[#allocation4 + $0xe] sm:$0xff] }
 0x634   : > { %4471 = vmatpush1.bf16.msra.mxu0 %v7207_v48  ;;  %v7251_v48 = vld [vmem:[#allocation9 + $0x374] ss:$8 sps:$4 sm:$0xff]  }
 0x635   : > { %4472 = vmatprep.subr.bf16.mxu0 %v7212_v14  ;;  %v4356_v14 = vld [vmem:[#allocation4 + $0x49] sm:$0x3] }
 0x636   : > { %v4365_v1 = vmul.f32 %v8198_v11, %v4356_v14  ;;  %v4789_v14 = vld [vmem:[#allocation4 + $0x26] sm:$0xff] }
 0x637   : > { %4292 = vmatmul.mubr.bf16.gmra.mrb[24].mxu0 %v9082_v5  ;;  %v4568_v5 = vld [vmem:[#allocation4 + $0x15] sm:$0xff] }
 0x638   : > { %4473 = vmatpush1.bf16.msra.mxu0 %v7210_v37  ;;  %4301 = vmatprep.mubr.bf16.mxu0 %v7599_v31  ;;  %v7254_v37 = vld [vmem:[#allocation9 + $0x384] ss:$8 sps:$4 sm:$0xff]  }
 0x639   : > { %4474 = vmatprep.subr.bf16.mxu0 %v7215_v21  ;;  %v4370_v21 = vpack.c.bf16 %v4365_v1, %v4365_v1  ;;  %v7282_v1 = vld [vmem:[#allocation9 + $0x420] ss:$8 sps:$4 sm:$0xff]  }
 0x63c   : > { %4475 = vmatpush1.bf16.msra.mxu0 %v7213_v3  ;;  %v4577_v3 = vmul.f32 %v8136_v39, %v4568_v5  ;;  %v7258_v39 = vld [vmem:[#allocation9 + $0x3a0] ss:$8 sps:$4 sm:$0xff]   ;;  %v7285_v5 = vld [vmem:[#allocation9 + $0x430] ss:$8 sps:$4 sm:$0xff]  }
 0x63d   : > { %4476 = vmatprep.subr.bf16.mxu0 %v7218_v9  ;;  %v4576_v9 = vmul.f32 %v8133_v38, %v4567_v50  ;;  %v7263_v38 = vld [vmem:[#allocation9 + $0x3b4] ss:$8 sps:$4 sm:$0xff]   ;;  %v7290_v50 = vld [vmem:[#allocation9 + $0x444] ss:$8 sps:$4 sm:$0xff]  }
 0x63f   : > { %4302 = vmatmul.mubr.bf16.gmra.mrb[28].mxu0 %v9083_v42  ;;  %v7257_v42 = vld [vmem:[#allocation9 + $0x394] ss:$8 sps:$4 sm:$0xff]  }
 0x640   : > { %4477 = vmatpush1.bf16.msra.mxu0 %v7216_v45  ;;  %4311 = vmatprep.mubr.bf16.mxu0 %v7599_v31  ;;  %v7252_v45 = vld [vmem:[#allocation9 + $0x380] ss:$8 sps:$4 sm:$0xff]  }
 0x641   : > { %4478 = vmatprep.subr.bf16.mxu0 %v7221_v43  ;;  %v4585_v43 = vpack.c.bf16 %v4577_v3, %v4576_v9  ;;  %v4791_v3 = vld [vmem:[#allocation4 + $0x36] sm:$0xff]  ;;  %v4790_v9 = vld [vmem:[#allocation4 + $0x2e] sm:$0xff] }
 0x644   : > { %4479 = vmatpush1.bf16.msra.mxu0 %v7219_v26  ;;  %v4570_v26 = vld [vmem:[#allocation4 + $0x25] sm:$0xff] }
 0x645   : > { %4480 = vmatprep.subr.bf16.mxu0 %v7224_v46  ;;  %v7255_v46 = vld [vmem:[#allocation9 + $0x390] ss:$8 sps:$4 sm:$0xff]  }
 0x647   : > { %4312 = vmatmul.mubr.bf16.gmra.mrb[32].mxu0 %v9084_v16  ;;  %v7260_v16 = vld [vmem:[#allocation9 + $0x3a4] ss:$8 sps:$4 sm:$0xff]  }
 0x648   : > { %4481 = vmatpush1.bf16.msra.mxu0 %v7222_v15  ;;  %4321 = vmatprep.mubr.bf16.mxu0 %v7599_v31  ;;  %v4569_v15 = vld [vmem:[#allocation4 + $0x1d] sm:$0xff] }
 0x649   : > { %4482 = vmatprep.subr.bf16.mxu0 %v7227_v25  ;;  %v4579_v25 = vmul.f32 %v8166_v58, %v4570_v26  ;;  %v7291_v26 = vld [vmem:[#allocation9 + $0x450] ss:$8 sps:$4 sm:$0xff]  }
 0x64c   : > { %4483 = vmatpush1.bf16.msra.mxu0 %v7225_v47  ;;  %v4578_v47 = vmul.f32 %v8163_v57, %v4569_v15  ;;  %v7264_v57 = vld [vmem:[#allocation9 + $0x3c0] ss:$8 sps:$4 sm:$0xff]  }
 0x64d   : > { %4687 = vmatprep.subr.bf16.mxu0 %v7230_v12  ;;  %v4793_v15 = vld [vmem:[#allocation4 + $0x46] sm:$0xff] }
 0x64e   : > { %v4586_v12 = vpack.c.bf16 %v4579_v25, %v4578_v47  ;;  %v4792_v25 = vld [vmem:[#allocation4 + $0x3e] sm:$0xff] }
 0x64f   : > { %4322 = vmatmul.mubr.bf16.gmra.mrb[36].mxu0 %v4151_v62  ;;  %v7261_v62 = vld [vmem:[#allocation9 + $0x3b0] ss:$8 sps:$4 sm:$0xff]   ;;  %v4798_v47 = vpack.c.bf16 %v4793_v15, %v4792_v25 }
 0x650   : > { %4500 = vmatprep.mubr.bf16.mxu0 %v7599_v31 }
 0x657   : > { %4501 = vmatmul.mubr.bf16.vlgmr.msra.gmra.mrb[20].mxu0 %v9085_v41  ;;  %v7266_v41 = vld [vmem:[#allocation9 + $0x3c4] ss:$8 sps:$4 sm:$0xff]  }
 0x658   : > { %4688 = vmatpush1.bf16.msra.mxu0 %v7228_v8  ;;  %4510 = vmatprep.mubr.bf16.mxu0 %v7599_v31  ;;  %v4571_v8 = vld [vmem:[#allocation4 + $0x2d] sm:$0xff] }
 0x659   : > { %4689 = vmatprep.subr.bf16.mxu0 %v7233_v18  ;;  %v4581_v18 = vmul.f32 %v8194_v0, %v4572_v44  ;;  %v4580_v58 = vmul.f32 %v8191_v10, %v4571_v8  ;;  %v7270_v10 = vld [vmem:[#allocation9 + $0x3e0] ss:$8 sps:$4 sm:$0xff]   ;;  %v9089_v8 = vpack.c.bf16 %v8826_v35, %v8822_v4 }
 0x65c   : > { %4690 = vmatpush1.bf16.msra.mxu0 %v7231_v22  ;;  %v4587_v22 = vpack.c.bf16 %v4581_v18, %v4580_v58  ;;  %v5003_v18 = vld [vmem:[#allocation4 + $0x47] sm:$0xff] }
 0x65d   : > { %4691 = vmatprep.subr.bf16.mxu0 %v7236_v27  ;;  %v7269_v27 = vld [vmem:[#allocation9 + $0x3d4] ss:$8 sps:$4 sm:$0xff]  }
 0x65f   : > { %4511 = vmatmul.mubr.bf16.gmra.mrb[24].mxu0 %v9086_v53  ;;  %v7267_v53 = vld [vmem:[#allocation9 + $0x3d0] ss:$8 sps:$4 sm:$0xff]  }
 0x660   : > { %4692 = vmatpush1.bf16.msra.mxu0 %v7234_v61  ;;  %4520 = vmatprep.mubr.bf16.mxu0 %v7599_v31  ;;  %v4574_v61 = vld [vmem:[#allocation4 + $0x45] sm:$0xff] }
 0x661   : > { %4693 = vmatprep.subr.bf16.mxu0 %v7239_v29  ;;  %v4573_v29 = vld [vmem:[#allocation4 + $0x3d] sm:$0xff] }
 0x662   : > { %v4582_v0 = vmul.f32 %v8210_v17, %v4573_v29  ;;  %v4787_v17 = vld [vmem:[#allocation4 + $0x16] sm:$0xff] }
 0x664   : > { %4694 = vmatpush1.bf16.msra.mxu0 %v7237_v33  ;;  %v4583_v33 = vmul.f32 %v8213_v23, %v4574_v61 }
 0x665   : > { %4695 = vmatprep.subr.bf16.mxu0 %v7242_v52  ;;  %v7272_v52 = vld [vmem:[#allocation9 + $0x3e4] ss:$8 sps:$4 sm:$0xff]  }
 0x667   : > { %4521 = vmatmul.mubr.bf16.gmra.mrb[28].mxu0 %v9087_v20 }
 0x668   : > { %4696 = vmatpush1.bf16.msra.mxu0 %v7240_v49  ;;  %4530 = vmatprep.mubr.bf16.mxu0 %v7599_v31  ;;  %v4575_v49 = vld [vmem:[#allocation4 + $0x4d] sm:$0x3] }
 0x669   : > { %4697 = vmatprep.subr.bf16.mxu0 %v7245_v55  ;;  %v4588_v55 = vpack.c.bf16 %v4583_v33, %v4582_v0  ;;  %v4584_v20 = vmul.f32 %v8228_v34, %v4575_v49  ;;  %v7279_v34 = vld [vmem:[#allocation9 + $0x410] ss:$8 sps:$4 sm:$0xff]  }
 0x66b   : > { %v4589_v23 = vpack.c.bf16 %v4584_v20, %v4584_v20 }
 0x66c   : > { %4698 = vmatpush1.bf16.msra.mxu0 %v7243_v32  ;;  %v7273_v32 = vld [vmem:[#allocation9 + $0x3f0] ss:$8 sps:$4 sm:$0xff]  }
 0x66d   : > { %4699 = vmatprep.subr.bf16.mxu0 %v7248_v19  ;;  %v7276_v19 = vld [vmem:[#allocation9 + $0x400] ss:$8 sps:$4 sm:$0xff]  }
 0x66f   : > { %4531 = vmatmul.mubr.bf16.gmra.mrb[32].mxu0 %v4369_v2  ;;  %v7281_v2 = vld [vmem:[#allocation9 + $0x414] ss:$8 sps:$4 sm:$0xff]  }
 0x670   : > { %4700 = vmatpush1.bf16.msra.mxu0 %v7246_v54  ;;  %4540 = vmatprep.mubr.bf16.mxu0 %v7599_v31  ;;  %v4795_v54 = vpack.c.bf16 %v4787_v17, %v4786_v36 }
 0x671   : > { %4701 = vmatprep.subr.bf16.mxu0 %v7251_v48  ;;  %v7284_v48 = vld [vmem:[#allocation9 + $0x424] ss:$8 sps:$4 sm:$0xff]  }
 0x674   : > { %4702 = vmatpush1.bf16.msra.mxu0 %v7249_v51  ;;  %v4788_v51 = vld [vmem:[#allocation4 + $0x1e] sm:$0xff] }
 0x675   : > { %4897 = vmatprep.subr.bf16.mxu0 %v7254_v37  ;;  %v4796_v37 = vpack.c.bf16 %v4789_v14, %v4788_v51 }
 0x677   : > { %4541 = vmatmul.mubr.bf16.gmra.mrb[36].mxu0 %v4370_v21  ;;  %v7287_v21 = vld [vmem:[#allocation9 + $0x434] ss:$8 sps:$4 sm:$0xff]  }
 0x678   : > { %4719 = vmatprep.mubr.bf16.mxu0 %v7599_v31 }
 0x67f   : > { %4720 = vmatmul.mubr.bf16.vlgmr.msra.gmra.mrb[20].mxu0 %v4585_v43  ;;  %v4797_v43 = vpack.c.bf16 %v4791_v3, %v4790_v9 }
 0x680   : > { %4898 = vmatpush1.bf16.msra.mxu0 %v7252_v45  ;;  %4729 = vmatprep.mubr.bf16.mxu0 %v7599_v31  ;;  %v7288_v45 = vld [vmem:[#allocation9 + $0x440] ss:$8 sps:$4 sm:$0xff]  }
 0x681   : > { %4899 = vmatprep.subr.bf16.mxu0 %v7257_v42  ;;  %v7293_v42 = vld [vmem:[#allocation9 + $0x454] ss:$8 sps:$4 sm:$0xff]  }
 0x684   : > { %4900 = vmatpush1.bf16.msra.mxu0 %v7255_v46  ;;  %v7296_v46 = vld [vmem:[#allocation9 + $0x464] ss:$8 sps:$4 sm:$0xff]  }
 0x685   : > { %4901 = vmatprep.subr.bf16.mxu0 %v7260_v16  ;;  %v7294_v16 = vld [vmem:[#allocation9 + $0x460] ss:$8 sps:$4 sm:$0xff]  }
 0x687   : > { %4730 = vmatmul.mubr.bf16.gmra.mrb[24].mxu0 %v4586_v12  ;;  %v4794_v12 = vld [vmem:[#allocation4 + $0x4e] sm:$0x3] }
 0x688   : > { %4902 = vmatpush1.bf16.msra.mxu0 %v7258_v39  ;;  %4739 = vmatprep.mubr.bf16.mxu0 %v7599_v31  ;;  %v7299_v39 = vld [vmem:[#allocation9 + $0x474] ss:$8 sps:$4 sm:$0xff]   ;;  %v4799_v44 = vpack.c.bf16 %v4794_v12, %v4794_v12 }
 0x689   : > { %4903 = vmatprep.subr.bf16.mxu0 %v7263_v38  ;;  %v7297_v38 = vld [vmem:[#allocation9 + $0x470] ss:$8 sps:$4 sm:$0xff]  }
 0x68c   : > { %4904 = vmatpush1.bf16.msra.mxu0 %v7261_v62  ;;  %v9088_v62 = vpack.c.bf16 %v8789_v13, %v8785_v59  ;;  %v5011_v59 = vmul.f32 %v8171_v60, %v8906_v6  ;;  %v5004_v13 = vld [vmem:[#allocation4 + $0x4f] sm:$0x3] }
 0x68d   : > { %4905 = vmatprep.subr.bf16.mxu0 %v7266_v41  ;;  %v5012_v41 = vmul.f32 %v8174_v63, %v5003_v18  ;;  %v5013_v4 = vmul.f32 %v8198_v11, %v5004_v13  ;;  %v8990_v63 = vrot.slane %v5215_v56, %v5219_v24 }
 0x68f   : > { %4740 = vmatmul.mubr.bf16.gmra.mrb[28].mxu0 %v4587_v22  ;;  %v5017_v58 = vpack.c.bf16 %v5012_v41, %v5011_v59  ;;  %v5018_v35 = vpack.c.bf16 %v5013_v4, %v5013_v4 }
 0x690   : > { %4906 = vmatpush1.bf16.msra.mxu0 %v7264_v57  ;;  %4749 = vmatprep.mubr.bf16.mxu0 %v7599_v31  ;;  %v5245_v57 = vld [vmem:[#allocation18] sm:$0x3] }
 0x691   : > { %4907 = vmatprep.subr.bf16.mxu0 %v7269_v27  ;;  %v8994_v6 = vrot.slane %v5245_v57, %v5219_v24 }
 0x694   : > { %4908 = vmatpush1.bf16.msra.mxu0 %v7267_v53 }
 0x695   : > { %4909 = vmatprep.subr.bf16.mxu0 %v7272_v52 }
 0x697   : > { %4750 = vmatmul.mubr.bf16.gmra.mrb[32].mxu0 %v4588_v55 }
 0x698   : > { %4910 = vmatpush1.bf16.msra.mxu0 %v7270_v10  ;;  %4759 = vmatprep.mubr.bf16.mxu0 %v7599_v31 }
 0x699   : > { %4911 = vmatprep.subr.bf16.mxu0 %v7275_v28 }
 0x69c   : > { %4912 = vmatpush1.bf16.msra.mxu0 %v7273_v32 }
 0x69d   : > { %5116 = vmatprep.subr.bf16.mxu0 %v7278_v7 }
 0x69f   : > { %4760 = vmatmul.mubr.bf16.gmra.mrb[36].mxu0 %v4589_v23 }
 0x6a0   : > { %4929 = vmatprep.mubr.bf16.mxu0 %v7599_v31 }
 0x6a7   : > { %4930 = vmatmul.mubr.bf16.vlgmr.msra.gmra.mrb[20].mxu0 %v4795_v54 }
 0x6a8   : > { %5117 = vmatpush1.bf16.msra.mxu0 %v7276_v19  ;;  %4939 = vmatprep.mubr.bf16.mxu0 %v7599_v31 }
 0x6a9   : > { %5118 = vmatprep.subr.bf16.mxu0 %v7281_v2 }
 0x6ac   : > { %5119 = vmatpush1.bf16.msra.mxu0 %v7279_v34 }
 0x6ad   : > { %5120 = vmatprep.subr.bf16.mxu0 %v7284_v48 }
 0x6af   : > { %4940 = vmatmul.mubr.bf16.gmra.mrb[24].mxu0 %v4796_v37 }
 0x6b0   : > { %5121 = vmatpush1.bf16.msra.mxu0 %v7282_v1  ;;  %4949 = vmatprep.mubr.bf16.mxu0 %v7599_v31 }
 0x6b1   : > { %5122 = vmatprep.subr.bf16.mxu0 %v7287_v21 }
 0x6b4   : > { %5123 = vmatpush1.bf16.msra.mxu0 %v7285_v5 }
 0x6b5   : > { %5124 = vmatprep.subr.bf16.mxu0 %v7290_v50 }
 0x6b7   : > { %4950 = vmatmul.mubr.bf16.gmra.mrb[28].mxu0 %v4797_v43 }
 0x6b8   : > { %5125 = vmatpush1.bf16.msra.mxu0 %v7288_v45  ;;  %4959 = vmatprep.mubr.bf16.mxu0 %v7599_v31 }
 0x6b9   : > { %5126 = vmatprep.subr.bf16.mxu0 %v7293_v42 }
 0x6bc   : > { %5127 = vmatpush1.bf16.msra.mxu0 %v7291_v26 }
 0x6bd   : > { %5128 = vmatprep.subr.bf16.mxu0 %v7296_v46 }
 0x6bf   : > { %4960 = vmatmul.mubr.bf16.gmra.mrb[32].mxu0 %v4798_v47 }
 0x6c0   : > { %5129 = vmatpush1.bf16.msra.mxu0 %v7294_v16  ;;  %4969 = vmatprep.mubr.bf16.mxu0 %v7599_v31 }
 0x6c1   : > { %5130 = vmatprep.subr.bf16.mxu0 %v7299_v39 }
 0x6c4   : > { %5131 = vmatpush1.bf16.msra.mxu0 %v7297_v38 }
 0x6c7   : > { %4970 = vmatmul.mubr.bf16.gmra.mrb[36].mxu0 %v4799_v44 }
 0x6c8   : > { %5148 = vmatprep.mubr.bf16.mxu0 %v7599_v31 }
 0x6cf   : > { %5149 = vmatmul.mubr.bf16.vlgmr.msra.gmra.mrb[20].mxu0 %v9088_v62 }
 0x6d0   : > { %5158 = vmatprep.mubr.bf16.mxu0 %v7599_v31 }
 0x6d7   : > { %5159 = vmatmul.mubr.bf16.gmra.mrb[24].mxu0 %v9089_v8 }
 0x6d8   : > { %5168 = vmatprep.mubr.bf16.mxu0 %v7599_v31 }
 0x6df   : > { %5169 = vmatmul.mubr.bf16.gmra.mrb[28].mxu0 %v5016_v30  ;;  %v5223_v30 = vsub.s32 1, %v8008_v40 }
 0x6e0   : > { %5178 = vmatprep.mubr.bf16.mxu0 %v7599_v31 }
 0x6e1   : > { %v8992_v60 = vrot.slane %v5215_v56, %v5223_v30  ;;  %v8997_v11 = vrot.slane %v5245_v57, %v5223_v30 }
 0x6e7   : > { %5179 = vmatmul.mubr.bf16.gmra.mrb[32].mxu0 %v5017_v58 }
 0x6e8   : > { %5188 = vmatprep.mubr.bf16.mxu0 %v7599_v31 }
 0x6ef   : > { %5189 = vmatmul.mubr.bf16.gmra.mrb[36].mxu0 %v5018_v35 }
 0x7a2   : > { %v5150_v22 = vpop.f32.mrb[20].mxu0 }
 0x7a3   : > { %v5227_v31 = vmul.f32 %v8990_v63, %v5150_v22  ;;  %v5152_v27 = vpop.f32.mrb[21].mxu0 }
 0x7a4   : > { %v5228_v61 = vmul.f32 %v8992_v60, %v5152_v27  ;;  %v5154_v29 = vpop.f32.mrb[22].mxu0 }
 0x7a5   : > { %v5257_v40 = vadd.f32 %v8994_v6, %v5227_v31  ;;  %v5229_v53 = vmul.f32 %v8990_v63, %v5154_v29  ;;  %v5156_v33 = vpop.f32.mrb[23].mxu0 }
 0x7a6   : > { %v5258_v52 = vadd.f32 %v8997_v11, %v5228_v61  ;;  %v5230_v0 = vmul.f32 %v8992_v60, %v5156_v33 }
 0x7a7   : > { %vm5275_vm12 = vcmp.ge.f32.partialorder %v5257_v40, 0.0  ;;  %v5293_v10 = vmul.f32 0.1, %v5257_v40  ;;  %v5259_v49 = vadd.f32 %v8994_v6, %v5229_v53 }
 0x7a8   : > { %vm5276_vm13 = vcmp.ge.f32.partialorder %v5258_v52, 0.0  ;;  %v5294_v55 = vmul.f32 0.1, %v5258_v52  ;;  %v5260_v28 = vadd.f32 %v8997_v11, %v5230_v0 }
 0x7a9   : > { %v5311_v20 = vsel %vm5275_vm12, %v5257_v40, %v5293_v10  ;;  %vm5277_vm14 = vcmp.ge.f32.partialorder %v5259_v49, 0.0  ;;  %v5295_v32 = vmul.f32 0.1, %v5259_v49 }
 0x7aa   : > { %v5312_v7 = vsel %vm5276_vm13, %v5258_v52, %v5294_v55  ;;  %vm5278_vm15 = vcmp.ge.f32.partialorder %v5260_v28, 0.0  ;;  %v5296_v23 = vmul.f32 0.1, %v5260_v28  ;;  %v5160_v17 = vpop.f32.mrb[24].mxu0 }
 0x7ab   : > { %v5862_v19 = vpack.c.bf16 %v5312_v7, %v5311_v20  ;;  %v5313_v36 = vsel %vm5277_vm14, %v5259_v49, %v5295_v32  ;;  %v5231_v54 = vmul.f32 %v8990_v63, %v5160_v17  ;;  %v5162_v2 = vpop.f32.mrb[25].mxu0 }
 0x7ac   : > { %v5314_v34 = vsel %vm5278_vm15, %v5260_v28, %v5296_v23  ;;  %v5232_v48 = vmul.f32 %v8992_v60, %v5162_v2  ;;  %v5164_v14 = vpop.f32.mrb[26].mxu0 }
 0x7ad   : > { %5385 = vst [vmem:[%s9010_s18] sm:$0xff] %v5862_v19  ;;  %v5863_v51 = vpack.c.bf16 %v5314_v34, %v5313_v36  ;;  %v5261_v1 = vadd.f32 %v8994_v6, %v5231_v54  ;;  %v5233_v37 = vmul.f32 %v8990_v63, %v5164_v14  ;;  %v5166_v21 = vpop.f32.mrb[27].mxu0 }
 0x7ae   : > { %v5262_v5 = vadd.f32 %v8997_v11, %v5232_v48  ;;  %v5234_v50 = vmul.f32 %v8992_v60, %v5166_v21 }
 0x7af   : > { %5386 = vst [vmem:[%s9010_s18 + $0x8] sm:$0xff] %v5863_v51  ;;  %vm5279_vm1 = vcmp.ge.f32.partialorder %v5261_v1, 0.0  ;;  %v5297_v3 = vmul.f32 0.1, %v5261_v1  ;;  %v5263_v9 = vadd.f32 %v8994_v6, %v5233_v37 }
 0x7b0   : > { %vm5280_vm4 = vcmp.ge.f32.partialorder %v5262_v5, 0.0  ;;  %v5298_v45 = vmul.f32 0.1, %v5262_v5  ;;  %v5264_v43 = vadd.f32 %v8997_v11, %v5234_v50 }
 0x7b1   : > { %v5315_v42 = vsel %vm5279_vm1, %v5261_v1, %v5297_v3  ;;  %vm5281_vm5 = vcmp.ge.f32.partialorder %v5263_v9, 0.0  ;;  %v5299_v26 = vmul.f32 0.1, %v5263_v9 }
 0x7b2   : > { %v5316_v46 = vsel %vm5280_vm4, %v5262_v5, %v5298_v45  ;;  %vm5282_vm3 = vcmp.ge.f32.partialorder %v5264_v43, 0.0  ;;  %v5300_v15 = vmul.f32 0.1, %v5264_v43  ;;  %v5170_v25 = vpop.f32.mrb[28].mxu0 }
 0x7b3   : > { %v5864_v16 = vpack.c.bf16 %v5316_v46, %v5315_v42  ;;  %v5317_v47 = vsel %vm5281_vm5, %v5263_v9, %v5299_v26  ;;  %v5235_v39 = vmul.f32 %v8990_v63, %v5170_v25  ;;  %v5172_v12 = vpop.f32.mrb[29].mxu0 }
 0x7b4   : > { %v5318_v38 = vsel %vm5282_vm3, %v5264_v43, %v5300_v15  ;;  %v5236_v44 = vmul.f32 %v8992_v60, %v5172_v12  ;;  %v5174_v62 = vpop.f32.mrb[30].mxu0 }
 0x7b5   : > { %5387 = vst [vmem:[%s9010_s18 + $0x10] sm:$0xff] %v5864_v16  ;;  %v5865_v8 = vpack.c.bf16 %v5318_v38, %v5317_v47  ;;  %v5265_v18 = vadd.f32 %v8994_v6, %v5235_v39  ;;  %v5237_v41 = vmul.f32 %v8990_v63, %v5174_v62  ;;  %v5176_v59 = vpop.f32.mrb[31].mxu0 }
 0x7b6   : > { %v5266_v13 = vadd.f32 %v8997_v11, %v5236_v44  ;;  %v5238_v58 = vmul.f32 %v8992_v60, %v5176_v59 }
 0x7b7   : > { %5388 = vst [vmem:[%s9010_s18 + $0x18] sm:$0xff] %v5865_v8  ;;  %vm5283_vm6 = vcmp.ge.f32.partialorder %v5265_v18, 0.0  ;;  %v5301_v4 = vmul.f32 0.1, %v5265_v18  ;;  %v5267_v35 = vadd.f32 %v8994_v6, %v5237_v41 }
 0x7b8   : > { %vm5284_vm7 = vcmp.ge.f32.partialorder %v5266_v13, 0.0  ;;  %v5302_v24 = vmul.f32 0.1, %v5266_v13  ;;  %v5268_v56 = vadd.f32 %v8997_v11, %v5238_v58 }
 0x7b9   : > { %v5319_v30 = vsel %vm5283_vm6, %v5265_v18, %v5301_v4  ;;  %vm5285_vm8 = vcmp.ge.f32.partialorder %v5267_v35, 0.0  ;;  %v5303_v57 = vmul.f32 0.1, %v5267_v35 }
 0x7ba   : > { %v5320_v22 = vsel %vm5284_vm7, %v5266_v13, %v5302_v24  ;;  %vm5286_vm9 = vcmp.ge.f32.partialorder %v5268_v56, 0.0  ;;  %v5304_v31 = vmul.f32 0.1, %v5268_v56  ;;  %v5180_v27 = vpop.f32.mrb[32].mxu0 }
 0x7bb   : > { %v5866_v61 = vpack.c.bf16 %v5320_v22, %v5319_v30  ;;  %v5321_v29 = vsel %vm5285_vm8, %v5267_v35, %v5303_v57  ;;  %v5239_v40 = vmul.f32 %v8990_v63, %v5180_v27  ;;  %v5182_v53 = vpop.f32.mrb[33].mxu0 }
 0x7bc   : > { %v5322_v33 = vsel %vm5286_vm9, %v5268_v56, %v5304_v31  ;;  %v5240_v52 = vmul.f32 %v8992_v60, %v5182_v53  ;;  %v5184_v0 = vpop.f32.mrb[34].mxu0 }
 0x7bd   : > { %5389 = vst [vmem:[%s9010_s18 + $0x20] sm:$0xff] %v5866_v61  ;;  %v5867_v10 = vpack.c.bf16 %v5322_v33, %v5321_v29  ;;  %v5269_v49 = vadd.f32 %v8994_v6, %v5239_v40  ;;  %v5241_v55 = vmul.f32 %v8990_v63, %v5184_v0  ;;  %v5186_v28 = vpop.f32.mrb[35].mxu0 }
 0x7be   : > { %v5270_v20 = vadd.f32 %v8997_v11, %v5240_v52  ;;  %v5242_v32 = vmul.f32 %v8992_v60, %v5186_v28 }
 0x7bf   : > { %5390 = vst [vmem:[%s9010_s18 + $0x28] sm:$0xff] %v5867_v10  ;;  %vm5287_vm2 = vcmp.ge.f32.partialorder %v5269_v49, 0.0  ;;  %v5305_v7 = vmul.f32 0.1, %v5269_v49  ;;  %v5271_v23 = vadd.f32 %v8994_v6, %v5241_v55 }
 0x7c0   : > { %vm5288_vm0 = vcmp.ge.f32.partialorder %v5270_v20, 0.0  ;;  %v5306_v17 = vmul.f32 0.1, %v5270_v20  ;;  %v5272_v19 = vadd.f32 %v8997_v11, %v5242_v32 }
 0x7c1   : > { %v5323_v36 = vsel %vm5287_vm2, %v5269_v49, %v5305_v7  ;;  %vm5289_vm10 = vcmp.ge.f32.partialorder %v5271_v23, 0.0  ;;  %v5307_v54 = vmul.f32 0.1, %v5271_v23 }
 0x7c2   : > { %v5324_v2 = vsel %vm5288_vm0, %v5270_v20, %v5306_v17  ;;  %vm5290_vm11 = vcmp.ge.f32.partialorder %v5272_v19, 0.0  ;;  %v5308_v34 = vmul.f32 0.1, %v5272_v19  ;;  %v5190_v48 = vpop.f32.mrb[36].mxu0 }
 0x7c3   : > { %v5868_v14 = vpack.c.bf16 %v5324_v2, %v5323_v36  ;;  %v5325_v51 = vsel %vm5289_vm10, %v5271_v23, %v5307_v54  ;;  %v5243_v1 = vmul.f32 %v8990_v63, %v5190_v48  ;;  %v5192_v37 = vpop.f32.mrb[37].mxu0 }
 0x7c4   : > { %v5326_v21 = vsel %vm5290_vm11, %v5272_v19, %v5308_v34  ;;  %v5244_v5 = vmul.f32 %v8992_v60, %v5192_v37  ;;  %v5194_v50 = vpop.f32.mrb[38].mxu0 }
 0x7c5   : > { %5391 = vst [vmem:[%s9010_s18 + $0x30] sm:$0xff] %v5868_v14  ;;  %v5869_v3 = vpack.c.bf16 %v5326_v21, %v5325_v51  ;;  %v5273_v9 = vadd.f32 %v8994_v6, %v5243_v1  ;;  %v5195_v45 = vpop.f32.mrb[39].mxu0 }
 0x7c6   : > { %v5274_v43 = vadd.f32 %v8997_v11, %v5244_v5 }
 0x7c7   : > { %5392 = vst [vmem:[%s9010_s18 + $0x38] sm:$0xff] %v5869_v3  ;;  %vm5291_vm12 = vcmp.ge.f32.partialorder %v5273_v9, 0.0  ;;  %v5309_v42 = vmul.f32 0.1, %v5273_v9 }
 0x7c8   : > { %vm5292_vm13 = vcmp.ge.f32.partialorder %v5274_v43, 0.0  ;;  %v5310_v26 = vmul.f32 0.1, %v5274_v43 }
 0x7c9   : > { %v5327_v46 = vsel %vm5291_vm12, %v5273_v9, %v5309_v42 }
 0x7ca   : > { %v5328_v63 = vsel %vm5292_vm13, %v5274_v43, %v5310_v26 }
 0x7cb   : > { %v5870_v15 = vpack.c.bf16 %v5328_v63, %v5327_v46 }
 0x7cd   : > { %5393 = vst [vmem:[%s9010_s18 + $0x40] sm:$0x11] %v5870_v15 }
 0x7ce PF: > { %s25_s13 = sadd.s32 1, %s7581_s13  }
 0x7cf   : > { %p22_p11 = scmp.ge.s32.totalorder %s25_s13, 4  }
 0x7d1   :  { %24 = sbr.rel (!%p22_p11) target bundleno = 7 (0x7), region = 149 }
 0x7d8   :  { %5415 = vsyncpa [#allocation6], 1 }
 0x7d9   :  { %5417 = vsyncpa [#allocation6 + $0x1], 1 }
 0x7da   :  { %5418 = vsyncpa [#allocation8], 1 }
 0x7db   :  { %5419 = vsyncpa [#allocation11], 1 }
 0x7dc   :  { %5420 = vsyncpa [#allocation14], 1 }
 0x7dd   :  { %5421 = vsyncpa [#allocation17], 1 }

// kernel: image_inertial_encoder_forward.3
= control target key start
LH: loop header
LB: loop body
LE: loop exit
PB: predicated region body
PF: predicated region fallthrough
CT: control target
= control target key end

     0   :  { %8 = vsyncpa [#allocation3], 0  ;;  %s17663_s0 = inlined_call_operand.vmem [shape: bf16[2,16896], index: 0, kind: input, shape index: {}]   ;;  %s17664_s1 = inlined_call_operand.hbm [shape: bf16[16896,256], index: 1, kind: input, shape index: {}]   ;;  %s17665_s2 = inlined_call_operand.hbm [shape: f32[1,256], index: 2, kind: input, shape index: {}]   ;;  %s17666_s3 = inlined_call_operand.vmem [shape: f32[2,256], index: 3, kind: output, shape index: {}]  }
   0x1   :  { %10 = vsyncpa [#allocation3 + $0x1], 0 }
   0x2   :  { %11 = vsyncpa [#allocation5], 0 }
   0x3   :  { %13 = vsyncpa [#allocation5 + $0x1], 0  ;;  %s16145_s12 = smov 0   ;;  %s16147_s13 = smov 0  }
   0x4   :  { %s16149_s14 = smov 0   ;;  %s16151_s15 = smov 0  }
   0x5 LB: > { %s16164_s16 = sadd.s32 4294967295, %s16117_s15   ;;  %s16167_s17 = sadd.s32 1, %s16117_s15   ;;  %s16117_s15 = sphi %s16151_s15, %s17676_s15   ;;  %s16113_s14 = sphi %s16149_s14, %s17675_s14   ;;  %s16109_s13 = sphi %s16147_s13, %s17674_s13   ;;  %s16105_s12 = sphi %s16145_s12, %s17673_s12  }
   0x6   : > { %s44_s18 = ssub.s32 %s16117_s15, %s16167_s17  ;;  %s47_s19 = sadd.s32 1, %s16113_s14 }
   0x7   : > { %p45_p0 = scmp.eq.s32.totalorder %s44_s18, 0  ;;  %p54_p1 = scmp.ne.s32.totalorder %s16113_s14, %s16109_s13 }
   0x8   : > { %p55_p2 = scmp.eq.s32.totalorder %s16117_s15, 0  ;;  %p60_p3 = scmp.ne.s32.totalorder %s16109_s13, %s16105_s12 }
   0x9   : > { %s16177_s20 = scalar_select %p45_p0, %s16113_s14, %s47_s19  }
   0xa   : > { %p56_p4 = por %p55_p2, %p54_p1  ;;  %p61_p5 = scmp.eq.s32.totalorder %s16164_s16, 0 }
   0xb   : > { %p14910_p6 = scmp.lt.s32.totalorder %s16117_s15, 2  ;;  %s16186_s22 = sand.u32 1, %s16113_s14  }
   0xc   : > { %p16181_p7 = por %p61_p5, %p60_p3  ;;  %s14897_s23 = smul.u32 8448, %s16186_s22 }
   0xd   : > { %s12381_s24 = sshll.u32 %s16117_s15, 6  ;;  %p16190_p8 = pnand %p14910_p6, %p56_p4 }
   0xe   : > { %s17668_s21 = scalar_select %p16181_p7, 1, 0 }
   0xf   : > { %s16197_s28 = scalar_lea.hbm %s17664_s1, %s12381_s24  ;;  %s143_s29 = scalar_lea.vmem [#allocation2], %s14897_s23 }
  0x10   : > { %s149_s30 = sshll.u32 %s143_s29, 4  ;;  %s140_s4 = scalar_lea.sflag [#allocation3], %s16186_s22  ;;  %s16199_s30 = int_to_ptr.vmem [resolvable:$true] %s149_s30 }
  0x11   : > { %s16019_s5 = scalar_lea.hbm %s16197_s28, 135168  ;;  %p16021_p10 = pneg %p16190_p8 }
  0x12   : > { %p16020_p9 = scmp.ne.s32.totalorder %s16197_s28, %s16019_s5  ;;  %s16024_s8 = scalar_lea.hbm %s17664_s1, 270336 }
  0x13   : > { %p16025_p13 = scmp.lt.u32.totalorder %s16197_s28, %s17664_s1  ;;  %p16026_p0 = scmp.lt.u32.totalorder %s16024_s8, %s16019_s5 }
  0x14   : > { %p16022_p11 = pnand %p16021_p10, %p16020_p9  ;;  %p16028_p2 = scmp.lt.u32.totalorder %s16019_s5, %s16197_s28 }
  0x15   : > { %p16027_p1 = por %p16026_p0, %p16025_p13 }
  0x16   : > { %p16023_p12 = pneg %p16022_p11 }
  0x17   : > { %p16029_p3 = por %p16028_p2, %p16027_p1 }
  0x19   : > { %p16030_p4 = pnand %p16029_p3, %p16023_p12 }
  0x1b   : > { %16033 = shalt.err (!%p16030_p4)
}
  0x1c   : > { %s16034_s11 = scalar_lea.vmem %s16199_s30, 135168  ;;  %s16119_s12 = smov [#allocation2]  }
  0x1d   : > { %p16035_p5 = scmp.ne.s32.totalorder %s16199_s30, %s16034_s11  ;;  %s16039_s18 = sshll.u32 %s16119_s12, 4  ;;  %s16040_s18 = int_to_ptr.vmem [resolvable:$false] %s16039_s18 }
  0x1e   : > { %s16041_s19 = scalar_lea.vmem %s16040_s18, 270336  ;;  %p16042_p11 = scmp.lt.s32.totalorder %s16199_s30, %s16040_s18 }
  0x1f   : > { %p16037_p6 = pnand %p16035_p5, %p16021_p10  ;;  %p16043_p13 = scmp.lt.s32.totalorder %s16041_s19, %s16034_s11 }
  0x21   : > { %p16038_p9 = pneg %p16037_p6  ;;  %p16044_p0 = por %p16043_p13, %p16042_p11 }
  0x23   : > { %p16045_p1 = pnand %p16044_p0, %p16038_p9 }
  0x25   : > { %16048 = shalt.err (!%p16045_p1)
}
  0x26   : > { %s16120_s23 = smov 128   ;;  %s16121_s24 = smov 64  }
  0x27   : > { %s16122_s26 = smov 4   ;;  %p12383_p12 = scmp.ge.s32.totalorder %s16117_s15, 1 }
  0x28   : > { %14906 = dma.hbm_to_vmem [thread:$0]  (!%p16190_p8), %s16197_s28, 135168, %s16199_s30, %s140_s4, %s16120_s23, %s16121_s24, %s16122_s26  }
  0x29   : > { %p174_p2 = scmp.lt.s32.totalorder %s16117_s15, 3  ;;  %s12382_s29 = sshll.u32 %s16117_s15, 4 }
  0x2a   : > { %s16239_s7 = scalar_lea.hbm %s17665_s2, %s12382_s29  ;;  %s162_s8 = scalar_lea.vmem [#allocation4], %s16186_s22 }
  0x2b   : > { %p16231_p3 = pnand %p12383_p12, %p174_p2  ;;  %s169_s9 = sshll.u32 %s162_s8, 4  ;;  %s170_s9 = int_to_ptr.vmem [resolvable:$true] %s169_s9 }
  0x2c   : > { %s160_s28 = scalar_lea.sflag [#allocation5], %s16186_s22  ;;  %s16049_s30 = scalar_lea.hbm %s16239_s7, 16 }
  0x2d   : > { %s17670_s27 = scalar_select %p16231_p3, 1, 0 }
  0x2e   : > { %p16050_p4 = scmp.ne.s32.totalorder %s16239_s7, %s16049_s30  ;;  %s16054_s10 = scalar_lea.hbm %s17665_s2, 32 }
  0x2f   : > { %p16055_p9 = scmp.lt.u32.totalorder %s16239_s7, %s17665_s2  ;;  %p16056_p11 = scmp.lt.u32.totalorder %s16054_s10, %s16049_s30 }
  0x30   : > { %p16052_p5 = pnand %p16050_p4, %p16021_p10  ;;  %p16058_p0 = scmp.lt.u32.totalorder %s16049_s30, %s16239_s7 }
  0x31   : > { %p16057_p13 = por %p16056_p11, %p16055_p9 }
  0x32   : > { %p16053_p6 = pneg %p16052_p5 }
  0x33   : > { %p16059_p1 = por %p16058_p0, %p16057_p13 }
  0x35   : > { %p16060_p12 = pnand %p16059_p1, %p16053_p6 }
  0x37   : > { %16063 = shalt.err (!%p16060_p12)
}
  0x38   : > { %s16064_s22 = scalar_lea.vmem %s170_s9, 16  ;;  %s16123_s18 = smov [#allocation4]  }
  0x39   : > { %p16065_p2 = scmp.ne.s32.totalorder %s170_s9, %s16064_s22  ;;  %s16069_s19 = sshll.u32 %s16123_s18, 4  ;;  %s16070_s19 = int_to_ptr.vmem [resolvable:$false] %s16069_s19 }
  0x3a   : > { %s16071_s23 = scalar_lea.vmem %s16070_s19, 32  ;;  %p16072_p7 = scmp.lt.s32.totalorder %s170_s9, %s16070_s19 }
  0x3b   : > { %p16067_p4 = pnand %p16065_p2, %p16021_p10  ;;  %p16073_p3 = scmp.lt.s32.totalorder %s16071_s23, %s16064_s22 }
  0x3d   : > { %p16068_p5 = pneg %p16067_p4  ;;  %p16074_p9 = por %p16073_p3, %p16072_p7 }
  0x3f   : > { %p16075_p11 = pnand %p16074_p9, %p16068_p5 }
  0x41   : > { %16078 = shalt.err (!%p16075_p11)
}
  0x42   : > { %14909 = dma.hbm_to_vmem [thread:$0]  (!%p16190_p8), %s16239_s7, 16, %s170_s9, %s160_s28  }
  0x43   : > { %p17671_p6 = scmp.ne.s32.totalorder %s17670_s27, 0 }
  0x44   : > { %s16265_s24 = sand.u32 (!%p17671_p6), 1, %s16109_s13   ;;  %p17672_p7 = scmp.ne.s32.totalorder (!%p17671_p6), %s17668_s21, 0 }
  0x45   : > { %178 = sbr.rel (%p17671_p6) target bundleno = 1357 (0x54d), region = 32  ;;  %s181_s29 = scalar_lea.sflag (!%p17671_p6), [#allocation3], %s16265_s24 }
  0x46   : > { %s14898_s26 = smul.u32 (!%p17671_p6), 8448, %s16265_s24 }
  0x48   : > { %s16269_s5 = scalar_lea.vmem (!%p17671_p6), [#allocation2], %s14898_s26 }
  0x4c   : > { %16096 = dma.done.wait (%p17672_p7), %s181_s29, 135168  }
  0x4d   : > { %16098 = vsyncadd (%p17672_p7), %s181_s29, 4294832128  ;;  %s190_s25 = scalar_lea.sflag [#allocation5], %s16265_s24  ;;  %s192_s27 = scalar_lea.vmem [#allocation4], %s16265_s24 }
  0x4e   : > { %16100 = dma.done.wait (%p17672_p7), %s190_s25, 16  }
  0x4f   : > { %16102 = vsyncadd (%p17672_p7), %s190_s25, 4294967280  ;;  %v14947_v0 = vld [vmem:[%s16269_s5 + $0x40] sm:$0xff]   ;;  %v14951_v4 = vld [vmem:[%s16269_s5 + $0x48] sm:$0xff]   ;;  %v16124_v22 = vmov 1966171168   ;;  %v2380_v24 = vlaneseq  ;;  %p218_p8 = scmp.lt.s32.totalorder %s16164_s16, 1 }
  0x50   : > { %v14948_v1 = vld [vmem:[%s16269_s5 + $0xc0] sm:$0xff]   ;;  %13445 = vmatprep.subr.bf16.mxu0 %v14947_v0  ;;  %v14952_v5 = vld [vmem:[%s16269_s5 + $0xc8] sm:$0xff]   ;;  %v14955_v8 = vld [vmem:[%s16269_s5 + $0x50] sm:$0xff]   ;;  %v2378_v23 = vunpack.c.l.s4 %v16124_v22 }
  0x51   : > { %v14949_v2 = vld [vmem:[%s16269_s5] sm:$0xff]   ;;  %13467 = vmatprep.subr.bf16.mxu1 %v14948_v1  ;;  %v14953_v6 = vld [vmem:[%s16269_s5 + $0x8] sm:$0xff]   ;;  %v14956_v9 = vld [vmem:[%s16269_s5 + $0xd0] sm:$0xff]   ;;  %v2381_v30 = vshrl.u32 %v2380_v24, 7  ;;  %s17678_s16 = smov (!%p218_p8, %s16164_s16), 1 }
  0x52   : > { %v14950_v3 = vld [vmem:[%s16269_s5 + $0x80] sm:$0xff]   ;;  %13446 = vmatpush3.bf16.msra.mxu0 %v14949_v2  ;;  %v14954_v7 = vld [vmem:[%s16269_s5 + $0x88] sm:$0xff]   ;;  %v14957_v10 = vld [vmem:[%s16269_s5 + $0x10] sm:$0xff]   ;;  %v2379_v29 = vunpack.c.0.s8 %v2378_v23 }
  0x53   : > { %13468 = vmatpush3.bf16.msra.mxu1 %v14950_v3  ;;  %13447 = vmatprep.subr.bf16.mxu0 %v14951_v4  ;;  %v14958_v11 = vld [vmem:[%s16269_s5 + $0x90] sm:$0xff]   ;;  %v14959_v12 = vld [vmem:[%s16269_s5 + $0x58] sm:$0xff]   ;;  %v14963_v16 = vld [vmem:[%s16269_s5 + $0x60] sm:$0xff]  }
  0x54   : > { %13469 = vmatprep.subr.bf16.mxu1 %v14952_v5  ;;  %v14960_v13 = vld [vmem:[%s16269_s5 + $0xd8] sm:$0xff]   ;;  %v14964_v17 = vld [vmem:[%s16269_s5 + $0xe0] sm:$0xff]   ;;  %v14967_v20 = vld [vmem:[%s16269_s5 + $0x68] sm:$0xff]   ;;  %v16311_v35 = vsub.s32 %v2379_v29, %v2381_v30 }
  0x55   : > { %v14961_v14 = vld [vmem:[%s16269_s5 + $0x18] sm:$0xff]   ;;  %v14965_v18 = vld [vmem:[%s16269_s5 + $0x20] sm:$0xff]   ;;  %v14968_v21 = vld [vmem:[%s16269_s5 + $0xe8] sm:$0xff]  }
  0x56   : > { %13448 = vmatpush3.bf16.msra.mxu0 %v14953_v6  ;;  %v14962_v15 = vld [vmem:[%s16269_s5 + $0x98] sm:$0xff]   ;;  %v14966_v19 = vld [vmem:[%s16269_s5 + $0xa0] sm:$0xff]   ;;  %v14969_v25 = vld [vmem:[%s16269_s5 + $0x28] sm:$0xff]  }
  0x57   : > { %13470 = vmatpush3.bf16.msra.mxu1 %v14954_v7  ;;  %13449 = vmatprep.subr.bf16.mxu0 %v14955_v8  ;;  %v14970_v26 = vld [vmem:[%s16269_s5 + $0xa8] sm:$0xff]   ;;  %v14971_v27 = vld [vmem:[%s16269_s5 + $0x70] sm:$0xff]   ;;  %v14975_v33 = vld [vmem:[%s16269_s5 + $0x78] sm:$0xff]  }
  0x58   : > { %13471 = vmatprep.subr.bf16.mxu1 %v14956_v9  ;;  %v14972_v28 = vld [vmem:[%s16269_s5 + $0xf0] sm:$0xff]   ;;  %v14976_v34 = vld [vmem:[%s16269_s5 + $0xf8] sm:$0xff]   ;;  %v223_v38 = vld [vmem:[%s17663_s0] sm:$0xff] }
  0x59   : > { %v14973_v31 = vld [vmem:[%s16269_s5 + $0x30] sm:$0xff]   ;;  %v14977_v36 = vld [vmem:[%s16269_s5 + $0x38] sm:$0xff]   ;;  %v2376_v39 = vcombine.high %v223_v38, %v223_v38  ;;  %v2383_v40 = vrot.slane %v223_v38, %v16311_v35  ;;  %v14980_v41 = vld [vmem:[%s16269_s5 + $0x140] sm:$0xff]  }
  0x5a   : > { %13450 = vmatpush3.bf16.msra.mxu0 %v14957_v10  ;;  %v14974_v32 = vld [vmem:[%s16269_s5 + $0xb0] sm:$0xff]   ;;  %v14978_v37 = vld [vmem:[%s16269_s5 + $0xb8] sm:$0xff]   ;;  %v14981_v42 = vld [vmem:[%s16269_s5 + $0x1c0] sm:$0xff]  }
  0x5b   : > { %13472 = vmatpush3.bf16.msra.mxu1 %v14958_v11  ;;  %13451 = vmatprep.subr.bf16.mxu0 %v14959_v12  ;;  %v2391_v43 = vcombine.high %v2383_v40, %v2383_v40  ;;  %v2399_v44 = vrot.slane %v2383_v40, %v16311_v35  ;;  %v16323_v45 = vrot.slane %v2376_v39, %v16311_v35  ;;  %v14982_v46 = vld [vmem:[%s16269_s5 + $0x100] sm:$0xff]   ;;  %v14984_v51 = vld [vmem:[%s16269_s5 + $0x148] sm:$0xff]   ;;  %v14988_v58 = vld [vmem:[%s16269_s5 + $0x150] sm:$0xff]  }
  0x5c   : > { %13473 = vmatprep.subr.bf16.mxu1 %v14960_v13  ;;  %v14983_v48 = vld [vmem:[%s16269_s5 + $0x180] sm:$0xff]   ;;  %v14985_v53 = vld [vmem:[%s16269_s5 + $0x1c8] sm:$0xff]   ;;  %v14989_v59 = vld [vmem:[%s16269_s5 + $0x1d0] sm:$0xff]  }
  0x5d   : > { %v2413_v47 = vrot.slane %v2391_v43, %v16311_v35  ;;  %v2392_v49 = vcombine.high %v16323_v45, %v16323_v45  ;;  %v2421_v50 = vcombine.high %v2399_v44, %v2399_v44  ;;  %v14986_v55 = vld [vmem:[%s16269_s5 + $0x108] sm:$0xff]   ;;  %v14990_v60 = vld [vmem:[%s16269_s5 + $0x110] sm:$0xff]   ;;  %v14992_v62 = vld [vmem:[%s16269_s5 + $0x158] sm:$0xff]  }
  0x5e   : > { %13452 = vmatpush3.bf16.msra.mxu0 %v14961_v14  ;;  %v14987_v56 = vld [vmem:[%s16269_s5 + $0x188] sm:$0xff]   ;;  %v14991_v61 = vld [vmem:[%s16269_s5 + $0x190] sm:$0xff]   ;;  %v14993_v63 = vld [vmem:[%s16269_s5 + $0x1d8] sm:$0xff]  }
  0x5f   : > { %13474 = vmatpush3.bf16.msra.mxu1 %v14962_v15  ;;  %13453 = vmatprep.subr.bf16.mxu0 %v14963_v16  ;;  %v2423_v52 = vcombine.high %v2413_v47, %v2413_v47  ;;  %v2420_v54 = vrot.slane %v2392_v49, %v16311_v35  ;;  %v14994_v0 = vld [vmem:[%s16269_s5 + $0x118] sm:$0xff]   ;;  %v14996_v2 = vld [vmem:[%s16269_s5 + $0x160] sm:$0xff]   ;;  %v15000_v6 = vld [vmem:[%s16269_s5 + $0x168] sm:$0xff]  }
  0x60   : > { %13475 = vmatprep.subr.bf16.mxu1 %v14964_v17  ;;  %9684 = vmatprep.mubr.bf16.mxu0 %v2413_v47  ;;  %v14995_v1 = vld [vmem:[%s16269_s5 + $0x198] sm:$0xff]   ;;  %v14997_v3 = vld [vmem:[%s16269_s5 + $0x1e0] sm:$0xff]   ;;  %v15001_v7 = vld [vmem:[%s16269_s5 + $0x1e8] sm:$0xff]  }
  0x61   : > { %9724 = vmatprep.mubr.bf16.mxu1 %v2423_v52  ;;  %v2424_v57 = vcombine.high %v2420_v54, %v2420_v54  ;;  %v14998_v4 = vld [vmem:[%s16269_s5 + $0x120] sm:$0xff]   ;;  %v15002_v8 = vld [vmem:[%s16269_s5 + $0x128] sm:$0xff]   ;;  %v15004_v10 = vld [vmem:[%s16269_s5 + $0x170] sm:$0xff]  }
  0x62   : > { %13454 = vmatpush3.bf16.msra.mxu0 %v14965_v18  ;;  %v14999_v5 = vld [vmem:[%s16269_s5 + $0x1a0] sm:$0xff]   ;;  %v15003_v9 = vld [vmem:[%s16269_s5 + $0x1a8] sm:$0xff]   ;;  %v15005_v11 = vld [vmem:[%s16269_s5 + $0x1f0] sm:$0xff]   ;;  %v2406_v18 = vrot.slane %v16323_v45, %v16311_v35 }
  0x63   : > { %13476 = vmatpush3.bf16.msra.mxu1 %v14966_v19  ;;  %13455 = vmatprep.subr.bf16.mxu0 %v14967_v20  ;;  %v15006_v12 = vld [vmem:[%s16269_s5 + $0x130] sm:$0xff]   ;;  %v15008_v14 = vld [vmem:[%s16269_s5 + $0x178] sm:$0xff]   ;;  %v15012_v19 = vld [vmem:[%s16269_s5 + $0x240] sm:$0xff]  }
  0x64   : > { %13477 = vmatprep.subr.bf16.mxu1 %v14968_v21  ;;  %v15007_v13 = vld [vmem:[%s16269_s5 + $0x1b0] sm:$0xff]   ;;  %v15009_v15 = vld [vmem:[%s16269_s5 + $0x1f8] sm:$0xff]   ;;  %v15013_v20 = vld [vmem:[%s16269_s5 + $0x2c0] sm:$0xff]   ;;  %v2422_v23 = vcombine.high %v2406_v18, %v2406_v18 }
  0x65   : > { %v15010_v16 = vld [vmem:[%s16269_s5 + $0x138] sm:$0xff]   ;;  %v15014_v21 = vld [vmem:[%s16269_s5 + $0x200] sm:$0xff]   ;;  %v15016_v24 = vld [vmem:[%s16269_s5 + $0x248] sm:$0xff]  }
  0x66   : > { %13456 = vmatpush3.bf16.msra.mxu0 %v14969_v25  ;;  %v15011_v17 = vld [vmem:[%s16269_s5 + $0x1b8] sm:$0xff]   ;;  %v15015_v22 = vld [vmem:[%s16269_s5 + $0x280] sm:$0xff]   ;;  %v15017_v25 = vld [vmem:[%s16269_s5 + $0x2c8] sm:$0xff]  }
  0x67   : > { %13478 = vmatpush3.bf16.msra.mxu1 %v14970_v26  ;;  %13457 = vmatprep.subr.bf16.mxu0 %v14971_v27  ;;  %v15018_v26 = vld [vmem:[%s16269_s5 + $0x208] sm:$0xff]   ;;  %v15021_v29 = vld [vmem:[%s16269_s5 + $0x2d0] sm:$0xff]   ;;  %v15029_v38 = vld [vmem:[%s16269_s5 + $0x2e0] sm:$0xff]  }
  0x68   : > { %13479 = vmatprep.subr.bf16.mxu1 %v14972_v28  ;;  %v15019_v27 = vld [vmem:[%s16269_s5 + $0x288] sm:$0xff]   ;;  %v15020_v28 = vld [vmem:[%s16269_s5 + $0x250] sm:$0xff]   ;;  %v15030_v39 = vld [vmem:[%s16269_s5 + $0x220] sm:$0xff]  }
  0x69   : > { %v15022_v30 = vld [vmem:[%s16269_s5 + $0x210] sm:$0xff]   ;;  %v15031_v40 = vld [vmem:[%s16269_s5 + $0x2a0] sm:$0xff]   ;;  %v15034_v43 = vld [vmem:[%s16269_s5 + $0x228] sm:$0xff]  }
  0x6a   : > { %13458 = vmatpush3.bf16.msra.mxu0 %v14973_v31  ;;  %v15023_v31 = vld [vmem:[%s16269_s5 + $0x290] sm:$0xff]   ;;  %v15040_v49 = vld [vmem:[%s16269_s5 + $0x278] sm:$0xff]   ;;  %v224_v52 = vld [vmem:[%s17663_s0 + $0x8] sm:$0xff] }
  0x6b   : > { %13480 = vmatpush3.bf16.msra.mxu1 %v14974_v32  ;;  %13459 = vmatprep.subr.bf16.mxu0 %v14975_v33  ;;  %v15024_v32 = vld [vmem:[%s16269_s5 + $0x258] sm:$0xff]   ;;  %v15036_v45 = vld [vmem:[%s16269_s5 + $0x270] sm:$0xff]  }
  0x6c   : > { %13481 = vmatprep.subr.bf16.mxu1 %v14976_v34  ;;  %v15025_v33 = vld [vmem:[%s16269_s5 + $0x2d8] sm:$0xff]   ;;  %v15038_v47 = vld [vmem:[%s16269_s5 + $0x230] sm:$0xff]  }
  0x6d   : > { %v15026_v34 = vld [vmem:[%s16269_s5 + $0x218] sm:$0xff]  }
  0x6e   : > { %13460 = vmatpush3.bf16.msra.mxu0 %v14977_v36  ;;  %v15027_v36 = vld [vmem:[%s16269_s5 + $0x298] sm:$0xff]  }
  0x6f   : > { %13482 = vmatpush3.bf16.msra.mxu1 %v14978_v37  ;;  %13489 = vmatprep.subr.bf16.mxu0 %v14980_v41  ;;  %v15028_v37 = vld [vmem:[%s16269_s5 + $0x260] sm:$0xff]   ;;  %v15032_v41 = vld [vmem:[%s16269_s5 + $0x268] sm:$0xff]  }
  0x70   : > { %13511 = vmatprep.subr.bf16.mxu1 %v14981_v42  ;;  %v15033_v42 = vld [vmem:[%s16269_s5 + $0x2e8] sm:$0xff]  }
  0x71   : > { %9685 = vmatmul.mubr.bf16.vlgmr.msra.gmra.mrb[0].mxu0 %v2399_v44  ;;  %v15035_v44 = vld [vmem:[%s16269_s5 + $0x2a8] sm:$0xff]  }
  0x72   : > { %13490 = vmatpush3.bf16.msra.mxu0 %v14982_v46  ;;  %9725 = vmatmul.mubr.bf16.vlgmr.msra.gmra.mrb[0].mxu1 %v2421_v50  ;;  %v15037_v46 = vld [vmem:[%s16269_s5 + $0x2f0] sm:$0xff]   ;;  %v15041_v50 = vld [vmem:[%s16269_s5 + $0x2f8] sm:$0xff]  }
  0x73   : > { %13491 = vmatprep.subr.bf16.mxu0 %v14984_v51  ;;  %13512 = vmatpush3.bf16.msra.mxu1 %v14983_v48  ;;  %v15039_v48 = vld [vmem:[%s16269_s5 + $0x2b0] sm:$0xff]   ;;  %v15042_v51 = vld [vmem:[%s16269_s5 + $0x238] sm:$0xff]  }
  0x74   : > { %9764 = vmatprep.mubr.bf16.mxu0 %v2420_v54  ;;  %13513 = vmatprep.subr.bf16.mxu1 %v14985_v53  ;;  %v15043_v53 = vld [vmem:[%s16269_s5 + $0x2b8] sm:$0xff]   ;;  %v2432_v54 = vrot.slane %v224_v52, %v16311_v35 }
  0x75   : > { %9804 = vmatprep.mubr.bf16.mxu1 %v2424_v57 }
  0x76   : > { %13492 = vmatpush3.bf16.msra.mxu0 %v14986_v55  ;;  %v2425_v55 = vcombine.high %v224_v52, %v224_v52  ;;  %v2440_v57 = vcombine.high %v2432_v54, %v2432_v54  ;;  %v15093_v52 = vld [vmem:[%s16269_s5 + $0x460] sm:$0xff]  }
  0x77   : > { %13493 = vmatprep.subr.bf16.mxu0 %v14988_v58  ;;  %13514 = vmatpush3.bf16.msra.mxu1 %v14987_v56  ;;  %v15044_v56 = vld [vmem:[%s16269_s5 + $0x340] sm:$0xff]   ;;  %v2448_v58 = vrot.slane %v2432_v54, %v16311_v35 }
  0x78   : > { %13515 = vmatprep.subr.bf16.mxu1 %v14989_v59  ;;  %v15045_v59 = vld [vmem:[%s16269_s5 + $0x3c0] sm:$0xff]  }
  0x79   : > { %v15095_v54 = vld [vmem:[%s16269_s5 + $0x420] sm:$0xff]  }
  0x7a   : > { %13494 = vmatpush3.bf16.msra.mxu0 %v14990_v60  ;;  %v16401_v60 = vrot.slane %v2425_v55, %v16311_v35  ;;  %v15096_v55 = vld [vmem:[%s16269_s5 + $0x4a0] sm:$0xff]  }
  0x7b   : > { %13495 = vmatprep.subr.bf16.mxu0 %v14992_v62  ;;  %13516 = vmatpush3.bf16.msra.mxu1 %v14991_v61  ;;  %v15046_v61 = vld [vmem:[%s16269_s5 + $0x300] sm:$0xff]   ;;  %v2462_v62 = vrot.slane %v2440_v57, %v16311_v35  ;;  %v15098_v57 = vld [vmem:[%s16269_s5 + $0x4e8] sm:$0xff]  }
  0x7c   : > { %13517 = vmatprep.subr.bf16.mxu1 %v14993_v63  ;;  %v15047_v63 = vld [vmem:[%s16269_s5 + $0x380] sm:$0xff]  }
  0x7e   : > { %13496 = vmatpush3.bf16.msra.mxu0 %v14994_v0  ;;  %v2441_v0 = vcombine.high %v16401_v60, %v16401_v60 }
  0x7f   : > { %13497 = vmatprep.subr.bf16.mxu0 %v14996_v2  ;;  %13518 = vmatpush3.bf16.msra.mxu1 %v14995_v1  ;;  %v2470_v1 = vcombine.high %v2448_v58, %v2448_v58  ;;  %v15048_v2 = vld [vmem:[%s16269_s5 + $0x348] sm:$0xff]  }
  0x80   : > { %13519 = vmatprep.subr.bf16.mxu1 %v14997_v3  ;;  %v2472_v3 = vcombine.high %v2462_v62, %v2462_v62 }
  0x82   : > { %13498 = vmatpush3.bf16.msra.mxu0 %v14998_v4  ;;  %v15049_v4 = vld [vmem:[%s16269_s5 + $0x3c8] sm:$0xff]  }
  0x83   : > { %13499 = vmatprep.subr.bf16.mxu0 %v15000_v6  ;;  %13520 = vmatpush3.bf16.msra.mxu1 %v14999_v5  ;;  %v2469_v5 = vrot.slane %v2441_v0, %v16311_v35  ;;  %v15050_v6 = vld [vmem:[%s16269_s5 + $0x308] sm:$0xff]   ;;  %v15105_v0 = vld [vmem:[%s16269_s5 + $0x478] sm:$0xff]  }
  0x84   : > { %13521 = vmatprep.subr.bf16.mxu1 %v15001_v7  ;;  %v15051_v7 = vld [vmem:[%s16269_s5 + $0x388] sm:$0xff]  }
  0x86   : > { %13500 = vmatpush3.bf16.msra.mxu0 %v15002_v8  ;;  %v2473_v8 = vcombine.high %v2469_v5, %v2469_v5 }
  0x87   : > { %13501 = vmatprep.subr.bf16.mxu0 %v15004_v10  ;;  %13522 = vmatpush3.bf16.msra.mxu1 %v15003_v9  ;;  %v15052_v9 = vld [vmem:[%s16269_s5 + $0x350] sm:$0xff]  }
  0x88   : > { %13523 = vmatprep.subr.bf16.mxu1 %v15005_v11  ;;  %v15053_v10 = vld [vmem:[%s16269_s5 + $0x3d0] sm:$0xff]  }
  0x89   : > { %v15054_v11 = vld [vmem:[%s16269_s5 + $0x310] sm:$0xff]  }
  0x8a   : > { %13502 = vmatpush3.bf16.msra.mxu0 %v15006_v12  ;;  %v15055_v12 = vld [vmem:[%s16269_s5 + $0x390] sm:$0xff]  }
  0x8b   : > { %13503 = vmatprep.subr.bf16.mxu0 %v15008_v14  ;;  %13524 = vmatpush3.bf16.msra.mxu1 %v15007_v13  ;;  %v15056_v13 = vld [vmem:[%s16269_s5 + $0x358] sm:$0xff]  }
  0x8c   : > { %13525 = vmatprep.subr.bf16.mxu1 %v15009_v15  ;;  %v15057_v14 = vld [vmem:[%s16269_s5 + $0x3d8] sm:$0xff]  }
  0x8d   : > { %v15058_v15 = vld [vmem:[%s16269_s5 + $0x318] sm:$0xff]  }
  0x8e   : > { %13504 = vmatpush3.bf16.msra.mxu0 %v15010_v16  ;;  %v15059_v16 = vld [vmem:[%s16269_s5 + $0x398] sm:$0xff]  }
  0x8f   : > { %13533 = vmatprep.subr.bf16.mxu0 %v15012_v19  ;;  %13526 = vmatpush3.bf16.msra.mxu1 %v15011_v17  ;;  %v15060_v17 = vld [vmem:[%s16269_s5 + $0x360] sm:$0xff]  }
  0x90   : > { %13555 = vmatprep.subr.bf16.mxu1 %v15013_v20  ;;  %v15062_v19 = vld [vmem:[%s16269_s5 + $0x320] sm:$0xff]  }
  0x91   : > { %9765 = vmatmul.mubr.bf16.vlgmr.msra.gmra.mrb[4].mxu0 %v2406_v18  ;;  %v15061_v18 = vld [vmem:[%s16269_s5 + $0x3e0] sm:$0xff]  }
  0x92   : > { %13534 = vmatpush3.bf16.msra.mxu0 %v15014_v21  ;;  %9805 = vmatmul.mubr.bf16.vlgmr.msra.gmra.mrb[4].mxu1 %v2422_v23  ;;  %v15063_v20 = vld [vmem:[%s16269_s5 + $0x3a0] sm:$0xff]   ;;  %v15064_v21 = vld [vmem:[%s16269_s5 + $0x368] sm:$0xff]  }
  0x93   : > { %13535 = vmatprep.subr.bf16.mxu0 %v15016_v24  ;;  %13556 = vmatpush3.bf16.msra.mxu1 %v15015_v22  ;;  %v15065_v22 = vld [vmem:[%s16269_s5 + $0x3e8] sm:$0xff]  }
  0x94   : > { %13557 = vmatprep.subr.bf16.mxu1 %v15017_v25  ;;  %9844 = vmatprep.mubr.bf16.mxu0 %v2462_v62  ;;  %v15066_v23 = vld [vmem:[%s16269_s5 + $0x328] sm:$0xff]   ;;  %v15068_v25 = vld [vmem:[%s16269_s5 + $0x370] sm:$0xff]  }
  0x95   : > { %9884 = vmatprep.mubr.bf16.mxu1 %v2472_v3  ;;  %v15067_v24 = vld [vmem:[%s16269_s5 + $0x3a8] sm:$0xff]   ;;  %v15103_v62 = vld [vmem:[%s16269_s5 + $0x430] sm:$0xff]  }
  0x96   : > { %13536 = vmatpush3.bf16.msra.mxu0 %v15018_v26  ;;  %v15069_v26 = vld [vmem:[%s16269_s5 + $0x3f0] sm:$0xff]  }
  0x97   : > { %13537 = vmatprep.subr.bf16.mxu0 %v15020_v28  ;;  %13558 = vmatpush3.bf16.msra.mxu1 %v15019_v27  ;;  %v15070_v27 = vld [vmem:[%s16269_s5 + $0x330] sm:$0xff]  }
  0x98   : > { %13559 = vmatprep.subr.bf16.mxu1 %v15021_v29  ;;  %v15071_v28 = vld [vmem:[%s16269_s5 + $0x3b0] sm:$0xff]   ;;  %v15072_v29 = vld [vmem:[%s16269_s5 + $0x378] sm:$0xff]  }
  0x99   : > { %v225_v3 = vld [vmem:[%s17663_s0 + $0x10] sm:$0xff] }
  0x9a   : > { %13538 = vmatpush3.bf16.msra.mxu0 %v15022_v30  ;;  %v15073_v30 = vld [vmem:[%s16269_s5 + $0x3f8] sm:$0xff]  }
  0x9b   : > { %13539 = vmatprep.subr.bf16.mxu0 %v15024_v32  ;;  %13560 = vmatpush3.bf16.msra.mxu1 %v15023_v31  ;;  %v15074_v31 = vld [vmem:[%s16269_s5 + $0x338] sm:$0xff]  }
  0x9c   : > { %13561 = vmatprep.subr.bf16.mxu1 %v15025_v33  ;;  %v15075_v32 = vld [vmem:[%s16269_s5 + $0x3b8] sm:$0xff]   ;;  %v2455_v33 = vrot.slane %v16401_v60, %v16311_v35  ;;  %v15101_v60 = vld [vmem:[%s16269_s5 + $0x470] sm:$0xff]  }
  0x9e   : > { %13540 = vmatpush3.bf16.msra.mxu0 %v15026_v34  ;;  %v15077_v34 = vld [vmem:[%s16269_s5 + $0x440] sm:$0xff]  }
  0x9f   : > { %13541 = vmatprep.subr.bf16.mxu0 %v15028_v37  ;;  %13562 = vmatpush3.bf16.msra.mxu1 %v15027_v36  ;;  %v15078_v36 = vld [vmem:[%s16269_s5 + $0x4c0] sm:$0xff]  }
  0xa0   : > { %13563 = vmatprep.subr.bf16.mxu1 %v15029_v38  ;;  %v15079_v37 = vld [vmem:[%s16269_s5 + $0x400] sm:$0xff]  }
  0xa1   : > { %v15080_v38 = vld [vmem:[%s16269_s5 + $0x480] sm:$0xff]  }
  0xa2   : > { %13542 = vmatpush3.bf16.msra.mxu0 %v15030_v39  ;;  %v2471_v39 = vcombine.high %v2455_v33, %v2455_v33 }
  0xa3   : > { %13543 = vmatprep.subr.bf16.mxu0 %v15032_v41  ;;  %13564 = vmatpush3.bf16.msra.mxu1 %v15031_v40  ;;  %v15081_v40 = vld [vmem:[%s16269_s5 + $0x448] sm:$0xff]  }
  0xa4   : > { %13565 = vmatprep.subr.bf16.mxu1 %v15033_v42  ;;  %v15082_v41 = vld [vmem:[%s16269_s5 + $0x4c8] sm:$0xff]  }
  0xa5   : > { %v15083_v42 = vld [vmem:[%s16269_s5 + $0x408] sm:$0xff]  }
  0xa6   : > { %13544 = vmatpush3.bf16.msra.mxu0 %v15034_v43  ;;  %v15084_v43 = vld [vmem:[%s16269_s5 + $0x488] sm:$0xff]  }
  0xa7   : > { %13545 = vmatprep.subr.bf16.mxu0 %v15036_v45  ;;  %13566 = vmatpush3.bf16.msra.mxu1 %v15035_v44  ;;  %v15085_v44 = vld [vmem:[%s16269_s5 + $0x450] sm:$0xff]  }
  0xa8   : > { %13567 = vmatprep.subr.bf16.mxu1 %v15037_v46  ;;  %v15086_v45 = vld [vmem:[%s16269_s5 + $0x4d0] sm:$0xff]  }
  0xa9   : > { %v15087_v46 = vld [vmem:[%s16269_s5 + $0x410] sm:$0xff]  }
  0xaa   : > { %13546 = vmatpush3.bf16.msra.mxu0 %v15038_v47  ;;  %v15088_v47 = vld [vmem:[%s16269_s5 + $0x490] sm:$0xff]  }
  0xab   : > { %13547 = vmatprep.subr.bf16.mxu0 %v15040_v49  ;;  %13568 = vmatpush3.bf16.msra.mxu1 %v15039_v48  ;;  %v15089_v48 = vld [vmem:[%s16269_s5 + $0x458] sm:$0xff]  }
  0xac   : > { %13569 = vmatprep.subr.bf16.mxu1 %v15041_v50  ;;  %v15090_v49 = vld [vmem:[%s16269_s5 + $0x4d8] sm:$0xff]  }
  0xad   : > { %v15091_v50 = vld [vmem:[%s16269_s5 + $0x418] sm:$0xff]  }
  0xae   : > { %13548 = vmatpush3.bf16.msra.mxu0 %v15042_v51  ;;  %v15092_v51 = vld [vmem:[%s16269_s5 + $0x498] sm:$0xff]  }
  0xaf   : > { %13577 = vmatprep.subr.bf16.mxu0 %v15044_v56  ;;  %13570 = vmatpush3.bf16.msra.mxu1 %v15043_v53  ;;  %v15094_v53 = vld [vmem:[%s16269_s5 + $0x4e0] sm:$0xff]   ;;  %v15097_v56 = vld [vmem:[%s16269_s5 + $0x468] sm:$0xff]  }
  0xb0   : > { %13599 = vmatprep.subr.bf16.mxu1 %v15045_v59  ;;  %v15100_v59 = vld [vmem:[%s16269_s5 + $0x4a8] sm:$0xff]  }
  0xb1   : > { %9845 = vmatmul.mubr.bf16.vlgmr.msra.gmra.mrb[8].mxu0 %v2448_v58  ;;  %v15099_v58 = vld [vmem:[%s16269_s5 + $0x428] sm:$0xff]  }
  0xb2   : > { %13578 = vmatpush3.bf16.msra.mxu0 %v15046_v61  ;;  %9885 = vmatmul.mubr.bf16.vlgmr.msra.gmra.mrb[8].mxu1 %v2470_v1  ;;  %v15102_v61 = vld [vmem:[%s16269_s5 + $0x4f0] sm:$0xff]   ;;  %v15106_v1 = vld [vmem:[%s16269_s5 + $0x4f8] sm:$0xff]  }
  0xb3   : > { %13579 = vmatprep.subr.bf16.mxu0 %v15048_v2  ;;  %13600 = vmatpush3.bf16.msra.mxu1 %v15047_v63  ;;  %v15104_v63 = vld [vmem:[%s16269_s5 + $0x4b0] sm:$0xff]   ;;  %v15107_v2 = vld [vmem:[%s16269_s5 + $0x438] sm:$0xff]  }
  0xb4   : > { %9924 = vmatprep.mubr.bf16.mxu0 %v2469_v5  ;;  %13601 = vmatprep.subr.bf16.mxu1 %v15049_v4  ;;  %v15108_v4 = vld [vmem:[%s16269_s5 + $0x4b8] sm:$0xff]   ;;  %v2481_v5 = vrot.slane %v225_v3, %v16311_v35 }
  0xb5   : > { %9964 = vmatprep.mubr.bf16.mxu1 %v2473_v8 }
  0xb6   : > { %13580 = vmatpush3.bf16.msra.mxu0 %v15050_v6  ;;  %v2474_v6 = vcombine.high %v225_v3, %v225_v3  ;;  %v2489_v8 = vcombine.high %v2481_v5, %v2481_v5  ;;  %v15158_v3 = vld [vmem:[%s16269_s5 + $0x660] sm:$0xff]  }
  0xb7   : > { %13581 = vmatprep.subr.bf16.mxu0 %v15052_v9  ;;  %13602 = vmatpush3.bf16.msra.mxu1 %v15051_v7  ;;  %v15109_v7 = vld [vmem:[%s16269_s5 + $0x540] sm:$0xff]   ;;  %v2497_v9 = vrot.slane %v2481_v5, %v16311_v35 }
  0xb8   : > { %13603 = vmatprep.subr.bf16.mxu1 %v15053_v10  ;;  %v15110_v10 = vld [vmem:[%s16269_s5 + $0x5c0] sm:$0xff]  }
  0xb9   : > { %v15160_v5 = vld [vmem:[%s16269_s5 + $0x620] sm:$0xff]  }
  0xba   : > { %13582 = vmatpush3.bf16.msra.mxu0 %v15054_v11  ;;  %v16479_v11 = vrot.slane %v2474_v6, %v16311_v35  ;;  %v15161_v6 = vld [vmem:[%s16269_s5 + $0x6a0] sm:$0xff]  }
  0xbb   : > { %13583 = vmatprep.subr.bf16.mxu0 %v15056_v13  ;;  %13604 = vmatpush3.bf16.msra.mxu1 %v15055_v12  ;;  %v15111_v12 = vld [vmem:[%s16269_s5 + $0x500] sm:$0xff]   ;;  %v2511_v13 = vrot.slane %v2489_v8, %v16311_v35  ;;  %v15163_v8 = vld [vmem:[%s16269_s5 + $0x6e8] sm:$0xff]  }
  0xbc   : > { %13605 = vmatprep.subr.bf16.mxu1 %v15057_v14  ;;  %v15112_v14 = vld [vmem:[%s16269_s5 + $0x580] sm:$0xff]  }
  0xbe   : > { %13584 = vmatpush3.bf16.msra.mxu0 %v15058_v15  ;;  %v2490_v15 = vcombine.high %v16479_v11, %v16479_v11 }
  0xbf   : > { %13585 = vmatprep.subr.bf16.mxu0 %v15060_v17  ;;  %13606 = vmatpush3.bf16.msra.mxu1 %v15059_v16  ;;  %v2519_v16 = vcombine.high %v2497_v9, %v2497_v9  ;;  %v15113_v17 = vld [vmem:[%s16269_s5 + $0x548] sm:$0xff]  }
  0xc0   : > { %13607 = vmatprep.subr.bf16.mxu1 %v15061_v18  ;;  %v2521_v18 = vcombine.high %v2511_v13, %v2511_v13 }
  0xc2   : > { %13586 = vmatpush3.bf16.msra.mxu0 %v15062_v19  ;;  %v15114_v19 = vld [vmem:[%s16269_s5 + $0x5c8] sm:$0xff]  }
  0xc3   : > { %13587 = vmatprep.subr.bf16.mxu0 %v15064_v21  ;;  %13608 = vmatpush3.bf16.msra.mxu1 %v15063_v20  ;;  %v2518_v20 = vrot.slane %v2490_v15, %v16311_v35  ;;  %v15115_v21 = vld [vmem:[%s16269_s5 + $0x508] sm:$0xff]   ;;  %v15170_v15 = vld [vmem:[%s16269_s5 + $0x678] sm:$0xff]  }
  0xc4   : > { %13609 = vmatprep.subr.bf16.mxu1 %v15065_v22  ;;  %v15116_v22 = vld [vmem:[%s16269_s5 + $0x588] sm:$0xff]  }
  0xc6   : > { %13588 = vmatpush3.bf16.msra.mxu0 %v15066_v23  ;;  %v2522_v23 = vcombine.high %v2518_v20, %v2518_v20 }
  0xc7   : > { %13589 = vmatprep.subr.bf16.mxu0 %v15068_v25  ;;  %13610 = vmatpush3.bf16.msra.mxu1 %v15067_v24  ;;  %v15117_v24 = vld [vmem:[%s16269_s5 + $0x550] sm:$0xff]  }
  0xc8   : > { %13611 = vmatprep.subr.bf16.mxu1 %v15069_v26  ;;  %v15118_v25 = vld [vmem:[%s16269_s5 + $0x5d0] sm:$0xff]  }
  0xc9   : > { %v15119_v26 = vld [vmem:[%s16269_s5 + $0x510] sm:$0xff]  }
  0xca   : > { %13590 = vmatpush3.bf16.msra.mxu0 %v15070_v27  ;;  %v15120_v27 = vld [vmem:[%s16269_s5 + $0x590] sm:$0xff]  }
  0xcb   : > { %13591 = vmatprep.subr.bf16.mxu0 %v15072_v29  ;;  %13612 = vmatpush3.bf16.msra.mxu1 %v15071_v28  ;;  %v15121_v28 = vld [vmem:[%s16269_s5 + $0x558] sm:$0xff]  }
  0xcc   : > { %13613 = vmatprep.subr.bf16.mxu1 %v15073_v30  ;;  %v15122_v29 = vld [vmem:[%s16269_s5 + $0x5d8] sm:$0xff]  }
  0xcd   : > { %v15123_v30 = vld [vmem:[%s16269_s5 + $0x518] sm:$0xff]  }
  0xce   : > { %13592 = vmatpush3.bf16.msra.mxu0 %v15074_v31  ;;  %v15124_v31 = vld [vmem:[%s16269_s5 + $0x598] sm:$0xff]  }
  0xcf   : > { %13621 = vmatprep.subr.bf16.mxu0 %v15077_v34  ;;  %13614 = vmatpush3.bf16.msra.mxu1 %v15075_v32  ;;  %v15125_v32 = vld [vmem:[%s16269_s5 + $0x560] sm:$0xff]  }
  0xd0   : > { %13643 = vmatprep.subr.bf16.mxu1 %v15078_v36  ;;  %v15127_v34 = vld [vmem:[%s16269_s5 + $0x520] sm:$0xff]  }
  0xd1   : > { %9925 = vmatmul.mubr.bf16.vlgmr.msra.gmra.mrb[12].mxu0 %v2455_v33  ;;  %v15126_v33 = vld [vmem:[%s16269_s5 + $0x5e0] sm:$0xff]  }
  0xd2   : > { %13622 = vmatpush3.bf16.msra.mxu0 %v15079_v37  ;;  %9965 = vmatmul.mubr.bf16.vlgmr.msra.gmra.mrb[12].mxu1 %v2471_v39  ;;  %v15128_v36 = vld [vmem:[%s16269_s5 + $0x5a0] sm:$0xff]   ;;  %v15129_v37 = vld [vmem:[%s16269_s5 + $0x568] sm:$0xff]  }
  0xd3   : > { %13623 = vmatprep.subr.bf16.mxu0 %v15081_v40  ;;  %13644 = vmatpush3.bf16.msra.mxu1 %v15080_v38  ;;  %v15130_v38 = vld [vmem:[%s16269_s5 + $0x5e8] sm:$0xff]  }
  0xd4   : > { %13645 = vmatprep.subr.bf16.mxu1 %v15082_v41  ;;  %10004 = vmatprep.mubr.bf16.mxu0 %v2511_v13  ;;  %v15131_v39 = vld [vmem:[%s16269_s5 + $0x528] sm:$0xff]   ;;  %v15133_v41 = vld [vmem:[%s16269_s5 + $0x570] sm:$0xff]  }
  0xd5   : > { %10044 = vmatprep.mubr.bf16.mxu1 %v2521_v18  ;;  %v15132_v40 = vld [vmem:[%s16269_s5 + $0x5a8] sm:$0xff]   ;;  %v15168_v13 = vld [vmem:[%s16269_s5 + $0x630] sm:$0xff]   ;;  %v226_v18 = vld [vmem:[%s17663_s0 + $0x18] sm:$0xff] }
  0xd6   : > { %13624 = vmatpush3.bf16.msra.mxu0 %v15083_v42  ;;  %v15134_v42 = vld [vmem:[%s16269_s5 + $0x5f0] sm:$0xff]  }
  0xd7   : > { %13625 = vmatprep.subr.bf16.mxu0 %v15085_v44  ;;  %13646 = vmatpush3.bf16.msra.mxu1 %v15084_v43  ;;  %v15135_v43 = vld [vmem:[%s16269_s5 + $0x530] sm:$0xff]  }
  0xd8   : > { %13647 = vmatprep.subr.bf16.mxu1 %v15086_v45  ;;  %v15136_v44 = vld [vmem:[%s16269_s5 + $0x5b0] sm:$0xff]   ;;  %v15137_v45 = vld [vmem:[%s16269_s5 + $0x578] sm:$0xff]  }
  0xda   : > { %13626 = vmatpush3.bf16.msra.mxu0 %v15087_v46  ;;  %v15138_v46 = vld [vmem:[%s16269_s5 + $0x5f8] sm:$0xff]  }
  0xdb   : > { %13627 = vmatprep.subr.bf16.mxu0 %v15089_v48  ;;  %13648 = vmatpush3.bf16.msra.mxu1 %v15088_v47  ;;  %v15139_v47 = vld [vmem:[%s16269_s5 + $0x538] sm:$0xff]  }
  0xdc   : > { %13649 = vmatprep.subr.bf16.mxu1 %v15090_v49  ;;  %v15140_v48 = vld [vmem:[%s16269_s5 + $0x5b8] sm:$0xff]   ;;  %v2504_v49 = vrot.slane %v16479_v11, %v16311_v35  ;;  %v15166_v11 = vld [vmem:[%s16269_s5 + $0x670] sm:$0xff]  }
  0xde   : > { %13628 = vmatpush3.bf16.msra.mxu0 %v15091_v50  ;;  %v15142_v50 = vld [vmem:[%s16269_s5 + $0x640] sm:$0xff]  }
  0xdf   : > { %13629 = vmatprep.subr.bf16.mxu0 %v15093_v52  ;;  %13650 = vmatpush3.bf16.msra.mxu1 %v15092_v51  ;;  %v15143_v51 = vld [vmem:[%s16269_s5 + $0x6c0] sm:$0xff]  }
  0xe0   : > { %13651 = vmatprep.subr.bf16.mxu1 %v15094_v53  ;;  %v15144_v52 = vld [vmem:[%s16269_s5 + $0x600] sm:$0xff]  }
  0xe1   : > { %v15145_v53 = vld [vmem:[%s16269_s5 + $0x680] sm:$0xff]  }
  0xe2   : > { %13630 = vmatpush3.bf16.msra.mxu0 %v15095_v54  ;;  %v2520_v54 = vcombine.high %v2504_v49, %v2504_v49 }
  0xe3   : > { %13631 = vmatprep.subr.bf16.mxu0 %v15097_v56  ;;  %13652 = vmatpush3.bf16.msra.mxu1 %v15096_v55  ;;  %v15146_v55 = vld [vmem:[%s16269_s5 + $0x648] sm:$0xff]  }
  0xe4   : > { %13653 = vmatprep.subr.bf16.mxu1 %v15098_v57  ;;  %v15147_v56 = vld [vmem:[%s16269_s5 + $0x6c8] sm:$0xff]  }
  0xe5   : > { %v15148_v57 = vld [vmem:[%s16269_s5 + $0x608] sm:$0xff]  }
  0xe6   : > { %13632 = vmatpush3.bf16.msra.mxu0 %v15099_v58  ;;  %v15149_v58 = vld [vmem:[%s16269_s5 + $0x688] sm:$0xff]  }
  0xe7   : > { %13633 = vmatprep.subr.bf16.mxu0 %v15101_v60  ;;  %13654 = vmatpush3.bf16.msra.mxu1 %v15100_v59  ;;  %v15150_v59 = vld [vmem:[%s16269_s5 + $0x650] sm:$0xff]  }
  0xe8   : > { %13655 = vmatprep.subr.bf16.mxu1 %v15102_v61  ;;  %v15151_v60 = vld [vmem:[%s16269_s5 + $0x6d0] sm:$0xff]  }
  0xe9   : > { %v15152_v61 = vld [vmem:[%s16269_s5 + $0x610] sm:$0xff]  }
  0xea   : > { %13634 = vmatpush3.bf16.msra.mxu0 %v15103_v62  ;;  %v15153_v62 = vld [vmem:[%s16269_s5 + $0x690] sm:$0xff]  }
  0xeb   : > { %13635 = vmatprep.subr.bf16.mxu0 %v15105_v0  ;;  %13656 = vmatpush3.bf16.msra.mxu1 %v15104_v63  ;;  %v15154_v63 = vld [vmem:[%s16269_s5 + $0x658] sm:$0xff]  }
  0xec   : > { %13657 = vmatprep.subr.bf16.mxu1 %v15106_v1  ;;  %v15155_v0 = vld [vmem:[%s16269_s5 + $0x6d8] sm:$0xff]  }
  0xed   : > { %v15156_v1 = vld [vmem:[%s16269_s5 + $0x618] sm:$0xff]  }
  0xee   : > { %13636 = vmatpush3.bf16.msra.mxu0 %v15107_v2  ;;  %v15157_v2 = vld [vmem:[%s16269_s5 + $0x698] sm:$0xff]  }
  0xef   : > { %13665 = vmatprep.subr.bf16.mxu0 %v15109_v7  ;;  %13658 = vmatpush3.bf16.msra.mxu1 %v15108_v4  ;;  %v15159_v4 = vld [vmem:[%s16269_s5 + $0x6e0] sm:$0xff]   ;;  %v15162_v7 = vld [vmem:[%s16269_s5 + $0x668] sm:$0xff]  }
  0xf0   : > { %13687 = vmatprep.subr.bf16.mxu1 %v15110_v10  ;;  %v15165_v10 = vld [vmem:[%s16269_s5 + $0x6a8] sm:$0xff]  }
  0xf1   : > { %10005 = vmatmul.mubr.bf16.vlgmr.msra.gmra.mrb[16].mxu0 %v2497_v9  ;;  %v15164_v9 = vld [vmem:[%s16269_s5 + $0x628] sm:$0xff]  }
  0xf2   : > { %13666 = vmatpush3.bf16.msra.mxu0 %v15111_v12  ;;  %10045 = vmatmul.mubr.bf16.vlgmr.msra.gmra.mrb[16].mxu1 %v2519_v16  ;;  %v15167_v12 = vld [vmem:[%s16269_s5 + $0x6f0] sm:$0xff]   ;;  %v15171_v16 = vld [vmem:[%s16269_s5 + $0x6f8] sm:$0xff]  }
  0xf3   : > { %13667 = vmatprep.subr.bf16.mxu0 %v15113_v17  ;;  %13688 = vmatpush3.bf16.msra.mxu1 %v15112_v14  ;;  %v15169_v14 = vld [vmem:[%s16269_s5 + $0x6b0] sm:$0xff]   ;;  %v15172_v17 = vld [vmem:[%s16269_s5 + $0x638] sm:$0xff]  }
  0xf4   : > { %10084 = vmatprep.mubr.bf16.mxu0 %v2518_v20  ;;  %13689 = vmatprep.subr.bf16.mxu1 %v15114_v19  ;;  %v2530_v19 = vrot.slane %v226_v18, %v16311_v35  ;;  %v15174_v20 = vld [vmem:[%s16269_s5 + $0x740] sm:$0xff]  }
  0xf5   : > { %10124 = vmatprep.mubr.bf16.mxu1 %v2522_v23 }
  0xf6   : > { %13668 = vmatpush3.bf16.msra.mxu0 %v15115_v21  ;;  %v2523_v21 = vcombine.high %v226_v18, %v226_v18  ;;  %v2538_v23 = vcombine.high %v2530_v19, %v2530_v19 }
  0xf7   : > { %13669 = vmatprep.subr.bf16.mxu0 %v15117_v24  ;;  %13690 = vmatpush3.bf16.msra.mxu1 %v15116_v22  ;;  %v15173_v22 = vld [vmem:[%s16269_s5 + $0x6b8] sm:$0xff]   ;;  %v2546_v24 = vrot.slane %v2530_v19, %v16311_v35  ;;  %v15211_v19 = vld [vmem:[%s16269_s5 + $0x848] sm:$0xff]  }
  0xf8   : > { %13691 = vmatprep.subr.bf16.mxu1 %v15118_v25  ;;  %v15175_v25 = vld [vmem:[%s16269_s5 + $0x7c0] sm:$0xff]  }
  0xfa   : > { %13670 = vmatpush3.bf16.msra.mxu0 %v15119_v26  ;;  %v16557_v26 = vrot.slane %v2523_v21, %v16311_v35  ;;  %v15213_v21 = vld [vmem:[%s16269_s5 + $0x808] sm:$0xff]  }
  0xfb   : > { %13671 = vmatprep.subr.bf16.mxu0 %v15121_v28  ;;  %13692 = vmatpush3.bf16.msra.mxu1 %v15120_v27  ;;  %v2560_v27 = vrot.slane %v2538_v23, %v16311_v35  ;;  %v15176_v28 = vld [vmem:[%s16269_s5 + $0x700] sm:$0xff]   ;;  %v15215_v23 = vld [vmem:[%s16269_s5 + $0x850] sm:$0xff]  }
  0xfc   : > { %13693 = vmatprep.subr.bf16.mxu1 %v15122_v29  ;;  %v2539_v29 = vcombine.high %v16557_v26, %v16557_v26 }
  0xfe   : > { %13672 = vmatpush3.bf16.msra.mxu0 %v15123_v30  ;;  %v2568_v30 = vcombine.high %v2546_v24, %v2546_v24 }
  0xff   : > { %13673 = vmatprep.subr.bf16.mxu0 %v15125_v32  ;;  %13694 = vmatpush3.bf16.msra.mxu1 %v15124_v31  ;;  %v15178_v31 = vld [vmem:[%s16269_s5 + $0x748] sm:$0xff]   ;;  %v2570_v32 = vcombine.high %v2560_v27, %v2560_v27 }
 0x100   : > { %13695 = vmatprep.subr.bf16.mxu1 %v15126_v33  ;;  %v15177_v33 = vld [vmem:[%s16269_s5 + $0x780] sm:$0xff]  }
 0x102   : > { %13674 = vmatpush3.bf16.msra.mxu0 %v15127_v34  ;;  %v2567_v34 = vrot.slane %v2539_v29, %v16311_v35  ;;  %v15221_v29 = vld [vmem:[%s16269_s5 + $0x818] sm:$0xff]  }
 0x103   : > { %13675 = vmatprep.subr.bf16.mxu0 %v15129_v37  ;;  %13696 = vmatpush3.bf16.msra.mxu1 %v15128_v36  ;;  %v15179_v36 = vld [vmem:[%s16269_s5 + $0x7c8] sm:$0xff]  }
 0x104   : > { %13697 = vmatprep.subr.bf16.mxu1 %v15130_v38  ;;  %v15180_v37 = vld [vmem:[%s16269_s5 + $0x708] sm:$0xff]   ;;  %v2571_v38 = vcombine.high %v2567_v34, %v2567_v34 }
 0x106   : > { %13676 = vmatpush3.bf16.msra.mxu0 %v15131_v39  ;;  %v15182_v39 = vld [vmem:[%s16269_s5 + $0x750] sm:$0xff]  }
 0x107   : > { %13677 = vmatprep.subr.bf16.mxu0 %v15133_v41  ;;  %13698 = vmatpush3.bf16.msra.mxu1 %v15132_v40  ;;  %v15181_v40 = vld [vmem:[%s16269_s5 + $0x788] sm:$0xff]   ;;  %v15183_v41 = vld [vmem:[%s16269_s5 + $0x7d0] sm:$0xff]  }
 0x108   : > { %13699 = vmatprep.subr.bf16.mxu1 %v15134_v42  ;;  %v15184_v42 = vld [vmem:[%s16269_s5 + $0x710] sm:$0xff]  }
 0x10a   : > { %13678 = vmatpush3.bf16.msra.mxu0 %v15135_v43  ;;  %v15186_v43 = vld [vmem:[%s16269_s5 + $0x758] sm:$0xff]  }
 0x10b   : > { %13679 = vmatprep.subr.bf16.mxu0 %v15137_v45  ;;  %13700 = vmatpush3.bf16.msra.mxu1 %v15136_v44  ;;  %v15185_v44 = vld [vmem:[%s16269_s5 + $0x790] sm:$0xff]   ;;  %v15187_v45 = vld [vmem:[%s16269_s5 + $0x7d8] sm:$0xff]  }
 0x10c   : > { %13701 = vmatprep.subr.bf16.mxu1 %v15138_v46  ;;  %v15188_v46 = vld [vmem:[%s16269_s5 + $0x718] sm:$0xff]  }
 0x10e   : > { %13680 = vmatpush3.bf16.msra.mxu0 %v15139_v47  ;;  %v15190_v47 = vld [vmem:[%s16269_s5 + $0x760] sm:$0xff]  }
 0x10f   : > { %13709 = vmatprep.subr.bf16.mxu0 %v15142_v50  ;;  %13702 = vmatpush3.bf16.msra.mxu1 %v15140_v48  ;;  %v15189_v48 = vld [vmem:[%s16269_s5 + $0x798] sm:$0xff]   ;;  %v15192_v50 = vld [vmem:[%s16269_s5 + $0x720] sm:$0xff]  }
 0x110   : > { %13731 = vmatprep.subr.bf16.mxu1 %v15143_v51  ;;  %v15194_v51 = vld [vmem:[%s16269_s5 + $0x768] sm:$0xff]  }
 0x111   : > { %10085 = vmatmul.mubr.bf16.vlgmr.msra.gmra.mrb[20].mxu0 %v2504_v49  ;;  %v15191_v49 = vld [vmem:[%s16269_s5 + $0x7e0] sm:$0xff]  }
 0x112   : > { %13710 = vmatpush3.bf16.msra.mxu0 %v15144_v52  ;;  %10125 = vmatmul.mubr.bf16.vlgmr.msra.gmra.mrb[20].mxu1 %v2520_v54  ;;  %v15193_v52 = vld [vmem:[%s16269_s5 + $0x7a0] sm:$0xff]  }
 0x113   : > { %13711 = vmatprep.subr.bf16.mxu0 %v15146_v55  ;;  %13732 = vmatpush3.bf16.msra.mxu1 %v15145_v53  ;;  %v15195_v53 = vld [vmem:[%s16269_s5 + $0x7e8] sm:$0xff]   ;;  %v12385_v54 = vld [vmem:[%s192_s27] ss:$0 sm:$0xff] }
 0x114   : > { %13733 = vmatprep.subr.bf16.mxu1 %v15147_v56  ;;  %10164 = vmatprep.mubr.bf16.mxu0 %v2560_v27  ;;  %v15196_v55 = vld [vmem:[%s16269_s5 + $0x728] sm:$0xff]   ;;  %v15219_v27 = vld [vmem:[%s16269_s5 + $0x858] sm:$0xff]  }
 0x115   : > { %10204 = vmatprep.mubr.bf16.mxu1 %v2570_v32  ;;  %v15224_v32 = vld [vmem:[%s16269_s5 + $0x8e0] sm:$0xff]  }
 0x116   : > { %13712 = vmatpush3.bf16.msra.mxu0 %v15148_v57  ;;  %v15198_v57 = vld [vmem:[%s16269_s5 + $0x770] sm:$0xff]  }
 0x117   : > { %13713 = vmatprep.subr.bf16.mxu0 %v15150_v59  ;;  %13734 = vmatpush3.bf16.msra.mxu1 %v15149_v58  ;;  %v15197_v59 = vld [vmem:[%s16269_s5 + $0x7a8] sm:$0xff]  }
 0x118   : > { %13735 = vmatprep.subr.bf16.mxu1 %v15151_v60 }
 0x11a   : > { %13714 = vmatpush3.bf16.msra.mxu0 %v15152_v61 }
 0x11b   : > { %13715 = vmatprep.subr.bf16.mxu0 %v15154_v63  ;;  %13736 = vmatpush3.bf16.msra.mxu1 %v15153_v62  ;;  %v15199_v63 = vld [vmem:[%s16269_s5 + $0x7f0] sm:$0xff]  }
 0x11c   : > { %13737 = vmatprep.subr.bf16.mxu1 %v15155_v0  ;;  %v15200_v0 = vld [vmem:[%s16269_s5 + $0x730] sm:$0xff]  }
 0x11e   : > { %13716 = vmatpush3.bf16.msra.mxu0 %v15156_v1 }
 0x11f   : > { %13717 = vmatprep.subr.bf16.mxu0 %v15158_v3  ;;  %13738 = vmatpush3.bf16.msra.mxu1 %v15157_v2  ;;  %v15201_v3 = vld [vmem:[%s16269_s5 + $0x7b0] sm:$0xff]  }
 0x120   : > { %13739 = vmatprep.subr.bf16.mxu1 %v15159_v4 }
 0x122   : > { %13718 = vmatpush3.bf16.msra.mxu0 %v15160_v5 }
 0x123   : > { %13719 = vmatprep.subr.bf16.mxu0 %v15162_v7  ;;  %13740 = vmatpush3.bf16.msra.mxu1 %v15161_v6  ;;  %v15202_v7 = vld [vmem:[%s16269_s5 + $0x778] sm:$0xff]  }
 0x124   : > { %13741 = vmatprep.subr.bf16.mxu1 %v15163_v8 }
 0x126   : > { %13720 = vmatpush3.bf16.msra.mxu0 %v15164_v9  ;;  %v15203_v9 = vld [vmem:[%s16269_s5 + $0x7f8] sm:$0xff]  }
 0x127   : > { %13721 = vmatprep.subr.bf16.mxu0 %v15166_v11  ;;  %13742 = vmatpush3.bf16.msra.mxu1 %v15165_v10  ;;  %v15204_v11 = vld [vmem:[%s16269_s5 + $0x738] sm:$0xff]  }
 0x128   : > { %13743 = vmatprep.subr.bf16.mxu1 %v15167_v12  ;;  %v15205_v12 = vld [vmem:[%s16269_s5 + $0x7b8] sm:$0xff]  }
 0x12a   : > { %13722 = vmatpush3.bf16.msra.mxu0 %v15168_v13  ;;  %v2553_v13 = vrot.slane %v16557_v26, %v16311_v35  ;;  %v15218_v26 = vld [vmem:[%s16269_s5 + $0x890] sm:$0xff]  }
 0x12b   : > { %13723 = vmatprep.subr.bf16.mxu0 %v15170_v15  ;;  %13744 = vmatpush3.bf16.msra.mxu1 %v15169_v14  ;;  %v15207_v14 = vld [vmem:[%s16269_s5 + $0x840] sm:$0xff]  }
 0x12c   : > { %13745 = vmatprep.subr.bf16.mxu1 %v15171_v16  ;;  %v15208_v15 = vld [vmem:[%s16269_s5 + $0x8c0] sm:$0xff]   ;;  %v2569_v18 = vcombine.high %v2553_v13, %v2553_v13 }
 0x12d   : > { %v15209_v16 = vld [vmem:[%s16269_s5 + $0x800] sm:$0xff]  }
 0x12e   : > { %13724 = vmatpush3.bf16.msra.mxu0 %v15172_v17  ;;  %v15210_v17 = vld [vmem:[%s16269_s5 + $0x880] sm:$0xff]  }
 0x12f   : > { %13753 = vmatprep.subr.bf16.mxu0 %v15174_v20  ;;  %13746 = vmatpush3.bf16.msra.mxu1 %v15173_v22  ;;  %v15212_v20 = vld [vmem:[%s16269_s5 + $0x8c8] sm:$0xff]  }
 0x130   : > { %13775 = vmatprep.subr.bf16.mxu1 %v15175_v25  ;;  %v15214_v22 = vld [vmem:[%s16269_s5 + $0x888] sm:$0xff]   ;;  %v15217_v25 = vld [vmem:[%s16269_s5 + $0x810] sm:$0xff]  }
 0x131   : > { %10165 = vmatmul.mubr.bf16.vlgmr.msra.gmra.mrb[24].mxu0 %v2546_v24  ;;  %v15216_v24 = vld [vmem:[%s16269_s5 + $0x8d0] sm:$0xff]  }
 0x132   : > { %13754 = vmatpush3.bf16.msra.mxu0 %v15176_v28  ;;  %10205 = vmatmul.mubr.bf16.vlgmr.msra.gmra.mrb[24].mxu1 %v2568_v30  ;;  %v15220_v28 = vld [vmem:[%s16269_s5 + $0x8d8] sm:$0xff]  }
 0x133   : > { %13755 = vmatprep.subr.bf16.mxu0 %v15178_v31  ;;  %13776 = vmatpush3.bf16.msra.mxu1 %v15177_v33  ;;  %v15222_v30 = vld [vmem:[%s16269_s5 + $0x898] sm:$0xff]   ;;  %v15223_v31 = vld [vmem:[%s16269_s5 + $0x860] sm:$0xff]  }
 0x134   : > { %10244 = vmatprep.mubr.bf16.mxu0 %v2567_v34  ;;  %13777 = vmatprep.subr.bf16.mxu1 %v15179_v36  ;;  %v15225_v33 = vld [vmem:[%s16269_s5 + $0x820] sm:$0xff]   ;;  %v15227_v36 = vld [vmem:[%s16269_s5 + $0x868] sm:$0xff]  }
 0x135   : > { %10284 = vmatprep.mubr.bf16.mxu1 %v2571_v38  ;;  %v15226_v34 = vld [vmem:[%s16269_s5 + $0x8a0] sm:$0xff]   ;;  %v15229_v38 = vld [vmem:[%s16269_s5 + $0x828] sm:$0xff]  }
 0x136   : > { %13756 = vmatpush3.bf16.msra.mxu0 %v15180_v37  ;;  %v15228_v37 = vld [vmem:[%s16269_s5 + $0x8e8] sm:$0xff]  }
 0x137   : > { %13757 = vmatprep.subr.bf16.mxu0 %v15182_v39  ;;  %13778 = vmatpush3.bf16.msra.mxu1 %v15181_v40  ;;  %v15230_v39 = vld [vmem:[%s16269_s5 + $0x8a8] sm:$0xff]  }
 0x138   : > { %13779 = vmatprep.subr.bf16.mxu1 %v15183_v41  ;;  %v15231_v41 = vld [vmem:[%s16269_s5 + $0x870] sm:$0xff]  }
 0x13a   : > { %13758 = vmatpush3.bf16.msra.mxu0 %v15184_v42 }
 0x13b   : > { %13759 = vmatprep.subr.bf16.mxu0 %v15186_v43  ;;  %13780 = vmatpush3.bf16.msra.mxu1 %v15185_v44  ;;  %v15232_v43 = vld [vmem:[%s16269_s5 + $0x8f0] sm:$0xff]  }
 0x13c   : > { %13781 = vmatprep.subr.bf16.mxu1 %v15187_v45 }
 0x13e   : > { %13760 = vmatpush3.bf16.msra.mxu0 %v15188_v46 }
 0x13f   : > { %13761 = vmatprep.subr.bf16.mxu0 %v15190_v47  ;;  %13782 = vmatpush3.bf16.msra.mxu1 %v15189_v48 }
 0x140   : > { %13783 = vmatprep.subr.bf16.mxu1 %v15191_v49  ;;  %v15233_v49 = vld [vmem:[%s16269_s5 + $0x830] sm:$0xff]  }
 0x142   : > { %13762 = vmatpush3.bf16.msra.mxu0 %v15192_v50  ;;  %v15234_v50 = vld [vmem:[%s16269_s5 + $0x8b0] sm:$0xff]  }
 0x143   : > { %13763 = vmatprep.subr.bf16.mxu0 %v15194_v51  ;;  %13784 = vmatpush3.bf16.msra.mxu1 %v15193_v52 }
 0x144   : > { %v13461_v56 = vpop.f32.mrb[0].mxu0  ;;  %13785 = vmatprep.subr.bf16.mxu1 %v15195_v53 }
 0x145   : > { %v13462_v58 = vpop.f32.mrb[1].mxu0  ;;  %v13483_v60 = vpop.f32.mrb[0].mxu1 }
 0x146   : > { %v13463_v61 = vadd.f32 %v13462_v58, %v13461_v56  ;;  %v13464_v62 = vpop.f32.mrb[2].mxu0  ;;  %v13484_v1 = vpop.f32.mrb[1].mxu1  ;;  %13764 = vmatpush3.bf16.msra.mxu0 %v15196_v55  ;;  %v15236_v56 = vld [vmem:[%s16269_s5 + $0x8f8] sm:$0xff]  }
 0x147   : > { %v13465_v2 = vpop.f32.mrb[3].mxu0  ;;  %v13485_v5 = vadd.f32 %v13484_v1, %v13483_v60  ;;  %v13486_v6 = vpop.f32.mrb[2].mxu1  ;;  %13765 = vmatprep.subr.bf16.mxu0 %v15198_v57  ;;  %13786 = vmatpush3.bf16.msra.mxu1 %v15197_v59  ;;  %v15237_v58 = vld [vmem:[%s16269_s5 + $0x838] sm:$0xff]   ;;  %v227_v59 = vld [vmem:[%s17663_s0 + $0x20] sm:$0xff] }
 0x148   : > { %v9687_v4 = vadd.f32 %v13463_v61, %v12385_v54  ;;  %v13487_v8 = vpop.f32.mrb[3].mxu1  ;;  %13787 = vmatprep.subr.bf16.mxu1 %v15199_v63  ;;  %v15235_v54 = vld [vmem:[%s16269_s5 + $0x878] sm:$0xff]   ;;  %v2579_v60 = vrot.slane %v227_v59, %v16311_v35  ;;  %v15239_v61 = vld [vmem:[%s16269_s5 + $0x940] sm:$0xff]   ;;  %v2572_v62 = vcombine.high %v227_v59, %v227_v59  ;;  %v15276_v59 = vld [vmem:[%s16269_s5 + $0xa48] sm:$0xff]  }
 0x149   : > { %v15238_v63 = vld [vmem:[%s16269_s5 + $0x8b8] sm:$0xff]   ;;  %v15240_v2 = vld [vmem:[%s16269_s5 + $0x9c0] sm:$0xff]  }
 0x14a   : > { %v16593_v10 = vadd.f32 %v13485_v5, %v9687_v4  ;;  %13766 = vmatpush3.bf16.msra.mxu0 %v15200_v0  ;;  %v2587_v0 = vcombine.high %v2579_v60, %v2579_v60  ;;  %v2595_v1 = vrot.slane %v2579_v60, %v16311_v35  ;;  %v15241_v4 = vld [vmem:[%s16269_s5 + $0x900] sm:$0xff]   ;;  %v15277_v60 = vld [vmem:[%s16269_s5 + $0xac8] sm:$0xff]  }
 0x14b   : > { %13767 = vmatprep.subr.bf16.mxu0 %v15202_v7  ;;  %13788 = vmatpush3.bf16.msra.mxu1 %v15201_v3  ;;  %v16642_v3 = vrot.slane %v2572_v62, %v16311_v35  ;;  %v15242_v6 = vld [vmem:[%s16269_s5 + $0x980] sm:$0xff]   ;;  %v15279_v62 = vld [vmem:[%s16269_s5 + $0xa88] sm:$0xff]  }
 0x14c   : > { %13789 = vmatprep.subr.bf16.mxu1 %v15203_v9  ;;  %v2609_v5 = vrot.slane %v2587_v0, %v16311_v35  ;;  %v2617_v8 = vcombine.high %v2595_v1, %v2595_v1  ;;  %v15243_v9 = vld [vmem:[%s16269_s5 + $0x948] sm:$0xff]   ;;  %v15281_v0 = vld [vmem:[%s16269_s5 + $0xad0] sm:$0xff]  }
 0x14d   : > { %v2588_v7 = vcombine.high %v16642_v3, %v16642_v3 }
 0x14e   : > { %13768 = vmatpush3.bf16.msra.mxu0 %v15204_v11  ;;  %v15244_v11 = vld [vmem:[%s16269_s5 + $0x9c8] sm:$0xff]  }
 0x14f   : > { %13797 = vmatprep.subr.bf16.mxu0 %v15207_v14  ;;  %13790 = vmatpush3.bf16.msra.mxu1 %v15205_v12  ;;  %v2616_v12 = vrot.slane %v2588_v7, %v16311_v35  ;;  %v15246_v14 = vld [vmem:[%s16269_s5 + $0x988] sm:$0xff]   ;;  %v15288_v7 = vld [vmem:[%s16269_s5 + $0xa60] sm:$0xff]  }
 0x150   : > { %13819 = vmatprep.subr.bf16.mxu1 %v15208_v15 }
 0x151   : > { %10245 = vmatmul.mubr.bf16.vlgmr.msra.gmra.mrb[28].mxu0 %v2553_v13  ;;  %v15245_v13 = vld [vmem:[%s16269_s5 + $0x908] sm:$0xff]   ;;  %v2620_v15 = vcombine.high %v2616_v12, %v2616_v12 }
 0x152   : > { %13798 = vmatpush3.bf16.msra.mxu0 %v15209_v16  ;;  %10285 = vmatmul.mubr.bf16.vlgmr.msra.gmra.mrb[28].mxu1 %v2569_v18  ;;  %v15247_v16 = vld [vmem:[%s16269_s5 + $0x950] sm:$0xff]  }
 0x153   : > { %13799 = vmatprep.subr.bf16.mxu0 %v15211_v19  ;;  %13820 = vmatpush3.bf16.msra.mxu1 %v15210_v17  ;;  %v15248_v17 = vld [vmem:[%s16269_s5 + $0x9d0] sm:$0xff]  }
 0x154   : > { %13821 = vmatprep.subr.bf16.mxu1 %v15212_v20  ;;  %10324 = vmatprep.mubr.bf16.mxu0 %v2609_v5  ;;  %v15249_v18 = vld [vmem:[%s16269_s5 + $0x910] sm:$0xff]   ;;  %v15251_v20 = vld [vmem:[%s16269_s5 + $0x958] sm:$0xff]  }
 0x155   : > { %v15250_v19 = vld [vmem:[%s16269_s5 + $0x990] sm:$0xff]  }
 0x156   : > { %13800 = vmatpush3.bf16.msra.mxu0 %v15213_v21  ;;  %v15252_v21 = vld [vmem:[%s16269_s5 + $0x9d8] sm:$0xff]  }
 0x157   : > { %13801 = vmatprep.subr.bf16.mxu0 %v15215_v23  ;;  %13822 = vmatpush3.bf16.msra.mxu1 %v15214_v22  ;;  %v15253_v22 = vld [vmem:[%s16269_s5 + $0x918] sm:$0xff]  }
 0x158   : > { %13823 = vmatprep.subr.bf16.mxu1 %v15216_v24  ;;  %v15254_v23 = vld [vmem:[%s16269_s5 + $0x998] sm:$0xff]   ;;  %v15255_v24 = vld [vmem:[%s16269_s5 + $0x960] sm:$0xff]  }
 0x15a   : > { %13802 = vmatpush3.bf16.msra.mxu0 %v15217_v25  ;;  %v15256_v25 = vld [vmem:[%s16269_s5 + $0x9e0] sm:$0xff]  }
 0x15b   : > { %13803 = vmatprep.subr.bf16.mxu0 %v15219_v27  ;;  %13824 = vmatpush3.bf16.msra.mxu1 %v15218_v26  ;;  %v15257_v26 = vld [vmem:[%s16269_s5 + $0x920] sm:$0xff]  }
 0x15c   : > { %13825 = vmatprep.subr.bf16.mxu1 %v15220_v28  ;;  %v15258_v27 = vld [vmem:[%s16269_s5 + $0x9a0] sm:$0xff]   ;;  %v15259_v28 = vld [vmem:[%s16269_s5 + $0x968] sm:$0xff]  }
 0x15e   : > { %13804 = vmatpush3.bf16.msra.mxu0 %v15221_v29  ;;  %v15260_v29 = vld [vmem:[%s16269_s5 + $0x9e8] sm:$0xff]  }
 0x15f   : > { %13805 = vmatprep.subr.bf16.mxu0 %v15223_v31  ;;  %13826 = vmatpush3.bf16.msra.mxu1 %v15222_v30  ;;  %v15261_v30 = vld [vmem:[%s16269_s5 + $0x928] sm:$0xff]  }
 0x160   : > { %13827 = vmatprep.subr.bf16.mxu1 %v15224_v32  ;;  %v15262_v32 = vld [vmem:[%s16269_s5 + $0x9a8] sm:$0xff]  }
 0x162   : > { %13806 = vmatpush3.bf16.msra.mxu0 %v15225_v33 }
 0x163   : > { %13807 = vmatprep.subr.bf16.mxu0 %v15227_v36  ;;  %13828 = vmatpush3.bf16.msra.mxu1 %v15226_v34  ;;  %v15263_v34 = vld [vmem:[%s16269_s5 + $0x970] sm:$0xff]  }
 0x164   : > { %v13505_v40 = vpop.f32.mrb[4].mxu0  ;;  %13829 = vmatprep.subr.bf16.mxu1 %v15228_v37 }
 0x165   : > { %v13506_v42 = vpop.f32.mrb[5].mxu0  ;;  %v13527_v44 = vpop.f32.mrb[4].mxu1 }
 0x166   : > { %v13507_v45 = vadd.f32 %v13506_v42, %v13505_v40  ;;  %v13508_v46 = vpop.f32.mrb[6].mxu0  ;;  %v13528_v47 = vpop.f32.mrb[5].mxu1  ;;  %13808 = vmatpush3.bf16.msra.mxu0 %v15229_v38  ;;  %v15265_v40 = vld [vmem:[%s16269_s5 + $0x930] sm:$0xff]  }
 0x167   : > { %v13509_v48 = vpop.f32.mrb[7].mxu0  ;;  %v13529_v52 = vadd.f32 %v13528_v47, %v13527_v44  ;;  %v13530_v53 = vpop.f32.mrb[6].mxu1  ;;  %13809 = vmatprep.subr.bf16.mxu0 %v15231_v41  ;;  %13830 = vmatpush3.bf16.msra.mxu1 %v15230_v39  ;;  %v15264_v39 = vld [vmem:[%s16269_s5 + $0x9f0] sm:$0xff]  }
 0x168   : > { %v9767_v51 = vadd.f32 %v13507_v45, %v16593_v10  ;;  %v13531_v55 = vpop.f32.mrb[7].mxu1  ;;  %13831 = vmatprep.subr.bf16.mxu1 %v15232_v43  ;;  %v2619_v10 = vcombine.high %v2609_v5, %v2609_v5  ;;  %v15266_v46 = vld [vmem:[%s16269_s5 + $0x9b0] sm:$0xff]   ;;  %v15267_v48 = vld [vmem:[%s16269_s5 + $0x978] sm:$0xff]   ;;  %v2602_v53 = vrot.slane %v16642_v3, %v16311_v35 }
 0x169   : > { %v15273_v55 = vld [vmem:[%s16269_s5 + $0xac0] sm:$0xff]   ;;  %v15284_v3 = vld [vmem:[%s16269_s5 + $0xa58] sm:$0xff]  }
 0x16a   : > { %v16630_v57 = vadd.f32 %v13529_v52, %v9767_v51  ;;  %13810 = vmatpush3.bf16.msra.mxu0 %v15233_v49  ;;  %10364 = vmatprep.mubr.bf16.mxu1 %v2619_v10  ;;  %v15269_v51 = vld [vmem:[%s16269_s5 + $0x938] sm:$0xff]   ;;  %v15291_v10 = vld [vmem:[%s16269_s5 + $0xaa0] sm:$0xff]  }
 0x16b   : > { %13811 = vmatprep.subr.bf16.mxu0 %v15235_v54  ;;  %13832 = vmatpush3.bf16.msra.mxu1 %v15234_v50  ;;  %v15268_v50 = vld [vmem:[%s16269_s5 + $0x9f8] sm:$0xff]   ;;  %v15272_v54 = vld [vmem:[%s16269_s5 + $0xa40] sm:$0xff]  }
 0x16c   : > { %13833 = vmatprep.subr.bf16.mxu1 %v15236_v56  ;;  %v15270_v52 = vld [vmem:[%s16269_s5 + $0x9b8] sm:$0xff]   ;;  %v15274_v56 = vld [vmem:[%s16269_s5 + $0xa00] sm:$0xff]  }
 0x16d   : > { %v15286_v5 = vld [vmem:[%s16269_s5 + $0xa18] sm:$0xff]  }
 0x16e   : > { %13812 = vmatpush3.bf16.msra.mxu0 %v15237_v58  ;;  %v2618_v58 = vcombine.high %v2602_v53, %v2602_v53 }
 0x16f   : > { %13841 = vmatprep.subr.bf16.mxu0 %v15239_v61  ;;  %13834 = vmatpush3.bf16.msra.mxu1 %v15238_v63  ;;  %v15278_v61 = vld [vmem:[%s16269_s5 + $0xa08] sm:$0xff]   ;;  %v15280_v63 = vld [vmem:[%s16269_s5 + $0xa50] sm:$0xff]  }
 0x170   : > { %13863 = vmatprep.subr.bf16.mxu1 %v15240_v2  ;;  %v15283_v2 = vld [vmem:[%s16269_s5 + $0xa90] sm:$0xff]  }
 0x171   : > { %10325 = vmatmul.mubr.bf16.vlgmr.msra.gmra.mrb[32].mxu0 %v2595_v1  ;;  %v15282_v1 = vld [vmem:[%s16269_s5 + $0xa10] sm:$0xff]  }
 0x172   : > { %13842 = vmatpush3.bf16.msra.mxu0 %v15241_v4  ;;  %10365 = vmatmul.mubr.bf16.vlgmr.msra.gmra.mrb[32].mxu1 %v2617_v8  ;;  %v15285_v4 = vld [vmem:[%s16269_s5 + $0xad8] sm:$0xff]   ;;  %v15289_v8 = vld [vmem:[%s16269_s5 + $0xae0] sm:$0xff]  }
 0x173   : > { %13843 = vmatprep.subr.bf16.mxu0 %v15243_v9  ;;  %13864 = vmatpush3.bf16.msra.mxu1 %v15242_v6  ;;  %v15287_v6 = vld [vmem:[%s16269_s5 + $0xa98] sm:$0xff]   ;;  %v15290_v9 = vld [vmem:[%s16269_s5 + $0xa20] sm:$0xff]  }
 0x174   : > { %10404 = vmatprep.mubr.bf16.mxu0 %v2616_v12  ;;  %13865 = vmatprep.subr.bf16.mxu1 %v15244_v11  ;;  %v15292_v11 = vld [vmem:[%s16269_s5 + $0xa68] sm:$0xff]  }
 0x175   : > { %10444 = vmatprep.mubr.bf16.mxu1 %v2620_v15  ;;  %v15293_v12 = vld [vmem:[%s16269_s5 + $0xae8] sm:$0xff]  }
 0x176   : > { %13844 = vmatpush3.bf16.msra.mxu0 %v15245_v13  ;;  %v15294_v13 = vld [vmem:[%s16269_s5 + $0xa28] sm:$0xff]  }
 0x177   : > { %13845 = vmatprep.subr.bf16.mxu0 %v15247_v16  ;;  %13866 = vmatpush3.bf16.msra.mxu1 %v15246_v14  ;;  %v15295_v15 = vld [vmem:[%s16269_s5 + $0xaa8] sm:$0xff]  }
 0x178   : > { %13867 = vmatprep.subr.bf16.mxu1 %v15248_v17  ;;  %v15296_v17 = vld [vmem:[%s16269_s5 + $0xa70] sm:$0xff]  }
 0x17a   : > { %13846 = vmatpush3.bf16.msra.mxu0 %v15249_v18 }
 0x17b   : > { %13847 = vmatprep.subr.bf16.mxu0 %v15251_v20  ;;  %13868 = vmatpush3.bf16.msra.mxu1 %v15250_v19 }
 0x17c   : > { %13869 = vmatprep.subr.bf16.mxu1 %v15252_v21 }
 0x17e   : > { %13848 = vmatpush3.bf16.msra.mxu0 %v15253_v22 }
 0x17f   : > { %13849 = vmatprep.subr.bf16.mxu0 %v15255_v24  ;;  %13870 = vmatpush3.bf16.msra.mxu1 %v15254_v23  ;;  %v15297_v23 = vld [vmem:[%s16269_s5 + $0xaf0] sm:$0xff]  }
 0x180   : > { %13871 = vmatprep.subr.bf16.mxu1 %v15256_v25  ;;  %v15298_v24 = vld [vmem:[%s16269_s5 + $0xa30] sm:$0xff]  }
 0x182   : > { %13850 = vmatpush3.bf16.msra.mxu0 %v15257_v26 }
 0x183   : > { %13851 = vmatprep.subr.bf16.mxu0 %v15259_v28  ;;  %13872 = vmatpush3.bf16.msra.mxu1 %v15258_v27  ;;  %v15299_v28 = vld [vmem:[%s16269_s5 + $0xab0] sm:$0xff]  }
 0x184   : > { %v13549_v31 = vpop.f32.mrb[8].mxu0  ;;  %13873 = vmatprep.subr.bf16.mxu1 %v15260_v29 }
 0x185   : > { %v13550_v33 = vpop.f32.mrb[9].mxu0  ;;  %v13571_v36 = vpop.f32.mrb[8].mxu1 }
 0x186   : > { %v13551_v37 = vadd.f32 %v13550_v33, %v13549_v31  ;;  %v13552_v38 = vpop.f32.mrb[10].mxu0  ;;  %v13572_v41 = vpop.f32.mrb[9].mxu1  ;;  %13852 = vmatpush3.bf16.msra.mxu0 %v15261_v30  ;;  %v15300_v30 = vld [vmem:[%s16269_s5 + $0xa78] sm:$0xff]  }
 0x187   : > { %v13553_v42 = vpop.f32.mrb[11].mxu0  ;;  %v13573_v44 = vadd.f32 %v13572_v41, %v13571_v36  ;;  %v13574_v45 = vpop.f32.mrb[10].mxu1  ;;  %13853 = vmatprep.subr.bf16.mxu0 %v15263_v34  ;;  %13874 = vmatpush3.bf16.msra.mxu1 %v15262_v32  ;;  %v15301_v32 = vld [vmem:[%s16269_s5 + $0xaf8] sm:$0xff]   ;;  %v228_v34 = vld [vmem:[%s17663_s0 + $0x28] sm:$0xff] }
 0x188   : > { %v9847_v43 = vadd.f32 %v13551_v37, %v16630_v57  ;;  %v13575_v47 = vpop.f32.mrb[11].mxu1  ;;  %13875 = vmatprep.subr.bf16.mxu1 %v15264_v39  ;;  %v15275_v57 = vld [vmem:[%s16269_s5 + $0xa80] sm:$0xff]   ;;  %v15302_v33 = vld [vmem:[%s16269_s5 + $0xa38] sm:$0xff]   ;;  %v2628_v36 = vrot.slane %v228_v34, %v16311_v35  ;;  %v2621_v38 = vcombine.high %v228_v34, %v228_v34  ;;  %v15341_v34 = vld [vmem:[%s16269_s5 + $0xc48] sm:$0xff]  }
 0x189   : > { %v15304_v37 = vld [vmem:[%s16269_s5 + $0xb40] sm:$0xff]   ;;  %v15303_v39 = vld [vmem:[%s16269_s5 + $0xab8] sm:$0xff]  }
 0x18a   : > { %v16676_v49 = vadd.f32 %v13573_v44, %v9847_v43  ;;  %13854 = vmatpush3.bf16.msra.mxu0 %v15265_v40  ;;  %v2636_v40 = vcombine.high %v2628_v36, %v2628_v36  ;;  %v2644_v41 = vrot.slane %v2628_v36, %v16311_v35  ;;  %v15305_v42 = vld [vmem:[%s16269_s5 + $0xbc0] sm:$0xff]   ;;  %v16726_v43 = vrot.slane %v2621_v38, %v16311_v35  ;;  %v15342_v36 = vld [vmem:[%s16269_s5 + $0xcc8] sm:$0xff]  }
 0x18b   : > { %13855 = vmatprep.subr.bf16.mxu0 %v15267_v48  ;;  %13876 = vmatpush3.bf16.msra.mxu1 %v15266_v46  ;;  %v15306_v44 = vld [vmem:[%s16269_s5 + $0xb00] sm:$0xff]   ;;  %v15344_v38 = vld [vmem:[%s16269_s5 + $0xc88] sm:$0xff]  }
 0x18c   : > { %13877 = vmatprep.subr.bf16.mxu1 %v15268_v50  ;;  %v2658_v45 = vrot.slane %v2636_v40, %v16311_v35  ;;  %v15307_v46 = vld [vmem:[%s16269_s5 + $0xb80] sm:$0xff]   ;;  %v2637_v47 = vcombine.high %v16726_v43, %v16726_v43  ;;  %v2666_v48 = vcombine.high %v2644_v41, %v2644_v41  ;;  %v15346_v40 = vld [vmem:[%s16269_s5 + $0xcd0] sm:$0xff]  }
 0x18e   : > { %13856 = vmatpush3.bf16.msra.mxu0 %v15269_v51  ;;  %v2668_v50 = vcombine.high %v2658_v45, %v2658_v45  ;;  %v15309_v51 = vld [vmem:[%s16269_s5 + $0xbc8] sm:$0xff]  }
 0x18f   : > { %13885 = vmatprep.subr.bf16.mxu0 %v15272_v54  ;;  %13878 = vmatpush3.bf16.msra.mxu1 %v15270_v52  ;;  %v2665_v52 = vrot.slane %v2637_v47, %v16311_v35  ;;  %v15311_v54 = vld [vmem:[%s16269_s5 + $0xb88] sm:$0xff]   ;;  %v15353_v47 = vld [vmem:[%s16269_s5 + $0xc60] sm:$0xff]  }
 0x190   : > { %13907 = vmatprep.subr.bf16.mxu1 %v15273_v55 }
 0x191   : > { %10405 = vmatmul.mubr.bf16.vlgmr.msra.gmra.mrb[36].mxu0 %v2602_v53  ;;  %v15310_v53 = vld [vmem:[%s16269_s5 + $0xb08] sm:$0xff]   ;;  %v2669_v55 = vcombine.high %v2665_v52, %v2665_v52 }
 0x192   : > { %13886 = vmatpush3.bf16.msra.mxu0 %v15274_v56  ;;  %10445 = vmatmul.mubr.bf16.vlgmr.msra.gmra.mrb[36].mxu1 %v2618_v58  ;;  %v15312_v56 = vld [vmem:[%s16269_s5 + $0xb50] sm:$0xff]  }
 0x193   : > { %13887 = vmatprep.subr.bf16.mxu0 %v15276_v59  ;;  %13908 = vmatpush3.bf16.msra.mxu1 %v15275_v57  ;;  %v15313_v57 = vld [vmem:[%s16269_s5 + $0xbd0] sm:$0xff]  }
 0x194   : > { %13909 = vmatprep.subr.bf16.mxu1 %v15277_v60  ;;  %10484 = vmatprep.mubr.bf16.mxu0 %v2658_v45  ;;  %v15314_v58 = vld [vmem:[%s16269_s5 + $0xb10] sm:$0xff]   ;;  %v15316_v60 = vld [vmem:[%s16269_s5 + $0xb58] sm:$0xff]  }
 0x195   : > { %10524 = vmatprep.mubr.bf16.mxu1 %v2668_v50  ;;  %v15315_v59 = vld [vmem:[%s16269_s5 + $0xb90] sm:$0xff]   ;;  %v15351_v45 = vld [vmem:[%s16269_s5 + $0xc18] sm:$0xff]   ;;  %v15356_v50 = vld [vmem:[%s16269_s5 + $0xca0] sm:$0xff]  }
 0x196   : > { %13888 = vmatpush3.bf16.msra.mxu0 %v15278_v61  ;;  %v15317_v61 = vld [vmem:[%s16269_s5 + $0xbd8] sm:$0xff]  }
 0x197   : > { %13889 = vmatprep.subr.bf16.mxu0 %v15280_v63  ;;  %13910 = vmatpush3.bf16.msra.mxu1 %v15279_v62  ;;  %v15318_v62 = vld [vmem:[%s16269_s5 + $0xb18] sm:$0xff]  }
 0x198   : > { %13911 = vmatprep.subr.bf16.mxu1 %v15281_v0  ;;  %v15319_v63 = vld [vmem:[%s16269_s5 + $0xb98] sm:$0xff]   ;;  %v15320_v0 = vld [vmem:[%s16269_s5 + $0xb60] sm:$0xff]  }
 0x19a   : > { %13890 = vmatpush3.bf16.msra.mxu0 %v15282_v1  ;;  %v15321_v1 = vld [vmem:[%s16269_s5 + $0xbe0] sm:$0xff]  }
 0x19b   : > { %13891 = vmatprep.subr.bf16.mxu0 %v15284_v3  ;;  %13912 = vmatpush3.bf16.msra.mxu1 %v15283_v2  ;;  %v15322_v2 = vld [vmem:[%s16269_s5 + $0xb20] sm:$0xff]  }
 0x19c   : > { %13913 = vmatprep.subr.bf16.mxu1 %v15285_v4  ;;  %v15323_v3 = vld [vmem:[%s16269_s5 + $0xba0] sm:$0xff]   ;;  %v15324_v4 = vld [vmem:[%s16269_s5 + $0xb68] sm:$0xff]  }
 0x19e   : > { %13892 = vmatpush3.bf16.msra.mxu0 %v15286_v5  ;;  %v15325_v5 = vld [vmem:[%s16269_s5 + $0xbe8] sm:$0xff]  }
 0x19f   : > { %13893 = vmatprep.subr.bf16.mxu0 %v15288_v7  ;;  %13914 = vmatpush3.bf16.msra.mxu1 %v15287_v6  ;;  %v15326_v7 = vld [vmem:[%s16269_s5 + $0xb28] sm:$0xff]  }
 0x1a0   : > { %13915 = vmatprep.subr.bf16.mxu1 %v15289_v8 }
 0x1a2   : > { %13894 = vmatpush3.bf16.msra.mxu0 %v15290_v9  ;;  %v15327_v9 = vld [vmem:[%s16269_s5 + $0xba8] sm:$0xff]  }
 0x1a3   : > { %13895 = vmatprep.subr.bf16.mxu0 %v15292_v11  ;;  %13916 = vmatpush3.bf16.msra.mxu1 %v15291_v10 }
 0x1a4   : > { %v13593_v14 = vpop.f32.mrb[12].mxu0  ;;  %13917 = vmatprep.subr.bf16.mxu1 %v15293_v12 }
 0x1a5   : > { %v13594_v16 = vpop.f32.mrb[13].mxu0  ;;  %v13615_v18 = vpop.f32.mrb[12].mxu1 }
 0x1a6   : > { %v13595_v19 = vadd.f32 %v13594_v16, %v13593_v14  ;;  %v13596_v20 = vpop.f32.mrb[14].mxu0  ;;  %v13616_v21 = vpop.f32.mrb[13].mxu1  ;;  %13896 = vmatpush3.bf16.msra.mxu0 %v15294_v13  ;;  %v15328_v13 = vld [vmem:[%s16269_s5 + $0xb70] sm:$0xff]  }
 0x1a7   : > { %v13597_v22 = vpop.f32.mrb[15].mxu0  ;;  %v13617_v26 = vadd.f32 %v13616_v21, %v13615_v18  ;;  %v13618_v27 = vpop.f32.mrb[14].mxu1  ;;  %13897 = vmatprep.subr.bf16.mxu0 %v15296_v17  ;;  %13918 = vmatpush3.bf16.msra.mxu1 %v15295_v15  ;;  %v15329_v14 = vld [vmem:[%s16269_s5 + $0xbf0] sm:$0xff]  }
 0x1a8   : > { %v9927_v25 = vadd.f32 %v13595_v19, %v16676_v49  ;;  %v13619_v29 = vpop.f32.mrb[15].mxu1  ;;  %13919 = vmatprep.subr.bf16.mxu1 %v15297_v23  ;;  %v15308_v49 = vld [vmem:[%s16269_s5 + $0xb48] sm:$0xff]   ;;  %v15330_v20 = vld [vmem:[%s16269_s5 + $0xb30] sm:$0xff]   ;;  %v15335_v27 = vld [vmem:[%s16269_s5 + $0xbb8] sm:$0xff]  }
 0x1a9   : > { %v15331_v22 = vld [vmem:[%s16269_s5 + $0xbb0] sm:$0xff]   ;;  %v15337_v29 = vld [vmem:[%s16269_s5 + $0xc40] sm:$0xff]  }
 0x1aa   : > { %v16713_v31 = vadd.f32 %v13617_v26, %v9927_v25  ;;  %13898 = vmatpush3.bf16.msra.mxu0 %v15298_v24  ;;  %v15332_v24 = vld [vmem:[%s16269_s5 + $0xb78] sm:$0xff]  }
 0x1ab   : > { %13899 = vmatprep.subr.bf16.mxu0 %v15300_v30  ;;  %13920 = vmatpush3.bf16.msra.mxu1 %v15299_v28  ;;  %v15333_v25 = vld [vmem:[%s16269_s5 + $0xbf8] sm:$0xff]   ;;  %v2651_v28 = vrot.slane %v16726_v43, %v16311_v35  ;;  %v15338_v30 = vld [vmem:[%s16269_s5 + $0xcc0] sm:$0xff]  }
 0x1ac   : > { %13921 = vmatprep.subr.bf16.mxu1 %v15301_v32  ;;  %v15334_v26 = vld [vmem:[%s16269_s5 + $0xb38] sm:$0xff]   ;;  %v15340_v32 = vld [vmem:[%s16269_s5 + $0xc80] sm:$0xff]  }
 0x1ad   : > { %v15349_v43 = vld [vmem:[%s16269_s5 + $0xc58] sm:$0xff]  }
 0x1ae   : > { %13900 = vmatpush3.bf16.msra.mxu0 %v15302_v33  ;;  %v2667_v33 = vcombine.high %v2651_v28, %v2651_v28 }
 0x1af   : > { %13929 = vmatprep.subr.bf16.mxu0 %v15304_v37  ;;  %13922 = vmatpush3.bf16.msra.mxu1 %v15303_v39  ;;  %v15343_v37 = vld [vmem:[%s16269_s5 + $0xc08] sm:$0xff]   ;;  %v15345_v39 = vld [vmem:[%s16269_s5 + $0xc50] sm:$0xff]  }
 0x1b0   : > { %13951 = vmatprep.subr.bf16.mxu1 %v15305_v42  ;;  %v15348_v42 = vld [vmem:[%s16269_s5 + $0xc90] sm:$0xff]  }
 0x1b1   : > { %10485 = vmatmul.mubr.bf16.vlgmr.msra.gmra.mrb[40].mxu0 %v2644_v41  ;;  %v15347_v41 = vld [vmem:[%s16269_s5 + $0xc10] sm:$0xff]  }
 0x1b2   : > { %13930 = vmatpush3.bf16.msra.mxu0 %v15306_v44  ;;  %10525 = vmatmul.mubr.bf16.vlgmr.msra.gmra.mrb[40].mxu1 %v2666_v48  ;;  %v15350_v44 = vld [vmem:[%s16269_s5 + $0xcd8] sm:$0xff]   ;;  %v15354_v48 = vld [vmem:[%s16269_s5 + $0xce0] sm:$0xff]  }
 0x1b3   : > { %13931 = vmatprep.subr.bf16.mxu0 %v15308_v49  ;;  %13952 = vmatpush3.bf16.msra.mxu1 %v15307_v46  ;;  %v15352_v46 = vld [vmem:[%s16269_s5 + $0xc98] sm:$0xff]   ;;  %v15355_v49 = vld [vmem:[%s16269_s5 + $0xc20] sm:$0xff]  }
 0x1b4   : > { %10564 = vmatprep.mubr.bf16.mxu0 %v2665_v52  ;;  %13953 = vmatprep.subr.bf16.mxu1 %v15309_v51  ;;  %v15357_v51 = vld [vmem:[%s16269_s5 + $0xc68] sm:$0xff]  }
 0x1b5   : > { %10604 = vmatprep.mubr.bf16.mxu1 %v2669_v55  ;;  %v15358_v52 = vld [vmem:[%s16269_s5 + $0xce8] sm:$0xff]  }
 0x1b6   : > { %13932 = vmatpush3.bf16.msra.mxu0 %v15310_v53 }
 0x1b7   : > { %13933 = vmatprep.subr.bf16.mxu0 %v15312_v56  ;;  %13954 = vmatpush3.bf16.msra.mxu1 %v15311_v54  ;;  %v15359_v54 = vld [vmem:[%s16269_s5 + $0xc28] sm:$0xff]   ;;  %v15361_v56 = vld [vmem:[%s16269_s5 + $0xc70] sm:$0xff]  }
 0x1b8   : > { %13955 = vmatprep.subr.bf16.mxu1 %v15313_v57 }
 0x1ba   : > { %13934 = vmatpush3.bf16.msra.mxu0 %v15314_v58 }
 0x1bb   : > { %13935 = vmatprep.subr.bf16.mxu0 %v15316_v60  ;;  %13956 = vmatpush3.bf16.msra.mxu1 %v15315_v59 }
 0x1bc   : > { %13957 = vmatprep.subr.bf16.mxu1 %v15317_v61  ;;  %v15360_v61 = vld [vmem:[%s16269_s5 + $0xca8] sm:$0xff]  }
 0x1be   : > { %13936 = vmatpush3.bf16.msra.mxu0 %v15318_v62 }
 0x1bf   : > { %13937 = vmatprep.subr.bf16.mxu0 %v15320_v0  ;;  %13958 = vmatpush3.bf16.msra.mxu1 %v15319_v63  ;;  %v15362_v63 = vld [vmem:[%s16269_s5 + $0xcf0] sm:$0xff]  }
 0x1c0   : > { %13959 = vmatprep.subr.bf16.mxu1 %v15321_v1 }
 0x1c2   : > { %13938 = vmatpush3.bf16.msra.mxu0 %v15322_v2 }
 0x1c3   : > { %13939 = vmatprep.subr.bf16.mxu0 %v15324_v4  ;;  %13960 = vmatpush3.bf16.msra.mxu1 %v15323_v3  ;;  %v15363_v3 = vld [vmem:[%s16269_s5 + $0xc30] sm:$0xff]  }
 0x1c4   : > { %v13637_v6 = vpop.f32.mrb[16].mxu0  ;;  %13961 = vmatprep.subr.bf16.mxu1 %v15325_v5  ;;  %v15365_v5 = vld [vmem:[%s16269_s5 + $0xc78] sm:$0xff]  }
 0x1c5   : > { %v13638_v8 = vpop.f32.mrb[17].mxu0  ;;  %v13659_v10 = vpop.f32.mrb[16].mxu1 }
 0x1c6   : > { %v13639_v11 = vadd.f32 %v13638_v8, %v13637_v6  ;;  %v13640_v12 = vpop.f32.mrb[18].mxu0  ;;  %v13660_v15 = vpop.f32.mrb[17].mxu1  ;;  %13940 = vmatpush3.bf16.msra.mxu0 %v15326_v7  ;;  %v15364_v7 = vld [vmem:[%s16269_s5 + $0xcb0] sm:$0xff]   ;;  %v15366_v8 = vld [vmem:[%s16269_s5 + $0xcf8] sm:$0xff]  }
 0x1c7   : > { %v13641_v16 = vpop.f32.mrb[19].mxu0  ;;  %v13661_v18 = vadd.f32 %v13660_v15, %v13659_v10  ;;  %v13662_v19 = vpop.f32.mrb[18].mxu1  ;;  %13941 = vmatprep.subr.bf16.mxu0 %v15328_v13  ;;  %13962 = vmatpush3.bf16.msra.mxu1 %v15327_v9  ;;  %v15367_v9 = vld [vmem:[%s16269_s5 + $0xc38] sm:$0xff]   ;;  %v229_v10 = vld [vmem:[%s17663_s0 + $0x30] sm:$0xff]  ;;  %v15369_v12 = vld [vmem:[%s16269_s5 + $0xd40] sm:$0xff]  }
 0x1c8   : > { %v10007_v17 = vadd.f32 %v13639_v11, %v16713_v31  ;;  %v13663_v21 = vpop.f32.mrb[19].mxu1  ;;  %13963 = vmatprep.subr.bf16.mxu1 %v15329_v14  ;;  %v15339_v31 = vld [vmem:[%s16269_s5 + $0xc00] sm:$0xff]   ;;  %v2677_v11 = vrot.slane %v229_v10, %v16311_v35  ;;  %v2670_v13 = vcombine.high %v229_v10, %v229_v10  ;;  %v15368_v14 = vld [vmem:[%s16269_s5 + $0xcb8] sm:$0xff]   ;;  %v15406_v10 = vld [vmem:[%s16269_s5 + $0xe48] sm:$0xff]  }
 0x1c9   : > { %v15371_v19 = vld [vmem:[%s16269_s5 + $0xd00] sm:$0xff]  }
 0x1ca   : > { %v16759_v23 = vadd.f32 %v13661_v18, %v10007_v17  ;;  %13942 = vmatpush3.bf16.msra.mxu0 %v15330_v20  ;;  %v2685_v15 = vcombine.high %v2677_v11, %v2677_v11  ;;  %v2693_v16 = vrot.slane %v2677_v11, %v16311_v35  ;;  %v15370_v17 = vld [vmem:[%s16269_s5 + $0xdc0] sm:$0xff]   ;;  %v16810_v18 = vrot.slane %v2670_v13, %v16311_v35  ;;  %v15407_v11 = vld [vmem:[%s16269_s5 + $0xec8] sm:$0xff]  }
 0x1cb   : > { %13943 = vmatprep.subr.bf16.mxu0 %v15332_v24  ;;  %13964 = vmatpush3.bf16.msra.mxu1 %v15331_v22  ;;  %v15372_v21 = vld [vmem:[%s16269_s5 + $0xd80] sm:$0xff]   ;;  %v15373_v24 = vld [vmem:[%s16269_s5 + $0xd48] sm:$0xff]  }
 0x1cc   : > { %13965 = vmatprep.subr.bf16.mxu1 %v15333_v25  ;;  %v2707_v20 = vrot.slane %v2685_v15, %v16311_v35  ;;  %v2686_v22 = vcombine.high %v16810_v18, %v16810_v18  ;;  %v15409_v13 = vld [vmem:[%s16269_s5 + $0xe88] sm:$0xff]   ;;  %v15411_v15 = vld [vmem:[%s16269_s5 + $0xed0] sm:$0xff]  }
 0x1ce   : > { %13944 = vmatpush3.bf16.msra.mxu0 %v15334_v26  ;;  %v2717_v25 = vcombine.high %v2707_v20, %v2707_v20  ;;  %v15374_v26 = vld [vmem:[%s16269_s5 + $0xdc8] sm:$0xff]  }
 0x1cf   : > { %13973 = vmatprep.subr.bf16.mxu0 %v15337_v29  ;;  %13966 = vmatpush3.bf16.msra.mxu1 %v15335_v27  ;;  %v2714_v27 = vrot.slane %v2686_v22, %v16311_v35  ;;  %v15376_v29 = vld [vmem:[%s16269_s5 + $0xd88] sm:$0xff]   ;;  %v15418_v22 = vld [vmem:[%s16269_s5 + $0xe60] sm:$0xff]  }
 0x1d0   : > { %13995 = vmatprep.subr.bf16.mxu1 %v15338_v30 }
 0x1d1   : > { %10565 = vmatmul.mubr.bf16.vlgmr.msra.gmra.mrb[44].mxu0 %v2651_v28  ;;  %v15375_v28 = vld [vmem:[%s16269_s5 + $0xd08] sm:$0xff]   ;;  %v2718_v30 = vcombine.high %v2714_v27, %v2714_v27 }
 0x1d2   : > { %13974 = vmatpush3.bf16.msra.mxu0 %v15339_v31  ;;  %10605 = vmatmul.mubr.bf16.vlgmr.msra.gmra.mrb[44].mxu1 %v2667_v33  ;;  %v15377_v31 = vld [vmem:[%s16269_s5 + $0xd50] sm:$0xff]  }
 0x1d3   : > { %13975 = vmatprep.subr.bf16.mxu0 %v15341_v34  ;;  %13996 = vmatpush3.bf16.msra.mxu1 %v15340_v32  ;;  %v15378_v32 = vld [vmem:[%s16269_s5 + $0xdd0] sm:$0xff]  }
 0x1d4   : > { %13997 = vmatprep.subr.bf16.mxu1 %v15342_v36  ;;  %10644 = vmatprep.mubr.bf16.mxu0 %v2707_v20  ;;  %v15379_v33 = vld [vmem:[%s16269_s5 + $0xd10] sm:$0xff]   ;;  %v15381_v36 = vld [vmem:[%s16269_s5 + $0xd58] sm:$0xff]  }
 0x1d5   : > { %10684 = vmatprep.mubr.bf16.mxu1 %v2717_v25  ;;  %v15380_v34 = vld [vmem:[%s16269_s5 + $0xd90] sm:$0xff]   ;;  %v15416_v20 = vld [vmem:[%s16269_s5 + $0xe18] sm:$0xff]   ;;  %v15421_v25 = vld [vmem:[%s16269_s5 + $0xea0] sm:$0xff]  }
 0x1d6   : > { %13976 = vmatpush3.bf16.msra.mxu0 %v15343_v37  ;;  %v15382_v37 = vld [vmem:[%s16269_s5 + $0xdd8] sm:$0xff]  }
 0x1d7   : > { %13977 = vmatprep.subr.bf16.mxu0 %v15345_v39  ;;  %13998 = vmatpush3.bf16.msra.mxu1 %v15344_v38  ;;  %v15383_v38 = vld [vmem:[%s16269_s5 + $0xd18] sm:$0xff]  }
 0x1d8   : > { %13999 = vmatprep.subr.bf16.mxu1 %v15346_v40  ;;  %v15384_v39 = vld [vmem:[%s16269_s5 + $0xd98] sm:$0xff]   ;;  %v15385_v40 = vld [vmem:[%s16269_s5 + $0xd60] sm:$0xff]  }
 0x1da   : > { %13978 = vmatpush3.bf16.msra.mxu0 %v15347_v41  ;;  %v15386_v41 = vld [vmem:[%s16269_s5 + $0xde0] sm:$0xff]  }
 0x1db   : > { %13979 = vmatprep.subr.bf16.mxu0 %v15349_v43  ;;  %14000 = vmatpush3.bf16.msra.mxu1 %v15348_v42  ;;  %v15387_v42 = vld [vmem:[%s16269_s5 + $0xd20] sm:$0xff]  }
 0x1dc   : > { %14001 = vmatprep.subr.bf16.mxu1 %v15350_v44  ;;  %v15388_v43 = vld [vmem:[%s16269_s5 + $0xda0] sm:$0xff]   ;;  %v15389_v44 = vld [vmem:[%s16269_s5 + $0xd68] sm:$0xff]  }
 0x1de   : > { %13980 = vmatpush3.bf16.msra.mxu0 %v15351_v45  ;;  %v15390_v45 = vld [vmem:[%s16269_s5 + $0xde8] sm:$0xff]  }
 0x1df   : > { %13981 = vmatprep.subr.bf16.mxu0 %v15353_v47  ;;  %14002 = vmatpush3.bf16.msra.mxu1 %v15352_v46  ;;  %v15391_v47 = vld [vmem:[%s16269_s5 + $0xd28] sm:$0xff]  }
 0x1e0   : > { %14003 = vmatprep.subr.bf16.mxu1 %v15354_v48 }
 0x1e2   : > { %13982 = vmatpush3.bf16.msra.mxu0 %v15355_v49  ;;  %v15392_v49 = vld [vmem:[%s16269_s5 + $0xda8] sm:$0xff]  }
 0x1e3   : > { %13983 = vmatprep.subr.bf16.mxu0 %v15357_v51  ;;  %14004 = vmatpush3.bf16.msra.mxu1 %v15356_v50 }
 0x1e4   : > { %v13681_v53 = vpop.f32.mrb[20].mxu0  ;;  %14005 = vmatprep.subr.bf16.mxu1 %v15358_v52 }
 0x1e5   : > { %v13682_v55 = vpop.f32.mrb[21].mxu0  ;;  %v13703_v57 = vpop.f32.mrb[20].mxu1 }
 0x1e6   : > { %v13683_v58 = vadd.f32 %v13682_v55, %v13681_v53  ;;  %v13684_v59 = vpop.f32.mrb[22].mxu0  ;;  %v13704_v60 = vpop.f32.mrb[21].mxu1  ;;  %13984 = vmatpush3.bf16.msra.mxu0 %v15359_v54  ;;  %v15393_v53 = vld [vmem:[%s16269_s5 + $0xd70] sm:$0xff]  }
 0x1e7   : > { %v13685_v62 = vpop.f32.mrb[23].mxu0  ;;  %v13705_v1 = vadd.f32 %v13704_v60, %v13703_v57  ;;  %v13706_v2 = vpop.f32.mrb[22].mxu1  ;;  %13985 = vmatprep.subr.bf16.mxu0 %v15361_v56  ;;  %14006 = vmatpush3.bf16.msra.mxu1 %v15360_v61  ;;  %v15394_v54 = vld [vmem:[%s16269_s5 + $0xdf0] sm:$0xff]  }
 0x1e8   : > { %v10087_v0 = vadd.f32 %v13683_v58, %v16759_v23  ;;  %v13707_v4 = vpop.f32.mrb[23].mxu1  ;;  %14007 = vmatprep.subr.bf16.mxu1 %v15362_v63  ;;  %v2715_v23 = vcombine.high %v2693_v16, %v2693_v16  ;;  %v15395_v60 = vld [vmem:[%s16269_s5 + $0xd30] sm:$0xff]   ;;  %v15399_v2 = vld [vmem:[%s16269_s5 + $0xd38] sm:$0xff]  }
 0x1e9   : > { %v15396_v62 = vld [vmem:[%s16269_s5 + $0xdb0] sm:$0xff]   ;;  %v2700_v4 = vrot.slane %v16810_v18, %v16311_v35  ;;  %v15414_v18 = vld [vmem:[%s16269_s5 + $0xe58] sm:$0xff]  }
 0x1ea   : > { %v16796_v6 = vadd.f32 %v13705_v1, %v10087_v0  ;;  %13986 = vmatpush3.bf16.msra.mxu0 %v15363_v3  ;;  %v15397_v0 = vld [vmem:[%s16269_s5 + $0xd78] sm:$0xff]  }
 0x1eb   : > { %13987 = vmatprep.subr.bf16.mxu0 %v15365_v5  ;;  %14008 = vmatpush3.bf16.msra.mxu1 %v15364_v7  ;;  %v15398_v1 = vld [vmem:[%s16269_s5 + $0xdf8] sm:$0xff]   ;;  %v15402_v5 = vld [vmem:[%s16269_s5 + $0xe40] sm:$0xff]  }
 0x1ec   : > { %14009 = vmatprep.subr.bf16.mxu1 %v15366_v8  ;;  %v15400_v3 = vld [vmem:[%s16269_s5 + $0xdb8] sm:$0xff]   ;;  %v15404_v7 = vld [vmem:[%s16269_s5 + $0xe00] sm:$0xff]  }
 0x1ed   : > { %v15405_v8 = vld [vmem:[%s16269_s5 + $0xe80] sm:$0xff]  }
 0x1ee   : > { %13988 = vmatpush3.bf16.msra.mxu0 %v15367_v9  ;;  %v2716_v9 = vcombine.high %v2700_v4, %v2700_v4 }
 0x1ef   : > { %14017 = vmatprep.subr.bf16.mxu0 %v15369_v12  ;;  %14010 = vmatpush3.bf16.msra.mxu1 %v15368_v14  ;;  %v15408_v12 = vld [vmem:[%s16269_s5 + $0xe08] sm:$0xff]   ;;  %v15410_v14 = vld [vmem:[%s16269_s5 + $0xe50] sm:$0xff]  }
 0x1f0   : > { %14039 = vmatprep.subr.bf16.mxu1 %v15370_v17  ;;  %v15413_v17 = vld [vmem:[%s16269_s5 + $0xe90] sm:$0xff]  }
 0x1f1   : > { %10645 = vmatmul.mubr.bf16.vlgmr.msra.gmra.mrb[48].mxu0 %v2693_v16  ;;  %v15412_v16 = vld [vmem:[%s16269_s5 + $0xe10] sm:$0xff]  }
 0x1f2   : > { %14018 = vmatpush3.bf16.msra.mxu0 %v15371_v19  ;;  %10685 = vmatmul.mubr.bf16.vlgmr.msra.gmra.mrb[48].mxu1 %v2715_v23  ;;  %v15415_v19 = vld [vmem:[%s16269_s5 + $0xed8] sm:$0xff]   ;;  %v15419_v23 = vld [vmem:[%s16269_s5 + $0xee0] sm:$0xff]  }
 0x1f3   : > { %14019 = vmatprep.subr.bf16.mxu0 %v15373_v24  ;;  %14040 = vmatpush3.bf16.msra.mxu1 %v15372_v21  ;;  %v15417_v21 = vld [vmem:[%s16269_s5 + $0xe98] sm:$0xff]   ;;  %v15420_v24 = vld [vmem:[%s16269_s5 + $0xe20] sm:$0xff]  }
 0x1f4   : > { %10724 = vmatprep.mubr.bf16.mxu0 %v2714_v27  ;;  %14041 = vmatprep.subr.bf16.mxu1 %v15374_v26  ;;  %v15422_v26 = vld [vmem:[%s16269_s5 + $0xe68] sm:$0xff]  }
 0x1f5   : > { %10764 = vmatprep.mubr.bf16.mxu1 %v2718_v30  ;;  %v15423_v27 = vld [vmem:[%s16269_s5 + $0xee8] sm:$0xff]  }
 0x1f6   : > { %14020 = vmatpush3.bf16.msra.mxu0 %v15375_v28 }
 0x1f7   : > { %14021 = vmatprep.subr.bf16.mxu0 %v15377_v31  ;;  %14042 = vmatpush3.bf16.msra.mxu1 %v15376_v29  ;;  %v15424_v29 = vld [vmem:[%s16269_s5 + $0xe28] sm:$0xff]   ;;  %v15426_v31 = vld [vmem:[%s16269_s5 + $0xe70] sm:$0xff]  }
 0x1f8   : > { %14043 = vmatprep.subr.bf16.mxu1 %v15378_v32 }
 0x1fa   : > { %14022 = vmatpush3.bf16.msra.mxu0 %v15379_v33 }
 0x1fb   : > { %14023 = vmatprep.subr.bf16.mxu0 %v15381_v36  ;;  %14044 = vmatpush3.bf16.msra.mxu1 %v15380_v34 }
 0x1fc   : > { %14045 = vmatprep.subr.bf16.mxu1 %v15382_v37  ;;  %v15425_v37 = vld [vmem:[%s16269_s5 + $0xea8] sm:$0xff]  }
 0x1fe   : > { %14024 = vmatpush3.bf16.msra.mxu0 %v15383_v38 }
 0x1ff   : > { %14025 = vmatprep.subr.bf16.mxu0 %v15385_v40  ;;  %14046 = vmatpush3.bf16.msra.mxu1 %v15384_v39  ;;  %v15427_v39 = vld [vmem:[%s16269_s5 + $0xef0] sm:$0xff]  }
 0x200   : > { %14047 = vmatprep.subr.bf16.mxu1 %v15386_v41 }
 0x202   : > { %14026 = vmatpush3.bf16.msra.mxu0 %v15387_v42 }
 0x203   : > { %14027 = vmatprep.subr.bf16.mxu0 %v15389_v44  ;;  %14048 = vmatpush3.bf16.msra.mxu1 %v15388_v43  ;;  %v15428_v43 = vld [vmem:[%s16269_s5 + $0xe30] sm:$0xff]  }
 0x204   : > { %v13725_v46 = vpop.f32.mrb[24].mxu0  ;;  %14049 = vmatprep.subr.bf16.mxu1 %v15390_v45  ;;  %v15430_v45 = vld [vmem:[%s16269_s5 + $0xe78] sm:$0xff]  }
 0x205   : > { %v13726_v48 = vpop.f32.mrb[25].mxu0  ;;  %v13747_v50 = vpop.f32.mrb[24].mxu1 }
 0x206   : > { %v13727_v51 = vadd.f32 %v13726_v48, %v13725_v46  ;;  %v13728_v52 = vpop.f32.mrb[26].mxu0  ;;  %v13748_v55 = vpop.f32.mrb[25].mxu1  ;;  %14028 = vmatpush3.bf16.msra.mxu0 %v15391_v47  ;;  %v15429_v47 = vld [vmem:[%s16269_s5 + $0xeb0] sm:$0xff]   ;;  %v15431_v48 = vld [vmem:[%s16269_s5 + $0xef8] sm:$0xff]  }
 0x207   : > { %v13729_v56 = vpop.f32.mrb[27].mxu0  ;;  %v13749_v58 = vadd.f32 %v13748_v55, %v13747_v50  ;;  %v13750_v59 = vpop.f32.mrb[26].mxu1  ;;  %14029 = vmatprep.subr.bf16.mxu0 %v15393_v53  ;;  %14050 = vmatpush3.bf16.msra.mxu1 %v15392_v49  ;;  %v15432_v49 = vld [vmem:[%s16269_s5 + $0xe38] sm:$0xff]   ;;  %v15434_v52 = vld [vmem:[%s16269_s5 + $0xf40] sm:$0xff]  }
 0x208   : > { %v10167_v57 = vadd.f32 %v13727_v51, %v16796_v6  ;;  %v13751_v61 = vpop.f32.mrb[27].mxu1  ;;  %14051 = vmatprep.subr.bf16.mxu1 %v15394_v54  ;;  %v15403_v6 = vld [vmem:[%s16269_s5 + $0xec0] sm:$0xff]   ;;  %v230_v50 = vld [vmem:[%s17663_s0 + $0x38] sm:$0xff] }
 0x209   : > { %v2726_v51 = vrot.slane %v230_v50, %v16311_v35  ;;  %v2719_v53 = vcombine.high %v230_v50, %v230_v50  ;;  %v15433_v54 = vld [vmem:[%s16269_s5 + $0xeb8] sm:$0xff]   ;;  %v15436_v59 = vld [vmem:[%s16269_s5 + $0xf00] sm:$0xff]   ;;  %v15471_v50 = vld [vmem:[%s16269_s5 + $0x1048] sm:$0xff]  }
 0x20a   : > { %v16843_v63 = vadd.f32 %v13749_v58, %v10167_v57  ;;  %14030 = vmatpush3.bf16.msra.mxu0 %v15395_v60  ;;  %v15435_v57 = vld [vmem:[%s16269_s5 + $0xfc0] sm:$0xff]  }
 0x20b   : > { %14031 = vmatprep.subr.bf16.mxu0 %v15397_v0  ;;  %14052 = vmatpush3.bf16.msra.mxu1 %v15396_v62  ;;  %v2734_v55 = vcombine.high %v2726_v51, %v2726_v51  ;;  %v2742_v56 = vrot.slane %v2726_v51, %v16311_v35  ;;  %v16894_v58 = vrot.slane %v2719_v53, %v16311_v35  ;;  %v15437_v61 = vld [vmem:[%s16269_s5 + $0xf80] sm:$0xff]   ;;  %v15438_v0 = vld [vmem:[%s16269_s5 + $0xf48] sm:$0xff]  }
 0x20c   : > { %14053 = vmatprep.subr.bf16.mxu1 %v15398_v1  ;;  %v15472_v51 = vld [vmem:[%s16269_s5 + $0x10c8] sm:$0xff]  }
 0x20d   : > { %v2756_v60 = vrot.slane %v2734_v55, %v16311_v35  ;;  %v2735_v62 = vcombine.high %v16894_v58, %v16894_v58  ;;  %v15474_v53 = vld [vmem:[%s16269_s5 + $0x1088] sm:$0xff]   ;;  %v15476_v55 = vld [vmem:[%s16269_s5 + $0x10d0] sm:$0xff]  }
 0x20e   : > { %14032 = vmatpush3.bf16.msra.mxu0 %v15399_v2  ;;  %v15439_v2 = vld [vmem:[%s16269_s5 + $0xfc8] sm:$0xff]  }
 0x20f   : > { %14061 = vmatprep.subr.bf16.mxu0 %v15402_v5  ;;  %14054 = vmatpush3.bf16.msra.mxu1 %v15400_v3  ;;  %v2766_v1 = vcombine.high %v2756_v60, %v2756_v60  ;;  %v2763_v3 = vrot.slane %v2735_v62, %v16311_v35  ;;  %v15441_v5 = vld [vmem:[%s16269_s5 + $0xf88] sm:$0xff]   ;;  %v15483_v62 = vld [vmem:[%s16269_s5 + $0x1060] sm:$0xff]  }
 0x210   : > { %14083 = vmatprep.subr.bf16.mxu1 %v15403_v6 }
 0x211   : > { %10725 = vmatmul.mubr.bf16.vlgmr.msra.gmra.mrb[52].mxu0 %v2700_v4  ;;  %v15440_v4 = vld [vmem:[%s16269_s5 + $0xf08] sm:$0xff]   ;;  %v2767_v6 = vcombine.high %v2763_v3, %v2763_v3 }
 0x212   : > { %14062 = vmatpush3.bf16.msra.mxu0 %v15404_v7  ;;  %10765 = vmatmul.mubr.bf16.vlgmr.msra.gmra.mrb[52].mxu1 %v2716_v9  ;;  %v15442_v7 = vld [vmem:[%s16269_s5 + $0xf50] sm:$0xff]  }
 0x213   : > { %14063 = vmatprep.subr.bf16.mxu0 %v15406_v10  ;;  %14084 = vmatpush3.bf16.msra.mxu1 %v15405_v8  ;;  %v15443_v8 = vld [vmem:[%s16269_s5 + $0xfd0] sm:$0xff]  }
 0x214   : > { %14085 = vmatprep.subr.bf16.mxu1 %v15407_v11  ;;  %10804 = vmatprep.mubr.bf16.mxu0 %v2756_v60  ;;  %v15444_v9 = vld [vmem:[%s16269_s5 + $0xf10] sm:$0xff]   ;;  %v15446_v11 = vld [vmem:[%s16269_s5 + $0xf58] sm:$0xff]  }
 0x215   : > { %10844 = vmatprep.mubr.bf16.mxu1 %v2766_v1  ;;  %v15445_v10 = vld [vmem:[%s16269_s5 + $0xf90] sm:$0xff]   ;;  %v15481_v60 = vld [vmem:[%s16269_s5 + $0x1018] sm:$0xff]   ;;  %v15486_v1 = vld [vmem:[%s16269_s5 + $0x10a0] sm:$0xff]  }
 0x216   : > { %14064 = vmatpush3.bf16.msra.mxu0 %v15408_v12  ;;  %v15447_v12 = vld [vmem:[%s16269_s5 + $0xfd8] sm:$0xff]  }
 0x217   : > { %14065 = vmatprep.subr.bf16.mxu0 %v15410_v14  ;;  %14086 = vmatpush3.bf16.msra.mxu1 %v15409_v13  ;;  %v15448_v13 = vld [vmem:[%s16269_s5 + $0xf18] sm:$0xff]  }
 0x218   : > { %14087 = vmatprep.subr.bf16.mxu1 %v15411_v15  ;;  %v15449_v14 = vld [vmem:[%s16269_s5 + $0xf98] sm:$0xff]   ;;  %v15450_v15 = vld [vmem:[%s16269_s5 + $0xf60] sm:$0xff]  }
 0x21a   : > { %14066 = vmatpush3.bf16.msra.mxu0 %v15412_v16  ;;  %v15451_v16 = vld [vmem:[%s16269_s5 + $0xfe0] sm:$0xff]  }
 0x21b   : > { %14067 = vmatprep.subr.bf16.mxu0 %v15414_v18  ;;  %14088 = vmatpush3.bf16.msra.mxu1 %v15413_v17  ;;  %v15452_v17 = vld [vmem:[%s16269_s5 + $0xf20] sm:$0xff]  }
 0x21c   : > { %14089 = vmatprep.subr.bf16.mxu1 %v15415_v19  ;;  %v15453_v18 = vld [vmem:[%s16269_s5 + $0xfa0] sm:$0xff]   ;;  %v15454_v19 = vld [vmem:[%s16269_s5 + $0xf68] sm:$0xff]  }
 0x21e   : > { %14068 = vmatpush3.bf16.msra.mxu0 %v15416_v20  ;;  %v15455_v20 = vld [vmem:[%s16269_s5 + $0xfe8] sm:$0xff]  }
 0x21f   : > { %14069 = vmatprep.subr.bf16.mxu0 %v15418_v22  ;;  %14090 = vmatpush3.bf16.msra.mxu1 %v15417_v21  ;;  %v15456_v22 = vld [vmem:[%s16269_s5 + $0xf28] sm:$0xff]  }
 0x220   : > { %14091 = vmatprep.subr.bf16.mxu1 %v15419_v23 }
 0x222   : > { %14070 = vmatpush3.bf16.msra.mxu0 %v15420_v24  ;;  %v15457_v24 = vld [vmem:[%s16269_s5 + $0xfa8] sm:$0xff]  }
 0x223   : > { %14071 = vmatprep.subr.bf16.mxu0 %v15422_v26  ;;  %14092 = vmatpush3.bf16.msra.mxu1 %v15421_v25 }
 0x224   : > { %v13769_v28 = vpop.f32.mrb[28].mxu0  ;;  %14093 = vmatprep.subr.bf16.mxu1 %v15423_v27 }
 0x225   : > { %v13770_v30 = vpop.f32.mrb[29].mxu0  ;;  %v13791_v32 = vpop.f32.mrb[28].mxu1 }
 0x226   : > { %v13771_v33 = vadd.f32 %v13770_v30, %v13769_v28  ;;  %v13772_v34 = vpop.f32.mrb[30].mxu0  ;;  %v13792_v36 = vpop.f32.mrb[29].mxu1  ;;  %14072 = vmatpush3.bf16.msra.mxu0 %v15424_v29  ;;  %v15458_v28 = vld [vmem:[%s16269_s5 + $0xf70] sm:$0xff]  }
 0x227   : > { %v13773_v38 = vpop.f32.mrb[31].mxu0  ;;  %v13793_v41 = vadd.f32 %v13792_v36, %v13791_v32  ;;  %v13794_v42 = vpop.f32.mrb[30].mxu1  ;;  %14073 = vmatprep.subr.bf16.mxu0 %v15426_v31  ;;  %14094 = vmatpush3.bf16.msra.mxu1 %v15425_v37  ;;  %v15459_v29 = vld [vmem:[%s16269_s5 + $0xff0] sm:$0xff]  }
 0x228   : > { %v10247_v40 = vadd.f32 %v13771_v33, %v16843_v63  ;;  %v13795_v44 = vpop.f32.mrb[31].mxu1  ;;  %14095 = vmatprep.subr.bf16.mxu1 %v15427_v39  ;;  %v2764_v63 = vcombine.high %v2742_v56, %v2742_v56  ;;  %v15460_v36 = vld [vmem:[%s16269_s5 + $0xf30] sm:$0xff]   ;;  %v15464_v42 = vld [vmem:[%s16269_s5 + $0xf38] sm:$0xff]  }
 0x229   : > { %v15461_v38 = vld [vmem:[%s16269_s5 + $0xfb0] sm:$0xff]   ;;  %v2749_v44 = vrot.slane %v16894_v58, %v16311_v35  ;;  %v15479_v58 = vld [vmem:[%s16269_s5 + $0x1058] sm:$0xff]  }
 0x22a   : > { %v16880_v46 = vadd.f32 %v13793_v41, %v10247_v40  ;;  %14074 = vmatpush3.bf16.msra.mxu0 %v15428_v43  ;;  %v15462_v40 = vld [vmem:[%s16269_s5 + $0xf78] sm:$0xff]  }
 0x22b   : > { %14075 = vmatprep.subr.bf16.mxu0 %v15430_v45  ;;  %14096 = vmatpush3.bf16.msra.mxu1 %v15429_v47  ;;  %v15463_v41 = vld [vmem:[%s16269_s5 + $0xff8] sm:$0xff]   ;;  %v15467_v45 = vld [vmem:[%s16269_s5 + $0x1040] sm:$0xff]  }
 0x22c   : > { %14097 = vmatprep.subr.bf16.mxu1 %v15431_v48  ;;  %v15465_v43 = vld [vmem:[%s16269_s5 + $0xfb8] sm:$0xff]   ;;  %v15469_v47 = vld [vmem:[%s16269_s5 + $0x1000] sm:$0xff]  }
 0x22d   : > { %v15470_v48 = vld [vmem:[%s16269_s5 + $0x1080] sm:$0xff]  }
 0x22e   : > { %14076 = vmatpush3.bf16.msra.mxu0 %v15432_v49  ;;  %v2765_v49 = vcombine.high %v2749_v44, %v2749_v44 }
 0x22f   : > { %14105 = vmatprep.subr.bf16.mxu0 %v15434_v52  ;;  %14098 = vmatpush3.bf16.msra.mxu1 %v15433_v54  ;;  %v15473_v52 = vld [vmem:[%s16269_s5 + $0x1008] sm:$0xff]   ;;  %v15475_v54 = vld [vmem:[%s16269_s5 + $0x1050] sm:$0xff]  }
 0x230   : > { %14127 = vmatprep.subr.bf16.mxu1 %v15435_v57  ;;  %v15478_v57 = vld [vmem:[%s16269_s5 + $0x1090] sm:$0xff]  }
 0x231   : > { %10805 = vmatmul.mubr.bf16.vlgmr.msra.gmra.mrb[56].mxu0 %v2742_v56  ;;  %v15477_v56 = vld [vmem:[%s16269_s5 + $0x1010] sm:$0xff]  }
 0x232   : > { %14106 = vmatpush3.bf16.msra.mxu0 %v15436_v59  ;;  %10845 = vmatmul.mubr.bf16.vlgmr.msra.gmra.mrb[56].mxu1 %v2764_v63  ;;  %v15480_v59 = vld [vmem:[%s16269_s5 + $0x10d8] sm:$0xff]   ;;  %v15484_v63 = vld [vmem:[%s16269_s5 + $0x10e0] sm:$0xff]  }
 0x233   : > { %14107 = vmatprep.subr.bf16.mxu0 %v15438_v0  ;;  %14128 = vmatpush3.bf16.msra.mxu1 %v15437_v61  ;;  %v15482_v61 = vld [vmem:[%s16269_s5 + $0x1098] sm:$0xff]   ;;  %v15485_v0 = vld [vmem:[%s16269_s5 + $0x1020] sm:$0xff]  }
 0x234   : > { %10884 = vmatprep.mubr.bf16.mxu0 %v2763_v3  ;;  %14129 = vmatprep.subr.bf16.mxu1 %v15439_v2  ;;  %v15487_v2 = vld [vmem:[%s16269_s5 + $0x1068] sm:$0xff]  }
 0x235   : > { %10924 = vmatprep.mubr.bf16.mxu1 %v2767_v6  ;;  %v15488_v3 = vld [vmem:[%s16269_s5 + $0x10e8] sm:$0xff]  }
 0x236   : > { %14108 = vmatpush3.bf16.msra.mxu0 %v15440_v4 }
 0x237   : > { %14109 = vmatprep.subr.bf16.mxu0 %v15442_v7  ;;  %14130 = vmatpush3.bf16.msra.mxu1 %v15441_v5  ;;  %v15489_v5 = vld [vmem:[%s16269_s5 + $0x1028] sm:$0xff]   ;;  %v15491_v7 = vld [vmem:[%s16269_s5 + $0x1070] sm:$0xff]  }
 0x238   : > { %14131 = vmatprep.subr.bf16.mxu1 %v15443_v8 }
 0x23a   : > { %14110 = vmatpush3.bf16.msra.mxu0 %v15444_v9 }
 0x23b   : > { %14111 = vmatprep.subr.bf16.mxu0 %v15446_v11  ;;  %14132 = vmatpush3.bf16.msra.mxu1 %v15445_v10 }
 0x23c   : > { %14133 = vmatprep.subr.bf16.mxu1 %v15447_v12  ;;  %v15490_v12 = vld [vmem:[%s16269_s5 + $0x10a8] sm:$0xff]  }
 0x23e   : > { %14112 = vmatpush3.bf16.msra.mxu0 %v15448_v13 }
 0x23f   : > { %14113 = vmatprep.subr.bf16.mxu0 %v15450_v15  ;;  %14134 = vmatpush3.bf16.msra.mxu1 %v15449_v14  ;;  %v15492_v14 = vld [vmem:[%s16269_s5 + $0x10f0] sm:$0xff]  }
 0x240   : > { %14135 = vmatprep.subr.bf16.mxu1 %v15451_v16 }
 0x242   : > { %14114 = vmatpush3.bf16.msra.mxu0 %v15452_v17 }
 0x243   : > { %14115 = vmatprep.subr.bf16.mxu0 %v15454_v19  ;;  %14136 = vmatpush3.bf16.msra.mxu1 %v15453_v18  ;;  %v15493_v18 = vld [vmem:[%s16269_s5 + $0x1030] sm:$0xff]  }
 0x244   : > { %v13813_v21 = vpop.f32.mrb[32].mxu0  ;;  %14137 = vmatprep.subr.bf16.mxu1 %v15455_v20  ;;  %v15495_v20 = vld [vmem:[%s16269_s5 + $0x1078] sm:$0xff]  }
 0x245   : > { %v13814_v23 = vpop.f32.mrb[33].mxu0  ;;  %v13835_v25 = vpop.f32.mrb[32].mxu1 }
 0x246   : > { %v13815_v26 = vadd.f32 %v13814_v23, %v13813_v21  ;;  %v13816_v27 = vpop.f32.mrb[34].mxu0  ;;  %v13836_v30 = vpop.f32.mrb[33].mxu1  ;;  %14116 = vmatpush3.bf16.msra.mxu0 %v15456_v22  ;;  %v15494_v22 = vld [vmem:[%s16269_s5 + $0x10b0] sm:$0xff]   ;;  %v15496_v23 = vld [vmem:[%s16269_s5 + $0x10f8] sm:$0xff]  }
 0x247   : > { %v13817_v31 = vpop.f32.mrb[35].mxu0  ;;  %v13837_v33 = vadd.f32 %v13836_v30, %v13835_v25  ;;  %v13838_v34 = vpop.f32.mrb[34].mxu1  ;;  %14117 = vmatprep.subr.bf16.mxu0 %v15458_v28  ;;  %14138 = vmatpush3.bf16.msra.mxu1 %v15457_v24  ;;  %v15497_v24 = vld [vmem:[%s16269_s5 + $0x1038] sm:$0xff]   ;;  %v231_v25 = vld [vmem:[%s17663_s0 + $0x40] sm:$0xff] }
 0x248   : > { %v10327_v32 = vadd.f32 %v13815_v26, %v16880_v46  ;;  %v13839_v37 = vpop.f32.mrb[35].mxu1  ;;  %14139 = vmatprep.subr.bf16.mxu1 %v15459_v29  ;;  %v15468_v46 = vld [vmem:[%s16269_s5 + $0x10c0] sm:$0xff]   ;;  %v2775_v26 = vrot.slane %v231_v25, %v16311_v35  ;;  %v2768_v28 = vcombine.high %v231_v25, %v231_v25  ;;  %v15498_v29 = vld [vmem:[%s16269_s5 + $0x10b8] sm:$0xff]   ;;  %v15536_v25 = vld [vmem:[%s16269_s5 + $0x1248] sm:$0xff]  }
 0x249   : > { %v15499_v27 = vld [vmem:[%s16269_s5 + $0x1140] sm:$0xff]  }
 0x24a   : > { %v16927_v39 = vadd.f32 %v13837_v33, %v10327_v32  ;;  %14118 = vmatpush3.bf16.msra.mxu0 %v15460_v36  ;;  %v2783_v30 = vcombine.high %v2775_v26, %v2775_v26  ;;  %v2791_v31 = vrot.slane %v2775_v26, %v16311_v35  ;;  %v15500_v32 = vld [vmem:[%s16269_s5 + $0x11c0] sm:$0xff]   ;;  %v16978_v33 = vrot.slane %v2768_v28, %v16311_v35  ;;  %v15537_v26 = vld [vmem:[%s16269_s5 + $0x12c8] sm:$0xff]  }
 0x24b   : > { %14119 = vmatprep.subr.bf16.mxu0 %v15462_v40  ;;  %14140 = vmatpush3.bf16.msra.mxu1 %v15461_v38  ;;  %v15501_v34 = vld [vmem:[%s16269_s5 + $0x1100] sm:$0xff]   ;;  %v15503_v40 = vld [vmem:[%s16269_s5 + $0x1148] sm:$0xff]  }
 0x24c   : > { %14141 = vmatprep.subr.bf16.mxu1 %v15463_v41  ;;  %v2805_v36 = vrot.slane %v2783_v30, %v16311_v35  ;;  %v15502_v37 = vld [vmem:[%s16269_s5 + $0x1180] sm:$0xff]   ;;  %v2784_v38 = vcombine.high %v16978_v33, %v16978_v33  ;;  %v15539_v28 = vld [vmem:[%s16269_s5 + $0x1288] sm:$0xff]   ;;  %v15541_v30 = vld [vmem:[%s16269_s5 + $0x12d0] sm:$0xff]  }
 0x24e   : > { %14120 = vmatpush3.bf16.msra.mxu0 %v15464_v42  ;;  %v2815_v41 = vcombine.high %v2805_v36, %v2805_v36  ;;  %v15504_v42 = vld [vmem:[%s16269_s5 + $0x11c8] sm:$0xff]  }
 0x24f   : > { %14149 = vmatprep.subr.bf16.mxu0 %v15467_v45  ;;  %14142 = vmatpush3.bf16.msra.mxu1 %v15465_v43  ;;  %v2812_v43 = vrot.slane %v2784_v38, %v16311_v35  ;;  %v15506_v45 = vld [vmem:[%s16269_s5 + $0x1188] sm:$0xff]   ;;  %v15548_v38 = vld [vmem:[%s16269_s5 + $0x1260] sm:$0xff]  }
 0x250   : > { %14171 = vmatprep.subr.bf16.mxu1 %v15468_v46 }
 0x251   : > { %10885 = vmatmul.mubr.bf16.vlgmr.msra.gmra.mrb[60].mxu0 %v2749_v44  ;;  %v15505_v44 = vld [vmem:[%s16269_s5 + $0x1108] sm:$0xff]   ;;  %v2816_v46 = vcombine.high %v2812_v43, %v2812_v43 }
 0x252   : > { %14150 = vmatpush3.bf16.msra.mxu0 %v15469_v47  ;;  %10925 = vmatmul.mubr.bf16.vlgmr.msra.gmra.mrb[60].mxu1 %v2765_v49  ;;  %v15507_v47 = vld [vmem:[%s16269_s5 + $0x1150] sm:$0xff]  }
 0x253   : > { %14151 = vmatprep.subr.bf16.mxu0 %v15471_v50  ;;  %14172 = vmatpush3.bf16.msra.mxu1 %v15470_v48  ;;  %v15508_v48 = vld [vmem:[%s16269_s5 + $0x11d0] sm:$0xff]  }
 0x254   : > { %14173 = vmatprep.subr.bf16.mxu1 %v15472_v51  ;;  %10964 = vmatprep.mubr.bf16.mxu0 %v2805_v36  ;;  %v15509_v49 = vld [vmem:[%s16269_s5 + $0x1110] sm:$0xff]   ;;  %v15511_v51 = vld [vmem:[%s16269_s5 + $0x1158] sm:$0xff]  }
 0x255   : > { %11004 = vmatprep.mubr.bf16.mxu1 %v2815_v41  ;;  %v15510_v50 = vld [vmem:[%s16269_s5 + $0x1190] sm:$0xff]   ;;  %v15546_v36 = vld [vmem:[%s16269_s5 + $0x1218] sm:$0xff]   ;;  %v15551_v41 = vld [vmem:[%s16269_s5 + $0x12a0] sm:$0xff]  }
 0x256   : > { %14152 = vmatpush3.bf16.msra.mxu0 %v15473_v52  ;;  %v15512_v52 = vld [vmem:[%s16269_s5 + $0x11d8] sm:$0xff]  }
 0x257   : > { %14153 = vmatprep.subr.bf16.mxu0 %v15475_v54  ;;  %14174 = vmatpush3.bf16.msra.mxu1 %v15474_v53  ;;  %v15513_v53 = vld [vmem:[%s16269_s5 + $0x1118] sm:$0xff]  }
 0x258   : > { %14175 = vmatprep.subr.bf16.mxu1 %v15476_v55  ;;  %v15514_v54 = vld [vmem:[%s16269_s5 + $0x1198] sm:$0xff]   ;;  %v15515_v55 = vld [vmem:[%s16269_s5 + $0x1160] sm:$0xff]  }
 0x25a   : > { %14154 = vmatpush3.bf16.msra.mxu0 %v15477_v56  ;;  %v15516_v56 = vld [vmem:[%s16269_s5 + $0x11e0] sm:$0xff]  }
 0x25b   : > { %14155 = vmatprep.subr.bf16.mxu0 %v15479_v58  ;;  %14176 = vmatpush3.bf16.msra.mxu1 %v15478_v57  ;;  %v15517_v57 = vld [vmem:[%s16269_s5 + $0x1120] sm:$0xff]  }
 0x25c   : > { %14177 = vmatprep.subr.bf16.mxu1 %v15480_v59  ;;  %v15518_v58 = vld [vmem:[%s16269_s5 + $0x11a0] sm:$0xff]   ;;  %v15519_v59 = vld [vmem:[%s16269_s5 + $0x1168] sm:$0xff]  }
 0x25e   : > { %14156 = vmatpush3.bf16.msra.mxu0 %v15481_v60  ;;  %v15520_v60 = vld [vmem:[%s16269_s5 + $0x11e8] sm:$0xff]  }
 0x25f   : > { %14157 = vmatprep.subr.bf16.mxu0 %v15483_v62  ;;  %14178 = vmatpush3.bf16.msra.mxu1 %v15482_v61  ;;  %v15521_v62 = vld [vmem:[%s16269_s5 + $0x1128] sm:$0xff]  }
 0x260   : > { %14179 = vmatprep.subr.bf16.mxu1 %v15484_v63 }
 0x262   : > { %14158 = vmatpush3.bf16.msra.mxu0 %v15485_v0  ;;  %v15522_v0 = vld [vmem:[%s16269_s5 + $0x11a8] sm:$0xff]  }
 0x263   : > { %14159 = vmatprep.subr.bf16.mxu0 %v15487_v2  ;;  %14180 = vmatpush3.bf16.msra.mxu1 %v15486_v1 }
 0x264   : > { %v13857_v4 = vpop.f32.mrb[36].mxu0  ;;  %14181 = vmatprep.subr.bf16.mxu1 %v15488_v3 }
 0x265   : > { %v13858_v6 = vpop.f32.mrb[37].mxu0  ;;  %v13879_v8 = vpop.f32.mrb[36].mxu1 }
 0x266   : > { %v13859_v9 = vadd.f32 %v13858_v6, %v13857_v4  ;;  %v13860_v10 = vpop.f32.mrb[38].mxu0  ;;  %v13880_v11 = vpop.f32.mrb[37].mxu1  ;;  %14160 = vmatpush3.bf16.msra.mxu0 %v15489_v5  ;;  %v15523_v4 = vld [vmem:[%s16269_s5 + $0x1170] sm:$0xff]  }
 0x267   : > { %v13861_v13 = vpop.f32.mrb[39].mxu0  ;;  %v13881_v16 = vadd.f32 %v13880_v11, %v13879_v8  ;;  %v13882_v17 = vpop.f32.mrb[38].mxu1  ;;  %14161 = vmatprep.subr.bf16.mxu0 %v15491_v7  ;;  %14182 = vmatpush3.bf16.msra.mxu1 %v15490_v12  ;;  %v15524_v5 = vld [vmem:[%s16269_s5 + $0x11f0] sm:$0xff]  }
 0x268   : > { %v10407_v15 = vadd.f32 %v13859_v9, %v16927_v39  ;;  %v13883_v19 = vpop.f32.mrb[39].mxu1  ;;  %14183 = vmatprep.subr.bf16.mxu1 %v15492_v14  ;;  %v2813_v39 = vcombine.high %v2791_v31, %v2791_v31  ;;  %v15525_v11 = vld [vmem:[%s16269_s5 + $0x1130] sm:$0xff]   ;;  %v15529_v17 = vld [vmem:[%s16269_s5 + $0x1138] sm:$0xff]  }
 0x269   : > { %v15526_v13 = vld [vmem:[%s16269_s5 + $0x11b0] sm:$0xff]   ;;  %v2798_v19 = vrot.slane %v16978_v33, %v16311_v35  ;;  %v15544_v33 = vld [vmem:[%s16269_s5 + $0x1258] sm:$0xff]  }
 0x26a   : > { %v16964_v21 = vadd.f32 %v13881_v16, %v10407_v15  ;;  %14162 = vmatpush3.bf16.msra.mxu0 %v15493_v18  ;;  %v15527_v15 = vld [vmem:[%s16269_s5 + $0x1178] sm:$0xff]  }
 0x26b   : > { %14163 = vmatprep.subr.bf16.mxu0 %v15495_v20  ;;  %14184 = vmatpush3.bf16.msra.mxu1 %v15494_v22  ;;  %v15528_v16 = vld [vmem:[%s16269_s5 + $0x11f8] sm:$0xff]   ;;  %v15532_v20 = vld [vmem:[%s16269_s5 + $0x1240] sm:$0xff]  }
 0x26c   : > { %14185 = vmatprep.subr.bf16.mxu1 %v15496_v23  ;;  %v15530_v18 = vld [vmem:[%s16269_s5 + $0x11b8] sm:$0xff]   ;;  %v15534_v22 = vld [vmem:[%s16269_s5 + $0x1200] sm:$0xff]  }
 0x26d   : > { %v15535_v23 = vld [vmem:[%s16269_s5 + $0x1280] sm:$0xff]  }
 0x26e   : > { %14164 = vmatpush3.bf16.msra.mxu0 %v15497_v24  ;;  %v2814_v24 = vcombine.high %v2798_v19, %v2798_v19 }
 0x26f   : > { %14193 = vmatprep.subr.bf16.mxu0 %v15499_v27  ;;  %14186 = vmatpush3.bf16.msra.mxu1 %v15498_v29  ;;  %v15538_v27 = vld [vmem:[%s16269_s5 + $0x1208] sm:$0xff]   ;;  %v15540_v29 = vld [vmem:[%s16269_s5 + $0x1250] sm:$0xff]  }
 0x270   : > { %14215 = vmatprep.subr.bf16.mxu1 %v15500_v32  ;;  %v15543_v32 = vld [vmem:[%s16269_s5 + $0x1290] sm:$0xff]  }
 0x271   : > { %10965 = vmatmul.mubr.bf16.vlgmr.msra.gmra.mrb[64].mxu0 %v2791_v31  ;;  %v15542_v31 = vld [vmem:[%s16269_s5 + $0x1210] sm:$0xff]  }
 0x272   : > { %14194 = vmatpush3.bf16.msra.mxu0 %v15501_v34  ;;  %11005 = vmatmul.mubr.bf16.vlgmr.msra.gmra.mrb[64].mxu1 %v2813_v39  ;;  %v15545_v34 = vld [vmem:[%s16269_s5 + $0x12d8] sm:$0xff]   ;;  %v15549_v39 = vld [vmem:[%s16269_s5 + $0x12e0] sm:$0xff]  }
 0x273   : > { %14195 = vmatprep.subr.bf16.mxu0 %v15503_v40  ;;  %14216 = vmatpush3.bf16.msra.mxu1 %v15502_v37  ;;  %v15547_v37 = vld [vmem:[%s16269_s5 + $0x1298] sm:$0xff]   ;;  %v15550_v40 = vld [vmem:[%s16269_s5 + $0x1220] sm:$0xff]  }
 0x274   : > { %11044 = vmatprep.mubr.bf16.mxu0 %v2812_v43  ;;  %14217 = vmatprep.subr.bf16.mxu1 %v15504_v42  ;;  %v15552_v42 = vld [vmem:[%s16269_s5 + $0x1268] sm:$0xff]  }
 0x275   : > { %11084 = vmatprep.mubr.bf16.mxu1 %v2816_v46  ;;  %v15553_v43 = vld [vmem:[%s16269_s5 + $0x12e8] sm:$0xff]  }
 0x276   : > { %14196 = vmatpush3.bf16.msra.mxu0 %v15505_v44 }
 0x277   : > { %14197 = vmatprep.subr.bf16.mxu0 %v15507_v47  ;;  %14218 = vmatpush3.bf16.msra.mxu1 %v15506_v45  ;;  %v15554_v45 = vld [vmem:[%s16269_s5 + $0x1228] sm:$0xff]   ;;  %v15556_v47 = vld [vmem:[%s16269_s5 + $0x1270] sm:$0xff]  }
 0x278   : > { %14219 = vmatprep.subr.bf16.mxu1 %v15508_v48 }
 0x27a   : > { %14198 = vmatpush3.bf16.msra.mxu0 %v15509_v49 }
 0x27b   : > { %14199 = vmatprep.subr.bf16.mxu0 %v15511_v51  ;;  %14220 = vmatpush3.bf16.msra.mxu1 %v15510_v50 }
 0x27c   : > { %14221 = vmatprep.subr.bf16.mxu1 %v15512_v52  ;;  %v15555_v52 = vld [vmem:[%s16269_s5 + $0x12a8] sm:$0xff]  }
 0x27e   : > { %14200 = vmatpush3.bf16.msra.mxu0 %v15513_v53 }
 0x27f   : > { %14201 = vmatprep.subr.bf16.mxu0 %v15515_v55  ;;  %14222 = vmatpush3.bf16.msra.mxu1 %v15514_v54  ;;  %v15557_v54 = vld [vmem:[%s16269_s5 + $0x12f0] sm:$0xff]  }
 0x280   : > { %14223 = vmatprep.subr.bf16.mxu1 %v15516_v56 }
 0x282   : > { %14202 = vmatpush3.bf16.msra.mxu0 %v15517_v57 }
 0x283   : > { %14203 = vmatprep.subr.bf16.mxu0 %v15519_v59  ;;  %14224 = vmatpush3.bf16.msra.mxu1 %v15518_v58  ;;  %v15558_v58 = vld [vmem:[%s16269_s5 + $0x1230] sm:$0xff]  }
 0x284   : > { %v13901_v61 = vpop.f32.mrb[40].mxu0  ;;  %14225 = vmatprep.subr.bf16.mxu1 %v15520_v60  ;;  %v15560_v60 = vld [vmem:[%s16269_s5 + $0x1278] sm:$0xff]  }
 0x285   : > { %v13902_v63 = vpop.f32.mrb[41].mxu0  ;;  %v13923_v1 = vpop.f32.mrb[40].mxu1 }
 0x286   : > { %v13903_v2 = vadd.f32 %v13902_v63, %v13901_v61  ;;  %v13904_v3 = vpop.f32.mrb[42].mxu0  ;;  %v13924_v6 = vpop.f32.mrb[41].mxu1  ;;  %14204 = vmatpush3.bf16.msra.mxu0 %v15521_v62  ;;  %v15559_v62 = vld [vmem:[%s16269_s5 + $0x12b0] sm:$0xff]   ;;  %v15561_v63 = vld [vmem:[%s16269_s5 + $0x12f8] sm:$0xff]  }
 0x287   : > { %v13905_v7 = vpop.f32.mrb[43].mxu0  ;;  %v13925_v9 = vadd.f32 %v13924_v6, %v13923_v1  ;;  %v13926_v10 = vpop.f32.mrb[42].mxu1  ;;  %14205 = vmatprep.subr.bf16.mxu0 %v15523_v4  ;;  %14226 = vmatpush3.bf16.msra.mxu1 %v15522_v0  ;;  %v15562_v0 = vld [vmem:[%s16269_s5 + $0x1238] sm:$0xff]   ;;  %v232_v1 = vld [vmem:[%s17663_s0 + $0x48] sm:$0xff]  ;;  %v15564_v3 = vld [vmem:[%s16269_s5 + $0x1340] sm:$0xff]  }
 0x288   : > { %v10487_v8 = vadd.f32 %v13903_v2, %v16964_v21  ;;  %v13927_v12 = vpop.f32.mrb[43].mxu1  ;;  %14227 = vmatprep.subr.bf16.mxu1 %v15524_v5  ;;  %v15533_v21 = vld [vmem:[%s16269_s5 + $0x12c0] sm:$0xff]   ;;  %v2824_v2 = vrot.slane %v232_v1, %v16311_v35  ;;  %v2817_v4 = vcombine.high %v232_v1, %v232_v1  ;;  %v15563_v5 = vld [vmem:[%s16269_s5 + $0x12b8] sm:$0xff]   ;;  %v15601_v1 = vld [vmem:[%s16269_s5 + $0x1448] sm:$0xff]  }
 0x289   : > { %v15566_v10 = vld [vmem:[%s16269_s5 + $0x1300] sm:$0xff]  }
 0x28a   : > { %v17011_v14 = vadd.f32 %v13925_v9, %v10487_v8  ;;  %14206 = vmatpush3.bf16.msra.mxu0 %v15525_v11  ;;  %v2832_v6 = vcombine.high %v2824_v2, %v2824_v2  ;;  %v2840_v7 = vrot.slane %v2824_v2, %v16311_v35  ;;  %v15565_v8 = vld [vmem:[%s16269_s5 + $0x13c0] sm:$0xff]   ;;  %v17062_v9 = vrot.slane %v2817_v4, %v16311_v35  ;;  %v15602_v2 = vld [vmem:[%s16269_s5 + $0x14c8] sm:$0xff]  }
 0x28b   : > { %14207 = vmatprep.subr.bf16.mxu0 %v15527_v15  ;;  %14228 = vmatpush3.bf16.msra.mxu1 %v15526_v13  ;;  %v15567_v12 = vld [vmem:[%s16269_s5 + $0x1380] sm:$0xff]   ;;  %v15568_v15 = vld [vmem:[%s16269_s5 + $0x1348] sm:$0xff]  }
 0x28c   : > { %14229 = vmatprep.subr.bf16.mxu1 %v15528_v16  ;;  %v2854_v11 = vrot.slane %v2832_v6, %v16311_v35  ;;  %v2833_v13 = vcombine.high %v17062_v9, %v17062_v9  ;;  %v15604_v4 = vld [vmem:[%s16269_s5 + $0x1488] sm:$0xff]   ;;  %v15606_v6 = vld [vmem:[%s16269_s5 + $0x14d0] sm:$0xff]  }
 0x28e   : > { %14208 = vmatpush3.bf16.msra.mxu0 %v15529_v17  ;;  %v2864_v16 = vcombine.high %v2854_v11, %v2854_v11  ;;  %v15569_v17 = vld [vmem:[%s16269_s5 + $0x13c8] sm:$0xff]  }
 0x28f   : > { %14237 = vmatprep.subr.bf16.mxu0 %v15532_v20  ;;  %14230 = vmatpush3.bf16.msra.mxu1 %v15530_v18  ;;  %v2861_v18 = vrot.slane %v2833_v13, %v16311_v35  ;;  %v15571_v20 = vld [vmem:[%s16269_s5 + $0x1388] sm:$0xff]   ;;  %v15613_v13 = vld [vmem:[%s16269_s5 + $0x1460] sm:$0xff]  }
 0x290   : > { %14259 = vmatprep.subr.bf16.mxu1 %v15533_v21 }
 0x291   : > { %11045 = vmatmul.mubr.bf16.vlgmr.msra.gmra.mrb[68].mxu0 %v2798_v19  ;;  %v15570_v19 = vld [vmem:[%s16269_s5 + $0x1308] sm:$0xff]   ;;  %v2865_v21 = vcombine.high %v2861_v18, %v2861_v18 }
 0x292   : > { %14238 = vmatpush3.bf16.msra.mxu0 %v15534_v22  ;;  %11085 = vmatmul.mubr.bf16.vlgmr.msra.gmra.mrb[68].mxu1 %v2814_v24  ;;  %v15572_v22 = vld [vmem:[%s16269_s5 + $0x1350] sm:$0xff]  }
 0x293   : > { %14239 = vmatprep.subr.bf16.mxu0 %v15536_v25  ;;  %14260 = vmatpush3.bf16.msra.mxu1 %v15535_v23  ;;  %v15573_v23 = vld [vmem:[%s16269_s5 + $0x13d0] sm:$0xff]  }
 0x294   : > { %14261 = vmatprep.subr.bf16.mxu1 %v15537_v26  ;;  %11124 = vmatprep.mubr.bf16.mxu0 %v2854_v11  ;;  %v15574_v24 = vld [vmem:[%s16269_s5 + $0x1310] sm:$0xff]   ;;  %v15576_v26 = vld [vmem:[%s16269_s5 + $0x1358] sm:$0xff]  }
 0x295   : > { %11164 = vmatprep.mubr.bf16.mxu1 %v2864_v16  ;;  %v15575_v25 = vld [vmem:[%s16269_s5 + $0x1390] sm:$0xff]   ;;  %v15611_v11 = vld [vmem:[%s16269_s5 + $0x1418] sm:$0xff]   ;;  %v15616_v16 = vld [vmem:[%s16269_s5 + $0x14a0] sm:$0xff]  }
 0x296   : > { %14240 = vmatpush3.bf16.msra.mxu0 %v15538_v27  ;;  %v15577_v27 = vld [vmem:[%s16269_s5 + $0x13d8] sm:$0xff]  }
 0x297   : > { %14241 = vmatprep.subr.bf16.mxu0 %v15540_v29  ;;  %14262 = vmatpush3.bf16.msra.mxu1 %v15539_v28  ;;  %v15578_v28 = vld [vmem:[%s16269_s5 + $0x1318] sm:$0xff]  }
 0x298   : > { %14263 = vmatprep.subr.bf16.mxu1 %v15541_v30  ;;  %v15579_v29 = vld [vmem:[%s16269_s5 + $0x1398] sm:$0xff]   ;;  %v15580_v30 = vld [vmem:[%s16269_s5 + $0x1360] sm:$0xff]  }
 0x29a   : > { %14242 = vmatpush3.bf16.msra.mxu0 %v15542_v31  ;;  %v15581_v31 = vld [vmem:[%s16269_s5 + $0x13e0] sm:$0xff]  }
 0x29b   : > { %14243 = vmatprep.subr.bf16.mxu0 %v15544_v33  ;;  %14264 = vmatpush3.bf16.msra.mxu1 %v15543_v32  ;;  %v15582_v32 = vld [vmem:[%s16269_s5 + $0x1320] sm:$0xff]  }
 0x29c   : > { %14265 = vmatprep.subr.bf16.mxu1 %v15545_v34  ;;  %v15583_v33 = vld [vmem:[%s16269_s5 + $0x13a0] sm:$0xff]   ;;  %v15584_v34 = vld [vmem:[%s16269_s5 + $0x1368] sm:$0xff]  }
 0x29e   : > { %14244 = vmatpush3.bf16.msra.mxu0 %v15546_v36  ;;  %v15585_v36 = vld [vmem:[%s16269_s5 + $0x13e8] sm:$0xff]  }
 0x29f   : > { %14245 = vmatprep.subr.bf16.mxu0 %v15548_v38  ;;  %14266 = vmatpush3.bf16.msra.mxu1 %v15547_v37  ;;  %v15586_v38 = vld [vmem:[%s16269_s5 + $0x1328] sm:$0xff]  }
 0x2a0   : > { %14267 = vmatprep.subr.bf16.mxu1 %v15549_v39 }
 0x2a2   : > { %14246 = vmatpush3.bf16.msra.mxu0 %v15550_v40  ;;  %v15587_v40 = vld [vmem:[%s16269_s5 + $0x13a8] sm:$0xff]  }
 0x2a3   : > { %14247 = vmatprep.subr.bf16.mxu0 %v15552_v42  ;;  %14268 = vmatpush3.bf16.msra.mxu1 %v15551_v41 }
 0x2a4   : > { %v13945_v44 = vpop.f32.mrb[44].mxu0  ;;  %14269 = vmatprep.subr.bf16.mxu1 %v15553_v43 }
 0x2a5   : > { %v13946_v46 = vpop.f32.mrb[45].mxu0  ;;  %v13967_v48 = vpop.f32.mrb[44].mxu1 }
 0x2a6   : > { %v13947_v49 = vadd.f32 %v13946_v46, %v13945_v44  ;;  %v13948_v50 = vpop.f32.mrb[46].mxu0  ;;  %v13968_v51 = vpop.f32.mrb[45].mxu1  ;;  %14248 = vmatpush3.bf16.msra.mxu0 %v15554_v45  ;;  %v15588_v44 = vld [vmem:[%s16269_s5 + $0x1370] sm:$0xff]  }
 0x2a7   : > { %v13949_v53 = vpop.f32.mrb[47].mxu0  ;;  %v13969_v56 = vadd.f32 %v13968_v51, %v13967_v48  ;;  %v13970_v57 = vpop.f32.mrb[46].mxu1  ;;  %14249 = vmatprep.subr.bf16.mxu0 %v15556_v47  ;;  %14270 = vmatpush3.bf16.msra.mxu1 %v15555_v52  ;;  %v15589_v45 = vld [vmem:[%s16269_s5 + $0x13f0] sm:$0xff]  }
 0x2a8   : > { %v10567_v55 = vadd.f32 %v13947_v49, %v17011_v14  ;;  %v13971_v59 = vpop.f32.mrb[47].mxu1  ;;  %14271 = vmatprep.subr.bf16.mxu1 %v15557_v54  ;;  %v2862_v14 = vcombine.high %v2840_v7, %v2840_v7  ;;  %v15590_v51 = vld [vmem:[%s16269_s5 + $0x1330] sm:$0xff]   ;;  %v15594_v57 = vld [vmem:[%s16269_s5 + $0x1338] sm:$0xff]  }
 0x2a9   : > { %v15591_v53 = vld [vmem:[%s16269_s5 + $0x13b0] sm:$0xff]   ;;  %v2847_v59 = vrot.slane %v17062_v9, %v16311_v35  ;;  %v15609_v9 = vld [vmem:[%s16269_s5 + $0x1458] sm:$0xff]  }
 0x2aa   : > { %v17048_v61 = vadd.f32 %v13969_v56, %v10567_v55  ;;  %14250 = vmatpush3.bf16.msra.mxu0 %v15558_v58  ;;  %v15592_v55 = vld [vmem:[%s16269_s5 + $0x1378] sm:$0xff]  }
 0x2ab   : > { %14251 = vmatprep.subr.bf16.mxu0 %v15560_v60  ;;  %14272 = vmatpush3.bf16.msra.mxu1 %v15559_v62  ;;  %v15593_v56 = vld [vmem:[%s16269_s5 + $0x13f8] sm:$0xff]   ;;  %v15597_v60 = vld [vmem:[%s16269_s5 + $0x1440] sm:$0xff]  }
 0x2ac   : > { %14273 = vmatprep.subr.bf16.mxu1 %v15561_v63  ;;  %v15595_v58 = vld [vmem:[%s16269_s5 + $0x13b8] sm:$0xff]   ;;  %v15599_v62 = vld [vmem:[%s16269_s5 + $0x1400] sm:$0xff]  }
 0x2ad   : > { %v15600_v63 = vld [vmem:[%s16269_s5 + $0x1480] sm:$0xff]  }
 0x2ae   : > { %14252 = vmatpush3.bf16.msra.mxu0 %v15562_v0  ;;  %v2863_v0 = vcombine.high %v2847_v59, %v2847_v59 }
 0x2af   : > { %14281 = vmatprep.subr.bf16.mxu0 %v15564_v3  ;;  %14274 = vmatpush3.bf16.msra.mxu1 %v15563_v5  ;;  %v15603_v3 = vld [vmem:[%s16269_s5 + $0x1408] sm:$0xff]   ;;  %v15605_v5 = vld [vmem:[%s16269_s5 + $0x1450] sm:$0xff]  }
 0x2b0   : > { %14303 = vmatprep.subr.bf16.mxu1 %v15565_v8  ;;  %v15608_v8 = vld [vmem:[%s16269_s5 + $0x1490] sm:$0xff]  }
 0x2b1   : > { %11125 = vmatmul.mubr.bf16.vlgmr.msra.gmra.mrb[72].mxu0 %v2840_v7  ;;  %v15607_v7 = vld [vmem:[%s16269_s5 + $0x1410] sm:$0xff]  }
 0x2b2   : > { %14282 = vmatpush3.bf16.msra.mxu0 %v15566_v10  ;;  %11165 = vmatmul.mubr.bf16.vlgmr.msra.gmra.mrb[72].mxu1 %v2862_v14  ;;  %v15610_v10 = vld [vmem:[%s16269_s5 + $0x14d8] sm:$0xff]   ;;  %v15614_v14 = vld [vmem:[%s16269_s5 + $0x14e0] sm:$0xff]  }
 0x2b3   : > { %14283 = vmatprep.subr.bf16.mxu0 %v15568_v15  ;;  %14304 = vmatpush3.bf16.msra.mxu1 %v15567_v12  ;;  %v15612_v12 = vld [vmem:[%s16269_s5 + $0x1498] sm:$0xff]   ;;  %v15615_v15 = vld [vmem:[%s16269_s5 + $0x1420] sm:$0xff]  }
 0x2b4   : > { %11204 = vmatprep.mubr.bf16.mxu0 %v2861_v18  ;;  %14305 = vmatprep.subr.bf16.mxu1 %v15569_v17  ;;  %v15617_v17 = vld [vmem:[%s16269_s5 + $0x1468] sm:$0xff]  }
 0x2b5   : > { %11244 = vmatprep.mubr.bf16.mxu1 %v2865_v21  ;;  %v15618_v18 = vld [vmem:[%s16269_s5 + $0x14e8] sm:$0xff]  }
 0x2b6   : > { %14284 = vmatpush3.bf16.msra.mxu0 %v15570_v19 }
 0x2b7   : > { %14285 = vmatprep.subr.bf16.mxu0 %v15572_v22  ;;  %14306 = vmatpush3.bf16.msra.mxu1 %v15571_v20  ;;  %v15619_v20 = vld [vmem:[%s16269_s5 + $0x1428] sm:$0xff]   ;;  %v15621_v22 = vld [vmem:[%s16269_s5 + $0x1470] sm:$0xff]  }
 0x2b8   : > { %14307 = vmatprep.subr.bf16.mxu1 %v15573_v23 }
 0x2ba   : > { %14286 = vmatpush3.bf16.msra.mxu0 %v15574_v24 }
 0x2bb   : > { %14287 = vmatprep.subr.bf16.mxu0 %v15576_v26  ;;  %14308 = vmatpush3.bf16.msra.mxu1 %v15575_v25 }
 0x2bc   : > { %14309 = vmatprep.subr.bf16.mxu1 %v15577_v27  ;;  %v15620_v27 = vld [vmem:[%s16269_s5 + $0x14a8] sm:$0xff]  }
 0x2be   : > { %14288 = vmatpush3.bf16.msra.mxu0 %v15578_v28 }
 0x2bf   : > { %14289 = vmatprep.subr.bf16.mxu0 %v15580_v30  ;;  %14310 = vmatpush3.bf16.msra.mxu1 %v15579_v29  ;;  %v15622_v29 = vld [vmem:[%s16269_s5 + $0x14f0] sm:$0xff]  }
 0x2c0   : > { %14311 = vmatprep.subr.bf16.mxu1 %v15581_v31 }
 0x2c2   : > { %14290 = vmatpush3.bf16.msra.mxu0 %v15582_v32 }
 0x2c3   : > { %14291 = vmatprep.subr.bf16.mxu0 %v15584_v34  ;;  %14312 = vmatpush3.bf16.msra.mxu1 %v15583_v33  ;;  %v15623_v33 = vld [vmem:[%s16269_s5 + $0x1430] sm:$0xff]  }
 0x2c4   : > { %v13989_v37 = vpop.f32.mrb[48].mxu0  ;;  %14313 = vmatprep.subr.bf16.mxu1 %v15585_v36  ;;  %v15625_v36 = vld [vmem:[%s16269_s5 + $0x1478] sm:$0xff]  }
 0x2c5   : > { %v13990_v39 = vpop.f32.mrb[49].mxu0  ;;  %v14011_v41 = vpop.f32.mrb[48].mxu1 }
 0x2c6   : > { %v13991_v42 = vadd.f32 %v13990_v39, %v13989_v37  ;;  %v13992_v43 = vpop.f32.mrb[50].mxu0  ;;  %v14012_v46 = vpop.f32.mrb[49].mxu1  ;;  %14292 = vmatpush3.bf16.msra.mxu0 %v15586_v38  ;;  %v15624_v38 = vld [vmem:[%s16269_s5 + $0x14b0] sm:$0xff]   ;;  %v15626_v39 = vld [vmem:[%s16269_s5 + $0x14f8] sm:$0xff]  }
 0x2c7   : > { %v13993_v47 = vpop.f32.mrb[51].mxu0  ;;  %v14013_v49 = vadd.f32 %v14012_v46, %v14011_v41  ;;  %v14014_v50 = vpop.f32.mrb[50].mxu1  ;;  %14293 = vmatprep.subr.bf16.mxu0 %v15588_v44  ;;  %14314 = vmatpush3.bf16.msra.mxu1 %v15587_v40  ;;  %v15627_v40 = vld [vmem:[%s16269_s5 + $0x1438] sm:$0xff]   ;;  %v233_v41 = vld [vmem:[%s17663_s0 + $0x50] sm:$0xff]  ;;  %v15629_v43 = vld [vmem:[%s16269_s5 + $0x1540] sm:$0xff]  }
 0x2c8   : > { %v10647_v48 = vadd.f32 %v13991_v42, %v17048_v61  ;;  %v14015_v52 = vpop.f32.mrb[51].mxu1  ;;  %14315 = vmatprep.subr.bf16.mxu1 %v15589_v45  ;;  %v15598_v61 = vld [vmem:[%s16269_s5 + $0x14c0] sm:$0xff]   ;;  %v2873_v42 = vrot.slane %v233_v41, %v16311_v35  ;;  %v2866_v44 = vcombine.high %v233_v41, %v233_v41  ;;  %v15628_v45 = vld [vmem:[%s16269_s5 + $0x14b8] sm:$0xff]   ;;  %v15666_v41 = vld [vmem:[%s16269_s5 + $0x1648] sm:$0xff]  }
 0x2c9   : > { %v15631_v50 = vld [vmem:[%s16269_s5 + $0x1500] sm:$0xff]  }
 0x2ca   : > { %v17095_v54 = vadd.f32 %v14013_v49, %v10647_v48  ;;  %14294 = vmatpush3.bf16.msra.mxu0 %v15590_v51  ;;  %v2881_v46 = vcombine.high %v2873_v42, %v2873_v42  ;;  %v2889_v47 = vrot.slane %v2873_v42, %v16311_v35  ;;  %v15630_v48 = vld [vmem:[%s16269_s5 + $0x15c0] sm:$0xff]   ;;  %v17146_v49 = vrot.slane %v2866_v44, %v16311_v35  ;;  %v15667_v42 = vld [vmem:[%s16269_s5 + $0x16c8] sm:$0xff]  }
 0x2cb   : > { %14295 = vmatprep.subr.bf16.mxu0 %v15592_v55  ;;  %14316 = vmatpush3.bf16.msra.mxu1 %v15591_v53  ;;  %v15632_v52 = vld [vmem:[%s16269_s5 + $0x1580] sm:$0xff]   ;;  %v15633_v55 = vld [vmem:[%s16269_s5 + $0x1548] sm:$0xff]  }
 0x2cc   : > { %14317 = vmatprep.subr.bf16.mxu1 %v15593_v56  ;;  %v2903_v51 = vrot.slane %v2881_v46, %v16311_v35  ;;  %v2882_v53 = vcombine.high %v17146_v49, %v17146_v49  ;;  %v15669_v44 = vld [vmem:[%s16269_s5 + $0x1688] sm:$0xff]   ;;  %v15671_v46 = vld [vmem:[%s16269_s5 + $0x16d0] sm:$0xff]  }
 0x2ce   : > { %14296 = vmatpush3.bf16.msra.mxu0 %v15594_v57  ;;  %v2913_v56 = vcombine.high %v2903_v51, %v2903_v51  ;;  %v15634_v57 = vld [vmem:[%s16269_s5 + $0x15c8] sm:$0xff]  }
 0x2cf   : > { %14325 = vmatprep.subr.bf16.mxu0 %v15597_v60  ;;  %14318 = vmatpush3.bf16.msra.mxu1 %v15595_v58  ;;  %v2910_v58 = vrot.slane %v2882_v53, %v16311_v35  ;;  %v15636_v60 = vld [vmem:[%s16269_s5 + $0x1588] sm:$0xff]   ;;  %v15678_v53 = vld [vmem:[%s16269_s5 + $0x1660] sm:$0xff]  }
 0x2d0   : > { %14347 = vmatprep.subr.bf16.mxu1 %v15598_v61 }
 0x2d1   : > { %11205 = vmatmul.mubr.bf16.vlgmr.msra.gmra.mrb[76].mxu0 %v2847_v59  ;;  %v15635_v59 = vld [vmem:[%s16269_s5 + $0x1508] sm:$0xff]   ;;  %v2914_v61 = vcombine.high %v2910_v58, %v2910_v58 }
 0x2d2   : > { %14326 = vmatpush3.bf16.msra.mxu0 %v15599_v62  ;;  %11245 = vmatmul.mubr.bf16.vlgmr.msra.gmra.mrb[76].mxu1 %v2863_v0  ;;  %v15637_v62 = vld [vmem:[%s16269_s5 + $0x1550] sm:$0xff]  }
 0x2d3   : > { %14327 = vmatprep.subr.bf16.mxu0 %v15601_v1  ;;  %14348 = vmatpush3.bf16.msra.mxu1 %v15600_v63  ;;  %v15638_v63 = vld [vmem:[%s16269_s5 + $0x15d0] sm:$0xff]  }
 0x2d4   : > { %14349 = vmatprep.subr.bf16.mxu1 %v15602_v2  ;;  %11284 = vmatprep.mubr.bf16.mxu0 %v2903_v51  ;;  %v15639_v0 = vld [vmem:[%s16269_s5 + $0x1510] sm:$0xff]   ;;  %v15641_v2 = vld [vmem:[%s16269_s5 + $0x1558] sm:$0xff]  }
 0x2d5   : > { %11324 = vmatprep.mubr.bf16.mxu1 %v2913_v56  ;;  %v15640_v1 = vld [vmem:[%s16269_s5 + $0x1590] sm:$0xff]   ;;  %v15676_v51 = vld [vmem:[%s16269_s5 + $0x1618] sm:$0xff]   ;;  %v15681_v56 = vld [vmem:[%s16269_s5 + $0x16a0] sm:$0xff]  }
 0x2d6   : > { %14328 = vmatpush3.bf16.msra.mxu0 %v15603_v3  ;;  %v15642_v3 = vld [vmem:[%s16269_s5 + $0x15d8] sm:$0xff]  }
 0x2d7   : > { %14329 = vmatprep.subr.bf16.mxu0 %v15605_v5  ;;  %14350 = vmatpush3.bf16.msra.mxu1 %v15604_v4  ;;  %v15643_v4 = vld [vmem:[%s16269_s5 + $0x1518] sm:$0xff]  }
 0x2d8   : > { %14351 = vmatprep.subr.bf16.mxu1 %v15606_v6  ;;  %v15644_v5 = vld [vmem:[%s16269_s5 + $0x1598] sm:$0xff]   ;;  %v15645_v6 = vld [vmem:[%s16269_s5 + $0x1560] sm:$0xff]  }
 0x2da   : > { %14330 = vmatpush3.bf16.msra.mxu0 %v15607_v7  ;;  %v15646_v7 = vld [vmem:[%s16269_s5 + $0x15e0] sm:$0xff]  }
 0x2db   : > { %14331 = vmatprep.subr.bf16.mxu0 %v15609_v9  ;;  %14352 = vmatpush3.bf16.msra.mxu1 %v15608_v8  ;;  %v15647_v8 = vld [vmem:[%s16269_s5 + $0x1520] sm:$0xff]  }
 0x2dc   : > { %14353 = vmatprep.subr.bf16.mxu1 %v15610_v10  ;;  %v15648_v9 = vld [vmem:[%s16269_s5 + $0x15a0] sm:$0xff]   ;;  %v15649_v10 = vld [vmem:[%s16269_s5 + $0x1568] sm:$0xff]  }
 0x2de   : > { %14332 = vmatpush3.bf16.msra.mxu0 %v15611_v11  ;;  %v15650_v11 = vld [vmem:[%s16269_s5 + $0x15e8] sm:$0xff]  }
 0x2df   : > { %14333 = vmatprep.subr.bf16.mxu0 %v15613_v13  ;;  %14354 = vmatpush3.bf16.msra.mxu1 %v15612_v12  ;;  %v15651_v13 = vld [vmem:[%s16269_s5 + $0x1528] sm:$0xff]  }
 0x2e0   : > { %14355 = vmatprep.subr.bf16.mxu1 %v15614_v14 }
 0x2e2   : > { %14334 = vmatpush3.bf16.msra.mxu0 %v15615_v15  ;;  %v15652_v15 = vld [vmem:[%s16269_s5 + $0x15a8] sm:$0xff]  }
 0x2e3   : > { %14335 = vmatprep.subr.bf16.mxu0 %v15617_v17  ;;  %14356 = vmatpush3.bf16.msra.mxu1 %v15616_v16 }
 0x2e4   : > { %v14033_v19 = vpop.f32.mrb[52].mxu0  ;;  %14357 = vmatprep.subr.bf16.mxu1 %v15618_v18 }
 0x2e5   : > { %v14034_v21 = vpop.f32.mrb[53].mxu0  ;;  %v14055_v23 = vpop.f32.mrb[52].mxu1 }
 0x2e6   : > { %v14035_v24 = vadd.f32 %v14034_v21, %v14033_v19  ;;  %v14036_v25 = vpop.f32.mrb[54].mxu0  ;;  %v14056_v26 = vpop.f32.mrb[53].mxu1  ;;  %14336 = vmatpush3.bf16.msra.mxu0 %v15619_v20  ;;  %v15653_v19 = vld [vmem:[%s16269_s5 + $0x1570] sm:$0xff]  }
 0x2e7   : > { %v14037_v28 = vpop.f32.mrb[55].mxu0  ;;  %v14057_v31 = vadd.f32 %v14056_v26, %v14055_v23  ;;  %v14058_v32 = vpop.f32.mrb[54].mxu1  ;;  %14337 = vmatprep.subr.bf16.mxu0 %v15621_v22  ;;  %14358 = vmatpush3.bf16.msra.mxu1 %v15620_v27  ;;  %v15654_v20 = vld [vmem:[%s16269_s5 + $0x15f0] sm:$0xff]  }
 0x2e8   : > { %v10727_v30 = vadd.f32 %v14035_v24, %v17095_v54  ;;  %v14059_v34 = vpop.f32.mrb[55].mxu1  ;;  %14359 = vmatprep.subr.bf16.mxu1 %v15622_v29  ;;  %v2911_v54 = vcombine.high %v2889_v47, %v2889_v47  ;;  %v15655_v26 = vld [vmem:[%s16269_s5 + $0x1530] sm:$0xff]   ;;  %v15659_v32 = vld [vmem:[%s16269_s5 + $0x1538] sm:$0xff]  }
 0x2e9   : > { %v15656_v28 = vld [vmem:[%s16269_s5 + $0x15b0] sm:$0xff]   ;;  %v2896_v34 = vrot.slane %v17146_v49, %v16311_v35  ;;  %v15674_v49 = vld [vmem:[%s16269_s5 + $0x1658] sm:$0xff]  }
 0x2ea   : > { %v17132_v37 = vadd.f32 %v14057_v31, %v10727_v30  ;;  %14338 = vmatpush3.bf16.msra.mxu0 %v15623_v33  ;;  %v15657_v30 = vld [vmem:[%s16269_s5 + $0x1578] sm:$0xff]  }
 0x2eb   : > { %14339 = vmatprep.subr.bf16.mxu0 %v15625_v36  ;;  %14360 = vmatpush3.bf16.msra.mxu1 %v15624_v38  ;;  %v15658_v31 = vld [vmem:[%s16269_s5 + $0x15f8] sm:$0xff]   ;;  %v15662_v36 = vld [vmem:[%s16269_s5 + $0x1640] sm:$0xff]  }
 0x2ec   : > { %14361 = vmatprep.subr.bf16.mxu1 %v15626_v39  ;;  %v15660_v33 = vld [vmem:[%s16269_s5 + $0x15b8] sm:$0xff]   ;;  %v15664_v38 = vld [vmem:[%s16269_s5 + $0x1600] sm:$0xff]  }
 0x2ed   : > { %v15665_v39 = vld [vmem:[%s16269_s5 + $0x1680] sm:$0xff]  }
 0x2ee   : > { %14340 = vmatpush3.bf16.msra.mxu0 %v15627_v40  ;;  %v2912_v40 = vcombine.high %v2896_v34, %v2896_v34 }
 0x2ef   : > { %14369 = vmatprep.subr.bf16.mxu0 %v15629_v43  ;;  %14362 = vmatpush3.bf16.msra.mxu1 %v15628_v45  ;;  %v15668_v43 = vld [vmem:[%s16269_s5 + $0x1608] sm:$0xff]   ;;  %v15670_v45 = vld [vmem:[%s16269_s5 + $0x1650] sm:$0xff]  }
 0x2f0   : > { %14391 = vmatprep.subr.bf16.mxu1 %v15630_v48  ;;  %v15673_v48 = vld [vmem:[%s16269_s5 + $0x1690] sm:$0xff]  }
 0x2f1   : > { %11285 = vmatmul.mubr.bf16.vlgmr.msra.gmra.mrb[80].mxu0 %v2889_v47  ;;  %v15672_v47 = vld [vmem:[%s16269_s5 + $0x1610] sm:$0xff]  }
 0x2f2   : > { %14370 = vmatpush3.bf16.msra.mxu0 %v15631_v50  ;;  %11325 = vmatmul.mubr.bf16.vlgmr.msra.gmra.mrb[80].mxu1 %v2911_v54  ;;  %v15675_v50 = vld [vmem:[%s16269_s5 + $0x16d8] sm:$0xff]   ;;  %v15679_v54 = vld [vmem:[%s16269_s5 + $0x16e0] sm:$0xff]  }
 0x2f3   : > { %14371 = vmatprep.subr.bf16.mxu0 %v15633_v55  ;;  %14392 = vmatpush3.bf16.msra.mxu1 %v15632_v52  ;;  %v15677_v52 = vld [vmem:[%s16269_s5 + $0x1698] sm:$0xff]   ;;  %v15680_v55 = vld [vmem:[%s16269_s5 + $0x1620] sm:$0xff]  }
 0x2f4   : > { %11364 = vmatprep.mubr.bf16.mxu0 %v2910_v58  ;;  %14393 = vmatprep.subr.bf16.mxu1 %v15634_v57  ;;  %v15682_v57 = vld [vmem:[%s16269_s5 + $0x1668] sm:$0xff]  }
 0x2f5   : > { %11404 = vmatprep.mubr.bf16.mxu1 %v2914_v61  ;;  %v15683_v58 = vld [vmem:[%s16269_s5 + $0x16e8] sm:$0xff]  }
 0x2f6   : > { %14372 = vmatpush3.bf16.msra.mxu0 %v15635_v59 }
 0x2f7   : > { %14373 = vmatprep.subr.bf16.mxu0 %v15637_v62  ;;  %14394 = vmatpush3.bf16.msra.mxu1 %v15636_v60  ;;  %v15684_v60 = vld [vmem:[%s16269_s5 + $0x1628] sm:$0xff]   ;;  %v15686_v62 = vld [vmem:[%s16269_s5 + $0x1670] sm:$0xff]  }
 0x2f8   : > { %14395 = vmatprep.subr.bf16.mxu1 %v15638_v63 }
 0x2fa   : > { %14374 = vmatpush3.bf16.msra.mxu0 %v15639_v0 }
 0x2fb   : > { %14375 = vmatprep.subr.bf16.mxu0 %v15641_v2  ;;  %14396 = vmatpush3.bf16.msra.mxu1 %v15640_v1 }
 0x2fc   : > { %14397 = vmatprep.subr.bf16.mxu1 %v15642_v3  ;;  %v15685_v3 = vld [vmem:[%s16269_s5 + $0x16a8] sm:$0xff]  }
 0x2fe   : > { %14376 = vmatpush3.bf16.msra.mxu0 %v15643_v4 }
 0x2ff   : > { %14377 = vmatprep.subr.bf16.mxu0 %v15645_v6  ;;  %14398 = vmatpush3.bf16.msra.mxu1 %v15644_v5  ;;  %v15687_v5 = vld [vmem:[%s16269_s5 + $0x16f0] sm:$0xff]  }
 0x300   : > { %14399 = vmatprep.subr.bf16.mxu1 %v15646_v7 }
 0x302   : > { %14378 = vmatpush3.bf16.msra.mxu0 %v15647_v8 }
 0x303   : > { %14379 = vmatprep.subr.bf16.mxu0 %v15649_v10  ;;  %14400 = vmatpush3.bf16.msra.mxu1 %v15648_v9  ;;  %v15688_v9 = vld [vmem:[%s16269_s5 + $0x1630] sm:$0xff]  }
 0x304   : > { %v14077_v12 = vpop.f32.mrb[56].mxu0  ;;  %14401 = vmatprep.subr.bf16.mxu1 %v15650_v11  ;;  %v15690_v11 = vld [vmem:[%s16269_s5 + $0x1678] sm:$0xff]  }
 0x305   : > { %v14078_v14 = vpop.f32.mrb[57].mxu0  ;;  %v14099_v16 = vpop.f32.mrb[56].mxu1 }
 0x306   : > { %v14079_v17 = vadd.f32 %v14078_v14, %v14077_v12  ;;  %v14080_v18 = vpop.f32.mrb[58].mxu0  ;;  %v14100_v21 = vpop.f32.mrb[57].mxu1  ;;  %14380 = vmatpush3.bf16.msra.mxu0 %v15651_v13  ;;  %v15689_v13 = vld [vmem:[%s16269_s5 + $0x16b0] sm:$0xff]   ;;  %v15691_v14 = vld [vmem:[%s16269_s5 + $0x16f8] sm:$0xff]  }
 0x307   : > { %v14081_v22 = vpop.f32.mrb[59].mxu0  ;;  %v14101_v24 = vadd.f32 %v14100_v21, %v14099_v16  ;;  %v14102_v25 = vpop.f32.mrb[58].mxu1  ;;  %14381 = vmatprep.subr.bf16.mxu0 %v15653_v19  ;;  %14402 = vmatpush3.bf16.msra.mxu1 %v15652_v15  ;;  %v15692_v15 = vld [vmem:[%s16269_s5 + $0x1638] sm:$0xff]   ;;  %v15694_v18 = vld [vmem:[%s16269_s5 + $0x1740] sm:$0xff]  }
 0x308   : > { %v10807_v23 = vadd.f32 %v14079_v17, %v17132_v37  ;;  %v14103_v27 = vpop.f32.mrb[59].mxu1  ;;  %14403 = vmatprep.subr.bf16.mxu1 %v15654_v20  ;;  %v15663_v37 = vld [vmem:[%s16269_s5 + $0x16c0] sm:$0xff]   ;;  %v234_v16 = vld [vmem:[%s17663_s0 + $0x58] sm:$0xff] }
 0x309   : > { %v2922_v17 = vrot.slane %v234_v16, %v16311_v35  ;;  %v2915_v19 = vcombine.high %v234_v16, %v234_v16  ;;  %v15693_v20 = vld [vmem:[%s16269_s5 + $0x16b8] sm:$0xff]   ;;  %v15696_v25 = vld [vmem:[%s16269_s5 + $0x1700] sm:$0xff]   ;;  %v15731_v16 = vld [vmem:[%s16269_s5 + $0x1848] sm:$0xff]  }
 0x30a   : > { %v17179_v29 = vadd.f32 %v14101_v24, %v10807_v23  ;;  %14382 = vmatpush3.bf16.msra.mxu0 %v15655_v26  ;;  %v15695_v23 = vld [vmem:[%s16269_s5 + $0x17c0] sm:$0xff]  }
 0x30b   : > { %14383 = vmatprep.subr.bf16.mxu0 %v15657_v30  ;;  %14404 = vmatpush3.bf16.msra.mxu1 %v15656_v28  ;;  %v2930_v21 = vcombine.high %v2922_v17, %v2922_v17  ;;  %v2938_v22 = vrot.slane %v2922_v17, %v16311_v35  ;;  %v17230_v24 = vrot.slane %v2915_v19, %v16311_v35  ;;  %v15697_v27 = vld [vmem:[%s16269_s5 + $0x1780] sm:$0xff]   ;;  %v15698_v30 = vld [vmem:[%s16269_s5 + $0x1748] sm:$0xff]  }
 0x30c   : > { %14405 = vmatprep.subr.bf16.mxu1 %v15658_v31  ;;  %v15732_v17 = vld [vmem:[%s16269_s5 + $0x18c8] sm:$0xff]  }
 0x30d   : > { %v2952_v26 = vrot.slane %v2930_v21, %v16311_v35  ;;  %v2931_v28 = vcombine.high %v17230_v24, %v17230_v24  ;;  %v15734_v19 = vld [vmem:[%s16269_s5 + $0x1888] sm:$0xff]   ;;  %v15736_v21 = vld [vmem:[%s16269_s5 + $0x18d0] sm:$0xff]  }
 0x30e   : > { %14384 = vmatpush3.bf16.msra.mxu0 %v15659_v32  ;;  %v15699_v32 = vld [vmem:[%s16269_s5 + $0x17c8] sm:$0xff]  }
 0x30f   : > { %14413 = vmatprep.subr.bf16.mxu0 %v15662_v36  ;;  %14406 = vmatpush3.bf16.msra.mxu1 %v15660_v33  ;;  %v2962_v31 = vcombine.high %v2952_v26, %v2952_v26  ;;  %v2959_v33 = vrot.slane %v2931_v28, %v16311_v35  ;;  %v15701_v36 = vld [vmem:[%s16269_s5 + $0x1788] sm:$0xff]   ;;  %v15743_v28 = vld [vmem:[%s16269_s5 + $0x1860] sm:$0xff]  }
 0x310   : > { %14435 = vmatprep.subr.bf16.mxu1 %v15663_v37 }
 0x311   : > { %11365 = vmatmul.mubr.bf16.vlgmr.msra.gmra.mrb[84].mxu0 %v2896_v34  ;;  %v15700_v34 = vld [vmem:[%s16269_s5 + $0x1708] sm:$0xff]   ;;  %v2963_v37 = vcombine.high %v2959_v33, %v2959_v33 }
 0x312   : > { %14414 = vmatpush3.bf16.msra.mxu0 %v15664_v38  ;;  %11405 = vmatmul.mubr.bf16.vlgmr.msra.gmra.mrb[84].mxu1 %v2912_v40  ;;  %v15702_v38 = vld [vmem:[%s16269_s5 + $0x1750] sm:$0xff]  }
 0x313   : > { %14415 = vmatprep.subr.bf16.mxu0 %v15666_v41  ;;  %14436 = vmatpush3.bf16.msra.mxu1 %v15665_v39  ;;  %v15703_v39 = vld [vmem:[%s16269_s5 + $0x17d0] sm:$0xff]  }
 0x314   : > { %14437 = vmatprep.subr.bf16.mxu1 %v15667_v42  ;;  %11444 = vmatprep.mubr.bf16.mxu0 %v2952_v26  ;;  %v15704_v40 = vld [vmem:[%s16269_s5 + $0x1710] sm:$0xff]   ;;  %v15706_v42 = vld [vmem:[%s16269_s5 + $0x1758] sm:$0xff]  }
 0x315   : > { %11484 = vmatprep.mubr.bf16.mxu1 %v2962_v31  ;;  %v15705_v41 = vld [vmem:[%s16269_s5 + $0x1790] sm:$0xff]   ;;  %v15741_v26 = vld [vmem:[%s16269_s5 + $0x1818] sm:$0xff]   ;;  %v15746_v31 = vld [vmem:[%s16269_s5 + $0x18a0] sm:$0xff]  }
 0x316   : > { %14416 = vmatpush3.bf16.msra.mxu0 %v15668_v43  ;;  %v15707_v43 = vld [vmem:[%s16269_s5 + $0x17d8] sm:$0xff]  }
 0x317   : > { %14417 = vmatprep.subr.bf16.mxu0 %v15670_v45  ;;  %14438 = vmatpush3.bf16.msra.mxu1 %v15669_v44  ;;  %v15708_v44 = vld [vmem:[%s16269_s5 + $0x1718] sm:$0xff]  }
 0x318   : > { %14439 = vmatprep.subr.bf16.mxu1 %v15671_v46  ;;  %v15709_v45 = vld [vmem:[%s16269_s5 + $0x1798] sm:$0xff]   ;;  %v15710_v46 = vld [vmem:[%s16269_s5 + $0x1760] sm:$0xff]  }
 0x31a   : > { %14418 = vmatpush3.bf16.msra.mxu0 %v15672_v47  ;;  %v15711_v47 = vld [vmem:[%s16269_s5 + $0x17e0] sm:$0xff]  }
 0x31b   : > { %14419 = vmatprep.subr.bf16.mxu0 %v15674_v49  ;;  %14440 = vmatpush3.bf16.msra.mxu1 %v15673_v48  ;;  %v15712_v48 = vld [vmem:[%s16269_s5 + $0x1720] sm:$0xff]  }
 0x31c   : > { %14441 = vmatprep.subr.bf16.mxu1 %v15675_v50  ;;  %v15713_v49 = vld [vmem:[%s16269_s5 + $0x17a0] sm:$0xff]   ;;  %v15714_v50 = vld [vmem:[%s16269_s5 + $0x1768] sm:$0xff]  }
 0x31e   : > { %14420 = vmatpush3.bf16.msra.mxu0 %v15676_v51  ;;  %v15715_v51 = vld [vmem:[%s16269_s5 + $0x17e8] sm:$0xff]  }
 0x31f   : > { %14421 = vmatprep.subr.bf16.mxu0 %v15678_v53  ;;  %14442 = vmatpush3.bf16.msra.mxu1 %v15677_v52  ;;  %v15716_v53 = vld [vmem:[%s16269_s5 + $0x1728] sm:$0xff]  }
 0x320   : > { %14443 = vmatprep.subr.bf16.mxu1 %v15679_v54 }
 0x322   : > { %14422 = vmatpush3.bf16.msra.mxu0 %v15680_v55  ;;  %v15717_v55 = vld [vmem:[%s16269_s5 + $0x17a8] sm:$0xff]  }
 0x323   : > { %14423 = vmatprep.subr.bf16.mxu0 %v15682_v57  ;;  %14444 = vmatpush3.bf16.msra.mxu1 %v15681_v56 }
 0x324   : > { %v14121_v59 = vpop.f32.mrb[60].mxu0  ;;  %14445 = vmatprep.subr.bf16.mxu1 %v15683_v58 }
 0x325   : > { %v14122_v61 = vpop.f32.mrb[61].mxu0  ;;  %v14143_v63 = vpop.f32.mrb[60].mxu1 }
 0x326   : > { %v14123_v0 = vadd.f32 %v14122_v61, %v14121_v59  ;;  %v14124_v1 = vpop.f32.mrb[62].mxu0  ;;  %v14144_v2 = vpop.f32.mrb[61].mxu1  ;;  %14424 = vmatpush3.bf16.msra.mxu0 %v15684_v60  ;;  %v15718_v59 = vld [vmem:[%s16269_s5 + $0x1770] sm:$0xff]  }
 0x327   : > { %v14125_v4 = vpop.f32.mrb[63].mxu0  ;;  %v14145_v7 = vadd.f32 %v14144_v2, %v14143_v63  ;;  %v14146_v8 = vpop.f32.mrb[62].mxu1  ;;  %14425 = vmatprep.subr.bf16.mxu0 %v15686_v62  ;;  %14446 = vmatpush3.bf16.msra.mxu1 %v15685_v3  ;;  %v15719_v60 = vld [vmem:[%s16269_s5 + $0x17f0] sm:$0xff]  }
 0x328   : > { %v10887_v6 = vadd.f32 %v14123_v0, %v17179_v29  ;;  %v14147_v10 = vpop.f32.mrb[63].mxu1  ;;  %14447 = vmatprep.subr.bf16.mxu1 %v15687_v5  ;;  %v2960_v29 = vcombine.high %v2938_v22, %v2938_v22  ;;  %v15720_v2 = vld [vmem:[%s16269_s5 + $0x1730] sm:$0xff]   ;;  %v15724_v8 = vld [vmem:[%s16269_s5 + $0x1738] sm:$0xff]  }
 0x329   : > { %v15721_v4 = vld [vmem:[%s16269_s5 + $0x17b0] sm:$0xff]   ;;  %v2945_v10 = vrot.slane %v17230_v24, %v16311_v35  ;;  %v15739_v24 = vld [vmem:[%s16269_s5 + $0x1858] sm:$0xff]  }
 0x32a   : > { %v17216_v12 = vadd.f32 %v14145_v7, %v10887_v6  ;;  %14426 = vmatpush3.bf16.msra.mxu0 %v15688_v9  ;;  %v15722_v6 = vld [vmem:[%s16269_s5 + $0x1778] sm:$0xff]  }
 0x32b   : > { %14427 = vmatprep.subr.bf16.mxu0 %v15690_v11  ;;  %14448 = vmatpush3.bf16.msra.mxu1 %v15689_v13  ;;  %v15723_v7 = vld [vmem:[%s16269_s5 + $0x17f8] sm:$0xff]   ;;  %v15727_v11 = vld [vmem:[%s16269_s5 + $0x1840] sm:$0xff]  }
 0x32c   : > { %14449 = vmatprep.subr.bf16.mxu1 %v15691_v14  ;;  %v15725_v9 = vld [vmem:[%s16269_s5 + $0x17b8] sm:$0xff]   ;;  %v15729_v13 = vld [vmem:[%s16269_s5 + $0x1800] sm:$0xff]  }
 0x32d   : > { %v15730_v14 = vld [vmem:[%s16269_s5 + $0x1880] sm:$0xff]  }
 0x32e   : > { %14428 = vmatpush3.bf16.msra.mxu0 %v15692_v15  ;;  %v2961_v15 = vcombine.high %v2945_v10, %v2945_v10 }
 0x32f   : > { %14457 = vmatprep.subr.bf16.mxu0 %v15694_v18  ;;  %14450 = vmatpush3.bf16.msra.mxu1 %v15693_v20  ;;  %v15733_v18 = vld [vmem:[%s16269_s5 + $0x1808] sm:$0xff]   ;;  %v15735_v20 = vld [vmem:[%s16269_s5 + $0x1850] sm:$0xff]  }
 0x330   : > { %14479 = vmatprep.subr.bf16.mxu1 %v15695_v23  ;;  %v15738_v23 = vld [vmem:[%s16269_s5 + $0x1890] sm:$0xff]  }
 0x331   : > { %11445 = vmatmul.mubr.bf16.vlgmr.msra.gmra.mrb[88].mxu0 %v2938_v22  ;;  %v15737_v22 = vld [vmem:[%s16269_s5 + $0x1810] sm:$0xff]  }
 0x332   : > { %14458 = vmatpush3.bf16.msra.mxu0 %v15696_v25  ;;  %11485 = vmatmul.mubr.bf16.vlgmr.msra.gmra.mrb[88].mxu1 %v2960_v29  ;;  %v15740_v25 = vld [vmem:[%s16269_s5 + $0x18d8] sm:$0xff]   ;;  %v15744_v29 = vld [vmem:[%s16269_s5 + $0x18e0] sm:$0xff]  }
 0x333   : > { %14459 = vmatprep.subr.bf16.mxu0 %v15698_v30  ;;  %14480 = vmatpush3.bf16.msra.mxu1 %v15697_v27  ;;  %v15742_v27 = vld [vmem:[%s16269_s5 + $0x1898] sm:$0xff]   ;;  %v15745_v30 = vld [vmem:[%s16269_s5 + $0x1820] sm:$0xff]  }
 0x334   : > { %11524 = vmatprep.mubr.bf16.mxu0 %v2959_v33  ;;  %14481 = vmatprep.subr.bf16.mxu1 %v15699_v32  ;;  %v15747_v32 = vld [vmem:[%s16269_s5 + $0x1868] sm:$0xff]  }
 0x335   : > { %11564 = vmatprep.mubr.bf16.mxu1 %v2963_v37  ;;  %v15748_v33 = vld [vmem:[%s16269_s5 + $0x18e8] sm:$0xff]  }
 0x336   : > { %14460 = vmatpush3.bf16.msra.mxu0 %v15700_v34 }
 0x337   : > { %14461 = vmatprep.subr.bf16.mxu0 %v15702_v38  ;;  %14482 = vmatpush3.bf16.msra.mxu1 %v15701_v36  ;;  %v15749_v36 = vld [vmem:[%s16269_s5 + $0x1828] sm:$0xff]   ;;  %v15751_v38 = vld [vmem:[%s16269_s5 + $0x1870] sm:$0xff]  }
 0x338   : > { %14483 = vmatprep.subr.bf16.mxu1 %v15703_v39 }
 0x33a   : > { %14462 = vmatpush3.bf16.msra.mxu0 %v15704_v40 }
 0x33b   : > { %14463 = vmatprep.subr.bf16.mxu0 %v15706_v42  ;;  %14484 = vmatpush3.bf16.msra.mxu1 %v15705_v41 }
 0x33c   : > { %14485 = vmatprep.subr.bf16.mxu1 %v15707_v43  ;;  %v15750_v43 = vld [vmem:[%s16269_s5 + $0x18a8] sm:$0xff]  }
 0x33e   : > { %14464 = vmatpush3.bf16.msra.mxu0 %v15708_v44 }
 0x33f   : > { %14465 = vmatprep.subr.bf16.mxu0 %v15710_v46  ;;  %14486 = vmatpush3.bf16.msra.mxu1 %v15709_v45  ;;  %v15752_v45 = vld [vmem:[%s16269_s5 + $0x18f0] sm:$0xff]  }
 0x340   : > { %14487 = vmatprep.subr.bf16.mxu1 %v15711_v47 }
 0x342   : > { %14466 = vmatpush3.bf16.msra.mxu0 %v15712_v48 }
 0x343   : > { %14467 = vmatprep.subr.bf16.mxu0 %v15714_v50  ;;  %14488 = vmatpush3.bf16.msra.mxu1 %v15713_v49  ;;  %v15753_v49 = vld [vmem:[%s16269_s5 + $0x1830] sm:$0xff]  }
 0x344   : > { %v14165_v52 = vpop.f32.mrb[64].mxu0  ;;  %14489 = vmatprep.subr.bf16.mxu1 %v15715_v51  ;;  %v15755_v51 = vld [vmem:[%s16269_s5 + $0x1878] sm:$0xff]  }
 0x345   : > { %v14166_v54 = vpop.f32.mrb[65].mxu0  ;;  %v14187_v56 = vpop.f32.mrb[64].mxu1 }
 0x346   : > { %v14167_v57 = vadd.f32 %v14166_v54, %v14165_v52  ;;  %v14168_v58 = vpop.f32.mrb[66].mxu0  ;;  %v14188_v61 = vpop.f32.mrb[65].mxu1  ;;  %14468 = vmatpush3.bf16.msra.mxu0 %v15716_v53  ;;  %v15754_v53 = vld [vmem:[%s16269_s5 + $0x18b0] sm:$0xff]   ;;  %v15756_v54 = vld [vmem:[%s16269_s5 + $0x18f8] sm:$0xff]  }
 0x347   : > { %v14169_v62 = vpop.f32.mrb[67].mxu0  ;;  %v14189_v0 = vadd.f32 %v14188_v61, %v14187_v56  ;;  %v14190_v1 = vpop.f32.mrb[66].mxu1  ;;  %14469 = vmatprep.subr.bf16.mxu0 %v15718_v59  ;;  %14490 = vmatpush3.bf16.msra.mxu1 %v15717_v55  ;;  %v15757_v55 = vld [vmem:[%s16269_s5 + $0x1838] sm:$0xff]   ;;  %v235_v56 = vld [vmem:[%s17663_s0 + $0x60] sm:$0xff] }
 0x348   : > { %v10967_v63 = vadd.f32 %v14167_v57, %v17216_v12  ;;  %v14191_v3 = vpop.f32.mrb[67].mxu1  ;;  %14491 = vmatprep.subr.bf16.mxu1 %v15719_v60  ;;  %v15728_v12 = vld [vmem:[%s16269_s5 + $0x18c0] sm:$0xff]   ;;  %v2971_v57 = vrot.slane %v235_v56, %v16311_v35  ;;  %v2964_v59 = vcombine.high %v235_v56, %v235_v56  ;;  %v15758_v60 = vld [vmem:[%s16269_s5 + $0x18b8] sm:$0xff]   ;;  %v15796_v56 = vld [vmem:[%s16269_s5 + $0x1a48] sm:$0xff]  }
 0x349   : > { %v15759_v58 = vld [vmem:[%s16269_s5 + $0x1940] sm:$0xff]  }
 0x34a   : > { %v17263_v5 = vadd.f32 %v14189_v0, %v10967_v63  ;;  %14470 = vmatpush3.bf16.msra.mxu0 %v15720_v2  ;;  %v2979_v61 = vcombine.high %v2971_v57, %v2971_v57  ;;  %v2987_v62 = vrot.slane %v2971_v57, %v16311_v35  ;;  %v15760_v63 = vld [vmem:[%s16269_s5 + $0x19c0] sm:$0xff]   ;;  %v17314_v0 = vrot.slane %v2964_v59, %v16311_v35  ;;  %v15797_v57 = vld [vmem:[%s16269_s5 + $0x1ac8] sm:$0xff]  }
 0x34b   : > { %14471 = vmatprep.subr.bf16.mxu0 %v15722_v6  ;;  %14492 = vmatpush3.bf16.msra.mxu1 %v15721_v4  ;;  %v15761_v1 = vld [vmem:[%s16269_s5 + $0x1900] sm:$0xff]   ;;  %v15763_v6 = vld [vmem:[%s16269_s5 + $0x1948] sm:$0xff]  }
 0x34c   : > { %14493 = vmatprep.subr.bf16.mxu1 %v15723_v7  ;;  %v3001_v2 = vrot.slane %v2979_v61, %v16311_v35  ;;  %v15762_v3 = vld [vmem:[%s16269_s5 + $0x1980] sm:$0xff]   ;;  %v2980_v4 = vcombine.high %v17314_v0, %v17314_v0  ;;  %v15799_v59 = vld [vmem:[%s16269_s5 + $0x1a88] sm:$0xff]   ;;  %v15801_v61 = vld [vmem:[%s16269_s5 + $0x1ad0] sm:$0xff]  }
 0x34e   : > { %14472 = vmatpush3.bf16.msra.mxu0 %v15724_v8  ;;  %v3011_v7 = vcombine.high %v3001_v2, %v3001_v2  ;;  %v15764_v8 = vld [vmem:[%s16269_s5 + $0x19c8] sm:$0xff]  }
 0x34f   : > { %14501 = vmatprep.subr.bf16.mxu0 %v15727_v11  ;;  %14494 = vmatpush3.bf16.msra.mxu1 %v15725_v9  ;;  %v3008_v9 = vrot.slane %v2980_v4, %v16311_v35  ;;  %v15766_v11 = vld [vmem:[%s16269_s5 + $0x1988] sm:$0xff]   ;;  %v15808_v4 = vld [vmem:[%s16269_s5 + $0x1a60] sm:$0xff]  }
 0x350   : > { %14523 = vmatprep.subr.bf16.mxu1 %v15728_v12 }
 0x351   : > { %11525 = vmatmul.mubr.bf16.vlgmr.msra.gmra.mrb[92].mxu0 %v2945_v10  ;;  %v15765_v10 = vld [vmem:[%s16269_s5 + $0x1908] sm:$0xff]   ;;  %v3012_v12 = vcombine.high %v3008_v9, %v3008_v9 }
 0x352   : > { %14502 = vmatpush3.bf16.msra.mxu0 %v15729_v13  ;;  %11565 = vmatmul.mubr.bf16.vlgmr.msra.gmra.mrb[92].mxu1 %v2961_v15  ;;  %v15767_v13 = vld [vmem:[%s16269_s5 + $0x1950] sm:$0xff]  }
 0x353   : > { %14503 = vmatprep.subr.bf16.mxu0 %v15731_v16  ;;  %14524 = vmatpush3.bf16.msra.mxu1 %v15730_v14  ;;  %v15768_v14 = vld [vmem:[%s16269_s5 + $0x19d0] sm:$0xff]  }
 0x354   : > { %14525 = vmatprep.subr.bf16.mxu1 %v15732_v17  ;;  %11604 = vmatprep.mubr.bf16.mxu0 %v3001_v2  ;;  %v15769_v15 = vld [vmem:[%s16269_s5 + $0x1910] sm:$0xff]   ;;  %v15771_v17 = vld [vmem:[%s16269_s5 + $0x1958] sm:$0xff]  }
 0x355   : > { %11644 = vmatprep.mubr.bf16.mxu1 %v3011_v7  ;;  %v15770_v16 = vld [vmem:[%s16269_s5 + $0x1990] sm:$0xff]   ;;  %v15806_v2 = vld [vmem:[%s16269_s5 + $0x1a18] sm:$0xff]   ;;  %v15811_v7 = vld [vmem:[%s16269_s5 + $0x1aa0] sm:$0xff]  }
 0x356   : > { %14504 = vmatpush3.bf16.msra.mxu0 %v15733_v18  ;;  %v15772_v18 = vld [vmem:[%s16269_s5 + $0x19d8] sm:$0xff]  }
 0x357   : > { %14505 = vmatprep.subr.bf16.mxu0 %v15735_v20  ;;  %14526 = vmatpush3.bf16.msra.mxu1 %v15734_v19  ;;  %v15773_v19 = vld [vmem:[%s16269_s5 + $0x1918] sm:$0xff]  }
 0x358   : > { %14527 = vmatprep.subr.bf16.mxu1 %v15736_v21  ;;  %v15774_v20 = vld [vmem:[%s16269_s5 + $0x1998] sm:$0xff]   ;;  %v15775_v21 = vld [vmem:[%s16269_s5 + $0x1960] sm:$0xff]  }
 0x35a   : > { %14506 = vmatpush3.bf16.msra.mxu0 %v15737_v22  ;;  %v15776_v22 = vld [vmem:[%s16269_s5 + $0x19e0] sm:$0xff]  }
 0x35b   : > { %14507 = vmatprep.subr.bf16.mxu0 %v15739_v24  ;;  %14528 = vmatpush3.bf16.msra.mxu1 %v15738_v23  ;;  %v15777_v23 = vld [vmem:[%s16269_s5 + $0x1920] sm:$0xff]  }
 0x35c   : > { %14529 = vmatprep.subr.bf16.mxu1 %v15740_v25  ;;  %v15778_v24 = vld [vmem:[%s16269_s5 + $0x19a0] sm:$0xff]   ;;  %v15779_v25 = vld [vmem:[%s16269_s5 + $0x1968] sm:$0xff]  }
 0x35e   : > { %14508 = vmatpush3.bf16.msra.mxu0 %v15741_v26  ;;  %v15780_v26 = vld [vmem:[%s16269_s5 + $0x19e8] sm:$0xff]  }
 0x35f   : > { %14509 = vmatprep.subr.bf16.mxu0 %v15743_v28  ;;  %14530 = vmatpush3.bf16.msra.mxu1 %v15742_v27  ;;  %v15781_v28 = vld [vmem:[%s16269_s5 + $0x1928] sm:$0xff]  }
 0x360   : > { %14531 = vmatprep.subr.bf16.mxu1 %v15744_v29 }
 0x362   : > { %14510 = vmatpush3.bf16.msra.mxu0 %v15745_v30  ;;  %v15782_v30 = vld [vmem:[%s16269_s5 + $0x19a8] sm:$0xff]  }
 0x363   : > { %14511 = vmatprep.subr.bf16.mxu0 %v15747_v32  ;;  %14532 = vmatpush3.bf16.msra.mxu1 %v15746_v31 }
 0x364   : > { %v14209_v34 = vpop.f32.mrb[68].mxu0  ;;  %14533 = vmatprep.subr.bf16.mxu1 %v15748_v33 }
 0x365   : > { %v14210_v37 = vpop.f32.mrb[69].mxu0  ;;  %v14231_v39 = vpop.f32.mrb[68].mxu1 }
 0x366   : > { %v14211_v40 = vadd.f32 %v14210_v37, %v14209_v34  ;;  %v14212_v41 = vpop.f32.mrb[70].mxu0  ;;  %v14232_v42 = vpop.f32.mrb[69].mxu1  ;;  %14512 = vmatpush3.bf16.msra.mxu0 %v15749_v36  ;;  %v15783_v34 = vld [vmem:[%s16269_s5 + $0x1970] sm:$0xff]  }
 0x367   : > { %v14213_v44 = vpop.f32.mrb[71].mxu0  ;;  %v14233_v47 = vadd.f32 %v14232_v42, %v14231_v39  ;;  %v14234_v48 = vpop.f32.mrb[70].mxu1  ;;  %14513 = vmatprep.subr.bf16.mxu0 %v15751_v38  ;;  %14534 = vmatpush3.bf16.msra.mxu1 %v15750_v43  ;;  %v15784_v36 = vld [vmem:[%s16269_s5 + $0x19f0] sm:$0xff]  }
 0x368   : > { %v11047_v46 = vadd.f32 %v14211_v40, %v17263_v5  ;;  %v14235_v50 = vpop.f32.mrb[71].mxu1  ;;  %14535 = vmatprep.subr.bf16.mxu1 %v15752_v45  ;;  %v3009_v5 = vcombine.high %v2987_v62, %v2987_v62  ;;  %v15785_v42 = vld [vmem:[%s16269_s5 + $0x1930] sm:$0xff]   ;;  %v15789_v48 = vld [vmem:[%s16269_s5 + $0x1938] sm:$0xff]  }
 0x369   : > { %v15786_v44 = vld [vmem:[%s16269_s5 + $0x19b0] sm:$0xff]   ;;  %v2994_v50 = vrot.slane %v17314_v0, %v16311_v35  ;;  %v15804_v0 = vld [vmem:[%s16269_s5 + $0x1a58] sm:$0xff]  }
 0x36a   : > { %v17300_v52 = vadd.f32 %v14233_v47, %v11047_v46  ;;  %14514 = vmatpush3.bf16.msra.mxu0 %v15753_v49  ;;  %v15787_v46 = vld [vmem:[%s16269_s5 + $0x1978] sm:$0xff]  }
 0x36b   : > { %14515 = vmatprep.subr.bf16.mxu0 %v15755_v51  ;;  %14536 = vmatpush3.bf16.msra.mxu1 %v15754_v53  ;;  %v15788_v47 = vld [vmem:[%s16269_s5 + $0x19f8] sm:$0xff]   ;;  %v15792_v51 = vld [vmem:[%s16269_s5 + $0x1a40] sm:$0xff]  }
 0x36c   : > { %14537 = vmatprep.subr.bf16.mxu1 %v15756_v54  ;;  %v15790_v49 = vld [vmem:[%s16269_s5 + $0x19b8] sm:$0xff]   ;;  %v15794_v53 = vld [vmem:[%s16269_s5 + $0x1a00] sm:$0xff]  }
 0x36d   : > { %v15795_v54 = vld [vmem:[%s16269_s5 + $0x1a80] sm:$0xff]  }
 0x36e   : > { %14516 = vmatpush3.bf16.msra.mxu0 %v15757_v55  ;;  %v3010_v55 = vcombine.high %v2994_v50, %v2994_v50 }
 0x36f   : > { %14545 = vmatprep.subr.bf16.mxu0 %v15759_v58  ;;  %14538 = vmatpush3.bf16.msra.mxu1 %v15758_v60  ;;  %v15798_v58 = vld [vmem:[%s16269_s5 + $0x1a08] sm:$0xff]   ;;  %v15800_v60 = vld [vmem:[%s16269_s5 + $0x1a50] sm:$0xff]  }
 0x370   : > { %14567 = vmatprep.subr.bf16.mxu1 %v15760_v63  ;;  %v15803_v63 = vld [vmem:[%s16269_s5 + $0x1a90] sm:$0xff]  }
 0x371   : > { %11605 = vmatmul.mubr.bf16.vlgmr.msra.gmra.mrb[96].mxu0 %v2987_v62  ;;  %v15802_v62 = vld [vmem:[%s16269_s5 + $0x1a10] sm:$0xff]  }
 0x372   : > { %14546 = vmatpush3.bf16.msra.mxu0 %v15761_v1  ;;  %11645 = vmatmul.mubr.bf16.vlgmr.msra.gmra.mrb[96].mxu1 %v3009_v5  ;;  %v15805_v1 = vld [vmem:[%s16269_s5 + $0x1ad8] sm:$0xff]   ;;  %v15809_v5 = vld [vmem:[%s16269_s5 + $0x1ae0] sm:$0xff]  }
 0x373   : > { %14547 = vmatprep.subr.bf16.mxu0 %v15763_v6  ;;  %14568 = vmatpush3.bf16.msra.mxu1 %v15762_v3  ;;  %v15807_v3 = vld [vmem:[%s16269_s5 + $0x1a98] sm:$0xff]   ;;  %v15810_v6 = vld [vmem:[%s16269_s5 + $0x1a20] sm:$0xff]  }
 0x374   : > { %11684 = vmatprep.mubr.bf16.mxu0 %v3008_v9  ;;  %14569 = vmatprep.subr.bf16.mxu1 %v15764_v8  ;;  %v15812_v8 = vld [vmem:[%s16269_s5 + $0x1a68] sm:$0xff]  }
 0x375   : > { %11724 = vmatprep.mubr.bf16.mxu1 %v3012_v12  ;;  %v15813_v9 = vld [vmem:[%s16269_s5 + $0x1ae8] sm:$0xff]  }
 0x376   : > { %14548 = vmatpush3.bf16.msra.mxu0 %v15765_v10 }
 0x377   : > { %14549 = vmatprep.subr.bf16.mxu0 %v15767_v13  ;;  %14570 = vmatpush3.bf16.msra.mxu1 %v15766_v11  ;;  %v15814_v11 = vld [vmem:[%s16269_s5 + $0x1a28] sm:$0xff]   ;;  %v15816_v13 = vld [vmem:[%s16269_s5 + $0x1a70] sm:$0xff]  }
 0x378   : > { %14571 = vmatprep.subr.bf16.mxu1 %v15768_v14 }
 0x37a   : > { %14550 = vmatpush3.bf16.msra.mxu0 %v15769_v15 }
 0x37b   : > { %14551 = vmatprep.subr.bf16.mxu0 %v15771_v17  ;;  %14572 = vmatpush3.bf16.msra.mxu1 %v15770_v16 }
 0x37c   : > { %14573 = vmatprep.subr.bf16.mxu1 %v15772_v18  ;;  %v15815_v18 = vld [vmem:[%s16269_s5 + $0x1aa8] sm:$0xff]  }
 0x37e   : > { %14552 = vmatpush3.bf16.msra.mxu0 %v15773_v19 }
 0x37f   : > { %14553 = vmatprep.subr.bf16.mxu0 %v15775_v21  ;;  %14574 = vmatpush3.bf16.msra.mxu1 %v15774_v20  ;;  %v15817_v20 = vld [vmem:[%s16269_s5 + $0x1af0] sm:$0xff]  }
 0x380   : > { %14575 = vmatprep.subr.bf16.mxu1 %v15776_v22 }
 0x382   : > { %14554 = vmatpush3.bf16.msra.mxu0 %v15777_v23 }
 0x383   : > { %14555 = vmatprep.subr.bf16.mxu0 %v15779_v25  ;;  %14576 = vmatpush3.bf16.msra.mxu1 %v15778_v24  ;;  %v15818_v24 = vld [vmem:[%s16269_s5 + $0x1a30] sm:$0xff]  }
 0x384   : > { %v14253_v27 = vpop.f32.mrb[72].mxu0  ;;  %14577 = vmatprep.subr.bf16.mxu1 %v15780_v26  ;;  %v15820_v26 = vld [vmem:[%s16269_s5 + $0x1a78] sm:$0xff]  }
 0x385   : > { %v14254_v29 = vpop.f32.mrb[73].mxu0  ;;  %v14275_v31 = vpop.f32.mrb[72].mxu1 }
 0x386   : > { %v14255_v32 = vadd.f32 %v14254_v29, %v14253_v27  ;;  %v14256_v33 = vpop.f32.mrb[74].mxu0  ;;  %v14276_v37 = vpop.f32.mrb[73].mxu1  ;;  %14556 = vmatpush3.bf16.msra.mxu0 %v15781_v28  ;;  %v15819_v28 = vld [vmem:[%s16269_s5 + $0x1ab0] sm:$0xff]   ;;  %v15821_v29 = vld [vmem:[%s16269_s5 + $0x1af8] sm:$0xff]  }
 0x387   : > { %v14257_v38 = vpop.f32.mrb[75].mxu0  ;;  %v14277_v40 = vadd.f32 %v14276_v37, %v14275_v31  ;;  %v14278_v41 = vpop.f32.mrb[74].mxu1  ;;  %14557 = vmatprep.subr.bf16.mxu0 %v15783_v34  ;;  %14578 = vmatpush3.bf16.msra.mxu1 %v15782_v30  ;;  %v15822_v30 = vld [vmem:[%s16269_s5 + $0x1a38] sm:$0xff]   ;;  %v236_v31 = vld [vmem:[%s17663_s0 + $0x68] sm:$0xff]  ;;  %v15824_v33 = vld [vmem:[%s16269_s5 + $0x1b40] sm:$0xff]  }
 0x388   : > { %v11127_v39 = vadd.f32 %v14255_v32, %v17300_v52  ;;  %v14279_v43 = vpop.f32.mrb[75].mxu1  ;;  %14579 = vmatprep.subr.bf16.mxu1 %v15784_v36  ;;  %v15793_v52 = vld [vmem:[%s16269_s5 + $0x1ac0] sm:$0xff]   ;;  %v3020_v32 = vrot.slane %v236_v31, %v16311_v35  ;;  %v3013_v34 = vcombine.high %v236_v31, %v236_v31  ;;  %v15823_v36 = vld [vmem:[%s16269_s5 + $0x1ab8] sm:$0xff]   ;;  %v15861_v31 = vld [vmem:[%s16269_s5 + $0x1c48] sm:$0xff]  }
 0x389   : > { %v15826_v41 = vld [vmem:[%s16269_s5 + $0x1b00] sm:$0xff]  }
 0x38a   : > { %v17347_v45 = vadd.f32 %v14277_v40, %v11127_v39  ;;  %14558 = vmatpush3.bf16.msra.mxu0 %v15785_v42  ;;  %v3028_v37 = vcombine.high %v3020_v32, %v3020_v32  ;;  %v3036_v38 = vrot.slane %v3020_v32, %v16311_v35  ;;  %v15825_v39 = vld [vmem:[%s16269_s5 + $0x1bc0] sm:$0xff]   ;;  %v17398_v40 = vrot.slane %v3013_v34, %v16311_v35  ;;  %v15862_v32 = vld [vmem:[%s16269_s5 + $0x1cc8] sm:$0xff]  }
 0x38b   : > { %14559 = vmatprep.subr.bf16.mxu0 %v15787_v46  ;;  %14580 = vmatpush3.bf16.msra.mxu1 %v15786_v44  ;;  %v15827_v43 = vld [vmem:[%s16269_s5 + $0x1b80] sm:$0xff]   ;;  %v15828_v46 = vld [vmem:[%s16269_s5 + $0x1b48] sm:$0xff]  }
 0x38c   : > { %14581 = vmatprep.subr.bf16.mxu1 %v15788_v47  ;;  %v3050_v42 = vrot.slane %v3028_v37, %v16311_v35  ;;  %v3029_v44 = vcombine.high %v17398_v40, %v17398_v40  ;;  %v15864_v34 = vld [vmem:[%s16269_s5 + $0x1c88] sm:$0xff]   ;;  %v15866_v37 = vld [vmem:[%s16269_s5 + $0x1cd0] sm:$0xff]  }
 0x38e   : > { %14560 = vmatpush3.bf16.msra.mxu0 %v15789_v48  ;;  %v3060_v47 = vcombine.high %v3050_v42, %v3050_v42  ;;  %v15829_v48 = vld [vmem:[%s16269_s5 + $0x1bc8] sm:$0xff]  }
 0x38f   : > { %14589 = vmatprep.subr.bf16.mxu0 %v15792_v51  ;;  %14582 = vmatpush3.bf16.msra.mxu1 %v15790_v49  ;;  %v3057_v49 = vrot.slane %v3029_v44, %v16311_v35  ;;  %v15831_v51 = vld [vmem:[%s16269_s5 + $0x1b88] sm:$0xff]   ;;  %v15873_v44 = vld [vmem:[%s16269_s5 + $0x1c60] sm:$0xff]  }
 0x390   : > { %14611 = vmatprep.subr.bf16.mxu1 %v15793_v52 }
 0x391   : > { %11685 = vmatmul.mubr.bf16.vlgmr.msra.gmra.mrb[100].mxu0 %v2994_v50  ;;  %v15830_v50 = vld [vmem:[%s16269_s5 + $0x1b08] sm:$0xff]   ;;  %v3061_v52 = vcombine.high %v3057_v49, %v3057_v49 }
 0x392   : > { %14590 = vmatpush3.bf16.msra.mxu0 %v15794_v53  ;;  %11725 = vmatmul.mubr.bf16.vlgmr.msra.gmra.mrb[100].mxu1 %v3010_v55  ;;  %v15832_v53 = vld [vmem:[%s16269_s5 + $0x1b50] sm:$0xff]  }
 0x393   : > { %14591 = vmatprep.subr.bf16.mxu0 %v15796_v56  ;;  %14612 = vmatpush3.bf16.msra.mxu1 %v15795_v54  ;;  %v15833_v54 = vld [vmem:[%s16269_s5 + $0x1bd0] sm:$0xff]  }
 0x394   : > { %14613 = vmatprep.subr.bf16.mxu1 %v15797_v57  ;;  %11764 = vmatprep.mubr.bf16.mxu0 %v3050_v42  ;;  %v15834_v55 = vld [vmem:[%s16269_s5 + $0x1b10] sm:$0xff]   ;;  %v15836_v57 = vld [vmem:[%s16269_s5 + $0x1b58] sm:$0xff]  }
 0x395   : > { %11804 = vmatprep.mubr.bf16.mxu1 %v3060_v47  ;;  %v15835_v56 = vld [vmem:[%s16269_s5 + $0x1b90] sm:$0xff]   ;;  %v15871_v42 = vld [vmem:[%s16269_s5 + $0x1c18] sm:$0xff]   ;;  %v15876_v47 = vld [vmem:[%s16269_s5 + $0x1ca0] sm:$0xff]  }
 0x396   : > { %14592 = vmatpush3.bf16.msra.mxu0 %v15798_v58  ;;  %v15837_v58 = vld [vmem:[%s16269_s5 + $0x1bd8] sm:$0xff]  }
 0x397   : > { %14593 = vmatprep.subr.bf16.mxu0 %v15800_v60  ;;  %14614 = vmatpush3.bf16.msra.mxu1 %v15799_v59  ;;  %v15838_v59 = vld [vmem:[%s16269_s5 + $0x1b18] sm:$0xff]  }
 0x398   : > { %14615 = vmatprep.subr.bf16.mxu1 %v15801_v61  ;;  %v15839_v60 = vld [vmem:[%s16269_s5 + $0x1b98] sm:$0xff]   ;;  %v15840_v61 = vld [vmem:[%s16269_s5 + $0x1b60] sm:$0xff]  }
 0x39a   : > { %14594 = vmatpush3.bf16.msra.mxu0 %v15802_v62  ;;  %v15841_v62 = vld [vmem:[%s16269_s5 + $0x1be0] sm:$0xff]  }
 0x39b   : > { %14595 = vmatprep.subr.bf16.mxu0 %v15804_v0  ;;  %14616 = vmatpush3.bf16.msra.mxu1 %v15803_v63  ;;  %v15842_v63 = vld [vmem:[%s16269_s5 + $0x1b20] sm:$0xff]  }
 0x39c   : > { %14617 = vmatprep.subr.bf16.mxu1 %v15805_v1  ;;  %v15843_v0 = vld [vmem:[%s16269_s5 + $0x1ba0] sm:$0xff]   ;;  %v15844_v1 = vld [vmem:[%s16269_s5 + $0x1b68] sm:$0xff]  }
 0x39e   : > { %14596 = vmatpush3.bf16.msra.mxu0 %v15806_v2  ;;  %v15845_v2 = vld [vmem:[%s16269_s5 + $0x1be8] sm:$0xff]  }
 0x39f   : > { %14597 = vmatprep.subr.bf16.mxu0 %v15808_v4  ;;  %14618 = vmatpush3.bf16.msra.mxu1 %v15807_v3  ;;  %v15846_v4 = vld [vmem:[%s16269_s5 + $0x1b28] sm:$0xff]  }
 0x3a0   : > { %14619 = vmatprep.subr.bf16.mxu1 %v15809_v5 }
 0x3a2   : > { %14598 = vmatpush3.bf16.msra.mxu0 %v15810_v6  ;;  %v15847_v6 = vld [vmem:[%s16269_s5 + $0x1ba8] sm:$0xff]  }
 0x3a3   : > { %14599 = vmatprep.subr.bf16.mxu0 %v15812_v8  ;;  %14620 = vmatpush3.bf16.msra.mxu1 %v15811_v7 }
 0x3a4   : > { %v14297_v10 = vpop.f32.mrb[76].mxu0  ;;  %14621 = vmatprep.subr.bf16.mxu1 %v15813_v9 }
 0x3a5   : > { %v14298_v12 = vpop.f32.mrb[77].mxu0  ;;  %v14319_v14 = vpop.f32.mrb[76].mxu1 }
 0x3a6   : > { %v14299_v15 = vadd.f32 %v14298_v12, %v14297_v10  ;;  %v14300_v16 = vpop.f32.mrb[78].mxu0  ;;  %v14320_v17 = vpop.f32.mrb[77].mxu1  ;;  %14600 = vmatpush3.bf16.msra.mxu0 %v15814_v11  ;;  %v15848_v10 = vld [vmem:[%s16269_s5 + $0x1b70] sm:$0xff]  }
 0x3a7   : > { %v14301_v19 = vpop.f32.mrb[79].mxu0  ;;  %v14321_v22 = vadd.f32 %v14320_v17, %v14319_v14  ;;  %v14322_v23 = vpop.f32.mrb[78].mxu1  ;;  %14601 = vmatprep.subr.bf16.mxu0 %v15816_v13  ;;  %14622 = vmatpush3.bf16.msra.mxu1 %v15815_v18  ;;  %v15849_v11 = vld [vmem:[%s16269_s5 + $0x1bf0] sm:$0xff]  }
 0x3a8   : > { %v11207_v21 = vadd.f32 %v14299_v15, %v17347_v45  ;;  %v14323_v25 = vpop.f32.mrb[79].mxu1  ;;  %14623 = vmatprep.subr.bf16.mxu1 %v15817_v20  ;;  %v3058_v45 = vcombine.high %v3036_v38, %v3036_v38  ;;  %v15850_v17 = vld [vmem:[%s16269_s5 + $0x1b30] sm:$0xff]   ;;  %v15854_v23 = vld [vmem:[%s16269_s5 + $0x1b38] sm:$0xff]  }
 0x3a9   : > { %v15851_v19 = vld [vmem:[%s16269_s5 + $0x1bb0] sm:$0xff]   ;;  %v3043_v25 = vrot.slane %v17398_v40, %v16311_v35  ;;  %v15869_v40 = vld [vmem:[%s16269_s5 + $0x1c58] sm:$0xff]  }
 0x3aa   : > { %v17384_v27 = vadd.f32 %v14321_v22, %v11207_v21  ;;  %14602 = vmatpush3.bf16.msra.mxu0 %v15818_v24  ;;  %v15852_v21 = vld [vmem:[%s16269_s5 + $0x1b78] sm:$0xff]  }
 0x3ab   : > { %14603 = vmatprep.subr.bf16.mxu0 %v15820_v26  ;;  %14624 = vmatpush3.bf16.msra.mxu1 %v15819_v28  ;;  %v15853_v22 = vld [vmem:[%s16269_s5 + $0x1bf8] sm:$0xff]   ;;  %v15857_v26 = vld [vmem:[%s16269_s5 + $0x1c40] sm:$0xff]  }
 0x3ac   : > { %14625 = vmatprep.subr.bf16.mxu1 %v15821_v29  ;;  %v15855_v24 = vld [vmem:[%s16269_s5 + $0x1bb8] sm:$0xff]   ;;  %v15859_v28 = vld [vmem:[%s16269_s5 + $0x1c00] sm:$0xff]  }
 0x3ad   : > { %v15860_v29 = vld [vmem:[%s16269_s5 + $0x1c80] sm:$0xff]  }
 0x3ae   : > { %14604 = vmatpush3.bf16.msra.mxu0 %v15822_v30  ;;  %v3059_v30 = vcombine.high %v3043_v25, %v3043_v25 }
 0x3af   : > { %14633 = vmatprep.subr.bf16.mxu0 %v15824_v33  ;;  %14626 = vmatpush3.bf16.msra.mxu1 %v15823_v36  ;;  %v15863_v33 = vld [vmem:[%s16269_s5 + $0x1c08] sm:$0xff]   ;;  %v15865_v36 = vld [vmem:[%s16269_s5 + $0x1c50] sm:$0xff]  }
 0x3b0   : > { %14655 = vmatprep.subr.bf16.mxu1 %v15825_v39  ;;  %v15868_v39 = vld [vmem:[%s16269_s5 + $0x1c90] sm:$0xff]  }
 0x3b1   : > { %11765 = vmatmul.mubr.bf16.vlgmr.msra.gmra.mrb[104].mxu0 %v3036_v38  ;;  %v15867_v38 = vld [vmem:[%s16269_s5 + $0x1c10] sm:$0xff]  }
 0x3b2   : > { %14634 = vmatpush3.bf16.msra.mxu0 %v15826_v41  ;;  %11805 = vmatmul.mubr.bf16.vlgmr.msra.gmra.mrb[104].mxu1 %v3058_v45  ;;  %v15870_v41 = vld [vmem:[%s16269_s5 + $0x1cd8] sm:$0xff]   ;;  %v15874_v45 = vld [vmem:[%s16269_s5 + $0x1ce0] sm:$0xff]  }
 0x3b3   : > { %14635 = vmatprep.subr.bf16.mxu0 %v15828_v46  ;;  %14656 = vmatpush3.bf16.msra.mxu1 %v15827_v43  ;;  %v15872_v43 = vld [vmem:[%s16269_s5 + $0x1c98] sm:$0xff]   ;;  %v15875_v46 = vld [vmem:[%s16269_s5 + $0x1c20] sm:$0xff]  }
 0x3b4   : > { %11844 = vmatprep.mubr.bf16.mxu0 %v3057_v49  ;;  %14657 = vmatprep.subr.bf16.mxu1 %v15829_v48  ;;  %v15877_v48 = vld [vmem:[%s16269_s5 + $0x1c68] sm:$0xff]  }
 0x3b5   : > { %11884 = vmatprep.mubr.bf16.mxu1 %v3061_v52  ;;  %v15878_v49 = vld [vmem:[%s16269_s5 + $0x1ce8] sm:$0xff]  }
 0x3b6   : > { %14636 = vmatpush3.bf16.msra.mxu0 %v15830_v50 }
 0x3b7   : > { %14637 = vmatprep.subr.bf16.mxu0 %v15832_v53  ;;  %14658 = vmatpush3.bf16.msra.mxu1 %v15831_v51  ;;  %v15879_v51 = vld [vmem:[%s16269_s5 + $0x1c28] sm:$0xff]   ;;  %v15881_v53 = vld [vmem:[%s16269_s5 + $0x1c70] sm:$0xff]  }
 0x3b8   : > { %14659 = vmatprep.subr.bf16.mxu1 %v15833_v54 }
 0x3ba   : > { %14638 = vmatpush3.bf16.msra.mxu0 %v15834_v55 }
 0x3bb   : > { %14639 = vmatprep.subr.bf16.mxu0 %v15836_v57  ;;  %14660 = vmatpush3.bf16.msra.mxu1 %v15835_v56 }
 0x3bc   : > { %14661 = vmatprep.subr.bf16.mxu1 %v15837_v58  ;;  %v15880_v58 = vld [vmem:[%s16269_s5 + $0x1ca8] sm:$0xff]  }
 0x3be   : > { %14640 = vmatpush3.bf16.msra.mxu0 %v15838_v59 }
 0x3bf   : > { %14641 = vmatprep.subr.bf16.mxu0 %v15840_v61  ;;  %14662 = vmatpush3.bf16.msra.mxu1 %v15839_v60  ;;  %v15882_v60 = vld [vmem:[%s16269_s5 + $0x1cf0] sm:$0xff]  }
 0x3c0   : > { %14663 = vmatprep.subr.bf16.mxu1 %v15841_v62 }
 0x3c2   : > { %14642 = vmatpush3.bf16.msra.mxu0 %v15842_v63 }
 0x3c3   : > { %14643 = vmatprep.subr.bf16.mxu0 %v15844_v1  ;;  %14664 = vmatpush3.bf16.msra.mxu1 %v15843_v0  ;;  %v15883_v0 = vld [vmem:[%s16269_s5 + $0x1c30] sm:$0xff]  }
 0x3c4   : > { %v14341_v3 = vpop.f32.mrb[80].mxu0  ;;  %14665 = vmatprep.subr.bf16.mxu1 %v15845_v2  ;;  %v15885_v2 = vld [vmem:[%s16269_s5 + $0x1c78] sm:$0xff]  }
 0x3c5   : > { %v14342_v5 = vpop.f32.mrb[81].mxu0  ;;  %v14363_v7 = vpop.f32.mrb[80].mxu1 }
 0x3c6   : > { %v14343_v8 = vadd.f32 %v14342_v5, %v14341_v3  ;;  %v14344_v9 = vpop.f32.mrb[82].mxu0  ;;  %v14364_v12 = vpop.f32.mrb[81].mxu1  ;;  %14644 = vmatpush3.bf16.msra.mxu0 %v15846_v4  ;;  %v15884_v4 = vld [vmem:[%s16269_s5 + $0x1cb0] sm:$0xff]   ;;  %v15886_v5 = vld [vmem:[%s16269_s5 + $0x1cf8] sm:$0xff]  }
 0x3c7   : > { %v14345_v13 = vpop.f32.mrb[83].mxu0  ;;  %v14365_v15 = vadd.f32 %v14364_v12, %v14363_v7  ;;  %v14366_v16 = vpop.f32.mrb[82].mxu1  ;;  %14645 = vmatprep.subr.bf16.mxu0 %v15848_v10  ;;  %14666 = vmatpush3.bf16.msra.mxu1 %v15847_v6  ;;  %v15887_v6 = vld [vmem:[%s16269_s5 + $0x1c38] sm:$0xff]   ;;  %v237_v7 = vld [vmem:[%s17663_s0 + $0x70] sm:$0xff]  ;;  %v15889_v9 = vld [vmem:[%s16269_s5 + $0x1d40] sm:$0xff]  }
 0x3c8   : > { %v11287_v14 = vadd.f32 %v14343_v8, %v17384_v27  ;;  %v14367_v18 = vpop.f32.mrb[83].mxu1  ;;  %14667 = vmatprep.subr.bf16.mxu1 %v15849_v11  ;;  %v15858_v27 = vld [vmem:[%s16269_s5 + $0x1cc0] sm:$0xff]   ;;  %v3069_v8 = vrot.slane %v237_v7, %v16311_v35  ;;  %v3062_v10 = vcombine.high %v237_v7, %v237_v7  ;;  %v15888_v11 = vld [vmem:[%s16269_s5 + $0x1cb8] sm:$0xff]   ;;  %v15926_v7 = vld [vmem:[%s16269_s5 + $0x1e48] sm:$0xff]  }
 0x3c9   : > { %v15891_v16 = vld [vmem:[%s16269_s5 + $0x1d00] sm:$0xff]  }
 0x3ca   : > { %v17431_v20 = vadd.f32 %v14365_v15, %v11287_v14  ;;  %14646 = vmatpush3.bf16.msra.mxu0 %v15850_v17  ;;  %v3077_v12 = vcombine.high %v3069_v8, %v3069_v8  ;;  %v3085_v13 = vrot.slane %v3069_v8, %v16311_v35  ;;  %v15890_v14 = vld [vmem:[%s16269_s5 + $0x1dc0] sm:$0xff]   ;;  %v17482_v15 = vrot.slane %v3062_v10, %v16311_v35  ;;  %v15927_v8 = vld [vmem:[%s16269_s5 + $0x1ec8] sm:$0xff]  }
 0x3cb   : > { %14647 = vmatprep.subr.bf16.mxu0 %v15852_v21  ;;  %14668 = vmatpush3.bf16.msra.mxu1 %v15851_v19  ;;  %v15892_v18 = vld [vmem:[%s16269_s5 + $0x1d80] sm:$0xff]   ;;  %v15893_v21 = vld [vmem:[%s16269_s5 + $0x1d48] sm:$0xff]  }
 0x3cc   : > { %14669 = vmatprep.subr.bf16.mxu1 %v15853_v22  ;;  %v3099_v17 = vrot.slane %v3077_v12, %v16311_v35  ;;  %v3078_v19 = vcombine.high %v17482_v15, %v17482_v15  ;;  %v15929_v10 = vld [vmem:[%s16269_s5 + $0x1e88] sm:$0xff]   ;;  %v15931_v12 = vld [vmem:[%s16269_s5 + $0x1ed0] sm:$0xff]  }
 0x3ce   : > { %14648 = vmatpush3.bf16.msra.mxu0 %v15854_v23  ;;  %v3109_v22 = vcombine.high %v3099_v17, %v3099_v17  ;;  %v15894_v23 = vld [vmem:[%s16269_s5 + $0x1dc8] sm:$0xff]  }
 0x3cf   : > { %14677 = vmatprep.subr.bf16.mxu0 %v15857_v26  ;;  %14670 = vmatpush3.bf16.msra.mxu1 %v15855_v24  ;;  %v3106_v24 = vrot.slane %v3078_v19, %v16311_v35  ;;  %v15896_v26 = vld [vmem:[%s16269_s5 + $0x1d88] sm:$0xff]   ;;  %v15938_v19 = vld [vmem:[%s16269_s5 + $0x1e60] sm:$0xff]  }
 0x3d0   : > { %14699 = vmatprep.subr.bf16.mxu1 %v15858_v27 }
 0x3d1   : > { %11845 = vmatmul.mubr.bf16.vlgmr.msra.gmra.mrb[108].mxu0 %v3043_v25  ;;  %v15895_v25 = vld [vmem:[%s16269_s5 + $0x1d08] sm:$0xff]   ;;  %v3110_v27 = vcombine.high %v3106_v24, %v3106_v24 }
 0x3d2   : > { %14678 = vmatpush3.bf16.msra.mxu0 %v15859_v28  ;;  %11885 = vmatmul.mubr.bf16.vlgmr.msra.gmra.mrb[108].mxu1 %v3059_v30  ;;  %v15897_v28 = vld [vmem:[%s16269_s5 + $0x1d50] sm:$0xff]  }
 0x3d3   : > { %14679 = vmatprep.subr.bf16.mxu0 %v15861_v31  ;;  %14700 = vmatpush3.bf16.msra.mxu1 %v15860_v29  ;;  %v15898_v29 = vld [vmem:[%s16269_s5 + $0x1dd0] sm:$0xff]  }
 0x3d4   : > { %14701 = vmatprep.subr.bf16.mxu1 %v15862_v32  ;;  %11924 = vmatprep.mubr.bf16.mxu0 %v3099_v17  ;;  %v15899_v30 = vld [vmem:[%s16269_s5 + $0x1d10] sm:$0xff]   ;;  %v15901_v32 = vld [vmem:[%s16269_s5 + $0x1d58] sm:$0xff]  }
 0x3d5   : > { %11964 = vmatprep.mubr.bf16.mxu1 %v3109_v22  ;;  %v15900_v31 = vld [vmem:[%s16269_s5 + $0x1d90] sm:$0xff]   ;;  %v15936_v17 = vld [vmem:[%s16269_s5 + $0x1e18] sm:$0xff]   ;;  %v15941_v22 = vld [vmem:[%s16269_s5 + $0x1ea0] sm:$0xff]  }
 0x3d6   : > { %14680 = vmatpush3.bf16.msra.mxu0 %v15863_v33  ;;  %v15902_v33 = vld [vmem:[%s16269_s5 + $0x1dd8] sm:$0xff]  }
 0x3d7   : > { %14681 = vmatprep.subr.bf16.mxu0 %v15865_v36  ;;  %14702 = vmatpush3.bf16.msra.mxu1 %v15864_v34  ;;  %v15903_v34 = vld [vmem:[%s16269_s5 + $0x1d18] sm:$0xff]  }
 0x3d8   : > { %14703 = vmatprep.subr.bf16.mxu1 %v15866_v37  ;;  %v15904_v36 = vld [vmem:[%s16269_s5 + $0x1d98] sm:$0xff]   ;;  %v15905_v37 = vld [vmem:[%s16269_s5 + $0x1d60] sm:$0xff]  }
 0x3da   : > { %14682 = vmatpush3.bf16.msra.mxu0 %v15867_v38  ;;  %v15906_v38 = vld [vmem:[%s16269_s5 + $0x1de0] sm:$0xff]  }
 0x3db   : > { %14683 = vmatprep.subr.bf16.mxu0 %v15869_v40  ;;  %14704 = vmatpush3.bf16.msra.mxu1 %v15868_v39  ;;  %v15907_v39 = vld [vmem:[%s16269_s5 + $0x1d20] sm:$0xff]  }
 0x3dc   : > { %14705 = vmatprep.subr.bf16.mxu1 %v15870_v41  ;;  %v15908_v40 = vld [vmem:[%s16269_s5 + $0x1da0] sm:$0xff]   ;;  %v15909_v41 = vld [vmem:[%s16269_s5 + $0x1d68] sm:$0xff]  }
 0x3de   : > { %14684 = vmatpush3.bf16.msra.mxu0 %v15871_v42  ;;  %v15910_v42 = vld [vmem:[%s16269_s5 + $0x1de8] sm:$0xff]  }
 0x3df   : > { %14685 = vmatprep.subr.bf16.mxu0 %v15873_v44  ;;  %14706 = vmatpush3.bf16.msra.mxu1 %v15872_v43  ;;  %v15911_v44 = vld [vmem:[%s16269_s5 + $0x1d28] sm:$0xff]  }
 0x3e0   : > { %14707 = vmatprep.subr.bf16.mxu1 %v15874_v45 }
 0x3e2   : > { %14686 = vmatpush3.bf16.msra.mxu0 %v15875_v46  ;;  %v15912_v46 = vld [vmem:[%s16269_s5 + $0x1da8] sm:$0xff]  }
 0x3e3   : > { %14687 = vmatprep.subr.bf16.mxu0 %v15877_v48  ;;  %14708 = vmatpush3.bf16.msra.mxu1 %v15876_v47 }
 0x3e4   : > { %v14385_v50 = vpop.f32.mrb[84].mxu0  ;;  %14709 = vmatprep.subr.bf16.mxu1 %v15878_v49 }
 0x3e5   : > { %v14386_v52 = vpop.f32.mrb[85].mxu0  ;;  %v14407_v54 = vpop.f32.mrb[84].mxu1 }
 0x3e6   : > { %v14387_v55 = vadd.f32 %v14386_v52, %v14385_v50  ;;  %v14388_v56 = vpop.f32.mrb[86].mxu0  ;;  %v14408_v57 = vpop.f32.mrb[85].mxu1  ;;  %14688 = vmatpush3.bf16.msra.mxu0 %v15879_v51  ;;  %v15913_v50 = vld [vmem:[%s16269_s5 + $0x1d70] sm:$0xff]  }
 0x3e7   : > { %v14389_v59 = vpop.f32.mrb[87].mxu0  ;;  %v14409_v62 = vadd.f32 %v14408_v57, %v14407_v54  ;;  %v14410_v63 = vpop.f32.mrb[86].mxu1  ;;  %14689 = vmatprep.subr.bf16.mxu0 %v15881_v53  ;;  %14710 = vmatpush3.bf16.msra.mxu1 %v15880_v58  ;;  %v15914_v51 = vld [vmem:[%s16269_s5 + $0x1df0] sm:$0xff]  }
 0x3e8   : > { %v11367_v61 = vadd.f32 %v14387_v55, %v17431_v20  ;;  %v14411_v1 = vpop.f32.mrb[87].mxu1  ;;  %14711 = vmatprep.subr.bf16.mxu1 %v15882_v60  ;;  %v3107_v20 = vcombine.high %v3085_v13, %v3085_v13  ;;  %v15915_v57 = vld [vmem:[%s16269_s5 + $0x1d30] sm:$0xff]   ;;  %v15919_v63 = vld [vmem:[%s16269_s5 + $0x1d38] sm:$0xff]  }
 0x3e9   : > { %v15916_v59 = vld [vmem:[%s16269_s5 + $0x1db0] sm:$0xff]   ;;  %v3092_v1 = vrot.slane %v17482_v15, %v16311_v35  ;;  %v15934_v15 = vld [vmem:[%s16269_s5 + $0x1e58] sm:$0xff]  }
 0x3ea   : > { %v17468_v3 = vadd.f32 %v14409_v62, %v11367_v61  ;;  %14690 = vmatpush3.bf16.msra.mxu0 %v15883_v0  ;;  %v15917_v61 = vld [vmem:[%s16269_s5 + $0x1d78] sm:$0xff]  }
 0x3eb   : > { %14691 = vmatprep.subr.bf16.mxu0 %v15885_v2  ;;  %14712 = vmatpush3.bf16.msra.mxu1 %v15884_v4  ;;  %v15918_v62 = vld [vmem:[%s16269_s5 + $0x1df8] sm:$0xff]   ;;  %v15922_v2 = vld [vmem:[%s16269_s5 + $0x1e40] sm:$0xff]  }
 0x3ec   : > { %14713 = vmatprep.subr.bf16.mxu1 %v15886_v5  ;;  %v15920_v0 = vld [vmem:[%s16269_s5 + $0x1db8] sm:$0xff]   ;;  %v15924_v4 = vld [vmem:[%s16269_s5 + $0x1e00] sm:$0xff]  }
 0x3ed   : > { %v15925_v5 = vld [vmem:[%s16269_s5 + $0x1e80] sm:$0xff]  }
 0x3ee   : > { %14692 = vmatpush3.bf16.msra.mxu0 %v15887_v6  ;;  %v3108_v6 = vcombine.high %v3092_v1, %v3092_v1 }
 0x3ef   : > { %14721 = vmatprep.subr.bf16.mxu0 %v15889_v9  ;;  %14714 = vmatpush3.bf16.msra.mxu1 %v15888_v11  ;;  %v15928_v9 = vld [vmem:[%s16269_s5 + $0x1e08] sm:$0xff]   ;;  %v15930_v11 = vld [vmem:[%s16269_s5 + $0x1e50] sm:$0xff]  }
 0x3f0   : > { %14743 = vmatprep.subr.bf16.mxu1 %v15890_v14  ;;  %v15933_v14 = vld [vmem:[%s16269_s5 + $0x1e90] sm:$0xff]  }
 0x3f1   : > { %11925 = vmatmul.mubr.bf16.vlgmr.msra.gmra.mrb[112].mxu0 %v3085_v13  ;;  %v15932_v13 = vld [vmem:[%s16269_s5 + $0x1e10] sm:$0xff]  }
 0x3f2   : > { %14722 = vmatpush3.bf16.msra.mxu0 %v15891_v16  ;;  %11965 = vmatmul.mubr.bf16.vlgmr.msra.gmra.mrb[112].mxu1 %v3107_v20  ;;  %v15935_v16 = vld [vmem:[%s16269_s5 + $0x1ed8] sm:$0xff]   ;;  %v15939_v20 = vld [vmem:[%s16269_s5 + $0x1ee0] sm:$0xff]  }
 0x3f3   : > { %14723 = vmatprep.subr.bf16.mxu0 %v15893_v21  ;;  %14744 = vmatpush3.bf16.msra.mxu1 %v15892_v18  ;;  %v15937_v18 = vld [vmem:[%s16269_s5 + $0x1e98] sm:$0xff]   ;;  %v15940_v21 = vld [vmem:[%s16269_s5 + $0x1e20] sm:$0xff]  }
 0x3f4   : > { %12004 = vmatprep.mubr.bf16.mxu0 %v3106_v24  ;;  %14745 = vmatprep.subr.bf16.mxu1 %v15894_v23  ;;  %v15942_v23 = vld [vmem:[%s16269_s5 + $0x1e68] sm:$0xff]  }
 0x3f5   : > { %12044 = vmatprep.mubr.bf16.mxu1 %v3110_v27  ;;  %v15943_v24 = vld [vmem:[%s16269_s5 + $0x1ee8] sm:$0xff]  }
 0x3f6   : > { %14724 = vmatpush3.bf16.msra.mxu0 %v15895_v25 }
 0x3f7   : > { %14725 = vmatprep.subr.bf16.mxu0 %v15897_v28  ;;  %14746 = vmatpush3.bf16.msra.mxu1 %v15896_v26  ;;  %v15944_v26 = vld [vmem:[%s16269_s5 + $0x1e28] sm:$0xff]   ;;  %v15946_v28 = vld [vmem:[%s16269_s5 + $0x1e70] sm:$0xff]  }
 0x3f8   : > { %14747 = vmatprep.subr.bf16.mxu1 %v15898_v29 }
 0x3fa   : > { %14726 = vmatpush3.bf16.msra.mxu0 %v15899_v30 }
 0x3fb   : > { %14727 = vmatprep.subr.bf16.mxu0 %v15901_v32  ;;  %14748 = vmatpush3.bf16.msra.mxu1 %v15900_v31 }
 0x3fc   : > { %14749 = vmatprep.subr.bf16.mxu1 %v15902_v33  ;;  %v15945_v33 = vld [vmem:[%s16269_s5 + $0x1ea8] sm:$0xff]  }
 0x3fe   : > { %14728 = vmatpush3.bf16.msra.mxu0 %v15903_v34 }
 0x3ff   : > { %14729 = vmatprep.subr.bf16.mxu0 %v15905_v37  ;;  %14750 = vmatpush3.bf16.msra.mxu1 %v15904_v36  ;;  %v15947_v36 = vld [vmem:[%s16269_s5 + $0x1ef0] sm:$0xff]  }
 0x400   : > { %14751 = vmatprep.subr.bf16.mxu1 %v15906_v38 }
 0x402   : > { %14730 = vmatpush3.bf16.msra.mxu0 %v15907_v39 }
 0x403   : > { %14731 = vmatprep.subr.bf16.mxu0 %v15909_v41  ;;  %14752 = vmatpush3.bf16.msra.mxu1 %v15908_v40  ;;  %v15948_v40 = vld [vmem:[%s16269_s5 + $0x1e30] sm:$0xff]  }
 0x404   : > { %v14429_v43 = vpop.f32.mrb[88].mxu0  ;;  %14753 = vmatprep.subr.bf16.mxu1 %v15910_v42  ;;  %v15950_v42 = vld [vmem:[%s16269_s5 + $0x1e78] sm:$0xff]  }
 0x405   : > { %v14430_v45 = vpop.f32.mrb[89].mxu0  ;;  %v14451_v47 = vpop.f32.mrb[88].mxu1 }
 0x406   : > { %v14431_v48 = vadd.f32 %v14430_v45, %v14429_v43  ;;  %v14432_v49 = vpop.f32.mrb[90].mxu0  ;;  %v14452_v52 = vpop.f32.mrb[89].mxu1  ;;  %14732 = vmatpush3.bf16.msra.mxu0 %v15911_v44  ;;  %v15949_v44 = vld [vmem:[%s16269_s5 + $0x1eb0] sm:$0xff]   ;;  %v15951_v45 = vld [vmem:[%s16269_s5 + $0x1ef8] sm:$0xff]  }
 0x407   : > { %v14433_v53 = vpop.f32.mrb[91].mxu0  ;;  %v14453_v55 = vadd.f32 %v14452_v52, %v14451_v47  ;;  %v14454_v56 = vpop.f32.mrb[90].mxu1  ;;  %14733 = vmatprep.subr.bf16.mxu0 %v15913_v50  ;;  %14754 = vmatpush3.bf16.msra.mxu1 %v15912_v46  ;;  %v15952_v46 = vld [vmem:[%s16269_s5 + $0x1e38] sm:$0xff]   ;;  %v15954_v49 = vld [vmem:[%s16269_s5 + $0x1f40] sm:$0xff]  }
 0x408   : > { %v11447_v54 = vadd.f32 %v14431_v48, %v17468_v3  ;;  %v14455_v58 = vpop.f32.mrb[91].mxu1  ;;  %14755 = vmatprep.subr.bf16.mxu1 %v15914_v51  ;;  %v15923_v3 = vld [vmem:[%s16269_s5 + $0x1ec0] sm:$0xff]   ;;  %v238_v47 = vld [vmem:[%s17663_s0 + $0x78] sm:$0xff] }
 0x409   : > { %v3118_v48 = vrot.slane %v238_v47, %v16311_v35  ;;  %v3111_v50 = vcombine.high %v238_v47, %v238_v47  ;;  %v15953_v51 = vld [vmem:[%s16269_s5 + $0x1eb8] sm:$0xff]   ;;  %v15956_v56 = vld [vmem:[%s16269_s5 + $0x1f00] sm:$0xff]   ;;  %v15991_v47 = vld [vmem:[%s16269_s5 + $0x2048] sm:$0xff]  }
 0x40a   : > { %v17515_v60 = vadd.f32 %v14453_v55, %v11447_v54  ;;  %14734 = vmatpush3.bf16.msra.mxu0 %v15915_v57  ;;  %v15955_v54 = vld [vmem:[%s16269_s5 + $0x1fc0] sm:$0xff]  }
 0x40b   : > { %14735 = vmatprep.subr.bf16.mxu0 %v15917_v61  ;;  %14756 = vmatpush3.bf16.msra.mxu1 %v15916_v59  ;;  %v3126_v52 = vcombine.high %v3118_v48, %v3118_v48  ;;  %v3134_v53 = vrot.slane %v3118_v48, %v16311_v35  ;;  %v17566_v55 = vrot.slane %v3111_v50, %v16311_v35  ;;  %v15957_v58 = vld [vmem:[%s16269_s5 + $0x1f80] sm:$0xff]   ;;  %v15958_v61 = vld [vmem:[%s16269_s5 + $0x1f48] sm:$0xff]  }
 0x40c   : > { %14757 = vmatprep.subr.bf16.mxu1 %v15918_v62  ;;  %v15992_v48 = vld [vmem:[%s16269_s5 + $0x20c8] sm:$0xff]  }
 0x40d   : > { %v3148_v57 = vrot.slane %v3126_v52, %v16311_v35  ;;  %v3127_v59 = vcombine.high %v17566_v55, %v17566_v55  ;;  %v15994_v50 = vld [vmem:[%s16269_s5 + $0x2088] sm:$0xff]   ;;  %v15996_v52 = vld [vmem:[%s16269_s5 + $0x20d0] sm:$0xff]  }
 0x40e   : > { %14736 = vmatpush3.bf16.msra.mxu0 %v15919_v63  ;;  %v15959_v63 = vld [vmem:[%s16269_s5 + $0x1fc8] sm:$0xff]  }
 0x40f   : > { %14765 = vmatprep.subr.bf16.mxu0 %v15922_v2  ;;  %14758 = vmatpush3.bf16.msra.mxu1 %v15920_v0  ;;  %v3158_v62 = vcombine.high %v3148_v57, %v3148_v57  ;;  %v3155_v0 = vrot.slane %v3127_v59, %v16311_v35  ;;  %v15961_v2 = vld [vmem:[%s16269_s5 + $0x1f88] sm:$0xff]   ;;  %v16003_v59 = vld [vmem:[%s16269_s5 + $0x2060] sm:$0xff]  }
 0x410   : > { %14787 = vmatprep.subr.bf16.mxu1 %v15923_v3 }
 0x411   : > { %12005 = vmatmul.mubr.bf16.vlgmr.msra.gmra.mrb[116].mxu0 %v3092_v1  ;;  %v15960_v1 = vld [vmem:[%s16269_s5 + $0x1f08] sm:$0xff]   ;;  %v3159_v3 = vcombine.high %v3155_v0, %v3155_v0 }
 0x412   : > { %14766 = vmatpush3.bf16.msra.mxu0 %v15924_v4  ;;  %12045 = vmatmul.mubr.bf16.vlgmr.msra.gmra.mrb[116].mxu1 %v3108_v6  ;;  %v15962_v4 = vld [vmem:[%s16269_s5 + $0x1f50] sm:$0xff]  }
 0x413   : > { %14767 = vmatprep.subr.bf16.mxu0 %v15926_v7  ;;  %14788 = vmatpush3.bf16.msra.mxu1 %v15925_v5  ;;  %v15963_v5 = vld [vmem:[%s16269_s5 + $0x1fd0] sm:$0xff]  }
 0x414   : > { %14789 = vmatprep.subr.bf16.mxu1 %v15927_v8  ;;  %12084 = vmatprep.mubr.bf16.mxu0 %v3148_v57  ;;  %v15964_v6 = vld [vmem:[%s16269_s5 + $0x1f10] sm:$0xff]   ;;  %v15966_v8 = vld [vmem:[%s16269_s5 + $0x1f58] sm:$0xff]  }
 0x415   : > { %12124 = vmatprep.mubr.bf16.mxu1 %v3158_v62  ;;  %v15965_v7 = vld [vmem:[%s16269_s5 + $0x1f90] sm:$0xff]   ;;  %v16001_v57 = vld [vmem:[%s16269_s5 + $0x2018] sm:$0xff]   ;;  %v16006_v62 = vld [vmem:[%s16269_s5 + $0x20a0] sm:$0xff]  }
 0x416   : > { %14768 = vmatpush3.bf16.msra.mxu0 %v15928_v9  ;;  %v15967_v9 = vld [vmem:[%s16269_s5 + $0x1fd8] sm:$0xff]  }
 0x417   : > { %14769 = vmatprep.subr.bf16.mxu0 %v15930_v11  ;;  %14790 = vmatpush3.bf16.msra.mxu1 %v15929_v10  ;;  %v15968_v10 = vld [vmem:[%s16269_s5 + $0x1f18] sm:$0xff]  }
 0x418   : > { %14791 = vmatprep.subr.bf16.mxu1 %v15931_v12  ;;  %v15969_v11 = vld [vmem:[%s16269_s5 + $0x1f98] sm:$0xff]   ;;  %v15970_v12 = vld [vmem:[%s16269_s5 + $0x1f60] sm:$0xff]  }
 0x41a   : > { %14770 = vmatpush3.bf16.msra.mxu0 %v15932_v13  ;;  %v15971_v13 = vld [vmem:[%s16269_s5 + $0x1fe0] sm:$0xff]  }
 0x41b   : > { %14771 = vmatprep.subr.bf16.mxu0 %v15934_v15  ;;  %14792 = vmatpush3.bf16.msra.mxu1 %v15933_v14  ;;  %v15972_v14 = vld [vmem:[%s16269_s5 + $0x1f20] sm:$0xff]  }
 0x41c   : > { %14793 = vmatprep.subr.bf16.mxu1 %v15935_v16  ;;  %v15973_v15 = vld [vmem:[%s16269_s5 + $0x1fa0] sm:$0xff]   ;;  %v15974_v16 = vld [vmem:[%s16269_s5 + $0x1f68] sm:$0xff]  }
 0x41e   : > { %14772 = vmatpush3.bf16.msra.mxu0 %v15936_v17  ;;  %v15975_v17 = vld [vmem:[%s16269_s5 + $0x1fe8] sm:$0xff]  }
 0x41f   : > { %14773 = vmatprep.subr.bf16.mxu0 %v15938_v19  ;;  %14794 = vmatpush3.bf16.msra.mxu1 %v15937_v18  ;;  %v15976_v19 = vld [vmem:[%s16269_s5 + $0x1f28] sm:$0xff]  }
 0x420   : > { %14795 = vmatprep.subr.bf16.mxu1 %v15939_v20 }
 0x422   : > { %14774 = vmatpush3.bf16.msra.mxu0 %v15940_v21  ;;  %v15977_v21 = vld [vmem:[%s16269_s5 + $0x1fa8] sm:$0xff]  }
 0x423   : > { %14775 = vmatprep.subr.bf16.mxu0 %v15942_v23  ;;  %14796 = vmatpush3.bf16.msra.mxu1 %v15941_v22 }
 0x424   : > { %v14473_v25 = vpop.f32.mrb[92].mxu0  ;;  %14797 = vmatprep.subr.bf16.mxu1 %v15943_v24 }
 0x425   : > { %v14474_v27 = vpop.f32.mrb[93].mxu0  ;;  %v14495_v29 = vpop.f32.mrb[92].mxu1 }
 0x426   : > { %v14475_v30 = vadd.f32 %v14474_v27, %v14473_v25  ;;  %v14476_v31 = vpop.f32.mrb[94].mxu0  ;;  %v14496_v32 = vpop.f32.mrb[93].mxu1  ;;  %14776 = vmatpush3.bf16.msra.mxu0 %v15944_v26  ;;  %v15978_v25 = vld [vmem:[%s16269_s5 + $0x1f70] sm:$0xff]  }
 0x427   : > { %v14477_v34 = vpop.f32.mrb[95].mxu0  ;;  %v14497_v38 = vadd.f32 %v14496_v32, %v14495_v29  ;;  %v14498_v39 = vpop.f32.mrb[94].mxu1  ;;  %14777 = vmatprep.subr.bf16.mxu0 %v15946_v28  ;;  %14798 = vmatpush3.bf16.msra.mxu1 %v15945_v33  ;;  %v15979_v26 = vld [vmem:[%s16269_s5 + $0x1ff0] sm:$0xff]  }
 0x428   : > { %v11527_v37 = vadd.f32 %v14475_v30, %v17515_v60  ;;  %v14499_v41 = vpop.f32.mrb[95].mxu1  ;;  %14799 = vmatprep.subr.bf16.mxu1 %v15947_v36  ;;  %v3156_v60 = vcombine.high %v3134_v53, %v3134_v53  ;;  %v15980_v32 = vld [vmem:[%s16269_s5 + $0x1f30] sm:$0xff]   ;;  %v15984_v39 = vld [vmem:[%s16269_s5 + $0x1f38] sm:$0xff]  }
 0x429   : > { %v15981_v34 = vld [vmem:[%s16269_s5 + $0x1fb0] sm:$0xff]   ;;  %v3141_v41 = vrot.slane %v17566_v55, %v16311_v35  ;;  %v15999_v55 = vld [vmem:[%s16269_s5 + $0x2058] sm:$0xff]  }
 0x42a   : > { %v17552_v43 = vadd.f32 %v14497_v38, %v11527_v37  ;;  %14778 = vmatpush3.bf16.msra.mxu0 %v15948_v40  ;;  %v15982_v37 = vld [vmem:[%s16269_s5 + $0x1f78] sm:$0xff]  }
 0x42b   : > { %14779 = vmatprep.subr.bf16.mxu0 %v15950_v42  ;;  %14800 = vmatpush3.bf16.msra.mxu1 %v15949_v44  ;;  %v15983_v38 = vld [vmem:[%s16269_s5 + $0x1ff8] sm:$0xff]   ;;  %v15987_v42 = vld [vmem:[%s16269_s5 + $0x2040] sm:$0xff]  }
 0x42c   : > { %14801 = vmatprep.subr.bf16.mxu1 %v15951_v45  ;;  %v15985_v40 = vld [vmem:[%s16269_s5 + $0x1fb8] sm:$0xff]   ;;  %v15989_v44 = vld [vmem:[%s16269_s5 + $0x2000] sm:$0xff]  }
 0x42d   : > { %v15990_v45 = vld [vmem:[%s16269_s5 + $0x2080] sm:$0xff]  }
 0x42e   : > { %14780 = vmatpush3.bf16.msra.mxu0 %v15952_v46  ;;  %v3157_v46 = vcombine.high %v3141_v41, %v3141_v41 }
 0x42f   : > { %14809 = vmatprep.subr.bf16.mxu0 %v15954_v49  ;;  %14802 = vmatpush3.bf16.msra.mxu1 %v15953_v51  ;;  %v15993_v49 = vld [vmem:[%s16269_s5 + $0x2008] sm:$0xff]   ;;  %v15995_v51 = vld [vmem:[%s16269_s5 + $0x2050] sm:$0xff]  }
 0x430   : > { %14831 = vmatprep.subr.bf16.mxu1 %v15955_v54  ;;  %v15998_v54 = vld [vmem:[%s16269_s5 + $0x2090] sm:$0xff]  }
 0x431   : > { %12085 = vmatmul.mubr.bf16.vlgmr.msra.gmra.mrb[120].mxu0 %v3134_v53  ;;  %v15997_v53 = vld [vmem:[%s16269_s5 + $0x2010] sm:$0xff]  }
 0x432   : > { %14810 = vmatpush3.bf16.msra.mxu0 %v15956_v56  ;;  %12125 = vmatmul.mubr.bf16.vlgmr.msra.gmra.mrb[120].mxu1 %v3156_v60  ;;  %v16000_v56 = vld [vmem:[%s16269_s5 + $0x20d8] sm:$0xff]   ;;  %v16004_v60 = vld [vmem:[%s16269_s5 + $0x20e0] sm:$0xff]  }
 0x433   : > { %14811 = vmatprep.subr.bf16.mxu0 %v15958_v61  ;;  %14832 = vmatpush3.bf16.msra.mxu1 %v15957_v58  ;;  %v16002_v58 = vld [vmem:[%s16269_s5 + $0x2098] sm:$0xff]   ;;  %v16005_v61 = vld [vmem:[%s16269_s5 + $0x2020] sm:$0xff]  }
 0x434   : > { %12164 = vmatprep.mubr.bf16.mxu0 %v3155_v0  ;;  %14833 = vmatprep.subr.bf16.mxu1 %v15959_v63  ;;  %v16007_v63 = vld [vmem:[%s16269_s5 + $0x2068] sm:$0xff]  }
 0x435   : > { %12204 = vmatprep.mubr.bf16.mxu1 %v3159_v3  ;;  %v16008_v0 = vld [vmem:[%s16269_s5 + $0x20e8] sm:$0xff]  }
 0x436   : > { %14812 = vmatpush3.bf16.msra.mxu0 %v15960_v1 }
 0x437   : > { %14813 = vmatprep.subr.bf16.mxu0 %v15962_v4  ;;  %14834 = vmatpush3.bf16.msra.mxu1 %v15961_v2  ;;  %v16009_v2 = vld [vmem:[%s16269_s5 + $0x2028] sm:$0xff]   ;;  %v16011_v4 = vld [vmem:[%s16269_s5 + $0x2070] sm:$0xff]  }
 0x438   : > { %14835 = vmatprep.subr.bf16.mxu1 %v15963_v5 }
 0x43a   : > { %14814 = vmatpush3.bf16.msra.mxu0 %v15964_v6 }
 0x43b   : > { %14815 = vmatprep.subr.bf16.mxu0 %v15966_v8  ;;  %14836 = vmatpush3.bf16.msra.mxu1 %v15965_v7 }
 0x43c   : > { %14837 = vmatprep.subr.bf16.mxu1 %v15967_v9  ;;  %v16010_v9 = vld [vmem:[%s16269_s5 + $0x20a8] sm:$0xff]  }
 0x43e   : > { %14816 = vmatpush3.bf16.msra.mxu0 %v15968_v10 }
 0x43f   : > { %14817 = vmatprep.subr.bf16.mxu0 %v15970_v12  ;;  %14838 = vmatpush3.bf16.msra.mxu1 %v15969_v11  ;;  %v16012_v11 = vld [vmem:[%s16269_s5 + $0x20f0] sm:$0xff]  }
 0x440   : > { %14839 = vmatprep.subr.bf16.mxu1 %v15971_v13 }
 0x442   : > { %14818 = vmatpush3.bf16.msra.mxu0 %v15972_v14 }
 0x443   : > { %14819 = vmatprep.subr.bf16.mxu0 %v15974_v16  ;;  %14840 = vmatpush3.bf16.msra.mxu1 %v15973_v15  ;;  %v16013_v15 = vld [vmem:[%s16269_s5 + $0x2030] sm:$0xff]  }
 0x444   : > { %v14517_v18 = vpop.f32.mrb[96].mxu0  ;;  %14841 = vmatprep.subr.bf16.mxu1 %v15975_v17  ;;  %v16015_v17 = vld [vmem:[%s16269_s5 + $0x2078] sm:$0xff]  }
 0x445   : > { %v14518_v20 = vpop.f32.mrb[97].mxu0  ;;  %v14539_v22 = vpop.f32.mrb[96].mxu1 }
 0x446   : > { %v14519_v23 = vadd.f32 %v14518_v20, %v14517_v18  ;;  %v14520_v24 = vpop.f32.mrb[98].mxu0  ;;  %v14540_v27 = vpop.f32.mrb[97].mxu1  ;;  %14820 = vmatpush3.bf16.msra.mxu0 %v15976_v19  ;;  %v16014_v19 = vld [vmem:[%s16269_s5 + $0x20b0] sm:$0xff]   ;;  %v16016_v20 = vld [vmem:[%s16269_s5 + $0x20f8] sm:$0xff]  }
 0x447   : > { %v14521_v28 = vpop.f32.mrb[99].mxu0  ;;  %v14541_v30 = vadd.f32 %v14540_v27, %v14539_v22  ;;  %v14542_v31 = vpop.f32.mrb[98].mxu1  ;;  %14821 = vmatprep.subr.bf16.mxu0 %v15978_v25  ;;  %14842 = vmatpush3.bf16.msra.mxu1 %v15977_v21  ;;  %v16017_v21 = vld [vmem:[%s16269_s5 + $0x2038] sm:$0xff]  }
 0x448   : > { %v11607_v29 = vadd.f32 %v14519_v23, %v17552_v43  ;;  %v14543_v33 = vpop.f32.mrb[99].mxu1  ;;  %14843 = vmatprep.subr.bf16.mxu1 %v15979_v26  ;;  %v15988_v43 = vld [vmem:[%s16269_s5 + $0x20c0] sm:$0xff]   ;;  %v16018_v25 = vld [vmem:[%s16269_s5 + $0x20b8] sm:$0xff]   ;;  %s12384_s5 = sshll.u32 %s17678_s16, 1 }
 0x449   : > { %v12386_v22 = vld.sshfl [vmem:[%s17663_s0 + $0x80] sm:$0x33 pattern:$0x75316420]  ;;  %s221_s23 = scalar_lea.vmem %s17666_s3, %s12384_s5 }
 0x44a   : > { %v17599_v36 = vadd.f32 %v14541_v30, %v11607_v29  ;;  %14822 = vmatpush3.bf16.msra.mxu0 %v15980_v32  ;;  %v3167_v23 = vcombine.high %v12386_v22, %v12386_v22  ;;  %v3174_v24 = vrot.slane %v12386_v22, %v16311_v35 }
 0x44b   : > { %14823 = vmatprep.subr.bf16.mxu0 %v15982_v37  ;;  %14844 = vmatpush3.bf16.msra.mxu1 %v15981_v34 }
 0x44c   : > { %14845 = vmatprep.subr.bf16.mxu1 %v15983_v38  ;;  %v3181_v26 = vrot.slane %v3167_v23, %v16311_v35  ;;  %v3182_v28 = vcombine.high %v3174_v24, %v3174_v24 }
 0x44e   : > { %14824 = vmatpush3.bf16.msra.mxu0 %v15984_v39  ;;  %v3183_v27 = vcombine.high %v3181_v26, %v3181_v26 }
 0x44f   : > { %14853 = vmatprep.subr.bf16.mxu0 %v15987_v42  ;;  %14846 = vmatpush3.bf16.msra.mxu1 %v15985_v40 }
 0x450   : > { %14875 = vmatprep.subr.bf16.mxu1 %v15988_v43 }
 0x451   : > { %12165 = vmatmul.mubr.bf16.vlgmr.msra.gmra.mrb[124].mxu0 %v3141_v41 }
 0x452   : > { %14854 = vmatpush3.bf16.msra.mxu0 %v15989_v44  ;;  %12205 = vmatmul.mubr.bf16.vlgmr.msra.gmra.mrb[124].mxu1 %v3157_v46 }
 0x453   : > { %14855 = vmatprep.subr.bf16.mxu0 %v15991_v47  ;;  %14876 = vmatpush3.bf16.msra.mxu1 %v15990_v45 }
 0x454   : > { %14877 = vmatprep.subr.bf16.mxu1 %v15992_v48  ;;  %12244 = vmatprep.mubr.bf16.mxu0 %v3181_v26 }
 0x455   : > { %12284 = vmatprep.mubr.bf16.mxu1 %v3183_v27 }
 0x456   : > { %14856 = vmatpush3.bf16.msra.mxu0 %v15993_v49 }
 0x457   : > { %14857 = vmatprep.subr.bf16.mxu0 %v15995_v51  ;;  %14878 = vmatpush3.bf16.msra.mxu1 %v15994_v50 }
 0x458   : > { %14879 = vmatprep.subr.bf16.mxu1 %v15996_v52 }
 0x45a   : > { %14858 = vmatpush3.bf16.msra.mxu0 %v15997_v53 }
 0x45b   : > { %14859 = vmatprep.subr.bf16.mxu0 %v15999_v55  ;;  %14880 = vmatpush3.bf16.msra.mxu1 %v15998_v54 }
 0x45c   : > { %14881 = vmatprep.subr.bf16.mxu1 %v16000_v56 }
 0x45e   : > { %14860 = vmatpush3.bf16.msra.mxu0 %v16001_v57 }
 0x45f   : > { %14861 = vmatprep.subr.bf16.mxu0 %v16003_v59  ;;  %14882 = vmatpush3.bf16.msra.mxu1 %v16002_v58 }
 0x460   : > { %14883 = vmatprep.subr.bf16.mxu1 %v16004_v60 }
 0x462   : > { %14862 = vmatpush3.bf16.msra.mxu0 %v16005_v61 }
 0x463   : > { %14863 = vmatprep.subr.bf16.mxu0 %v16007_v63  ;;  %14884 = vmatpush3.bf16.msra.mxu1 %v16006_v62 }
 0x464   : > { %v14561_v1 = vpop.f32.mrb[100].mxu0  ;;  %14885 = vmatprep.subr.bf16.mxu1 %v16008_v0 }
 0x465   : > { %v14562_v3 = vpop.f32.mrb[101].mxu0  ;;  %v14583_v5 = vpop.f32.mrb[100].mxu1 }
 0x466   : > { %v14563_v6 = vadd.f32 %v14562_v3, %v14561_v1  ;;  %v14564_v7 = vpop.f32.mrb[102].mxu0  ;;  %v14584_v8 = vpop.f32.mrb[101].mxu1  ;;  %14864 = vmatpush3.bf16.msra.mxu0 %v16009_v2 }
 0x467   : > { %v14565_v10 = vpop.f32.mrb[103].mxu0  ;;  %v14585_v13 = vadd.f32 %v14584_v8, %v14583_v5  ;;  %v14586_v14 = vpop.f32.mrb[102].mxu1  ;;  %14865 = vmatprep.subr.bf16.mxu0 %v16011_v4  ;;  %14886 = vmatpush3.bf16.msra.mxu1 %v16010_v9 }
 0x468   : > { %v11687_v12 = vadd.f32 %v14563_v6, %v17599_v36  ;;  %v14587_v16 = vpop.f32.mrb[103].mxu1  ;;  %14887 = vmatprep.subr.bf16.mxu1 %v16012_v11 }
 0x46a   : > { %v11727_v18 = vadd.f32 %v14585_v13, %v11687_v12  ;;  %14866 = vmatpush3.bf16.msra.mxu0 %v16013_v15 }
 0x46b   : > { %14867 = vmatprep.subr.bf16.mxu0 %v16015_v17  ;;  %14888 = vmatpush3.bf16.msra.mxu1 %v16014_v19 }
 0x46c   : > { %14889 = vmatprep.subr.bf16.mxu1 %v16016_v20 }
 0x46e   : > { %14868 = vmatpush3.bf16.msra.mxu0 %v16017_v21 }
 0x46f   : > { %14890 = vmatpush3.bf16.msra.mxu1 %v16018_v25 }
 0x471   : > { %12245 = vmatmul.mubr.bf16.vlgmr.msra.gmra.mrb[128].mxu0 %v3174_v24 }
 0x472   : > { %12285 = vmatmul.mubr.bf16.vlgmr.msra.gmra.mrb[128].mxu1 %v3182_v28 }
 0x484   : > { %v14605_v29 = vpop.f32.mrb[104].mxu0 }
 0x485   : > { %v14606_v30 = vpop.f32.mrb[105].mxu0  ;;  %v14627_v31 = vpop.f32.mrb[104].mxu1 }
 0x486   : > { %v14607_v32 = vadd.f32 %v14606_v30, %v14605_v29  ;;  %v14608_v33 = vpop.f32.mrb[106].mxu0  ;;  %v14628_v34 = vpop.f32.mrb[105].mxu1 }
 0x487   : > { %v14609_v36 = vpop.f32.mrb[107].mxu0  ;;  %v14629_v38 = vadd.f32 %v14628_v34, %v14627_v31  ;;  %v14630_v39 = vpop.f32.mrb[106].mxu1 }
 0x488   : > { %v11767_v37 = vadd.f32 %v14607_v32, %v11727_v18  ;;  %v14631_v40 = vpop.f32.mrb[107].mxu1 }
 0x48a   : > { %v11807_v35 = vadd.f32 %v14629_v38, %v11767_v37 }
 0x4a4   : > { %v14649_v41 = vpop.f32.mrb[108].mxu0 }
 0x4a5   : > { %v14650_v42 = vpop.f32.mrb[109].mxu0  ;;  %v14671_v43 = vpop.f32.mrb[108].mxu1 }
 0x4a6   : > { %v14651_v44 = vadd.f32 %v14650_v42, %v14649_v41  ;;  %v14652_v45 = vpop.f32.mrb[110].mxu0  ;;  %v14672_v46 = vpop.f32.mrb[109].mxu1 }
 0x4a7   : > { %v14653_v47 = vpop.f32.mrb[111].mxu0  ;;  %v14673_v49 = vadd.f32 %v14672_v46, %v14671_v43  ;;  %v14674_v50 = vpop.f32.mrb[110].mxu1 }
 0x4a8   : > { %v11847_v48 = vadd.f32 %v14651_v44, %v11807_v35  ;;  %v14675_v51 = vpop.f32.mrb[111].mxu1 }
 0x4aa   : > { %v11887_v52 = vadd.f32 %v14673_v49, %v11847_v48 }
 0x4c4   : > { %v14693_v53 = vpop.f32.mrb[112].mxu0 }
 0x4c5   : > { %v14694_v54 = vpop.f32.mrb[113].mxu0  ;;  %v14715_v55 = vpop.f32.mrb[112].mxu1 }
 0x4c6   : > { %v14695_v56 = vadd.f32 %v14694_v54, %v14693_v53  ;;  %v14696_v57 = vpop.f32.mrb[114].mxu0  ;;  %v14716_v58 = vpop.f32.mrb[113].mxu1 }
 0x4c7   : > { %v14697_v59 = vpop.f32.mrb[115].mxu0  ;;  %v14717_v61 = vadd.f32 %v14716_v58, %v14715_v55  ;;  %v14718_v62 = vpop.f32.mrb[114].mxu1 }
 0x4c8   : > { %v11927_v60 = vadd.f32 %v14695_v56, %v11887_v52  ;;  %v14719_v63 = vpop.f32.mrb[115].mxu1 }
 0x4ca   : > { %v11967_v0 = vadd.f32 %v14717_v61, %v11927_v60 }
 0x4e4   : > { %v14737_v1 = vpop.f32.mrb[116].mxu0 }
 0x4e5   : > { %v14738_v2 = vpop.f32.mrb[117].mxu0  ;;  %v14759_v3 = vpop.f32.mrb[116].mxu1 }
 0x4e6   : > { %v14739_v4 = vadd.f32 %v14738_v2, %v14737_v1  ;;  %v14740_v5 = vpop.f32.mrb[118].mxu0  ;;  %v14760_v6 = vpop.f32.mrb[117].mxu1 }
 0x4e7   : > { %v14741_v7 = vpop.f32.mrb[119].mxu0  ;;  %v14761_v9 = vadd.f32 %v14760_v6, %v14759_v3  ;;  %v14762_v10 = vpop.f32.mrb[118].mxu1 }
 0x4e8   : > { %v12007_v8 = vadd.f32 %v14739_v4, %v11967_v0  ;;  %v14763_v11 = vpop.f32.mrb[119].mxu1 }
 0x4ea   : > { %v12047_v12 = vadd.f32 %v14761_v9, %v12007_v8 }
 0x504   : > { %v14781_v13 = vpop.f32.mrb[120].mxu0 }
 0x505   : > { %v14782_v14 = vpop.f32.mrb[121].mxu0  ;;  %v14803_v15 = vpop.f32.mrb[120].mxu1 }
 0x506   : > { %v14783_v16 = vadd.f32 %v14782_v14, %v14781_v13  ;;  %v14784_v17 = vpop.f32.mrb[122].mxu0  ;;  %v14804_v18 = vpop.f32.mrb[121].mxu1 }
 0x507   : > { %v14785_v19 = vpop.f32.mrb[123].mxu0  ;;  %v14805_v21 = vadd.f32 %v14804_v18, %v14803_v15  ;;  %v14806_v22 = vpop.f32.mrb[122].mxu1 }
 0x508   : > { %v12087_v20 = vadd.f32 %v14783_v16, %v12047_v12  ;;  %v14807_v23 = vpop.f32.mrb[123].mxu1 }
 0x50a   : > { %v12127_v24 = vadd.f32 %v14805_v21, %v12087_v20 }
 0x524   : > { %v14825_v25 = vpop.f32.mrb[124].mxu0 }
 0x525   : > { %v14826_v26 = vpop.f32.mrb[125].mxu0  ;;  %v14847_v27 = vpop.f32.mrb[124].mxu1 }
 0x526   : > { %v14827_v28 = vadd.f32 %v14826_v26, %v14825_v25  ;;  %v14828_v29 = vpop.f32.mrb[126].mxu0  ;;  %v14848_v30 = vpop.f32.mrb[125].mxu1 }
 0x527   : > { %v14829_v31 = vpop.f32.mrb[127].mxu0  ;;  %v14849_v33 = vadd.f32 %v14848_v30, %v14847_v27  ;;  %v14850_v34 = vpop.f32.mrb[126].mxu1 }
 0x528   : > { %v12167_v32 = vadd.f32 %v14827_v28, %v12127_v24  ;;  %v14851_v36 = vpop.f32.mrb[127].mxu1 }
 0x52a   : > { %v12207_v37 = vadd.f32 %v14849_v33, %v12167_v32 }
 0x544   : > { %v14869_v38 = vpop.f32.mrb[128].mxu0 }
 0x545   : > { %v14870_v39 = vpop.f32.mrb[129].mxu0  ;;  %v14891_v40 = vpop.f32.mrb[128].mxu1 }
 0x546   : > { %v14871_v35 = vadd.f32 %v14870_v39, %v14869_v38  ;;  %v14872_v41 = vpop.f32.mrb[130].mxu0  ;;  %v14892_v42 = vpop.f32.mrb[129].mxu1 }
 0x547   : > { %v14873_v43 = vpop.f32.mrb[131].mxu0  ;;  %v14893_v45 = vadd.f32 %v14892_v42, %v14891_v40  ;;  %v14894_v46 = vpop.f32.mrb[130].mxu1 }
 0x548   : > { %v12247_v44 = vadd.f32 %v14871_v35, %v12207_v37  ;;  %v14895_v47 = vpop.f32.mrb[131].mxu1 }
 0x54a   : > { %v12287_v48 = vadd.f32 %v14893_v45, %v12247_v44 }
 0x54c   : > { %12292 = vst [vmem:[%s221_s23] sm:$0x3] %v12287_v48 }
 0x54d PF: > { %p16_p10 = scmp.ge.s32.totalorder %s16167_s17, 4   ;;  %s17673_s12 = smov %s16109_s13 }
 0x54e   : > { %s17674_s13 = smov %s16113_s14  ;;  %s17675_s14 = smov %s16177_s20 }
 0x54f   : > { %s17676_s15 = smov %s16167_s17  ;;  %18 = sbr.rel (!%p16_p10) target bundleno = 5 (0x5), region = 85 }
 0x556   :  { %12312 = vsyncpa [#allocation3], 1 }
 0x557   :  { %12314 = vsyncpa [#allocation3 + $0x1], 1 }
 0x558   :  { %12315 = vsyncpa [#allocation5], 1 }
 0x559   :  { %12317 = vsyncpa [#allocation5 + $0x1], 1 }

</bundles_post_ra>
